<compile_context>
chip_gen: v7x
topology: tpu7x:2x2x1
jax: 0.10.0
libtpu: 0.0.40
codegen_flags: <defaults>
</compile_context>

<pallas_src>
import functools

import jax
import jax.numpy as jnp
from jax.experimental import pallas as pl
from jax.experimental.pallas import tpu as pltpu

V_TH = 1.0  # IFNode threshold (spikingjelly default); hard reset to v_reset=0.


# ----------------------------------------------------------------------------
# ProjEnc point MLP: linear + bias + ReLU + linear + bias fused in one kernel.
# ----------------------------------------------------------------------------
def _enc_mlp_kernel(x_ref, w1_ref, b1_ref, w2_ref, b2_ref, o_ref):
    h = jnp.dot(x_ref[...], w1_ref[...], preferred_element_type=jnp.float32)
    h = jnp.maximum(h + b1_ref[...], 0.0)
    o_ref[...] = (jnp.dot(h, w2_ref[...], preferred_element_type=jnp.float32)
                  + b2_ref[...])


def enc_mlp(x, w1, b1, w2, b2):
    M, K = x.shape
    Hid = w1.shape[1]
    Dout = w2.shape[1]
    return pl.pallas_call(
        _enc_mlp_kernel,
        out_shape=jax.ShapeDtypeStruct((M, Dout), jnp.float32),
        grid=(1,),
        in_specs=[pl.BlockSpec((M, K), lambda i: (0, 0)),
                  pl.BlockSpec((K, Hid), lambda i: (0, 0)),
                  pl.BlockSpec((1, Hid), lambda i: (0, 0)),
                  pl.BlockSpec((Hid, Dout), lambda i: (0, 0)),
                  pl.BlockSpec((1, Dout), lambda i: (0, 0))],
        out_specs=pl.BlockSpec((M, Dout), lambda i: (0, 0)),
    )(x.astype(jnp.float32), w1, b1, w2, b2)


# ----------------------------------------------------------------------------
# Fused spiking network: stem conv+IF, SEW block (conv+IF, conv+IF, 'ADD'),
# global average pool over (T, H, W) and the linear head — one pallas_call.
# ----------------------------------------------------------------------------
def _fused_snn_kernel(img_ref, stem_w_ref, stem_b_ref, w1_ref, b1_ref,
                      w2_ref, b2_ref, fc_w_ref, fc_b_ref, out_ref,
                      xpad_ref, cols_ref, cur0_ref, v0_ref, v1_ref, v2_ref,
                      pool_ref, *, H, W, C, T):
    t = pl.program_id(1)

    def write_interior(x):
        # x: (H, W, C) f32.  The 1-px zero halo of xpad_ref is written once at
        # t == 0 and never touched again; only the interior is rewritten here.
        xpad_ref[1:H + 1, 1:W + 1, :] = x

    def conv3x3(w_ref):
        # In-kernel im2col with only 3 sublane-shifted loads (one per kernel
        # column dj); the 3 kernel-row offsets di reuse that shifted tensor
        # (major-axis slices are address-offset only).  Taps are stored into
        # the lane-dense bf16 `cols` scratch at 128-aligned lane offsets, then
        # ONE wide-K (H*W, 9C) x (9C, C) bf16 MXU dot produces the conv output
        # — no per-tap f32 accumulator read-modify-write.
        for dj in range(3):
            sh = xpad_ref[:, dj:dj + W, :]                 # (H+2, W, C) f32
            for di in range(3):
                tap = di * 3 + dj
                cols_ref[:, tap * C:(tap + 1) * C] = (
                    sh[di:di + H].reshape(H * W, C).astype(jnp.bfloat16))
        return jnp.dot(cols_ref[...], w_ref[...],
                       preferred_element_type=jnp.float32)  # (H*W, C) f32

    def if_step(v_ref, current):
        # spikingjelly IFNode: v += I; spike = (v >= V_TH); hard reset to 0.
        v = v_ref[...] + current
        fired = v >= V_TH
        v_ref[...] = jnp.where(fired, 0.0, v)
        return jnp.where(fired, 1.0, 0.0)                   # exact {0,1} f32

    @pl.when(t == 0)
    def _():
        # Per-image init.  Relies on t-minor iteration of the (b, t) grid with
        # per-core scratch under megacore sharding of the parallel b axis.
        xpad_ref[...] = jnp.zeros_like(xpad_ref)            # zero halo persists
        v0_ref[...] = jnp.zeros_like(v0_ref)
        v1_ref[...] = jnp.zeros_like(v1_ref)
        v2_ref[...] = jnp.zeros_like(v2_ref)
        pool_ref[...] = jnp.zeros_like(pool_ref)
        # Stem conv input is identical for every timestep (img.repeat(T, ...)
        # in the reference): compute it ONCE per image, replay from VMEM.
        write_interior(img_ref[0])
        cur0_ref[...] = conv3x3(stem_w_ref) + stem_b_ref[...]

    # ---- stem IF neuron (conv current replayed from scratch) ----
    s0 = if_step(v0_ref, cur0_ref[...])                     # (H*W, C)
    # SEW 'ADD' head input is pool(s2 + s0) = pool(s2) + pool(s0); accumulate
    # the s0 part now so s0 need not stay live across both conv layers.
    pool_ref[...] += jnp.sum(s0, axis=0, keepdims=True)

    # ---- SEW block, layer 1: conv3x3 + IF ----
    write_interior(s0.reshape(H, W, C))
    s1 = if_step(v1_ref, conv3x3(w1_ref) + b1_ref[...])

    # ---- SEW block, layer 2: conv3x3 + IF ----
    write_interior(s1.reshape(H, W, C))
    s2 = if_step(v2_ref, conv3x3(w2_ref) + b2_ref[...])
    pool_ref[...] += jnp.sum(s2, axis=0, keepdims=True)

    # ---- head: mean over (T, H, W), then ONE fc matmul + bias at the end ----
    @pl.when(t == T - 1)
    def _():
        pooled = pool_ref[...] * (1.0 / float(T * H * W))   # (1, C)
        logits = (jnp.dot(pooled, fc_w_ref[...],
                          preferred_element_type=jnp.float32) + fc_b_ref[...])
        # out block is (1, 8, CLS): the 8 sublane rows exist only for layout
        # alignment; broadcast so the store is unmasked, row 0 used by caller.
        out_ref[...] = jnp.broadcast_to(logits.reshape(1, 1, -1), out_ref.shape)


def fused_snn(img_c, params, *, T, H, W):
    # img_c: (B, H, W, C) f32, channels >= 3 are zero padding.
    B, _, _, C = img_c.shape
    CLS = params["fc_w"].shape[-1]
    kernel = functools.partial(_fused_snn_kernel, H=H, W=W, C=C, T=T)
    return pl.pallas_call(
        kernel,
        out_shape=jax.ShapeDtypeStruct((B, 8, CLS), jnp.float32),
        grid=(B, T),
        in_specs=[
            pl.BlockSpec((1, H, W, C), lambda b, t: (b, 0, 0, 0)),  # img (per b)
            pl.BlockSpec((9 * C, C), lambda b, t: (0, 0)),          # stem w
            pl.BlockSpec((1, C), lambda b, t: (0, 0)),              # stem b
            pl.BlockSpec((9 * C, C), lambda b, t: (0, 0)),          # blk w1
            pl.BlockSpec((1, C), lambda b, t: (0, 0)),              # blk b1
            pl.BlockSpec((9 * C, C), lambda b, t: (0, 0)),          # blk w2
            pl.BlockSpec((1, C), lambda b, t: (0, 0)),              # blk b2
            pl.BlockSpec((C, CLS), lambda b, t: (0, 0)),            # fc w
            pl.BlockSpec((1, CLS), lambda b, t: (0, 0)),            # fc b
        ],
        out_specs=pl.BlockSpec((1, 8, CLS), lambda b, t: (b, 0, 0)),
        scratch_shapes=[
            pltpu.VMEM((H + 2, W + 2, C), jnp.float32),   # padded activation
            pltpu.VMEM((H * W, 9 * C), jnp.bfloat16),     # im2col buffer
            pltpu.VMEM((H * W, C), jnp.float32),          # stem conv current
            pltpu.VMEM((H * W, C), jnp.float32),          # membrane v0 (stem)
            pltpu.VMEM((H * W, C), jnp.float32),          # membrane v1
            pltpu.VMEM((H * W, C), jnp.float32),          # membrane v2
            pltpu.VMEM((1, C), jnp.float32),              # pooled-sum acc
        ],
        compiler_params=pltpu.CompilerParams(
            dimension_semantics=("parallel", "arbitrary")),
    )(img_c,
      params["stem_w_wide"], params["stem_b"],
      params["blk_w1_wide"], params["blk_b1"],
      params["blk_w2_wide"], params["blk_b2"],
      params["fc_w"], params["fc_b"])


# ----------------------------------------------------------------------------
# ProjEnc (simplified): per-point MLP (Pallas) + geometric max-projection of
# point features onto an H x W grid (dense one-hot max-reduce, XLA glue).
# ----------------------------------------------------------------------------
def proj_enc(original_pc, pc, params, H, W):
    B, N, _ = pc.shape
    feat = enc_mlp(pc.reshape(B * N, 3),
                   params["enc_w1"], params["enc_b1"],
                   params["enc_w2"], params["enc_b2"]).reshape(B, N, 3)

    # Pixel coordinates from the original point cloud's xy extent.
    xy = original_pc[..., :2]
    mins = xy.min(axis=1, keepdims=True)
    maxs = xy.max(axis=1, keepdims=True)
    uv = (xy - mins) / (maxs - mins + 1e-6)   # eps-guard for degenerate clouds
    u = jnp.clip((uv[..., 0] * (W - 1)).astype(jnp.int32), 0, W - 1)
    v = jnp.clip((uv[..., 1] * (H - 1)).astype(jnp.int32), 0, H - 1)
    idx = v * W + u                                               # (B, N)

    # Dense one-hot segment-max (no serialized TPU scatter): N=64, HW=256.
    # TODO(synk): the reference ProjEnc projection is a learned/denser module;
    # this is the geometric scatter-max counterpart kept as dense XLA glue.
    onehot = idx[..., None] == jnp.arange(H * W)[None, None, :]   # (B, N, HW)
    masked = jnp.where(onehot[..., None], feat[:, :, None, :], -jnp.inf)
    img = jnp.max(masked, axis=1)                                 # (B, HW, 3)
    img = jnp.where(jnp.any(onehot, axis=1)[..., None], img, 0.0)
    return img.reshape(B, H, W, 3)                                # NHWC


# ----------------------------------------------------------------------------
# P2PSNN forward (T != 1 path): enc -> fused spiking base model -> mean over T.
# ----------------------------------------------------------------------------
def p2psnn_forward(pc, original_pc, params, T, H, W, classes):
    C = params["stem_b"].shape[-1]
    img = proj_enc(original_pc, pc, params, H, W)                 # (B, H, W, 3)
    # Channel-pad to a full lane width so the stem reuses the generic wide-K
    # conv path; the padded stem-weight rows are zero, so this is exact.
    img_c = jnp.pad(img, ((0, 0), (0, 0), (0, 0), (0, C - 3)))
    out = fused_snn(img_c, params, T=T, H=H, W=W)                 # (B, 8, CLS)
    return out[:, 0, :classes]                                    # (B, classes)


# ----------------------------------------------------------------------------
# Deterministic synthetic parameters, pre-shaped for the kernels.
# C = 128 keeps every activation lane-dense; classes are padded to 128 lanes;
# 3x3 conv weights are reshaped to wide-K (9*C, C) bf16 matrices.
# ----------------------------------------------------------------------------
def init_params(key, hidden=32, C=128, classes=10, cls_pad=128):
    ks = jax.random.split(key, 6)
    s = 0.05
    stem_w = s * jax.random.normal(ks[2], (9, 3, C), jnp.float32)
    stem_w_wide = jnp.pad(stem_w, ((0, 0), (0, C - 3), (0, 0)))
    stem_w_wide = stem_w_wide.reshape(9 * C, C).astype(jnp.bfloat16)
    blk_w1 = s * jax.random.normal(ks[3], (9, C, C), jnp.float32)
    blk_w2 = s * jax.random.normal(ks[4], (9, C, C), jnp.float32)
    fc_w = s * jax.random.normal(ks[5], (C, classes), jnp.float32)
    fc_w = jnp.pad(fc_w, ((0, 0), (0, cls_pad - classes)))
    return {
        "enc_w1": s * jax.random.normal(ks[0], (3, hidden), jnp.float32),
        "enc_b1": jnp.zeros((1, hidden), jnp.float32),
        "enc_w2": s * jax.random.normal(ks[1], (hidden, 3), jnp.float32),
        "enc_b2": jnp.zeros((1, 3), jnp.float32),
        "stem_w_wide": stem_w_wide,
        "stem_b": 0.5 * jnp.ones((1, C), jnp.float32),
        "blk_w1_wide": blk_w1.reshape(9 * C, C).astype(jnp.bfloat16),
        "blk_b1": 0.3 * jnp.ones((1, C), jnp.float32),
        "blk_w2_wide": blk_w2.reshape(9 * C, C).astype(jnp.bfloat16),
        "blk_b2": 0.3 * jnp.ones((1, C), jnp.float32),
        "fc_w": fc_w,
        "fc_b": jnp.zeros((1, cls_pad), jnp.float32),
    }


if __name__ == "__main__":
    key = jax.random.PRNGKey(0)
    kp, k1, k2 = jax.random.split(key, 3)

    B, N, H, W, T = 2, 64, 16, 16, 4
    CLASSES = 10
    params = init_params(kp, classes=CLASSES)

    original_pc = jax.random.normal(k1, (B, N, 3), jnp.float32)
    pc = original_pc + 0.01 * jax.random.normal(k2, (B, N, 3), jnp.float32)

    fwd = jax.jit(lambda a, b: p2psnn_forward(a, b, params, T, H, W, CLASSES))
    out = fwd(pc, original_pc)
    out = jax.block_until_ready(out)

    assert out.shape == (B, CLASSES) and out.dtype == jnp.float32
    assert bool(jnp.all(jnp.isfinite(out)))
    print("KERNEL_OK")
</pallas_src>

<mosaic_0001>
module attributes {stable_mosaic.version = 11 : i64} {
  func.func @_enc_mlp_kernel(%arg0: i32, %arg1: memref<128x3xf32, #tpu.memory_space<vmem>>, %arg2: memref<3x32xf32, #tpu.memory_space<vmem>>, %arg3: memref<1x32xf32, #tpu.memory_space<vmem>>, %arg4: memref<32x3xf32, #tpu.memory_space<vmem>>, %arg5: memref<1x3xf32, #tpu.memory_space<vmem>>, %arg6: memref<128x3xf32, #tpu.memory_space<vmem>>) attributes {dimension_semantics = [#tpu.dimension_semantics<arbitrary>], iteration_bounds = array<i64: 1>, scalar_prefetch = 0 : i64, scratch_operands = 0 : i64, tpu.core_type = #tpu.core_type<tc>, window_params = [{pipeline_mode = #tpu.pipeline_mode<synchronous>, transform_indices = @transform_0, window_bounds = array<i64: 128, 3>}, {pipeline_mode = #tpu.pipeline_mode<synchronous>, transform_indices = @transform_1, window_bounds = array<i64: 3, 32>}, {pipeline_mode = #tpu.pipeline_mode<synchronous>, transform_indices = @transform_2, window_bounds = array<i64: 1, 32>}, {pipeline_mode = #tpu.pipeline_mode<synchronous>, transform_indices = @transform_3, window_bounds = array<i64: 32, 3>}, {pipeline_mode = #tpu.pipeline_mode<synchronous>, transform_indices = @transform_4, window_bounds = array<i64: 1, 3>}, {pipeline_mode = #tpu.pipeline_mode<synchronous>, transform_indices = @transform_5, window_bounds = array<i64: 128, 3>}]} {
    %c0 = arith.constant 0 : index
    %c0_0 = arith.constant 0 : index
    %0 = vector.load %arg1[%c0, %c0_0] : memref<128x3xf32, #tpu.memory_space<vmem>>, vector<128x3xf32>
    %c0_1 = arith.constant 0 : index
    %c0_2 = arith.constant 0 : index
    %1 = vector.load %arg2[%c0_1, %c0_2] : memref<3x32xf32, #tpu.memory_space<vmem>>, vector<3x32xf32>
    %cst = arith.constant dense<0.000000e+00> : vector<128x32xf32>
    %2 = tpu.matmul %0, %1, %cst {dimension_numbers = #tpu.dot_dimension_numbers<[1], [0], [0], [1], [0, 0, 1, 1], [], []>} : vector<128x3xf32>, vector<3x32xf32>, vector<128x32xf32> -> vector<128x32xf32>
    %c0_3 = arith.constant 0 : index
    %c0_4 = arith.constant 0 : index
    %3 = vector.load %arg3[%c0_3, %c0_4] : memref<1x32xf32, #tpu.memory_space<vmem>>, vector<1x32xf32>
    %4 = vector.broadcast %3 : vector<1x32xf32> to vector<128x32xf32>
    %5 = arith.addf %2, %4 : vector<128x32xf32>
    %cst_5 = arith.constant 0.000000e+00 : f32
    %6 = vector.broadcast %cst_5 : f32 to vector<128x32xf32>
    %7 = arith.maximumf %5, %6 : vector<128x32xf32>
    %c0_6 = arith.constant 0 : index
    %c0_7 = arith.constant 0 : index
    %8 = vector.load %arg4[%c0_6, %c0_7] : memref<32x3xf32, #tpu.memory_space<vmem>>, vector<32x3xf32>
    %cst_8 = arith.constant dense<0.000000e+00> : vector<128x3xf32>
    %9 = tpu.matmul %7, %8, %cst_8 {dimension_numbers = #tpu.dot_dimension_numbers<[1], [0], [0], [1], [0, 0, 1, 1], [], []>} : vector<128x32xf32>, vector<32x3xf32>, vector<128x3xf32> -> vector<128x3xf32>
    %c0_9 = arith.constant 0 : index
    %c0_10 = arith.constant 0 : index
    %10 = vector.load %arg5[%c0_9, %c0_10] : memref<1x3xf32, #tpu.memory_space<vmem>>, vector<1x3xf32>
    %11 = vector.broadcast %10 : vector<1x3xf32> to vector<128x3xf32>
    %12 = arith.addf %9, %11 : vector<128x3xf32>
    %c0_11 = arith.constant 0 : index
    %c0_12 = arith.constant 0 : index
    %13 = vector.load %arg6[%c0_11, %c0_12] : memref<128x3xf32, #tpu.memory_space<vmem>>, vector<128x3xf32>
    tpu.vector_store %arg6[%c0_11, %c0_12], %12 {strides = array<i32>} : memref<128x3xf32, #tpu.memory_space<vmem>>, vector<128x3xf32>,
    return
  }
  func.func @transform_0(%arg0: i32) -> (i32, i32) {
    %c0_i32 = arith.constant 0 : i32
    %c0_i32_0 = arith.constant 0 : i32
    %c0_i32_1 = arith.constant 0 : i32
    return %c0_i32, %c0_i32_0 : i32, i32
  }
  func.func @transform_1(%arg0: i32) -> (i32, i32) {
    %c0_i32 = arith.constant 0 : i32
    %c0_i32_0 = arith.constant 0 : i32
    %c0_i32_1 = arith.constant 0 : i32
    return %c0_i32, %c0_i32_0 : i32, i32
  }
  func.func @transform_2(%arg0: i32) -> (i32, i32) {
    %c0_i32 = arith.constant 0 : i32
    %c0_i32_0 = arith.constant 0 : i32
    %c0_i32_1 = arith.constant 0 : i32
    return %c0_i32, %c0_i32_0 : i32, i32
  }
  func.func @transform_3(%arg0: i32) -> (i32, i32) {
    %c0_i32 = arith.constant 0 : i32
    %c0_i32_0 = arith.constant 0 : i32
    %c0_i32_1 = arith.constant 0 : i32
    return %c0_i32, %c0_i32_0 : i32, i32
  }
  func.func @transform_4(%arg0: i32) -> (i32, i32) {
    %c0_i32 = arith.constant 0 : i32
    %c0_i32_0 = arith.constant 0 : i32
    %c0_i32_1 = arith.constant 0 : i32
    return %c0_i32, %c0_i32_0 : i32, i32
  }
  func.func @transform_5(%arg0: i32) -> (i32, i32) {
    %c0_i32 = arith.constant 0 : i32
    %c0_i32_0 = arith.constant 0 : i32
    %c0_i32_1 = arith.constant 0 : i32
    return %c0_i32, %c0_i32_0 : i32, i32
  }
}

module attributes {stable_mosaic.version = 11 : i64} {
  func.func @_fused_snn_kernel(%arg0: i32, %arg1: i32, %arg2: memref<1x16x16x128xf32, #tpu.memory_space<vmem>>, %arg3: memref<1152x128xbf16, #tpu.memory_space<vmem>>, %arg4: memref<1x128xf32, #tpu.memory_space<vmem>>, %arg5: memref<1152x128xbf16, #tpu.memory_space<vmem>>, %arg6: memref<1x128xf32, #tpu.memory_space<vmem>>, %arg7: memref<1152x128xbf16, #tpu.memory_space<vmem>>, %arg8: memref<1x128xf32, #tpu.memory_space<vmem>>, %arg9: memref<128x128xf32, #tpu.memory_space<vmem>>, %arg10: memref<1x128xf32, #tpu.memory_space<vmem>>, %arg11: memref<1x8x128xf32, #tpu.memory_space<vmem>>, %arg12: memref<18x18x128xf32, #tpu.memory_space<vmem>>, %arg13: memref<256x1152xbf16, #tpu.memory_space<vmem>>, %arg14: memref<256x128xf32, #tpu.memory_space<vmem>>, %arg15: memref<256x128xf32, #tpu.memory_space<vmem>>, %arg16: memref<256x128xf32, #tpu.memory_space<vmem>>, %arg17: memref<256x128xf32, #tpu.memory_space<vmem>>, %arg18: memref<1x128xf32, #tpu.memory_space<vmem>>) attributes {dimension_semantics = [#tpu.dimension_semantics<parallel>, #tpu.dimension_semantics<arbitrary>], iteration_bounds = array<i64: 2, 4>, scalar_prefetch = 0 : i64, scratch_operands = 7 : i64, tpu.core_type = #tpu.core_type<tc>, window_params = [{transform_indices = @transform_0, window_bounds = array<i64: 1, 16, 16, 128>}, {pipeline_mode = #tpu.pipeline_mode<synchronous>, transform_indices = @transform_1, window_bounds = array<i64: 1152, 128>}, {pipeline_mode = #tpu.pipeline_mode<synchronous>, transform_indices = @transform_2, window_bounds = array<i64: 1, 128>}, {pipeline_mode = #tpu.pipeline_mode<synchronous>, transform_indices = @transform_3, window_bounds = array<i64: 1152, 128>}, {pipeline_mode = #tpu.pipeline_mode<synchronous>, transform_indices = @transform_4, window_bounds = array<i64: 1, 128>}, {pipeline_mode = #tpu.pipeline_mode<synchronous>, transform_indices = @transform_5, window_bounds = array<i64: 1152, 128>}, {pipeline_mode = #tpu.pipeline_mode<synchronous>, transform_indices = @transform_6, window_bounds = array<i64: 1, 128>}, {pipeline_mode = #tpu.pipeline_mode<synchronous>, transform_indices = @transform_7, window_bounds = array<i64: 128, 128>}, {pipeline_mode = #tpu.pipeline_mode<synchronous>, transform_indices = @transform_8, window_bounds = array<i64: 1, 128>}, {transform_indices = @transform_9, window_bounds = array<i64: 1, 8, 128>}]} {
    %c0_i32 = arith.constant 0 : i32
    %0 = arith.cmpi eq, %arg1, %c0_i32 : i32
    %1 = arith.extui %0 : i1 to i32
    %c0_i32_0 = arith.constant 0 : i32
    %2 = arith.cmpi ne, %1, %c0_i32_0 : i32
    scf.if %2 {
      %cst_100 = arith.constant 0.000000e+00 : f32
      %141 = vector.broadcast %cst_100 : f32 to vector<18x18x128xf32>
      %c0_101 = arith.constant 0 : index
      %c0_102 = arith.constant 0 : index
      %c0_103 = arith.constant 0 : index
      %142 = vector.load %arg12[%c0_101, %c0_102, %c0_103] : memref<18x18x128xf32, #tpu.memory_space<vmem>>, vector<18x18x128xf32>
      tpu.vector_store %arg12[%c0_101, %c0_102, %c0_103], %141 {strides = array<i32>} : memref<18x18x128xf32, #tpu.memory_space<vmem>>, vector<18x18x128xf32>,
      %cst_104 = arith.constant 0.000000e+00 : f32
      %143 = vector.broadcast %cst_104 : f32 to vector<256x128xf32>
      %c0_105 = arith.constant 0 : index
      %c0_106 = arith.constant 0 : index
      %144 = vector.load %arg15[%c0_105, %c0_106] : memref<256x128xf32, #tpu.memory_space<vmem>>, vector<256x128xf32>
      tpu.vector_store %arg15[%c0_105, %c0_106], %143 {strides = array<i32>} : memref<256x128xf32, #tpu.memory_space<vmem>>, vector<256x128xf32>,
      %cst_107 = arith.constant 0.000000e+00 : f32
      %145 = vector.broadcast %cst_107 : f32 to vector<256x128xf32>
      %c0_108 = arith.constant 0 : index
      %c0_109 = arith.constant 0 : index
      %146 = vector.load %arg16[%c0_108, %c0_109] : memref<256x128xf32, #tpu.memory_space<vmem>>, vector<256x128xf32>
      tpu.vector_store %arg16[%c0_108, %c0_109], %145 {strides = array<i32>} : memref<256x128xf32, #tpu.memory_space<vmem>>, vector<256x128xf32>,
      %cst_110 = arith.constant 0.000000e+00 : f32
      %147 = vector.broadcast %cst_110 : f32 to vector<256x128xf32>
      %c0_111 = arith.constant 0 : index
      %c0_112 = arith.constant 0 : index
      %148 = vector.load %arg17[%c0_111, %c0_112] : memref<256x128xf32, #tpu.memory_space<vmem>>, vector<256x128xf32>
      tpu.vector_store %arg17[%c0_111, %c0_112], %147 {strides = array<i32>} : memref<256x128xf32, #tpu.memory_space<vmem>>, vector<256x128xf32>,
      %cst_113 = arith.constant 0.000000e+00 : f32
      %149 = vector.broadcast %cst_113 : f32 to vector<1x128xf32>
      %c0_114 = arith.constant 0 : index
      %c0_115 = arith.constant 0 : index
      %150 = vector.load %arg18[%c0_114, %c0_115] : memref<1x128xf32, #tpu.memory_space<vmem>>, vector<1x128xf32>
      tpu.vector_store %arg18[%c0_114, %c0_115], %149 {strides = array<i32>} : memref<1x128xf32, #tpu.memory_space<vmem>>, vector<1x128xf32>,
      %c0_116 = arith.constant 0 : index
      %c0_117 = arith.constant 0 : index
      %c0_118 = arith.constant 0 : index
      %c0_119 = arith.constant 0 : index
      %151 = vector.load %arg2[%c0_116, %c0_117, %c0_118, %c0_119] : memref<1x16x16x128xf32, #tpu.memory_space<vmem>>, vector<1x16x16x128xf32>
      %152 = vector.shape_cast %151 : vector<1x16x16x128xf32> to vector<16x16x128xf32>
      %c1_120 = arith.constant 1 : index
      %c1_121 = arith.constant 1 : index
      %c0_122 = arith.constant 0 : index
      %153 = vector.load %arg12[%c1_120, %c1_121, %c0_122] : memref<18x18x128xf32, #tpu.memory_space<vmem>>, vector<16x16x128xf32>
      tpu.vector_store %arg12[%c1_120, %c1_121, %c0_122], %152 {strides = array<i32>} : memref<18x18x128xf32, #tpu.memory_space<vmem>>, vector<16x16x128xf32>,
      %c0_123 = arith.constant 0 : index
      %c0_124 = arith.constant 0 : index
      %c0_125 = arith.constant 0 : index
      %154 = vector.load %arg12[%c0_123, %c0_124, %c0_125] : memref<18x18x128xf32, #tpu.memory_space<vmem>>, vector<18x16x128xf32>
      %155 = vector.extract_strided_slice %154 {offsets = [0, 0, 0], sizes = [16, 16, 128], strides = [1, 1, 1]} : vector<18x16x128xf32> to vector<16x16x128xf32>
      %156 = vector.shape_cast %155 : vector<16x16x128xf32> to vector<256x128xf32>
      %157 = arith.truncf %156 : vector<256x128xf32> to vector<256x128xbf16>
      %c0_126 = arith.constant 0 : index
      %c0_127 = arith.constant 0 : index
      %158 = vector.load %arg13[%c0_126, %c0_127] : memref<256x1152xbf16, #tpu.memory_space<vmem>>, vector<256x128xbf16>
      tpu.vector_store %arg13[%c0_126, %c0_127], %157 {strides = array<i32>} : memref<256x1152xbf16, #tpu.memory_space<vmem>>, vector<256x128xbf16>,
      %159 = vector.extract_strided_slice %154 {offsets = [1, 0, 0], sizes = [16, 16, 128], strides = [1, 1, 1]} : vector<18x16x128xf32> to vector<16x16x128xf32>
      %160 = vector.shape_cast %159 : vector<16x16x128xf32> to vector<256x128xf32>
      %161 = arith.truncf %160 : vector<256x128xf32> to vector<256x128xbf16>
      %c0_128 = arith.constant 0 : index
      %c384_129 = arith.constant 384 : index
      %162 = vector.load %arg13[%c0_128, %c384_129] : memref<256x1152xbf16, #tpu.memory_space<vmem>>, vector<256x128xbf16>
      tpu.vector_store %arg13[%c0_128, %c384_129], %161 {strides = array<i32>} : memref<256x1152xbf16, #tpu.memory_space<vmem>>, vector<256x128xbf16>,
      %163 = vector.extract_strided_slice %154 {offsets = [2, 0, 0], sizes = [16, 16, 128], strides = [1, 1, 1]} : vector<18x16x128xf32> to vector<16x16x128xf32>
      %164 = vector.shape_cast %163 : vector<16x16x128xf32> to vector<256x128xf32>
      %165 = arith.truncf %164 : vector<256x128xf32> to vector<256x128xbf16>
      %c0_130 = arith.constant 0 : index
      %c768_131 = arith.constant 768 : index
      %166 = vector.load %arg13[%c0_130, %c768_131] : memref<256x1152xbf16, #tpu.memory_space<vmem>>, vector<256x128xbf16>
      tpu.vector_store %arg13[%c0_130, %c768_131], %165 {strides = array<i32>} : memref<256x1152xbf16, #tpu.memory_space<vmem>>, vector<256x128xbf16>,
      %c0_132 = arith.constant 0 : index
      %c1_133 = arith.constant 1 : index
      %c0_134 = arith.constant 0 : index
      %167 = vector.load %arg12[%c0_132, %c1_133, %c0_134] : memref<18x18x128xf32, #tpu.memory_space<vmem>>, vector<18x16x128xf32>
      %168 = vector.extract_strided_slice %167 {offsets = [0, 0, 0], sizes = [16, 16, 128], strides = [1, 1, 1]} : vector<18x16x128xf32> to vector<16x16x128xf32>
      %169 = vector.shape_cast %168 : vector<16x16x128xf32> to vector<256x128xf32>
      %170 = arith.truncf %169 : vector<256x128xf32> to vector<256x128xbf16>
      %c0_135 = arith.constant 0 : index
      %c128_136 = arith.constant 128 : index
      %171 = vector.load %arg13[%c0_135, %c128_136] : memref<256x1152xbf16, #tpu.memory_space<vmem>>, vector<256x128xbf16>
      tpu.vector_store %arg13[%c0_135, %c128_136], %170 {strides = array<i32>} : memref<256x1152xbf16, #tpu.memory_space<vmem>>, vector<256x128xbf16>,
      %172 = vector.extract_strided_slice %167 {offsets = [1, 0, 0], sizes = [16, 16, 128], strides = [1, 1, 1]} : vector<18x16x128xf32> to vector<16x16x128xf32>
      %173 = vector.shape_cast %172 : vector<16x16x128xf32> to vector<256x128xf32>
      %174 = arith.truncf %173 : vector<256x128xf32> to vector<256x128xbf16>
      %c0_137 = arith.constant 0 : index
      %c512_138 = arith.constant 512 : index
      %175 = vector.load %arg13[%c0_137, %c512_138] : memref<256x1152xbf16, #tpu.memory_space<vmem>>, vector<256x128xbf16>
      tpu.vector_store %arg13[%c0_137, %c512_138], %174 {strides = array<i32>} : memref<256x1152xbf16, #tpu.memory_space<vmem>>, vector<256x128xbf16>,
      %176 = vector.extract_strided_slice %167 {offsets = [2, 0, 0], sizes = [16, 16, 128], strides = [1, 1, 1]} : vector<18x16x128xf32> to vector<16x16x128xf32>
      %177 = vector.shape_cast %176 : vector<16x16x128xf32> to vector<256x128xf32>
      %178 = arith.truncf %177 : vector<256x128xf32> to vector<256x128xbf16>
      %c0_139 = arith.constant 0 : index
      %c896_140 = arith.constant 896 : index
      %179 = vector.load %arg13[%c0_139, %c896_140] : memref<256x1152xbf16, #tpu.memory_space<vmem>>, vector<256x128xbf16>
      tpu.vector_store %arg13[%c0_139, %c896_140], %178 {strides = array<i32>} : memref<256x1152xbf16, #tpu.memory_space<vmem>>, vector<256x128xbf16>,
      %c0_141 = arith.constant 0 : index
      %c2_142 = arith.constant 2 : index
      %c0_143 = arith.constant 0 : index
      %180 = vector.load %arg12[%c0_141, %c2_142, %c0_143] : memref<18x18x128xf32, #tpu.memory_space<vmem>>, vector<18x16x128xf32>
      %181 = vector.extract_strided_slice %180 {offsets = [0, 0, 0], sizes = [16, 16, 128], strides = [1, 1, 1]} : vector<18x16x128xf32> to vector<16x16x128xf32>
      %182 = vector.shape_cast %181 : vector<16x16x128xf32> to vector<256x128xf32>
      %183 = arith.truncf %182 : vector<256x128xf32> to vector<256x128xbf16>
      %c0_144 = arith.constant 0 : index
      %c256_145 = arith.constant 256 : index
      %184 = vector.load %arg13[%c0_144, %c256_145] : memref<256x1152xbf16, #tpu.memory_space<vmem>>, vector<256x128xbf16>
      tpu.vector_store %arg13[%c0_144, %c256_145], %183 {strides = array<i32>} : memref<256x1152xbf16, #tpu.memory_space<vmem>>, vector<256x128xbf16>,
      %185 = vector.extract_strided_slice %180 {offsets = [1, 0, 0], sizes = [16, 16, 128], strides = [1, 1, 1]} : vector<18x16x128xf32> to vector<16x16x128xf32>
      %186 = vector.shape_cast %185 : vector<16x16x128xf32> to vector<256x128xf32>
      %187 = arith.truncf %186 : vector<256x128xf32> to vector<256x128xbf16>
      %c0_146 = arith.constant 0 : index
      %c640_147 = arith.constant 640 : index
      %188 = vector.load %arg13[%c0_146, %c640_147] : memref<256x1152xbf16, #tpu.memory_space<vmem>>, vector<256x128xbf16>
      tpu.vector_store %arg13[%c0_146, %c640_147], %187 {strides = array<i32>} : memref<256x1152xbf16, #tpu.memory_space<vmem>>, vector<256x128xbf16>,
      %189 = vector.extract_strided_slice %180 {offsets = [2, 0, 0], sizes = [16, 16, 128], strides = [1, 1, 1]} : vector<18x16x128xf32> to vector<16x16x128xf32>
      %190 = vector.shape_cast %189 : vector<16x16x128xf32> to vector<256x128xf32>
      %191 = arith.truncf %190 : vector<256x128xf32> to vector<256x128xbf16>
      %c0_148 = arith.constant 0 : index
      %c1024_149 = arith.constant 1024 : index
      %192 = vector.load %arg13[%c0_148, %c1024_149] : memref<256x1152xbf16, #tpu.memory_space<vmem>>, vector<256x128xbf16>
      tpu.vector_store %arg13[%c0_148, %c1024_149], %191 {strides = array<i32>} : memref<256x1152xbf16, #tpu.memory_space<vmem>>, vector<256x128xbf16>,
      %c0_150 = arith.constant 0 : index
      %c0_151 = arith.constant 0 : index
      %193 = vector.load %arg13[%c0_150, %c0_151] : memref<256x1152xbf16, #tpu.memory_space<vmem>>, vector<256x1152xbf16>
      %c0_152 = arith.constant 0 : index
      %c0_153 = arith.constant 0 : index
      %194 = vector.load %arg3[%c0_152, %c0_153] : memref<1152x128xbf16, #tpu.memory_space<vmem>>, vector<1152x128xbf16>
      %cst_154 = arith.constant dense<0.000000e+00> : vector<256x128xf32>
      %195 = tpu.matmul %193, %194, %cst_154 {dimension_numbers = #tpu.dot_dimension_numbers<[1], [0], [0], [1], [0, 0, 1, 1], [], []>} : vector<256x1152xbf16>, vector<1152x128xbf16>, vector<256x128xf32> -> vector<256x128xf32>
      %c0_155 = arith.constant 0 : index
      %c0_156 = arith.constant 0 : index
      %196 = vector.load %arg4[%c0_155, %c0_156] : memref<1x128xf32, #tpu.memory_space<vmem>>, vector<1x128xf32>
      %197 = vector.broadcast %196 : vector<1x128xf32> to vector<256x128xf32>
      %198 = arith.addf %195, %197 : vector<256x128xf32>
      %c0_157 = arith.constant 0 : index
      %c0_158 = arith.constant 0 : index
      %199 = vector.load %arg14[%c0_157, %c0_158] : memref<256x128xf32, #tpu.memory_space<vmem>>, vector<256x128xf32>
      tpu.vector_store %arg14[%c0_157, %c0_158], %198 {strides = array<i32>} : memref<256x128xf32, #tpu.memory_space<vmem>>, vector<256x128xf32>,
    } else {
    }
    %c0 = arith.constant 0 : index
    %c0_1 = arith.constant 0 : index
    %3 = vector.load %arg14[%c0, %c0_1] : memref<256x128xf32, #tpu.memory_space<vmem>>, vector<256x128xf32>
    %c0_2 = arith.constant 0 : index
    %c0_3 = arith.constant 0 : index
    %4 = vector.load %arg15[%c0_2, %c0_3] : memref<256x128xf32, #tpu.memory_space<vmem>>, vector<256x128xf32>
    %5 = arith.addf %4, %3 : vector<256x128xf32>
    %cst = arith.constant 1.000000e+00 : f32
    %6 = vector.broadcast %cst : f32 to vector<256x128xf32>
    %7 = arith.cmpf oge, %5, %6 : vector<256x128xf32>
    %cst_4 = arith.constant 0.000000e+00 : f32
    %8 = vector.broadcast %cst_4 : f32 to vector<256x128xf32>
    %9 = arith.select %7, %8, %5 : vector<256x128xi1>, vector<256x128xf32>
    %c0_5 = arith.constant 0 : index
    %c0_6 = arith.constant 0 : index
    %10 = vector.load %arg15[%c0_5, %c0_6] : memref<256x128xf32, #tpu.memory_space<vmem>>, vector<256x128xf32>
    tpu.vector_store %arg15[%c0_5, %c0_6], %9 {strides = array<i32>} : memref<256x128xf32, #tpu.memory_space<vmem>>, vector<256x128xf32>,
    %cst_7 = arith.constant 1.000000e+00 : f32
    %cst_8 = arith.constant 0.000000e+00 : f32
    %11 = vector.broadcast %cst_7 : f32 to vector<256x128xf32>
    %12 = vector.broadcast %cst_8 : f32 to vector<256x128xf32>
    %13 = arith.select %7, %11, %12 : vector<256x128xi1>, vector<256x128xf32>
    %c0_9 = arith.constant 0 : index
    %c0_10 = arith.constant 0 : index
    %14 = vector.load %arg18[%c0_9, %c0_10] : memref<1x128xf32, #tpu.memory_space<vmem>>, vector<1x128xf32>
    %cst_11 = arith.constant dense<0.000000e+00> : vector<128xf32>
    %15 = vector.multi_reduction <add>, %13, %cst_11 [0] : vector<256x128xf32> to vector<128xf32>
    %16 = vector.shape_cast %15 : vector<128xf32> to vector<1x128xf32>
    %17 = arith.addf %14, %16 : vector<1x128xf32>
    %c0_12 = arith.constant 0 : index
    %c0_13 = arith.constant 0 : index
    %18 = vector.load %arg18[%c0_12, %c0_13] : memref<1x128xf32, #tpu.memory_space<vmem>>, vector<1x128xf32>
    tpu.vector_store %arg18[%c0_12, %c0_13], %17 {strides = array<i32>} : memref<1x128xf32, #tpu.memory_space<vmem>>, vector<1x128xf32>,
    %19 = vector.shape_cast %13 : vector<256x128xf32> to vector<16x16x128xf32>
    %c1 = arith.constant 1 : index
    %c1_14 = arith.constant 1 : index
    %c0_15 = arith.constant 0 : index
    %20 = vector.load %arg12[%c1, %c1_14, %c0_15] : memref<18x18x128xf32, #tpu.memory_space<vmem>>, vector<16x16x128xf32>
    tpu.vector_store %arg12[%c1, %c1_14, %c0_15], %19 {strides = array<i32>} : memref<18x18x128xf32, #tpu.memory_space<vmem>>, vector<16x16x128xf32>,
    %c0_16 = arith.constant 0 : index
    %c0_17 = arith.constant 0 : index
    %c0_18 = arith.constant 0 : index
    %21 = vector.load %arg12[%c0_16, %c0_17, %c0_18] : memref<18x18x128xf32, #tpu.memory_space<vmem>>, vector<18x16x128xf32>
    %22 = vector.extract_strided_slice %21 {offsets = [0, 0, 0], sizes = [16, 16, 128], strides = [1, 1, 1]} : vector<18x16x128xf32> to vector<16x16x128xf32>
    %23 = vector.shape_cast %22 : vector<16x16x128xf32> to vector<256x128xf32>
    %24 = arith.truncf %23 : vector<256x128xf32> to vector<256x128xbf16>
    %c0_19 = arith.constant 0 : index
    %c0_20 = arith.constant 0 : index
    %25 = vector.load %arg13[%c0_19, %c0_20] : memref<256x1152xbf16, #tpu.memory_space<vmem>>, vector<256x128xbf16>
    tpu.vector_store %arg13[%c0_19, %c0_20], %24 {strides = array<i32>} : memref<256x1152xbf16, #tpu.memory_space<vmem>>, vector<256x128xbf16>,
    %26 = vector.extract_strided_slice %21 {offsets = [1, 0, 0], sizes = [16, 16, 128], strides = [1, 1, 1]} : vector<18x16x128xf32> to vector<16x16x128xf32>
    %27 = vector.shape_cast %26 : vector<16x16x128xf32> to vector<256x128xf32>
    %28 = arith.truncf %27 : vector<256x128xf32> to vector<256x128xbf16>
    %c0_21 = arith.constant 0 : index
    %c384 = arith.constant 384 : index
    %29 = vector.load %arg13[%c0_21, %c384] : memref<256x1152xbf16, #tpu.memory_space<vmem>>, vector<256x128xbf16>
    tpu.vector_store %arg13[%c0_21, %c384], %28 {strides = array<i32>} : memref<256x1152xbf16, #tpu.memory_space<vmem>>, vector<256x128xbf16>,
    %30 = vector.extract_strided_slice %21 {offsets = [2, 0, 0], sizes = [16, 16, 128], strides = [1, 1, 1]} : vector<18x16x128xf32> to vector<16x16x128xf32>
    %31 = vector.shape_cast %30 : vector<16x16x128xf32> to vector<256x128xf32>
    %32 = arith.truncf %31 : vector<256x128xf32> to vector<256x128xbf16>
    %c0_22 = arith.constant 0 : index
    %c768 = arith.constant 768 : index
    %33 = vector.load %arg13[%c0_22, %c768] : memref<256x1152xbf16, #tpu.memory_space<vmem>>, vector<256x128xbf16>
    tpu.vector_store %arg13[%c0_22, %c768], %32 {strides = array<i32>} : memref<256x1152xbf16, #tpu.memory_space<vmem>>, vector<256x128xbf16>,
    %c0_23 = arith.constant 0 : index
    %c1_24 = arith.constant 1 : index
    %c0_25 = arith.constant 0 : index
    %34 = vector.load %arg12[%c0_23, %c1_24, %c0_25] : memref<18x18x128xf32, #tpu.memory_space<vmem>>, vector<18x16x128xf32>
    %35 = vector.extract_strided_slice %34 {offsets = [0, 0, 0], sizes = [16, 16, 128], strides = [1, 1, 1]} : vector<18x16x128xf32> to vector<16x16x128xf32>
    %36 = vector.shape_cast %35 : vector<16x16x128xf32> to vector<256x128xf32>
    %37 = arith.truncf %36 : vector<256x128xf32> to vector<256x128xbf16>
    %c0_26 = arith.constant 0 : index
    %c128 = arith.constant 128 : index
    %38 = vector.load %arg13[%c0_26, %c128] : memref<256x1152xbf16, #tpu.memory_space<vmem>>, vector<256x128xbf16>
    tpu.vector_store %arg13[%c0_26, %c128], %37 {strides = array<i32>} : memref<256x1152xbf16, #tpu.memory_space<vmem>>, vector<256x128xbf16>,
    %39 = vector.extract_strided_slice %34 {offsets = [1, 0, 0], sizes = [16, 16, 128], strides = [1, 1, 1]} : vector<18x16x128xf32> to vector<16x16x128xf32>
    %40 = vector.shape_cast %39 : vector<16x16x128xf32> to vector<256x128xf32>
    %41 = arith.truncf %40 : vector<256x128xf32> to vector<256x128xbf16>
    %c0_27 = arith.constant 0 : index
    %c512 = arith.constant 512 : index
    %42 = vector.load %arg13[%c0_27, %c512] : memref<256x1152xbf16, #tpu.memory_space<vmem>>, vector<256x128xbf16>
    tpu.vector_store %arg13[%c0_27, %c512], %41 {strides = array<i32>} : memref<256x1152xbf16, #tpu.memory_space<vmem>>, vector<256x128xbf16>,
    %43 = vector.extract_strided_slice %34 {offsets = [2, 0, 0], sizes = [16, 16, 128], strides = [1, 1, 1]} : vector<18x16x128xf32> to vector<16x16x128xf32>
    %44 = vector.shape_cast %43 : vector<16x16x128xf32> to vector<256x128xf32>
    %45 = arith.truncf %44 : vector<256x128xf32> to vector<256x128xbf16>
    %c0_28 = arith.constant 0 : index
    %c896 = arith.constant 896 : index
    %46 = vector.load %arg13[%c0_28, %c896] : memref<256x1152xbf16, #tpu.memory_space<vmem>>, vector<256x128xbf16>
    tpu.vector_store %arg13[%c0_28, %c896], %45 {strides = array<i32>} : memref<256x1152xbf16, #tpu.memory_space<vmem>>, vector<256x128xbf16>,
    %c0_29 = arith.constant 0 : index
    %c2 = arith.constant 2 : index
    %c0_30 = arith.constant 0 : index
    %47 = vector.load %arg12[%c0_29, %c2, %c0_30] : memref<18x18x128xf32, #tpu.memory_space<vmem>>, vector<18x16x128xf32>
    %48 = vector.extract_strided_slice %47 {offsets = [0, 0, 0], sizes = [16, 16, 128], strides = [1, 1, 1]} : vector<18x16x128xf32> to vector<16x16x128xf32>
    %49 = vector.shape_cast %48 : vector<16x16x128xf32> to vector<256x128xf32>
    %50 = arith.truncf %49 : vector<256x128xf32> to vector<256x128xbf16>
    %c0_31 = arith.constant 0 : index
    %c256 = arith.constant 256 : index
    %51 = vector.load %arg13[%c0_31, %c256] : memref<256x1152xbf16, #tpu.memory_space<vmem>>, vector<256x128xbf16>
    tpu.vector_store %arg13[%c0_31, %c256], %50 {strides = array<i32>} : memref<256x1152xbf16, #tpu.memory_space<vmem>>, vector<256x128xbf16>,
    %52 = vector.extract_strided_slice %47 {offsets = [1, 0, 0], sizes = [16, 16, 128], strides = [1, 1, 1]} : vector<18x16x128xf32> to vector<16x16x128xf32>
    %53 = vector.shape_cast %52 : vector<16x16x128xf32> to vector<256x128xf32>
    %54 = arith.truncf %53 : vector<256x128xf32> to vector<256x128xbf16>
    %c0_32 = arith.constant 0 : index
    %c640 = arith.constant 640 : index
    %55 = vector.load %arg13[%c0_32, %c640] : memref<256x1152xbf16, #tpu.memory_space<vmem>>, vector<256x128xbf16>
    tpu.vector_store %arg13[%c0_32, %c640], %54 {strides = array<i32>} : memref<256x1152xbf16, #tpu.memory_space<vmem>>, vector<256x128xbf16>,
    %56 = vector.extract_strided_slice %47 {offsets = [2, 0, 0], sizes = [16, 16, 128], strides = [1, 1, 1]} : vector<18x16x128xf32> to vector<16x16x128xf32>
    %57 = vector.shape_cast %56 : vector<16x16x128xf32> to vector<256x128xf32>
    %58 = arith.truncf %57 : vector<256x128xf32> to vector<256x128xbf16>
    %c0_33 = arith.constant 0 : index
    %c1024 = arith.constant 1024 : index
    %59 = vector.load %arg13[%c0_33, %c1024] : memref<256x1152xbf16, #tpu.memory_space<vmem>>, vector<256x128xbf16>
    tpu.vector_store %arg13[%c0_33, %c1024], %58 {strides = array<i32>} : memref<256x1152xbf16, #tpu.memory_space<vmem>>, vector<256x128xbf16>,
    %c0_34 = arith.constant 0 : index
    %c0_35 = arith.constant 0 : index
    %60 = vector.load %arg13[%c0_34, %c0_35] : memref<256x1152xbf16, #tpu.memory_space<vmem>>, vector<256x1152xbf16>
    %c0_36 = arith.constant 0 : index
    %c0_37 = arith.constant 0 : index
    %61 = vector.load %arg5[%c0_36, %c0_37] : memref<1152x128xbf16, #tpu.memory_space<vmem>>, vector<1152x128xbf16>
    %cst_38 = arith.constant dense<0.000000e+00> : vector<256x128xf32>
    %62 = tpu.matmul %60, %61, %cst_38 {dimension_numbers = #tpu.dot_dimension_numbers<[1], [0], [0], [1], [0, 0, 1, 1], [], []>} : vector<256x1152xbf16>, vector<1152x128xbf16>, vector<256x128xf32> -> vector<256x128xf32>
    %c0_39 = arith.constant 0 : index
    %c0_40 = arith.constant 0 : index
    %63 = vector.load %arg6[%c0_39, %c0_40] : memref<1x128xf32, #tpu.memory_space<vmem>>, vector<1x128xf32>
    %64 = vector.broadcast %63 : vector<1x128xf32> to vector<256x128xf32>
    %65 = arith.addf %62, %64 : vector<256x128xf32>
    %c0_41 = arith.constant 0 : index
    %c0_42 = arith.constant 0 : index
    %66 = vector.load %arg16[%c0_41, %c0_42] : memref<256x128xf32, #tpu.memory_space<vmem>>, vector<256x128xf32>
    %67 = arith.addf %66, %65 : vector<256x128xf32>
    %cst_43 = arith.constant 1.000000e+00 : f32
    %68 = vector.broadcast %cst_43 : f32 to vector<256x128xf32>
    %69 = arith.cmpf oge, %67, %68 : vector<256x128xf32>
    %cst_44 = arith.constant 0.000000e+00 : f32
    %70 = vector.broadcast %cst_44 : f32 to vector<256x128xf32>
    %71 = arith.select %69, %70, %67 : vector<256x128xi1>, vector<256x128xf32>
    %c0_45 = arith.constant 0 : index
    %c0_46 = arith.constant 0 : index
    %72 = vector.load %arg16[%c0_45, %c0_46] : memref<256x128xf32, #tpu.memory_space<vmem>>, vector<256x128xf32>
    tpu.vector_store %arg16[%c0_45, %c0_46], %71 {strides = array<i32>} : memref<256x128xf32, #tpu.memory_space<vmem>>, vector<256x128xf32>,
    %cst_47 = arith.constant 1.000000e+00 : f32
    %cst_48 = arith.constant 0.000000e+00 : f32
    %73 = vector.broadcast %cst_47 : f32 to vector<256x128xf32>
    %74 = vector.broadcast %cst_48 : f32 to vector<256x128xf32>
    %75 = arith.select %69, %73, %74 : vector<256x128xi1>, vector<256x128xf32>
    %76 = vector.shape_cast %75 : vector<256x128xf32> to vector<16x16x128xf32>
    %c1_49 = arith.constant 1 : index
    %c1_50 = arith.constant 1 : index
    %c0_51 = arith.constant 0 : index
    %77 = vector.load %arg12[%c1_49, %c1_50, %c0_51] : memref<18x18x128xf32, #tpu.memory_space<vmem>>, vector<16x16x128xf32>
    tpu.vector_store %arg12[%c1_49, %c1_50, %c0_51], %76 {strides = array<i32>} : memref<18x18x128xf32, #tpu.memory_space<vmem>>, vector<16x16x128xf32>,
    %c0_52 = arith.constant 0 : index
    %c0_53 = arith.constant 0 : index
    %c0_54 = arith.constant 0 : index
    %78 = vector.load %arg12[%c0_52, %c0_53, %c0_54] : memref<18x18x128xf32, #tpu.memory_space<vmem>>, vector<18x16x128xf32>
    %79 = vector.extract_strided_slice %78 {offsets = [0, 0, 0], sizes = [16, 16, 128], strides = [1, 1, 1]} : vector<18x16x128xf32> to vector<16x16x128xf32>
    %80 = vector.shape_cast %79 : vector<16x16x128xf32> to vector<256x128xf32>
    %81 = arith.truncf %80 : vector<256x128xf32> to vector<256x128xbf16>
    %c0_55 = arith.constant 0 : index
    %c0_56 = arith.constant 0 : index
    %82 = vector.load %arg13[%c0_55, %c0_56] : memref<256x1152xbf16, #tpu.memory_space<vmem>>, vector<256x128xbf16>
    tpu.vector_store %arg13[%c0_55, %c0_56], %81 {strides = array<i32>} : memref<256x1152xbf16, #tpu.memory_space<vmem>>, vector<256x128xbf16>,
    %83 = vector.extract_strided_slice %78 {offsets = [1, 0, 0], sizes = [16, 16, 128], strides = [1, 1, 1]} : vector<18x16x128xf32> to vector<16x16x128xf32>
    %84 = vector.shape_cast %83 : vector<16x16x128xf32> to vector<256x128xf32>
    %85 = arith.truncf %84 : vector<256x128xf32> to vector<256x128xbf16>
    %c0_57 = arith.constant 0 : index
    %c384_58 = arith.constant 384 : index
    %86 = vector.load %arg13[%c0_57, %c384_58] : memref<256x1152xbf16, #tpu.memory_space<vmem>>, vector<256x128xbf16>
    tpu.vector_store %arg13[%c0_57, %c384_58], %85 {strides = array<i32>} : memref<256x1152xbf16, #tpu.memory_space<vmem>>, vector<256x128xbf16>,
    %87 = vector.extract_strided_slice %78 {offsets = [2, 0, 0], sizes = [16, 16, 128], strides = [1, 1, 1]} : vector<18x16x128xf32> to vector<16x16x128xf32>
    %88 = vector.shape_cast %87 : vector<16x16x128xf32> to vector<256x128xf32>
    %89 = arith.truncf %88 : vector<256x128xf32> to vector<256x128xbf16>
    %c0_59 = arith.constant 0 : index
    %c768_60 = arith.constant 768 : index
    %90 = vector.load %arg13[%c0_59, %c768_60] : memref<256x1152xbf16, #tpu.memory_space<vmem>>, vector<256x128xbf16>
    tpu.vector_store %arg13[%c0_59, %c768_60], %89 {strides = array<i32>} : memref<256x1152xbf16, #tpu.memory_space<vmem>>, vector<256x128xbf16>,
    %c0_61 = arith.constant 0 : index
    %c1_62 = arith.constant 1 : index
    %c0_63 = arith.constant 0 : index
    %91 = vector.load %arg12[%c0_61, %c1_62, %c0_63] : memref<18x18x128xf32, #tpu.memory_space<vmem>>, vector<18x16x128xf32>
    %92 = vector.extract_strided_slice %91 {offsets = [0, 0, 0], sizes = [16, 16, 128], strides = [1, 1, 1]} : vector<18x16x128xf32> to vector<16x16x128xf32>
    %93 = vector.shape_cast %92 : vector<16x16x128xf32> to vector<256x128xf32>
    %94 = arith.truncf %93 : vector<256x128xf32> to vector<256x128xbf16>
    %c0_64 = arith.constant 0 : index
    %c128_65 = arith.constant 128 : index
    %95 = vector.load %arg13[%c0_64, %c128_65] : memref<256x1152xbf16, #tpu.memory_space<vmem>>, vector<256x128xbf16>
    tpu.vector_store %arg13[%c0_64, %c128_65], %94 {strides = array<i32>} : memref<256x1152xbf16, #tpu.memory_space<vmem>>, vector<256x128xbf16>,
    %96 = vector.extract_strided_slice %91 {offsets = [1, 0, 0], sizes = [16, 16, 128], strides = [1, 1, 1]} : vector<18x16x128xf32> to vector<16x16x128xf32>
    %97 = vector.shape_cast %96 : vector<16x16x128xf32> to vector<256x128xf32>
    %98 = arith.truncf %97 : vector<256x128xf32> to vector<256x128xbf16>
    %c0_66 = arith.constant 0 : index
    %c512_67 = arith.constant 512 : index
    %99 = vector.load %arg13[%c0_66, %c512_67] : memref<256x1152xbf16, #tpu.memory_space<vmem>>, vector<256x128xbf16>
    tpu.vector_store %arg13[%c0_66, %c512_67], %98 {strides = array<i32>} : memref<256x1152xbf16, #tpu.memory_space<vmem>>, vector<256x128xbf16>,
    %100 = vector.extract_strided_slice %91 {offsets = [2, 0, 0], sizes = [16, 16, 128], strides = [1, 1, 1]} : vector<18x16x128xf32> to vector<16x16x128xf32>
    %101 = vector.shape_cast %100 : vector<16x16x128xf32> to vector<256x128xf32>
    %102 = arith.truncf %101 : vector<256x128xf32> to vector<256x128xbf16>
    %c0_68 = arith.constant 0 : index
    %c896_69 = arith.constant 896 : index
    %103 = vector.load %arg13[%c0_68, %c896_69] : memref<256x1152xbf16, #tpu.memory_space<vmem>>, vector<256x128xbf16>
    tpu.vector_store %arg13[%c0_68, %c896_69], %102 {strides = array<i32>} : memref<256x1152xbf16, #tpu.memory_space<vmem>>, vector<256x128xbf16>,
    %c0_70 = arith.constant 0 : index
    %c2_71 = arith.constant 2 : index
    %c0_72 = arith.constant 0 : index
    %104 = vector.load %arg12[%c0_70, %c2_71, %c0_72] : memref<18x18x128xf32, #tpu.memory_space<vmem>>, vector<18x16x128xf32>
    %105 = vector.extract_strided_slice %104 {offsets = [0, 0, 0], sizes = [16, 16, 128], strides = [1, 1, 1]} : vector<18x16x128xf32> to vector<16x16x128xf32>
    %106 = vector.shape_cast %105 : vector<16x16x128xf32> to vector<256x128xf32>
    %107 = arith.truncf %106 : vector<256x128xf32> to vector<256x128xbf16>
    %c0_73 = arith.constant 0 : index
    %c256_74 = arith.constant 256 : index
    %108 = vector.load %arg13[%c0_73, %c256_74] : memref<256x1152xbf16, #tpu.memory_space<vmem>>, vector<256x128xbf16>
    tpu.vector_store %arg13[%c0_73, %c256_74], %107 {strides = array<i32>} : memref<256x1152xbf16, #tpu.memory_space<vmem>>, vector<256x128xbf16>,
    %109 = vector.extract_strided_slice %104 {offsets = [1, 0, 0], sizes = [16, 16, 128], strides = [1, 1, 1]} : vector<18x16x128xf32> to vector<16x16x128xf32>
    %110 = vector.shape_cast %109 : vector<16x16x128xf32> to vector<256x128xf32>
    %111 = arith.truncf %110 : vector<256x128xf32> to vector<256x128xbf16>
    %c0_75 = arith.constant 0 : index
    %c640_76 = arith.constant 640 : index
    %112 = vector.load %arg13[%c0_75, %c640_76] : memref<256x1152xbf16, #tpu.memory_space<vmem>>, vector<256x128xbf16>
    tpu.vector_store %arg13[%c0_75, %c640_76], %111 {strides = array<i32>} : memref<256x1152xbf16, #tpu.memory_space<vmem>>, vector<256x128xbf16>,
    %113 = vector.extract_strided_slice %104 {offsets = [2, 0, 0], sizes = [16, 16, 128], strides = [1, 1, 1]} : vector<18x16x128xf32> to vector<16x16x128xf32>
    %114 = vector.shape_cast %113 : vector<16x16x128xf32> to vector<256x128xf32>
    %115 = arith.truncf %114 : vector<256x128xf32> to vector<256x128xbf16>
    %c0_77 = arith.constant 0 : index
    %c1024_78 = arith.constant 1024 : index
    %116 = vector.load %arg13[%c0_77, %c1024_78] : memref<256x1152xbf16, #tpu.memory_space<vmem>>, vector<256x128xbf16>
    tpu.vector_store %arg13[%c0_77, %c1024_78], %115 {strides = array<i32>} : memref<256x1152xbf16, #tpu.memory_space<vmem>>, vector<256x128xbf16>,
    %c0_79 = arith.constant 0 : index
    %c0_80 = arith.constant 0 : index
    %117 = vector.load %arg13[%c0_79, %c0_80] : memref<256x1152xbf16, #tpu.memory_space<vmem>>, vector<256x1152xbf16>
    %c0_81 = arith.constant 0 : index
    %c0_82 = arith.constant 0 : index
    %118 = vector.load %arg7[%c0_81, %c0_82] : memref<1152x128xbf16, #tpu.memory_space<vmem>>, vector<1152x128xbf16>
    %cst_83 = arith.constant dense<0.000000e+00> : vector<256x128xf32>
    %119 = tpu.matmul %117, %118, %cst_83 {dimension_numbers = #tpu.dot_dimension_numbers<[1], [0], [0], [1], [0, 0, 1, 1], [], []>} : vector<256x1152xbf16>, vector<1152x128xbf16>, vector<256x128xf32> -> vector<256x128xf32>
    %c0_84 = arith.constant 0 : index
    %c0_85 = arith.constant 0 : index
    %120 = vector.load %arg8[%c0_84, %c0_85] : memref<1x128xf32, #tpu.memory_space<vmem>>, vector<1x128xf32>
    %121 = vector.broadcast %120 : vector<1x128xf32> to vector<256x128xf32>
    %122 = arith.addf %119, %121 : vector<256x128xf32>
    %c0_86 = arith.constant 0 : index
    %c0_87 = arith.constant 0 : index
    %123 = vector.load %arg17[%c0_86, %c0_87] : memref<256x128xf32, #tpu.memory_space<vmem>>, vector<256x128xf32>
    %124 = arith.addf %123, %122 : vector<256x128xf32>
    %cst_88 = arith.constant 1.000000e+00 : f32
    %125 = vector.broadcast %cst_88 : f32 to vector<256x128xf32>
    %126 = arith.cmpf oge, %124, %125 : vector<256x128xf32>
    %cst_89 = arith.constant 0.000000e+00 : f32
    %127 = vector.broadcast %cst_89 : f32 to vector<256x128xf32>
    %128 = arith.select %126, %127, %124 : vector<256x128xi1>, vector<256x128xf32>
    %c0_90 = arith.constant 0 : index
    %c0_91 = arith.constant 0 : index
    %129 = vector.load %arg17[%c0_90, %c0_91] : memref<256x128xf32, #tpu.memory_space<vmem>>, vector<256x128xf32>
    tpu.vector_store %arg17[%c0_90, %c0_91], %128 {strides = array<i32>} : memref<256x128xf32, #tpu.memory_space<vmem>>, vector<256x128xf32>,
    %cst_92 = arith.constant 1.000000e+00 : f32
    %cst_93 = arith.constant 0.000000e+00 : f32
    %130 = vector.broadcast %cst_92 : f32 to vector<256x128xf32>
    %131 = vector.broadcast %cst_93 : f32 to vector<256x128xf32>
    %132 = arith.select %126, %130, %131 : vector<256x128xi1>, vector<256x128xf32>
    %c0_94 = arith.constant 0 : index
    %c0_95 = arith.constant 0 : index
    %133 = vector.load %arg18[%c0_94, %c0_95] : memref<1x128xf32, #tpu.memory_space<vmem>>, vector<1x128xf32>
    %cst_96 = arith.constant dense<0.000000e+00> : vector<128xf32>
    %134 = vector.multi_reduction <add>, %132, %cst_96 [0] : vector<256x128xf32> to vector<128xf32>
    %135 = vector.shape_cast %134 : vector<128xf32> to vector<1x128xf32>
    %136 = arith.addf %133, %135 : vector<1x128xf32>
    %c0_97 = arith.constant 0 : index
    %c0_98 = arith.constant 0 : index
    %137 = vector.load %arg18[%c0_97, %c0_98] : memref<1x128xf32, #tpu.memory_space<vmem>>, vector<1x128xf32>
    tpu.vector_store %arg18[%c0_97, %c0_98], %136 {strides = array<i32>} : memref<1x128xf32, #tpu.memory_space<vmem>>, vector<1x128xf32>,
    %c3_i32 = arith.constant 3 : i32
    %138 = arith.cmpi eq, %arg1, %c3_i32 : i32
    %139 = arith.extui %138 : i1 to i32
    %c0_i32_99 = arith.constant 0 : i32
    %140 = arith.cmpi ne, %139, %c0_i32_99 : i32
    scf.if %140 {
      %c0_100 = arith.constant 0 : index
      %c0_101 = arith.constant 0 : index
      %141 = vector.load %arg18[%c0_100, %c0_101] : memref<1x128xf32, #tpu.memory_space<vmem>>, vector<1x128xf32>
      %cst_102 = arith.constant 9.765625E-4 : f32
      %142 = vector.broadcast %cst_102 : f32 to vector<1x128xf32>
      %143 = arith.mulf %141, %142 : vector<1x128xf32>
      %c0_103 = arith.constant 0 : index
      %c0_104 = arith.constant 0 : index
      %144 = vector.load %arg9[%c0_103, %c0_104] : memref<128x128xf32, #tpu.memory_space<vmem>>, vector<128x128xf32>
      %cst_105 = arith.constant dense<0.000000e+00> : vector<1x128xf32>
      %145 = tpu.matmul %143, %144, %cst_105 {dimension_numbers = #tpu.dot_dimension_numbers<[1], [0], [0], [1], [0, 0, 1, 1], [], []>} : vector<1x128xf32>, vector<128x128xf32>, vector<1x128xf32> -> vector<1x128xf32>
      %c0_106 = arith.constant 0 : index
      %c0_107 = arith.constant 0 : index
      %146 = vector.load %arg10[%c0_106, %c0_107] : memref<1x128xf32, #tpu.memory_space<vmem>>, vector<1x128xf32>
      %147 = arith.addf %145, %146 : vector<1x128xf32>
      %148 = vector.shape_cast %147 : vector<1x128xf32> to vector<1x1x128xf32>
      %149 = vector.shape_cast %148 : vector<1x1x128xf32> to vector<1x1x128xf32>
      %150 = vector.broadcast %149 : vector<1x1x128xf32> to vector<1x8x128xf32>
      %c0_108 = arith.constant 0 : index
      %c0_109 = arith.constant 0 : index
      %c0_110 = arith.constant 0 : index
      %151 = vector.load %arg11[%c0_108, %c0_109, %c0_110] : memref<1x8x128xf32, #tpu.memory_space<vmem>>, vector<1x8x128xf32>
      tpu.vector_store %arg11[%c0_108, %c0_109, %c0_110], %150 {strides = array<i32>} : memref<1x8x128xf32, #tpu.memory_space<vmem>>, vector<1x8x128xf32>,
    } else {
    }
    return
  }
  func.func @transform_0(%arg0: i32, %arg1: i32) -> (i32, i32, i32, i32) {
    %c0_i32 = arith.constant 0 : i32
    %c0_i32_0 = arith.constant 0 : i32
    %c0_i32_1 = arith.constant 0 : i32
    %c0_i32_2 = arith.constant 0 : i32
    return %arg0, %c0_i32, %c0_i32_0, %c0_i32_1 : i32, i32, i32, i32
  }
  func.func @transform_1(%arg0: i32, %arg1: i32) -> (i32, i32) {
    %c0_i32 = arith.constant 0 : i32
    %c0_i32_0 = arith.constant 0 : i32
    %c0_i32_1 = arith.constant 0 : i32
    return %c0_i32, %c0_i32_0 : i32, i32
  }
  func.func @transform_2(%arg0: i32, %arg1: i32) -> (i32, i32) {
    %c0_i32 = arith.constant 0 : i32
    %c0_i32_0 = arith.constant 0 : i32
    %c0_i32_1 = arith.constant 0 : i32
    return %c0_i32, %c0_i32_0 : i32, i32
  }
  func.func @transform_3(%arg0: i32, %arg1: i32) -> (i32, i32) {
    %c0_i32 = arith.constant 0 : i32
    %c0_i32_0 = arith.constant 0 : i32
    %c0_i32_1 = arith.constant 0 : i32
    return %c0_i32, %c0_i32_0 : i32, i32
  }
  func.func @transform_4(%arg0: i32, %arg1: i32) -> (i32, i32) {
    %c0_i32 = arith.constant 0 : i32
    %c0_i32_0 = arith.constant 0 : i32
    %c0_i32_1 = arith.constant 0 : i32
    return %c0_i32, %c0_i32_0 : i32, i32
  }
  func.func @transform_5(%arg0: i32, %arg1: i32) -> (i32, i32) {
    %c0_i32 = arith.constant 0 : i32
    %c0_i32_0 = arith.constant 0 : i32
    %c0_i32_1 = arith.constant 0 : i32
    return %c0_i32, %c0_i32_0 : i32, i32
  }
  func.func @transform_6(%arg0: i32, %arg1: i32) -> (i32, i32) {
    %c0_i32 = arith.constant 0 : i32
    %c0_i32_0 = arith.constant 0 : i32
    %c0_i32_1 = arith.constant 0 : i32
    return %c0_i32, %c0_i32_0 : i32, i32
  }
  func.func @transform_7(%arg0: i32, %arg1: i32) -> (i32, i32) {
    %c0_i32 = arith.constant 0 : i32
    %c0_i32_0 = arith.constant 0 : i32
    %c0_i32_1 = arith.constant 0 : i32
    return %c0_i32, %c0_i32_0 : i32, i32
  }
  func.func @transform_8(%arg0: i32, %arg1: i32) -> (i32, i32) {
    %c0_i32 = arith.constant 0 : i32
    %c0_i32_0 = arith.constant 0 : i32
    %c0_i32_1 = arith.constant 0 : i32
    return %c0_i32, %c0_i32_0 : i32, i32
  }
  func.func @transform_9(%arg0: i32, %arg1: i32) -> (i32, i32, i32) {
    %c0_i32 = arith.constant 0 : i32
    %c0_i32_0 = arith.constant 0 : i32
    %c0_i32_1 = arith.constant 0 : i32
    return %arg0, %c0_i32, %c0_i32_0 : i32, i32, i32
  }
}

</mosaic_0001>

<bundles_post_ra>
// kernel: _lambda_.2
= control target key start
LH: loop header
LB: loop body
LE: loop exit
PB: predicated region body
PF: predicated region fallthrough
CT: control target
= control target key end

     0   :  { %vm93_vm0 = vcmask 1042432   ;;  %vm44_vm1 = vcmask 23552   ;;  %vm269_vm2 = vcmask 261120   ;;  %s816_s1 = inlined_call_operand.vmem [shape: f32[3,32], index: 1, kind: input, shape index: {}]   ;;  %s817_s0 = inlined_call_operand.vmem [shape: f32[128,3], index: 0, kind: input, shape index: {}]   ;;  %s818_s3 = inlined_call_operand.vmem [shape: f32[32,3], index: 3, kind: input, shape index: {}]   ;;  %s819_s2 = inlined_call_operand.vmem [shape: f32[1,32], index: 2, kind: input, shape index: {}]   ;;  %s820_s4 = inlined_call_operand.vmem [shape: f32[1,3], index: 4, kind: input, shape index: {}]   ;;  %s821_s5 = inlined_call_operand.vmem [shape: f32[128,3], index: 5, kind: output, shape index: {}]  }
   0x1   :  { %v36_v0 = vld [vmem:[%s816_s1] sm:$0x7]  ;;  %v21_v2 = vld [vmem:[%s817_s0 + $0x8] sm:$0xff]  ;;  %v22_v3 = vld [vmem:[%s817_s0 + $0x10] sm:$0xff] }
   0x2   :  { %v20_v1 = vld [vmem:[%s817_s0] sm:$0xff]  ;;  %555 = vmatprep.subr.msk.mxu0 %vm93_vm0, %v36_v0  ;;  %v23_v4 = vld [vmem:[%s817_s0 + $0x18] sm:$0xff]  ;;  %v259_v7 = vld [vmem:[%s818_s3 + $0x8] sm:$0xff] }
   0x3   :  { %557 = vmatprep.mubr.msk.f32.mxu0 %vm44_vm1, %v20_v1  ;;  %556 = vmatpush3.msk.msra.mxu0 %vm93_vm0, %v36_v0  ;;  %v24_v5 = vld [vmem:[%s817_s0 + $0x20] sm:$0xff]  ;;  %v25_v9 = vld [vmem:[%s817_s0 + $0x28] sm:$0xff]  ;;  %v26_v10 = vld [vmem:[%s817_s0 + $0x30] sm:$0xff] }
   0x4   :  { %558 = vmatmul.mubr.msk.f32.vlgmr.msra.gmra.mrb[0].mxu0 %vm44_vm1, %v21_v2  ;;  %v258_v6 = vld [vmem:[%s818_s3] sm:$0xff]  ;;  %v27_v11 = vld [vmem:[%s817_s0 + $0x38] sm:$0xff]  ;;  %v29_v13 = vld [vmem:[%s817_s0 + $0x48] sm:$0xff] }
   0x5   :  { %560 = vmatprep.mubr.msk.f32.mxu0 %vm44_vm1, %v22_v3  ;;  %v613_v8 = vpack.c.bf16 %v259_v7, %v258_v6  ;;  %v28_v12 = vld [vmem:[%s817_s0 + $0x40] sm:$0xff]  ;;  %v30_v14 = vld [vmem:[%s817_s0 + $0x50] sm:$0xff]  ;;  %v31_v15 = vld [vmem:[%s817_s0 + $0x58] sm:$0xff] }
   0x6   :  { %v32_v16 = vld [vmem:[%s817_s0 + $0x60] sm:$0xff]  ;;  %v33_v17 = vld [vmem:[%s817_s0 + $0x68] sm:$0xff]  ;;  %v34_v18 = vld [vmem:[%s817_s0 + $0x70] sm:$0xff] }
   0x7   :  { %614 = vmatprep.subr.bf16.mxu1 %v613_v8  ;;  %v35_v19 = vld [vmem:[%s817_s0 + $0x78] sm:$0xff]  ;;  %v260_v20 = vld [vmem:[%s818_s3 + $0x10] sm:$0xff]  ;;  %v483_v23 = vld [vmem:[%s819_s2] ss:$0 sm:$0xff] }
   0x8   :  { %561 = vmatmul.mubr.msk.f32.gmra.mrb[2].mxu0 %vm44_vm1, %v23_v4  ;;  %616 = vmatpush3.bf16.msra.mxu1 %v613_v8  ;;  %v261_v21 = vld [vmem:[%s818_s3 + $0x18] sm:$0xff]  ;;  %v501_v8 = vld [vmem:[%s820_s4] ss:$0 sm:$0xff] }
   0x9   :  { %563 = vmatprep.mubr.msk.f32.mxu0 %vm44_vm1, %v24_v5  ;;  %v617_v22 = vpack.c.bf16 %v261_v21, %v260_v20 }
   0xb   :  { %618 = vmatprep.subr.bf16.mxu1 %v617_v22 }
   0xc   :  { %564 = vmatmul.mubr.msk.f32.gmra.mrb[4].mxu0 %vm44_vm1, %v25_v9  ;;  %620 = vmatpush3.bf16.msra.mxu1 %v617_v22 }
   0xd   :  { %566 = vmatprep.mubr.msk.f32.mxu0 %vm44_vm1, %v26_v10 }
  0x10   :  { %567 = vmatmul.mubr.msk.f32.gmra.mrb[6].mxu0 %vm44_vm1, %v27_v11 }
  0x11   :  { %569 = vmatprep.mubr.msk.f32.mxu0 %vm44_vm1, %v28_v12 }
  0x14   :  { %570 = vmatmul.mubr.msk.f32.gmra.mrb[8].mxu0 %vm44_vm1, %v29_v13 }
  0x15   :  { %572 = vmatprep.mubr.msk.f32.mxu0 %vm44_vm1, %v30_v14 }
  0x18   :  { %573 = vmatmul.mubr.msk.f32.gmra.mrb[10].mxu0 %vm44_vm1, %v31_v15 }
  0x19   :  { %575 = vmatprep.mubr.msk.f32.mxu0 %vm44_vm1, %v32_v16 }
  0x1c   :  { %576 = vmatmul.mubr.msk.f32.gmra.mrb[12].mxu0 %vm44_vm1, %v33_v17 }
  0x1d   :  { %578 = vmatprep.mubr.msk.f32.mxu0 %vm44_vm1, %v34_v18 }
  0x20   :  { %579 = vmatmul.mubr.msk.f32.gmra.mrb[14].mxu0 %vm44_vm1, %v35_v19 }
  0xd7   :  { %v559_v24 = vpop.f32.mrb[0].mxu0 }
  0xd8   :  { %v169_v25 = vadd.f32 %v559_v24, %v483_v23  ;;  %v163_v26 = vpop.f32.mrb[1].mxu0 }
  0xd9   :  { %v164_v27 = vadd.f32 %v483_v23, %v163_v26 }
  0xda   :  { %v243_v30 = vmax.f32 %v169_v25, 0.0 }
  0xdb   :  { %v242_v28 = vmax.f32 %v164_v27, 0.0  ;;  %v562_v29 = vpop.f32.mrb[2].mxu0 }
  0xdc   :  { %v179_v31 = vadd.f32 %v562_v29, %v483_v23  ;;  %v173_v32 = vpop.f32.mrb[3].mxu0 }
  0xdd   :  { %v174_v33 = vadd.f32 %v483_v23, %v173_v32  ;;  %589 = vmatprep.mubr.msk.f32.mxu1 %vm269_vm2, %v242_v28 }
  0xde   :  { %590 = vmatmul.mubr.msk.f32.vlgmr.msra.gmra.mrb[0].mxu1 %vm269_vm2, %v243_v30  ;;  %v245_v36 = vmax.f32 %v179_v31, 0.0 }
  0xdf   :  { %v244_v34 = vmax.f32 %v174_v33, 0.0  ;;  %v565_v35 = vpop.f32.mrb[4].mxu0 }
  0xe0   :  { %v189_v37 = vadd.f32 %v565_v35, %v483_v23  ;;  %v183_v38 = vpop.f32.mrb[5].mxu0 }
  0xe1   :  { %v184_v39 = vadd.f32 %v483_v23, %v183_v38  ;;  %592 = vmatprep.mubr.msk.f32.mxu1 %vm269_vm2, %v244_v34 }
  0xe2   :  { %593 = vmatmul.mubr.msk.f32.gmra.mrb[2].mxu1 %vm269_vm2, %v245_v36  ;;  %v247_v42 = vmax.f32 %v189_v37, 0.0 }
  0xe3   :  { %v246_v40 = vmax.f32 %v184_v39, 0.0  ;;  %v568_v41 = vpop.f32.mrb[6].mxu0 }
  0xe4   :  { %v199_v43 = vadd.f32 %v568_v41, %v483_v23  ;;  %v193_v44 = vpop.f32.mrb[7].mxu0 }
  0xe5   :  { %v194_v45 = vadd.f32 %v483_v23, %v193_v44  ;;  %595 = vmatprep.mubr.msk.f32.mxu1 %vm269_vm2, %v246_v40 }
  0xe6   :  { %596 = vmatmul.mubr.msk.f32.gmra.mrb[4].mxu1 %vm269_vm2, %v247_v42  ;;  %v249_v48 = vmax.f32 %v199_v43, 0.0 }
  0xe7   :  { %v248_v46 = vmax.f32 %v194_v45, 0.0  ;;  %v571_v47 = vpop.f32.mrb[8].mxu0 }
  0xe8   :  { %v209_v49 = vadd.f32 %v571_v47, %v483_v23  ;;  %v203_v50 = vpop.f32.mrb[9].mxu0 }
  0xe9   :  { %v204_v51 = vadd.f32 %v483_v23, %v203_v50  ;;  %598 = vmatprep.mubr.msk.f32.mxu1 %vm269_vm2, %v248_v46 }
  0xea   :  { %599 = vmatmul.mubr.msk.f32.gmra.mrb[6].mxu1 %vm269_vm2, %v249_v48  ;;  %v251_v54 = vmax.f32 %v209_v49, 0.0 }
  0xeb   :  { %v250_v52 = vmax.f32 %v204_v51, 0.0  ;;  %v574_v53 = vpop.f32.mrb[10].mxu0 }
  0xec   :  { %v219_v55 = vadd.f32 %v574_v53, %v483_v23  ;;  %v213_v56 = vpop.f32.mrb[11].mxu0 }
  0xed   :  { %v214_v57 = vadd.f32 %v483_v23, %v213_v56  ;;  %601 = vmatprep.mubr.msk.f32.mxu1 %vm269_vm2, %v250_v52 }
  0xee   :  { %602 = vmatmul.mubr.msk.f32.gmra.mrb[8].mxu1 %vm269_vm2, %v251_v54  ;;  %v253_v60 = vmax.f32 %v219_v55, 0.0 }
  0xef   :  { %v252_v58 = vmax.f32 %v214_v57, 0.0  ;;  %v577_v59 = vpop.f32.mrb[12].mxu0 }
  0xf0   :  { %v229_v61 = vadd.f32 %v577_v59, %v483_v23  ;;  %v223_v62 = vpop.f32.mrb[13].mxu0 }
  0xf1   :  { %v224_v63 = vadd.f32 %v483_v23, %v223_v62  ;;  %604 = vmatprep.mubr.msk.f32.mxu1 %vm269_vm2, %v252_v58 }
  0xf2   :  { %605 = vmatmul.mubr.msk.f32.gmra.mrb[10].mxu1 %vm269_vm2, %v253_v60  ;;  %v255_v2 = vmax.f32 %v229_v61, 0.0 }
  0xf3   :  { %v254_v0 = vmax.f32 %v224_v63, 0.0  ;;  %v580_v1 = vpop.f32.mrb[14].mxu0 }
  0xf4   :  { %v239_v3 = vadd.f32 %v580_v1, %v483_v23  ;;  %v233_v4 = vpop.f32.mrb[15].mxu0 }
  0xf5   :  { %v234_v5 = vadd.f32 %v483_v23, %v233_v4  ;;  %607 = vmatprep.mubr.msk.f32.mxu1 %vm269_vm2, %v254_v0 }
  0xf6   :  { %608 = vmatmul.mubr.msk.f32.gmra.mrb[12].mxu1 %vm269_vm2, %v255_v2  ;;  %v257_v7 = vmax.f32 %v239_v3, 0.0 }
  0xf7   :  { %v256_v6 = vmax.f32 %v234_v5, 0.0 }
  0xf9   :  { %610 = vmatprep.mubr.msk.f32.mxu1 %vm269_vm2, %v256_v6 }
  0xfa   :  { %611 = vmatmul.mubr.msk.f32.gmra.mrb[14].mxu1 %vm269_vm2, %v257_v7 }
 0x1b1   :  { %v591_v9 = vpop.f32.mrb[0].mxu1 }
 0x1b2   :  { %v390_v10 = vadd.f32 %v591_v9, %v501_v8  ;;  %v384_v11 = vpop.f32.mrb[1].mxu1 }
 0x1b3   :  { %v385_v12 = vadd.f32 %v501_v8, %v384_v11 }
 0x1b4   :  { %464 = vst.msk [vmem:[%s821_s5 + $0x8] sm:$0xff] %vm44_vm1, %v390_v10 }
 0x1b5   :  { %463 = vst.msk [vmem:[%s821_s5] sm:$0xff] %vm44_vm1, %v385_v12  ;;  %v594_v13 = vpop.f32.mrb[2].mxu1 }
 0x1b6   :  { %v400_v14 = vadd.f32 %v594_v13, %v501_v8  ;;  %v394_v15 = vpop.f32.mrb[3].mxu1 }
 0x1b7   :  { %v395_v16 = vadd.f32 %v501_v8, %v394_v15 }
 0x1b8   :  { %466 = vst.msk [vmem:[%s821_s5 + $0x18] sm:$0xff] %vm44_vm1, %v400_v14 }
 0x1b9   :  { %465 = vst.msk [vmem:[%s821_s5 + $0x10] sm:$0xff] %vm44_vm1, %v395_v16  ;;  %v597_v17 = vpop.f32.mrb[4].mxu1 }
 0x1ba   :  { %v410_v18 = vadd.f32 %v597_v17, %v501_v8  ;;  %v404_v19 = vpop.f32.mrb[5].mxu1 }
 0x1bb   :  { %v405_v20 = vadd.f32 %v501_v8, %v404_v19 }
 0x1bc   :  { %468 = vst.msk [vmem:[%s821_s5 + $0x28] sm:$0xff] %vm44_vm1, %v410_v18 }
 0x1bd   :  { %467 = vst.msk [vmem:[%s821_s5 + $0x20] sm:$0xff] %vm44_vm1, %v405_v20  ;;  %v600_v21 = vpop.f32.mrb[6].mxu1 }
 0x1be   :  { %v420_v22 = vadd.f32 %v600_v21, %v501_v8  ;;  %v414_v23 = vpop.f32.mrb[7].mxu1 }
 0x1bf   :  { %v415_v24 = vadd.f32 %v501_v8, %v414_v23 }
 0x1c0   :  { %470 = vst.msk [vmem:[%s821_s5 + $0x38] sm:$0xff] %vm44_vm1, %v420_v22 }
 0x1c1   :  { %469 = vst.msk [vmem:[%s821_s5 + $0x30] sm:$0xff] %vm44_vm1, %v415_v24  ;;  %v603_v25 = vpop.f32.mrb[8].mxu1 }
 0x1c2   :  { %v430_v26 = vadd.f32 %v603_v25, %v501_v8  ;;  %v424_v27 = vpop.f32.mrb[9].mxu1 }
 0x1c3   :  { %v425_v28 = vadd.f32 %v501_v8, %v424_v27 }
 0x1c4   :  { %472 = vst.msk [vmem:[%s821_s5 + $0x48] sm:$0xff] %vm44_vm1, %v430_v26 }
 0x1c5   :  { %471 = vst.msk [vmem:[%s821_s5 + $0x40] sm:$0xff] %vm44_vm1, %v425_v28  ;;  %v606_v29 = vpop.f32.mrb[10].mxu1 }
 0x1c6   :  { %v440_v30 = vadd.f32 %v606_v29, %v501_v8  ;;  %v434_v31 = vpop.f32.mrb[11].mxu1 }
 0x1c7   :  { %v435_v32 = vadd.f32 %v501_v8, %v434_v31 }
 0x1c8   :  { %474 = vst.msk [vmem:[%s821_s5 + $0x58] sm:$0xff] %vm44_vm1, %v440_v30 }
 0x1c9   :  { %473 = vst.msk [vmem:[%s821_s5 + $0x50] sm:$0xff] %vm44_vm1, %v435_v32  ;;  %v609_v33 = vpop.f32.mrb[12].mxu1 }
 0x1ca   :  { %v450_v34 = vadd.f32 %v609_v33, %v501_v8  ;;  %v444_v35 = vpop.f32.mrb[13].mxu1 }
 0x1cb   :  { %v445_v36 = vadd.f32 %v501_v8, %v444_v35 }
 0x1cc   :  { %476 = vst.msk [vmem:[%s821_s5 + $0x68] sm:$0xff] %vm44_vm1, %v450_v34 }
 0x1cd   :  { %475 = vst.msk [vmem:[%s821_s5 + $0x60] sm:$0xff] %vm44_vm1, %v445_v36  ;;  %v612_v37 = vpop.f32.mrb[14].mxu1 }
 0x1ce   :  { %v460_v38 = vadd.f32 %v612_v37, %v501_v8  ;;  %v454_v39 = vpop.f32.mrb[15].mxu1 }
 0x1cf   :  { %v455_v40 = vadd.f32 %v501_v8, %v454_v39 }
 0x1d0   :  { %478 = vst.msk [vmem:[%s821_s5 + $0x78] sm:$0xff] %vm44_vm1, %v460_v38 }
 0x1d1   :  { %477 = vst.msk [vmem:[%s821_s5 + $0x70] sm:$0xff] %vm44_vm1, %v455_v40 }

// kernel: _lambda_.3
= control target key start
LH: loop header
LB: loop body
LE: loop exit
PB: predicated region body
PF: predicated region fallthrough
CT: control target
= control target key end

     0   :  { %s9412_s30 = smov 0   ;;  %s9414_s10 = smov 0   ;;  %s12867_s0 = inlined_call_operand.vmem [shape: f32[2,16,16,128], index: 0, kind: input, shape index: {}]   ;;  %s12868_s1 = inlined_call_operand.vmem [shape: bf16[1152,128], index: 1, kind: input, shape index: {}]   ;;  %s12869_s2 = inlined_call_operand.vmem [shape: f32[1,128], index: 2, kind: input, shape index: {}]   ;;  %s12870_s3 = inlined_call_operand.vmem [shape: bf16[1152,128], index: 3, kind: input, shape index: {}]   ;;  %s12871_s4 = inlined_call_operand.vmem [shape: f32[1,128], index: 4, kind: input, shape index: {}, may-alias: {4,6}]   ;;  %s12872_s5 = inlined_call_operand.vmem [shape: bf16[1152,128], index: 5, kind: input, shape index: {}]   ;;  %s12873_s6 = inlined_call_operand.vmem [shape: f32[1,128], index: 6, kind: input, shape index: {}, may-alias: {4,6}]   ;;  %s12874_s7 = inlined_call_operand.vmem [shape: f32[128,128], index: 7, kind: input, shape index: {}]   ;;  %s12875_s8 = inlined_call_operand.vmem [shape: f32[1,128], index: 8, kind: input, shape index: {}]   ;;  %s12876_s9 = inlined_call_operand.vmem [shape: f32[2,8,128], index: 9, kind: output, shape index: {}]  }
   0x1   :  { %s9416_s11 = smov 0   ;;  %s9418_s12 = smov 0  }
   0x2   :  { %s9420_s13 = smov 0  }
   0x3 LB: > { %s28_s14 = sadd.s32 1, %s9345_s11  ;;  %s31_s15 = sadd.s32 1, %s9349_s12  ;;  %s9353_s13 = sphi %s9420_s13, %s19_s13   ;;  %s9349_s12 = sphi %s9418_s12, %s12999_s12   ;;  %s9345_s11 = sphi %s9416_s11, %s12998_s11   ;;  %s9341_s10 = sphi %s9414_s10, %s12997_s10   ;;  %s9337_s30 = sphi %s9412_s30, %s12996_s30  }
   0x4   : > { %p29_p0 = scmp.ge.s32.totalorder %s28_s14, 4  ;;  %p7029_p1 = scmp.ge.s32.totalorder %s9353_s13, 1 }
   0x5   : > { %p299_p2 = scmp.lt.s32.totalorder %s9353_s13, 9 }
   0x6   : > { %s13001_s14 = smov (%p29_p0, %s28_s14), 0  ;;  %s13003_s15 = smov (!%p29_p0, %s31_s15), %s9349_s12 }
   0x7   : > { %p300_p3 = pnand %p7029_p1, %p299_p2  ;;  %p33_p4 = scmp.ge.s32.totalorder %s13003_s15, 2 }
   0x9   : > { %s13005_s15 = smov (%p33_p4, %s13003_s15), 0  ;;  %303 = sbr.rel (%p300_p3) target bundleno = 1904 (0x770), region = 56 }
  0x10   : > { %p334_p5 = scmp.lt.s32.totalorder %s9341_s10, 1  ;;  %p7033_p6 = scmp.ne.s32.totalorder %s9337_s30, 0 }
  0x11   : > { %v9458_v0 = vld [vmem:[%s12868_s1 + $0x40] sm:$0xff] (!%p7033_p6)   ;;  %v9355_v2 = vmov (!%p7033_p6), 0.0   ;;  %v8956_v3 = vld [vmem:[%s12868_s1 + $0x48] sm:$0xff] (!%p7033_p6)   ;;  %v9356_v5 = vmov (!%p7033_p6), 0.0|0.0   ;;  %v8958_v6 = vld [vmem:[%s12868_s1 + $0x50] sm:$0xff] (!%p7033_p6)  }
  0x12   : > { %s13007_s10 = smov (!%p334_p5, %s9341_s10), 1  ;;  %347 = sbr.rel (%p7033_p6) target bundleno = 607 (0x25f), region = 60 }
  0x13   : > { %s7256_s16 = sshll.u32 %s13007_s10, 8  ;;  %s7032_s17 = sshll.u32 %s13007_s10, 3  ;;  %v9463_v1 = vld [vmem:[%s12868_s1] sm:$0xff] (!%p7033_p6)   ;;  %348 = vst [vmem:[#allocation2] sm:$0xff] (!%p7033_p6), %v9355_v2  ;;  %349 = vst [vmem:[#allocation2 + $0x8] sm:$0xff] (!%p7033_p6), %v9355_v2  ;;  %7257 = vmatprep.subr.bf16.mxu0 (!%p7033_p6), %v9458_v0  ;;  %8893 = vmatprep.subr.bf16.mxu1 (!%p7033_p6), %v9458_v0  ;;  %v8957_v4 = vld [vmem:[%s12868_s1 + $0x8] sm:$0xff] (!%p7033_p6)  }
  0x14   : > { %s9447_s20 = scalar_lea.vmem %s12867_s0, %s7256_s16  ;;  %s9452_s23 = scalar_lea.vmem %s12876_s9, %s7032_s17  ;;  %350 = vst [vmem:[#allocation2 + $0x10] sm:$0x3] (!%p7033_p6), %v9355_v2  ;;  %402 = vst [vmem:[#allocation5] sm:$0xff] (!%p7033_p6), %v9355_v2  ;;  %7258 = vmatpush3.bf16.msra.mxu0 (!%p7033_p6), %v9463_v1  ;;  %8901 = vmatpush3.bf16.msra.mxu1 (!%p7033_p6), %v9463_v1  ;;  %v8959_v7 = vld [vmem:[%s12868_s1 + $0x10] sm:$0xff] (!%p7033_p6)   ;;  %v8960_v8 = vld [vmem:[%s12868_s1 + $0x58] sm:$0xff] (!%p7033_p6)  }
  0x15   : > { %403 = vst [vmem:[#allocation5 + $0x8] sm:$0xff] (!%p7033_p6), %v9355_v2  ;;  %404 = vst [vmem:[#allocation5 + $0x10] sm:$0xff] (!%p7033_p6), %v9355_v2  ;;  %7259 = vmatprep.subr.bf16.mxu0 (!%p7033_p6), %v8956_v3  ;;  %8894 = vmatprep.subr.bf16.mxu1 (!%p7033_p6), %v8956_v3  ;;  %v8961_v9 = vld [vmem:[%s12868_s1 + $0x18] sm:$0xff] (!%p7033_p6)   ;;  %v8962_v10 = vld [vmem:[%s12868_s1 + $0x60] sm:$0xff] (!%p7033_p6)  }
  0x16   : > { %405 = vst [vmem:[#allocation5 + $0x18] sm:$0xff] (!%p7033_p6), %v9355_v2  ;;  %406 = vst [vmem:[#allocation5 + $0x20] sm:$0xff] (!%p7033_p6), %v9355_v2  ;;  %v8963_v11 = vld [vmem:[%s12868_s1 + $0x20] sm:$0xff] (!%p7033_p6)   ;;  %v8964_v12 = vld [vmem:[%s12868_s1 + $0x68] sm:$0xff] (!%p7033_p6)  }
  0x17   : > { %407 = vst [vmem:[#allocation5 + $0x28] sm:$0xff] (!%p7033_p6), %v9355_v2  ;;  %408 = vst [vmem:[#allocation5 + $0x30] sm:$0xff] (!%p7033_p6), %v9355_v2  ;;  %v521_v15 = vld [vmem:[%s9447_s20 + $0xb0] sm:$0xff] (!%p7033_p6)  ;;  %v522_v17 = vld [vmem:[%s9447_s20 + $0xb8] sm:$0xff] (!%p7033_p6) }
  0x18   : > { %409 = vst [vmem:[#allocation5 + $0x38] sm:$0xff] (!%p7033_p6), %v9355_v2  ;;  %410 = vst [vmem:[#allocation5 + $0x40] sm:$0xff] (!%p7033_p6), %v9355_v2  ;;  %7260 = vmatpush3.bf16.msra.mxu0 (!%p7033_p6), %v8957_v4  ;;  %8902 = vmatpush3.bf16.msra.mxu1 (!%p7033_p6), %v8957_v4  ;;  %v714_v18 = vpack.c.bf16 (!%p7033_p6), %v522_v17, %v521_v15  ;;  %v8965_v19 = vld [vmem:[%s12868_s1 + $0x28] sm:$0xff] (!%p7033_p6)   ;;  %v8966_v20 = vld [vmem:[%s12868_s1 + $0x70] sm:$0xff] (!%p7033_p6)  }
  0x19   : > { %411 = vst [vmem:[#allocation5 + $0x48] sm:$0xff] %v9355_v2  ;;  %412 = vst [vmem:[#allocation5 + $0x50] sm:$0xff] %v9355_v2  ;;  %7261 = vmatprep.subr.bf16.mxu0 %v8958_v6  ;;  %8895 = vmatprep.subr.bf16.mxu1 %v8958_v6  ;;  %v8967_v21 = vld [vmem:[%s12868_s1 + $0x30] sm:$0xff]   ;;  %v8968_v22 = vld [vmem:[%s12868_s1 + $0x78] sm:$0xff]  }
  0x1a   : > { %413 = vst [vmem:[#allocation5 + $0x58] sm:$0xff] %v9355_v2  ;;  %414 = vst [vmem:[#allocation5 + $0x60] sm:$0xff] %v9355_v2  ;;  %v666_v13 = vld [vmem:[#allocation2 + $0x1] sm:$0xff]  ;;  %1725 = vmatprep.mubr.bf16.mxu1 %v714_v18  ;;  %v8969_v31 = vld [vmem:[%s12868_s1 + $0x38] sm:$0xff]  }
  0x1b   : > { %415 = vst [vmem:[#allocation5 + $0x68] sm:$0xff] %v9355_v2  ;;  %416 = vst [vmem:[#allocation5 + $0x70] sm:$0xff] %v9355_v2  ;;  %v667_v14 = vld [vmem:[#allocation2 + $0x9] sm:$0xff]  ;;  %v499_v23 = vld [vmem:[%s9447_s20] sm:$0xff] }
  0x1c   : > { %417 = vst [vmem:[#allocation5 + $0x78] sm:$0xff] %v9355_v2  ;;  %418 = vst [vmem:[#allocation5 + $0x80] sm:$0xff] %v9355_v2  ;;  %7262 = vmatpush3.bf16.msra.mxu0 %v8959_v7  ;;  %8903 = vmatpush3.bf16.msra.mxu1 %v8959_v7  ;;  %v702_v16 = vpack.c.bf16 %v667_v14, %v666_v13  ;;  %v500_v24 = vld [vmem:[%s9447_s20 + $0x8] sm:$0xff]  ;;  %v523_v27 = vld [vmem:[%s9447_s20 + $0xc0] sm:$0xff] }
  0x1d   : > { %419 = vst [vmem:[#allocation5 + $0x88] sm:$0xff] %v9355_v2  ;;  %420 = vst [vmem:[#allocation5 + $0x90] sm:$0xff] %v9355_v2  ;;  %7263 = vmatprep.subr.bf16.mxu0 %v8960_v8  ;;  %8896 = vmatprep.subr.bf16.mxu1 %v8960_v8  ;;  %v703_v26 = vpack.c.bf16 %v500_v24, %v499_v23  ;;  %v524_v28 = vld [vmem:[%s9447_s20 + $0xc8] sm:$0xff]  ;;  %v8970_v33 = vld [vmem:[%s12868_s1 + $0xc0] sm:$0xff]  }
  0x1e   : > { %421 = vst [vmem:[#allocation5 + $0x98] sm:$0xff] %v9355_v2  ;;  %422 = vst [vmem:[#allocation5 + $0xa0] sm:$0xff] %v9355_v2  ;;  %1629 = vmatprep.mubr.bf16.mxu0 %v702_v16  ;;  %v715_v30 = vpack.c.bf16 %v524_v28, %v523_v27  ;;  %v8973_v34 = vld [vmem:[%s12868_s1 + $0x140] sm:$0xff]   ;;  %v501_v37 = vld [vmem:[%s9447_s20 + $0x10] sm:$0xff] }
  0x1f   : > { %423 = vst [vmem:[#allocation5 + $0xa8] sm:$0xff] %v9355_v2  ;;  %424 = vst [vmem:[#allocation5 + $0xb0] sm:$0xff] %v9355_v2  ;;  %v8971_v35 = vld [vmem:[%s12868_s1 + $0x80] sm:$0xff]   ;;  %v502_v38 = vld [vmem:[%s9447_s20 + $0x18] sm:$0xff] }
  0x20   : > { %425 = vst [vmem:[#allocation5 + $0xb8] sm:$0xff] %v9355_v2  ;;  %426 = vst [vmem:[#allocation5 + $0xc0] sm:$0xff] %v9355_v2  ;;  %7264 = vmatpush3.bf16.msra.mxu0 %v8961_v9  ;;  %8904 = vmatpush3.bf16.msra.mxu1 %v8961_v9  ;;  %v8975_v36 = vld [vmem:[%s12868_s1 + $0x100] sm:$0xff]   ;;  %v9683_v39 = vpack.c.bf16 %v502_v38, %v501_v37  ;;  %v525_v40 = vld [vmem:[%s9447_s20 + $0xd0] sm:$0xff] }
  0x21   : > { %427 = vst [vmem:[#allocation5 + $0xc8] sm:$0xff] %v9355_v2  ;;  %428 = vst [vmem:[#allocation5 + $0xd0] sm:$0xff] %v9355_v2  ;;  %7265 = vmatprep.subr.bf16.mxu0 %v8962_v10  ;;  %8897 = vmatprep.subr.bf16.mxu1 %v8962_v10  ;;  %v526_v41 = vld [vmem:[%s9447_s20 + $0xd8] sm:$0xff]  ;;  %v8972_v45 = vld [vmem:[%s12868_s1 + $0xc8] sm:$0xff]  }
  0x22   : > { %429 = vst [vmem:[#allocation5 + $0xd8] sm:$0xff] %v9355_v2  ;;  %430 = vst [vmem:[#allocation5 + $0xe0] sm:$0xff] %v9355_v2  ;;  %v716_v44 = vpack.c.bf16 %v526_v41, %v525_v40  ;;  %v8981_v50 = vld [vmem:[%s12868_s1 + $0x148] sm:$0xff]   ;;  %v8976_v53 = vld [vmem:[%s12868_s1 + $0xd0] sm:$0xff]  }
  0x23   : > { %431 = vst [vmem:[#allocation5 + $0xe8] sm:$0xff] %v9355_v2  ;;  %432 = vst [vmem:[#allocation5 + $0xf0] sm:$0xff] %v9355_v2  ;;  %v8974_v51 = vld [vmem:[%s12868_s1 + $0x88] sm:$0xff]   ;;  %v8977_v54 = vld [vmem:[%s12868_s1 + $0x90] sm:$0xff]  }
  0x24   : > { %433 = vst [vmem:[#allocation5 + $0xf8] sm:$0xff] %v9355_v2  ;;  %434 = vst [vmem:[#allocation6] sm:$0xff] %v9355_v2  ;;  %7266 = vmatpush3.bf16.msra.mxu0 %v8963_v11  ;;  %8905 = vmatpush3.bf16.msra.mxu1 %v8963_v11  ;;  %v8983_v52 = vld [vmem:[%s12868_s1 + $0x108] sm:$0xff]   ;;  %v8978_v60 = vld [vmem:[%s12868_s1 + $0xd8] sm:$0xff]  }
  0x25   : > { %435 = vst [vmem:[#allocation6 + $0x8] sm:$0xff] %v9355_v2  ;;  %436 = vst [vmem:[#allocation6 + $0x10] sm:$0xff] %v9355_v2  ;;  %7267 = vmatprep.subr.bf16.mxu0 %v8964_v12  ;;  %8898 = vmatprep.subr.bf16.mxu1 %v8964_v12  ;;  %v503_v62 = vld [vmem:[%s9447_s20 + $0x20] sm:$0xff]  ;;  %v504_v63 = vld [vmem:[%s9447_s20 + $0x28] sm:$0xff] }
  0x26   : > { %437 = vst [vmem:[#allocation6 + $0x18] sm:$0xff] %v9355_v2  ;;  %438 = vst [vmem:[#allocation6 + $0x20] sm:$0xff] %v9355_v2  ;;  %v9721_v0 = vpack.c.bf16 %v504_v63, %v503_v62  ;;  %v527_v1 = vld [vmem:[%s9447_s20 + $0xe0] sm:$0xff]  ;;  %v8979_v4 = vld [vmem:[%s12868_s1 + $0x98] sm:$0xff]  }
  0x27   : > { %439 = vst [vmem:[#allocation6 + $0x28] sm:$0xff] %v9355_v2  ;;  %440 = vst [vmem:[#allocation6 + $0x30] sm:$0xff] %v9355_v2  ;;  %v8989_v6 = vld [vmem:[%s12868_s1 + $0x150] sm:$0xff]   ;;  %v8982_v7 = vld [vmem:[%s12868_s1 + $0xa0] sm:$0xff]  }
  0x28   : > { %441 = vst [vmem:[#allocation6 + $0x38] sm:$0xff] %v9355_v2  ;;  %442 = vst [vmem:[#allocation6 + $0x40] sm:$0xff] %v9355_v2  ;;  %7268 = vmatpush3.bf16.msra.mxu0 %v8965_v19  ;;  %8906 = vmatpush3.bf16.msra.mxu1 %v8965_v19  ;;  %v8984_v8 = vld [vmem:[%s12868_s1 + $0xe8] sm:$0xff]   ;;  %v8991_v9 = vld [vmem:[%s12868_s1 + $0x110] sm:$0xff]  }
  0x29   : > { %443 = vst [vmem:[#allocation6 + $0x48] sm:$0xff] %v9355_v2  ;;  %444 = vst [vmem:[#allocation6 + $0x50] sm:$0xff] %v9355_v2  ;;  %7269 = vmatprep.subr.bf16.mxu0 %v8966_v20  ;;  %8899 = vmatprep.subr.bf16.mxu1 %v8966_v20  ;;  %v505_v10 = vld [vmem:[%s9447_s20 + $0x30] sm:$0xff]  ;;  %v506_v13 = vld [vmem:[%s9447_s20 + $0x38] sm:$0xff] }
  0x2a   : > { %445 = vst [vmem:[#allocation6 + $0x58] sm:$0xff] %v9355_v2  ;;  %446 = vst [vmem:[#allocation6 + $0x60] sm:$0xff] %v9355_v2  ;;  %v769_v20 = vld [vmem:[#allocation2 + $0xa] sm:$0xff] }
  0x2b   : > { %447 = vst [vmem:[#allocation6 + $0x68] sm:$0xff] %v9355_v2  ;;  %448 = vst [vmem:[#allocation6 + $0x70] sm:$0xff] %v9355_v2 }
  0x2c   : > { %449 = vst [vmem:[#allocation6 + $0x78] sm:$0xff] %v9355_v2  ;;  %450 = vst [vmem:[#allocation6 + $0x80] sm:$0xff] %v9355_v2  ;;  %7270 = vmatpush3.bf16.msra.mxu0 %v8967_v21  ;;  %8907 = vmatpush3.bf16.msra.mxu1 %v8967_v21  ;;  %v8985_v21 = vld [vmem:[%s12868_s1 + $0xa8] sm:$0xff]  }
  0x2d   : > { %451 = vst [vmem:[#allocation6 + $0x88] sm:$0xff] %v9355_v2  ;;  %452 = vst [vmem:[#allocation6 + $0x90] sm:$0xff] %v9355_v2  ;;  %7271 = vmatprep.subr.bf16.mxu0 %v8968_v22  ;;  %8900 = vmatprep.subr.bf16.mxu1 %v8968_v22 }
  0x2e   : > { %453 = vst [vmem:[#allocation6 + $0x98] sm:$0xff] %v9355_v2  ;;  %454 = vst [vmem:[#allocation6 + $0xa0] sm:$0xff] %v9355_v2 }
  0x2f   : > { %455 = vst [vmem:[#allocation6 + $0xa8] sm:$0xff] %v9355_v2  ;;  %456 = vst [vmem:[#allocation6 + $0xb0] sm:$0xff] %v9355_v2 }
  0x30   : > { %457 = vst [vmem:[#allocation6 + $0xb8] sm:$0xff] %v9355_v2  ;;  %458 = vst [vmem:[#allocation6 + $0xc0] sm:$0xff] %v9355_v2  ;;  %7272 = vmatpush3.bf16.msra.mxu0 %v8969_v31  ;;  %8908 = vmatpush3.bf16.msra.mxu1 %v8969_v31  ;;  %v8994_v31 = vld [vmem:[%s12868_s1 + $0x158] sm:$0xff]  }
  0x31   : > { %459 = vst [vmem:[#allocation6 + $0xc8] sm:$0xff] %v9355_v2  ;;  %460 = vst [vmem:[#allocation6 + $0xd0] sm:$0xff] %v9355_v2  ;;  %7369 = vmatprep.subr.bf16.mxu1 %v8970_v33  ;;  %7481 = vmatprep.subr.bf16.mxu0 %v8973_v34  ;;  %v8995_v34 = vld [vmem:[%s12868_s1 + $0x118] sm:$0xff]  }
  0x32   : > { %461 = vst [vmem:[#allocation6 + $0xd8] sm:$0xff] %v9355_v2  ;;  %462 = vst [vmem:[#allocation6 + $0xe0] sm:$0xff] %v9355_v2 }
  0x33   : > { %463 = vst [vmem:[#allocation6 + $0xe8] sm:$0xff] %v9355_v2  ;;  %464 = vst [vmem:[#allocation6 + $0xf0] sm:$0xff] %v9355_v2  ;;  %1630 = vmatmul.mubr.bf16.vlgmr.msra.gmra.mrb[0].mxu0 %v9356_v5 }
  0x34   : > { %465 = vst [vmem:[#allocation6 + $0xf8] sm:$0xff] %v9355_v2  ;;  %466 = vst [vmem:[#allocation7] sm:$0xff] %v9355_v2  ;;  %7482 = vmatpush3.bf16.msra.mxu0 %v8975_v36  ;;  %1637 = vmatprep.mubr.bf16.mxu0 %v703_v26  ;;  %v509_v36 = vld [vmem:[%s9447_s20 + $0x50] sm:$0xff] }
  0x35   : > { %467 = vst [vmem:[#allocation7 + $0x8] sm:$0xff] %v9355_v2  ;;  %468 = vst [vmem:[#allocation7 + $0x10] sm:$0xff] %v9355_v2  ;;  %7483 = vmatprep.subr.bf16.mxu0 %v8981_v50  ;;  %v8993_v50 = vld [vmem:[%s12868_s1 + $0x180] sm:$0xff]  }
  0x36   : > { %469 = vst [vmem:[#allocation7 + $0x18] sm:$0xff] %v9355_v2  ;;  %470 = vst [vmem:[#allocation7 + $0x20] sm:$0xff] %v9355_v2 }
  0x37   : > { %471 = vst [vmem:[#allocation7 + $0x28] sm:$0xff] %v9355_v2  ;;  %472 = vst [vmem:[#allocation7 + $0x30] sm:$0xff] %v9355_v2 }
  0x38   : > { %473 = vst [vmem:[#allocation7 + $0x38] sm:$0xff] %v9355_v2  ;;  %474 = vst [vmem:[#allocation7 + $0x40] sm:$0xff] %v9355_v2  ;;  %7484 = vmatpush3.bf16.msra.mxu0 %v8983_v52  ;;  %v511_v52 = vld [vmem:[%s9447_s20 + $0x60] sm:$0xff] }
  0x39   : > { %475 = vst [vmem:[#allocation7 + $0x48] sm:$0xff] %v9355_v2  ;;  %476 = vst [vmem:[#allocation7 + $0x50] sm:$0xff] %v9355_v2  ;;  %7485 = vmatprep.subr.bf16.mxu0 %v8989_v6  ;;  %v9000_v6 = vld [vmem:[%s12868_s1 + $0x168] sm:$0xff]  }
  0x3a   : > { %477 = vst [vmem:[#allocation7 + $0x58] sm:$0xff] %v9355_v2  ;;  %478 = vst [vmem:[#allocation7 + $0x60] sm:$0xff] %v9355_v2 }
  0x3b   : > { %479 = vst [vmem:[#allocation7 + $0x68] sm:$0xff] %v9355_v2  ;;  %480 = vst [vmem:[#allocation7 + $0x70] sm:$0xff] %v9355_v2 }
  0x3c   : > { %481 = vst [vmem:[#allocation7 + $0x78] sm:$0xff] %v9355_v2  ;;  %482 = vst [vmem:[#allocation7 + $0x80] sm:$0xff] %v9355_v2  ;;  %7486 = vmatpush3.bf16.msra.mxu0 %v8991_v9  ;;  %v9001_v9 = vld [vmem:[%s12868_s1 + $0x1d0] sm:$0xff]  }
  0x3d   : > { %483 = vst [vmem:[#allocation7 + $0x88] sm:$0xff] %v9355_v2  ;;  %484 = vst [vmem:[#allocation7 + $0x90] sm:$0xff] %v9355_v2  ;;  %7487 = vmatprep.subr.bf16.mxu0 %v8994_v31 }
  0x3e   : > { %485 = vst [vmem:[#allocation7 + $0x98] sm:$0xff] %v9355_v2  ;;  %486 = vst [vmem:[#allocation7 + $0xa0] sm:$0xff] %v9355_v2 }
  0x3f   : > { %487 = vst [vmem:[#allocation7 + $0xa8] sm:$0xff] %v9355_v2  ;;  %488 = vst [vmem:[#allocation7 + $0xb0] sm:$0xff] %v9355_v2 }
  0x40   : > { %489 = vst [vmem:[#allocation7 + $0xb8] sm:$0xff] %v9355_v2  ;;  %490 = vst [vmem:[#allocation7 + $0xc0] sm:$0xff] %v9355_v2  ;;  %7488 = vmatpush3.bf16.msra.mxu0 %v8995_v34 }
  0x41   : > { %491 = vst [vmem:[#allocation7 + $0xc8] sm:$0xff] %v9355_v2  ;;  %492 = vst [vmem:[#allocation7 + $0xd0] sm:$0xff] %v9355_v2 }
  0x42   : > { %493 = vst [vmem:[#allocation7 + $0xd8] sm:$0xff] %v9355_v2  ;;  %494 = vst [vmem:[#allocation7 + $0xe0] sm:$0xff] %v9355_v2 }
  0x43   : > { %495 = vst [vmem:[#allocation7 + $0xe8] sm:$0xff] %v9355_v2  ;;  %496 = vst [vmem:[#allocation7 + $0xf0] sm:$0xff] %v9355_v2 }
  0x44   : > { %497 = vst [vmem:[#allocation7 + $0xf8] sm:$0xff] %v9355_v2  ;;  %498 = vst [vmem:[#allocation8] sm:$0x1] %v9355_v2 }
  0x45   : > { %351 = vst [vmem:[#allocation2 + $0x18] sm:$0xff] %v9355_v2  ;;  %352 = vst [vmem:[#allocation2 + $0x20] sm:$0xff] %v9355_v2 }
  0x46   : > { %353 = vst [vmem:[#allocation2 + $0x28] sm:$0x3] %v9355_v2  ;;  %354 = vst [vmem:[#allocation2 + $0x30] sm:$0xff] %v9355_v2 }
  0x47   : > { %355 = vst [vmem:[#allocation2 + $0x38] sm:$0xff] %v9355_v2  ;;  %356 = vst [vmem:[#allocation2 + $0x40] sm:$0x3] %v9355_v2 }
  0x48   : > { %357 = vst [vmem:[#allocation2 + $0x48] sm:$0xff] %v9355_v2  ;;  %358 = vst [vmem:[#allocation2 + $0x50] sm:$0xff] %v9355_v2 }
  0x49   : > { %359 = vst [vmem:[#allocation2 + $0x58] sm:$0x3] %v9355_v2  ;;  %360 = vst [vmem:[#allocation2 + $0x60] sm:$0xff] %v9355_v2 }
  0x4a   : > { %361 = vst [vmem:[#allocation2 + $0x68] sm:$0xff] %v9355_v2  ;;  %362 = vst [vmem:[#allocation2 + $0x70] sm:$0x3] %v9355_v2 }
  0x4b   : > { %363 = vst [vmem:[#allocation2 + $0x78] sm:$0xff] %v9355_v2  ;;  %364 = vst [vmem:[#allocation2 + $0x80] sm:$0xff] %v9355_v2 }
  0x4c   : > { %365 = vst [vmem:[#allocation2 + $0x88] sm:$0x3] %v9355_v2  ;;  %366 = vst [vmem:[#allocation2 + $0x90] sm:$0xff] %v9355_v2 }
  0x4d   : > { %367 = vst [vmem:[#allocation2 + $0x98] sm:$0xff] %v9355_v2  ;;  %368 = vst [vmem:[#allocation2 + $0xa0] sm:$0x3] %v9355_v2 }
  0x4e   : > { %369 = vst [vmem:[#allocation2 + $0xa8] sm:$0xff] %v9355_v2  ;;  %370 = vst [vmem:[#allocation2 + $0xb0] sm:$0xff] %v9355_v2 }
  0x4f   : > { %371 = vst [vmem:[#allocation2 + $0xb8] sm:$0x3] %v9355_v2  ;;  %372 = vst [vmem:[#allocation2 + $0xc0] sm:$0xff] %v9355_v2 }
  0x50   : > { %373 = vst [vmem:[#allocation2 + $0xc8] sm:$0xff] %v9355_v2  ;;  %374 = vst [vmem:[#allocation2 + $0xd0] sm:$0x3] %v9355_v2 }
  0x51   : > { %375 = vst [vmem:[#allocation2 + $0xd8] sm:$0xff] %v9355_v2  ;;  %376 = vst [vmem:[#allocation2 + $0xe0] sm:$0xff] %v9355_v2 }
  0x52   : > { %377 = vst [vmem:[#allocation2 + $0xe8] sm:$0x3] %v9355_v2  ;;  %378 = vst [vmem:[#allocation2 + $0xf0] sm:$0xff] %v9355_v2 }
  0x53   : > { %379 = vst [vmem:[#allocation2 + $0xf8] sm:$0xff] %v9355_v2  ;;  %380 = vst [vmem:[#allocation2 + $0x100] sm:$0x3] %v9355_v2 }
  0x54   : > { %381 = vst [vmem:[#allocation2 + $0x108] sm:$0xff] %v9355_v2  ;;  %382 = vst [vmem:[#allocation2 + $0x110] sm:$0xff] %v9355_v2 }
  0x55   : > { %383 = vst [vmem:[#allocation2 + $0x118] sm:$0x3] %v9355_v2  ;;  %384 = vst [vmem:[#allocation2 + $0x120] sm:$0xff] %v9355_v2 }
  0x56   : > { %385 = vst [vmem:[#allocation2 + $0x128] sm:$0xff] %v9355_v2  ;;  %386 = vst [vmem:[#allocation2 + $0x130] sm:$0x3] %v9355_v2 }
  0x57   : > { %387 = vst [vmem:[#allocation2 + $0x138] sm:$0xff] %v9355_v2  ;;  %388 = vst [vmem:[#allocation2 + $0x140] sm:$0xff] %v9355_v2 }
  0x58   : > { %389 = vst [vmem:[#allocation2 + $0x148] sm:$0x3] %v9355_v2  ;;  %390 = vst [vmem:[#allocation2 + $0x150] sm:$0xff] %v9355_v2 }
  0x59   : > { %391 = vst [vmem:[#allocation2 + $0x158] sm:$0xff] %v9355_v2  ;;  %392 = vst [vmem:[#allocation2 + $0x160] sm:$0x3] %v9355_v2 }
  0x5a   : > { %393 = vst [vmem:[#allocation2 + $0x168] sm:$0xff] %v9355_v2  ;;  %394 = vst [vmem:[#allocation2 + $0x170] sm:$0xff] %v9355_v2 }
  0x5b   : > { %395 = vst [vmem:[#allocation2 + $0x178] sm:$0x3] %v9355_v2  ;;  %396 = vst [vmem:[#allocation2 + $0x180] sm:$0xff] %v9355_v2 }
  0x5c   : > { %397 = vst [vmem:[#allocation2 + $0x188] sm:$0xff] %v9355_v2  ;;  %398 = vst [vmem:[#allocation2 + $0x190] sm:$0x3] %v9355_v2 }
  0x5d   : > { %399 = vst [vmem:[#allocation2 + $0x198] sm:$0xff] %v9355_v2  ;;  %400 = vst [vmem:[#allocation2 + $0x1a0] sm:$0xff] %v9355_v2 }
  0x5e   : > { %401 = vst [vmem:[#allocation2 + $0x1a8] sm:$0x3] %v9355_v2  ;;  %616 = vst [vmem:[#allocation3] sm:$0xff] %v9356_v5  ;;  %v528_v2 = vld [vmem:[%s9447_s20 + $0xe8] sm:$0xff]  ;;  %v8980_v5 = vld [vmem:[%s12868_s1 + $0xe0] sm:$0xff]  }
  0x5f   : > { %554 = vst [vmem:[#allocation2 + $0x121] sm:$0xff] %v521_v15  ;;  %555 = vst [vmem:[#allocation2 + $0x129] sm:$0xff] %v522_v17  ;;  %v717_v3 = vpack.c.bf16 %v528_v2, %v527_v1  ;;  %v9752_v17 = vpack.c.bf16 %v506_v13, %v505_v10 }
  0x60   : > { %718 = vst [vmem:[#allocation3 + $0x8] sm:$0xff] %v702_v16  ;;  %746 = vst [vmem:[#allocation3 + $0x338] sm:$0xff] %v714_v18 }
  0x61   : > { %762 = vst [vmem:[#allocation3 + $0x308] sm:$0xff] %v714_v18  ;;  %532 = vst [vmem:[#allocation2 + $0x19] sm:$0xff] %v499_v23  ;;  %v768_v18 = vld [vmem:[#allocation2 + $0x2] sm:$0xff]  ;;  %v8986_v23 = vld [vmem:[%s12868_s1 + $0xf0] sm:$0xff]  }
  0x62   : > { %533 = vst [vmem:[#allocation2 + $0x21] sm:$0xff] %v500_v24  ;;  %556 = vst [vmem:[#allocation2 + $0x139] sm:$0xff] %v523_v27  ;;  %v9764_v22 = vpack.c.bf16 %v769_v20, %v768_v18  ;;  %v507_v24 = vld [vmem:[%s9447_s20 + $0x40] sm:$0xff] }
  0x63   : > { %557 = vst [vmem:[#allocation2 + $0x141] sm:$0xff] %v524_v28  ;;  %719 = vst [vmem:[#allocation3 + $0x50] sm:$0xff] %v703_v26 }
  0x64   : > { %735 = vst [vmem:[#allocation3 + $0x20] sm:$0xff] %v703_v26  ;;  %747 = vst [vmem:[#allocation3 + $0x380] sm:$0xff] %v715_v30 }
  0x65   : > { %763 = vst [vmem:[#allocation3 + $0x350] sm:$0xff] %v715_v30  ;;  %534 = vst [vmem:[#allocation2 + $0x31] sm:$0xff] %v501_v37  ;;  %v510_v37 = vld [vmem:[%s9447_s20 + $0x58] sm:$0xff] }
  0x66   : > { %v588_v25 = vld [vmem:[#allocation2 + $0x120] sm:$0xff]  ;;  %v589_v29 = vld [vmem:[#allocation2 + $0x128] sm:$0xff]  ;;  %535 = vst [vmem:[#allocation2 + $0x39] sm:$0xff] %v502_v38  ;;  %558 = vst [vmem:[#allocation2 + $0x151] sm:$0xff] %v525_v40 }
  0x67   : > { %v612_v32 = vpack.c.bf16 %v589_v29, %v588_v25  ;;  %559 = vst [vmem:[#allocation2 + $0x159] sm:$0xff] %v526_v41  ;;  %720 = vst [vmem:[#allocation3 + $0x98] sm:$0xff] %v9683_v39  ;;  %v508_v25 = vld [vmem:[%s9447_s20 + $0x48] sm:$0xff]  ;;  %v8987_v29 = vld [vmem:[%s12868_s1 + $0xb0] sm:$0xff]  }
  0x68   : > { %v566_v42 = vld [vmem:[#allocation2 + $0x18] sm:$0xff]  ;;  %736 = vst [vmem:[#allocation3 + $0x68] sm:$0xff] %v9683_v39  ;;  %752 = vst [vmem:[#allocation3 + $0x38] sm:$0xff] %v9683_v39  ;;  %v9774_v26 = vpack.c.bf16 %v508_v25, %v507_v24 }
  0x69   : > { %644 = vst [vmem:[#allocation3 + $0x330] sm:$0xff] %v612_v32  ;;  %660 = vst [vmem:[#allocation3 + $0x300] sm:$0xff] %v612_v32  ;;  %v567_v43 = vld [vmem:[#allocation2 + $0x20] sm:$0xff]  ;;  %v590_v47 = vld [vmem:[#allocation2 + $0x138] sm:$0xff]  ;;  %1726 = vmatmul.mubr.bf16.vlgmr.msra.gmra.mrb[0].mxu1 %v612_v32 }
  0x6a   : > { %v9690_v46 = vpack.c.bf16 %v567_v43, %v566_v42  ;;  %v591_v48 = vld [vmem:[#allocation2 + $0x140] sm:$0xff]  ;;  %748 = vst [vmem:[#allocation3 + $0x3c8] sm:$0xff] %v716_v44  ;;  %764 = vst [vmem:[#allocation3 + $0x398] sm:$0xff] %v716_v44  ;;  %7370 = vmatpush3.bf16.msra.mxu1 %v8971_v35  ;;  %1733 = vmatprep.mubr.bf16.mxu1 %v715_v30  ;;  %v8988_v32 = vld [vmem:[%s12868_s1 + $0xf8] sm:$0xff]  }
  0x6b   : > { %v613_v49 = vpack.c.bf16 %v591_v48, %v590_v47  ;;  %7371 = vmatprep.subr.bf16.mxu1 %v8972_v45  ;;  %536 = vst [vmem:[#allocation2 + $0x49] sm:$0xff] %v503_v62  ;;  %537 = vst [vmem:[#allocation2 + $0x51] sm:$0xff] %v504_v63  ;;  %v770_v27 = vld [vmem:[#allocation2 + $0x1a] sm:$0xff]  ;;  %v771_v28 = vld [vmem:[#allocation2 + $0x22] sm:$0xff] }
  0x6c   : > { %v568_v55 = vld [vmem:[#allocation2 + $0x30] sm:$0xff]  ;;  %560 = vst [vmem:[#allocation2 + $0x169] sm:$0xff] %v527_v1  ;;  %561 = vst [vmem:[#allocation2 + $0x171] sm:$0xff] %v528_v2  ;;  %1638 = vmatmul.mubr.bf16.gmra.mrb[4].mxu0 %v9690_v46  ;;  %v9779_v30 = vpack.c.bf16 %v771_v28, %v770_v27  ;;  %v8990_v42 = vld [vmem:[%s12868_s1 + $0xb8] sm:$0xff]  }
  0x6d   : > { %645 = vst [vmem:[#allocation3 + $0x378] sm:$0xff] %v613_v49  ;;  %661 = vst [vmem:[#allocation3 + $0x348] sm:$0xff] %v613_v49  ;;  %v569_v56 = vld [vmem:[#allocation2 + $0x38] sm:$0xff]  ;;  %v592_v58 = vld [vmem:[#allocation2 + $0x150] sm:$0xff]  ;;  %1645 = vmatprep.mubr.bf16.mxu0 %v9683_v39  ;;  %v9797_v39 = vpack.c.bf16 %v510_v37, %v509_v36 }
  0x6e   : > { %v9711_v57 = vpack.c.bf16 %v569_v56, %v568_v55  ;;  %v593_v59 = vld [vmem:[#allocation2 + $0x158] sm:$0xff]  ;;  %7372 = vmatpush3.bf16.msra.mxu1 %v8974_v51  ;;  %737 = vst [vmem:[#allocation3 + $0xb0] sm:$0xff] %v9721_v0  ;;  %753 = vst [vmem:[#allocation3 + $0x80] sm:$0xff] %v9721_v0  ;;  %v8999_v51 = vld [vmem:[%s12868_s1 + $0x120] sm:$0xff]  }
  0x6f   : > { %v9716_v61 = vpack.c.bf16 %v593_v59, %v592_v58  ;;  %7373 = vmatprep.subr.bf16.mxu1 %v8976_v53  ;;  %749 = vst [vmem:[#allocation3 + $0x410] sm:$0xff] %v717_v3  ;;  %765 = vst [vmem:[#allocation3 + $0x3e0] sm:$0xff] %v717_v3  ;;  %v772_v40 = vld [vmem:[#allocation2 + $0x32] sm:$0xff]  ;;  %v773_v41 = vld [vmem:[#allocation2 + $0x3a] sm:$0xff] }
  0x70   : > { %650 = vst [vmem:[#allocation3 + $0x30] sm:$0xff] %v9711_v57  ;;  %538 = vst [vmem:[#allocation2 + $0x61] sm:$0xff] %v505_v10  ;;  %v9802_v43 = vpack.c.bf16 %v773_v41, %v772_v40  ;;  %v512_v53 = vld [vmem:[%s9447_s20 + $0x68] sm:$0xff]  ;;  %v513_v58 = vld [vmem:[%s9447_s20 + $0x70] sm:$0xff] }
  0x71   : > { %662 = vst [vmem:[#allocation3 + $0x390] sm:$0xff] %v9716_v61  ;;  %1734 = vmatmul.mubr.bf16.gmra.mrb[4].mxu1 %v613_v49  ;;  %539 = vst [vmem:[#allocation2 + $0x69] sm:$0xff] %v506_v13  ;;  %v8998_v49 = vld [vmem:[%s12868_s1 + $0x160] sm:$0xff]   ;;  %v514_v63 = vld [vmem:[%s9447_s20 + $0x78] sm:$0xff] }
  0x72   : > { %7374 = vmatpush3.bf16.msra.mxu1 %v8977_v54  ;;  %1741 = vmatprep.mubr.bf16.mxu1 %v716_v44  ;;  %v570_v11 = vld [vmem:[#allocation2 + $0x48] sm:$0xff]  ;;  %v571_v12 = vld [vmem:[#allocation2 + $0x50] sm:$0xff]  ;;  %738 = vst [vmem:[#allocation3 + $0xf8] sm:$0xff] %v9752_v17  ;;  %754 = vst [vmem:[#allocation3 + $0xc8] sm:$0xff] %v9752_v17  ;;  %v9833_v54 = vpack.c.bf16 %v512_v53, %v511_v52  ;;  %v9843_v2 = vpack.c.bf16 %v514_v63, %v513_v58 }
  0x73   : > { %7375 = vmatprep.subr.bf16.mxu1 %v8978_v60  ;;  %v9750_v14 = vpack.c.bf16 %v571_v12, %v570_v11  ;;  %v594_v15 = vld [vmem:[#allocation2 + $0x168] sm:$0xff]  ;;  %v595_v16 = vld [vmem:[#allocation2 + $0x170] sm:$0xff]  ;;  %820 = vst [vmem:[#allocation3 + $0x10] sm:$0xff] %v9764_v22  ;;  %540 = vst [vmem:[#allocation2 + $0x79] sm:$0xff] %v507_v24  ;;  %7489 = vmatprep.subr.bf16.mxu0 %v8998_v49 }
  0x74   : > { %v9754_v19 = vpack.c.bf16 %v595_v16, %v594_v15  ;;  %1646 = vmatmul.mubr.bf16.gmra.mrb[8].mxu0 %v9711_v57  ;;  %541 = vst [vmem:[#allocation2 + $0x81] sm:$0xff] %v508_v25  ;;  %739 = vst [vmem:[#allocation3 + $0x140] sm:$0xff] %v9774_v26  ;;  %v8992_v44 = vld [vmem:[%s12868_s1 + $0x1c0] sm:$0xff]   ;;  %v774_v55 = vld [vmem:[#allocation2 + $0x4a] sm:$0xff] }
  0x75   : > { %651 = vst [vmem:[#allocation3 + $0x78] sm:$0xff] %v9750_v14  ;;  %1653 = vmatprep.mubr.bf16.mxu0 %v9721_v0  ;;  %755 = vst [vmem:[#allocation3 + $0x110] sm:$0xff] %v9774_v26  ;;  %v775_v56 = vld [vmem:[#allocation2 + $0x52] sm:$0xff]  ;;  %7490 = vmatpush3.bf16.msra.mxu0 %v8999_v51  ;;  %v515_v10 = vld [vmem:[%s9447_s20 + $0x80] sm:$0xff] }
  0x76   : > { %7376 = vmatpush3.bf16.msra.mxu1 %v8979_v4  ;;  %663 = vst [vmem:[#allocation3 + $0x3d8] sm:$0xff] %v9754_v19  ;;  %837 = vst [vmem:[#allocation3 + $0x28] sm:$0xff] %v9779_v30  ;;  %v9836_v62 = vpack.c.bf16 %v775_v56, %v774_v55  ;;  %7491 = vmatprep.subr.bf16.mxu0 %v9000_v6  ;;  %v516_v13 = vld [vmem:[%s9447_s20 + $0x88] sm:$0xff]  ;;  %v9004_v25 = vld [vmem:[%s12868_s1 + $0x170] sm:$0xff]  }
  0x77   : > { %7377 = vmatprep.subr.bf16.mxu1 %v8980_v5  ;;  %v572_v33 = vld [vmem:[#allocation2 + $0x60] sm:$0xff]  ;;  %542 = vst [vmem:[#allocation2 + $0x91] sm:$0xff] %v509_v36  ;;  %543 = vst [vmem:[#allocation2 + $0x99] sm:$0xff] %v510_v37  ;;  %v9875_v18 = vpack.c.bf16 %v516_v13, %v515_v10  ;;  %v9005_v27 = vld [vmem:[%s12868_s1 + $0x130] sm:$0xff]  }
  0x78   : > { %v573_v35 = vld [vmem:[#allocation2 + $0x68] sm:$0xff]  ;;  %740 = vst [vmem:[#allocation3 + $0x188] sm:$0xff] %v9797_v39  ;;  %756 = vst [vmem:[#allocation3 + $0x158] sm:$0xff] %v9797_v39  ;;  %v517_v28 = vld [vmem:[%s9447_s20 + $0x90] sm:$0xff] }
  0x79   : > { %1742 = vmatmul.mubr.bf16.gmra.mrb[8].mxu1 %v9716_v61  ;;  %v9795_v38 = vpack.c.bf16 %v573_v35, %v572_v33  ;;  %838 = vst [vmem:[#allocation3 + $0x70] sm:$0xff] %v9802_v43  ;;  %854 = vst [vmem:[#allocation3 + $0x40] sm:$0xff] %v9802_v43  ;;  %v777_v4 = vld [vmem:[#allocation2 + $0x6a] sm:$0xff]  ;;  %v9006_v35 = vld [vmem:[%s12868_s1 + $0x1d8] sm:$0xff]  }
  0x7a   : > { %7378 = vmatpush3.bf16.msra.mxu1 %v8982_v7  ;;  %1749 = vmatprep.mubr.bf16.mxu1 %v717_v3  ;;  %v574_v45 = vld [vmem:[#allocation2 + $0x78] sm:$0xff]  ;;  %544 = vst [vmem:[#allocation2 + $0xa9] sm:$0xff] %v511_v52  ;;  %545 = vst [vmem:[#allocation2 + $0xb1] sm:$0xff] %v512_v53  ;;  %v776_v3 = vld [vmem:[#allocation2 + $0x62] sm:$0xff] }
  0x7b   : > { %7379 = vmatprep.subr.bf16.mxu1 %v8984_v8  ;;  %652 = vst [vmem:[#allocation3 + $0xc0] sm:$0xff] %v9795_v38  ;;  %v575_v47 = vld [vmem:[#allocation2 + $0x80] sm:$0xff]  ;;  %546 = vst [vmem:[#allocation2 + $0xc1] sm:$0xff] %v513_v58  ;;  %v9847_v5 = vpack.c.bf16 %v777_v4, %v776_v3  ;;  %v8997_v7 = vld [vmem:[%s12868_s1 + $0x188] sm:$0xff]  }
  0x7c   : > { %1654 = vmatmul.mubr.bf16.gmra.mrb[12].mxu0 %v9750_v14  ;;  %v9816_v48 = vpack.c.bf16 %v575_v47, %v574_v45  ;;  %741 = vst [vmem:[#allocation3 + $0x1d0] sm:$0xff] %v9833_v54  ;;  %757 = vst [vmem:[#allocation3 + $0x1a0] sm:$0xff] %v9833_v54  ;;  %v9002_v8 = vld [vmem:[%s12868_s1 + $0x128] sm:$0xff]   ;;  %v778_v20 = vld [vmem:[#allocation2 + $0x7a] sm:$0xff] }
  0x7d   : > { %1661 = vmatprep.mubr.bf16.mxu0 %v9752_v17  ;;  %547 = vst [vmem:[#allocation2 + $0xc9] sm:$0xff] %v514_v63  ;;  %839 = vst [vmem:[#allocation3 + $0xb8] sm:$0xff] %v9836_v62  ;;  %7492 = vmatpush3.bf16.msra.mxu0 %v9002_v8  ;;  %v9007_v37 = vld [vmem:[%s12868_s1 + $0x198] sm:$0xff]   ;;  %v520_v41 = vld [vmem:[%s9447_s20 + $0xa8] sm:$0xff] }
  0x7e   : > { %7380 = vmatpush3.bf16.msra.mxu1 %v8985_v21  ;;  %653 = vst [vmem:[#allocation3 + $0x108] sm:$0xff] %v9816_v48  ;;  %v576_v59 = vld [vmem:[#allocation2 + $0x90] sm:$0xff]  ;;  %v577_v60 = vld [vmem:[#allocation2 + $0x98] sm:$0xff]  ;;  %855 = vst [vmem:[#allocation3 + $0x88] sm:$0xff] %v9836_v62  ;;  %7493 = vmatprep.subr.bf16.mxu0 %v9004_v25 }
  0x7f   : > { %7381 = vmatprep.subr.bf16.mxu1 %v8986_v23  ;;  %v9839_v1 = vpack.c.bf16 %v577_v60, %v576_v59  ;;  %840 = vst [vmem:[#allocation3 + $0x100] sm:$0xff] %v9847_v5  ;;  %856 = vst [vmem:[#allocation3 + $0xd0] sm:$0xff] %v9847_v5  ;;  %v779_v21 = vld [vmem:[#allocation2 + $0x82] sm:$0xff]  ;;  %v781_v33 = vld [vmem:[#allocation2 + $0x9a] sm:$0xff] }
  0x80   : > { %548 = vst [vmem:[#allocation2 + $0xd9] sm:$0xff] %v515_v10  ;;  %549 = vst [vmem:[#allocation2 + $0xe1] sm:$0xff] %v516_v13  ;;  %v9877_v23 = vpack.c.bf16 %v779_v21, %v778_v20  ;;  %v9009_v51 = vld [vmem:[%s12868_s1 + $0x138] sm:$0xff]   ;;  %v9010_v59 = vld [vmem:[%s12868_s1 + $0x1e0] sm:$0xff]  }
  0x81   : > { %1750 = vmatmul.mubr.bf16.gmra.mrb[12].mxu1 %v9754_v19  ;;  %654 = vst [vmem:[#allocation3 + $0x150] sm:$0xff] %v9839_v1  ;;  %v578_v11 = vld [vmem:[#allocation2 + $0xa8] sm:$0xff]  ;;  %v579_v12 = vld [vmem:[#allocation2 + $0xb0] sm:$0xff]  ;;  %550 = vst [vmem:[#allocation2 + $0xf1] sm:$0xff] %v517_v28  ;;  %7494 = vmatpush3.bf16.msra.mxu0 %v9005_v27 }
  0x82   : > { %7382 = vmatpush3.bf16.msra.mxu1 %v8987_v29  ;;  %1790 = vmatprep.mubr.bf16.mxu1 %v9690_v46  ;;  %v8996_v46 = vld [vmem:[%s12868_s1 + $0x1c8] sm:$0xff]   ;;  %v9870_v15 = vpack.c.bf16 %v579_v12, %v578_v11  ;;  %v580_v16 = vld [vmem:[#allocation2 + $0xc0] sm:$0xff]  ;;  %841 = vst [vmem:[#allocation3 + $0x148] sm:$0xff] %v9877_v23  ;;  %857 = vst [vmem:[#allocation3 + $0x118] sm:$0xff] %v9877_v23 }
  0x83   : > { %7383 = vmatprep.subr.bf16.mxu1 %v8988_v32  ;;  %v518_v29 = vld [vmem:[%s9447_s20 + $0x98] sm:$0xff]  ;;  %553 = vst [vmem:[#allocation2 + $0x111] sm:$0xff] %v520_v41  ;;  %v782_v45 = vld [vmem:[#allocation2 + $0xaa] sm:$0xff]  ;;  %v9011_v60 = vld [vmem:[%s12868_s1 + $0x1a0] sm:$0xff]  }
  0x84   : > { %1662 = vmatmul.mubr.bf16.gmra.mrb[16].mxu0 %v9795_v38  ;;  %655 = vst [vmem:[#allocation3 + $0x198] sm:$0xff] %v9870_v15  ;;  %551 = vst [vmem:[#allocation2 + $0xf9] sm:$0xff] %v518_v29  ;;  %v9895_v31 = vpack.c.bf16 %v518_v29, %v517_v28  ;;  %v780_v32 = vld [vmem:[#allocation2 + $0x92] sm:$0xff]  ;;  %v784_v52 = vld [vmem:[#allocation2 + $0xc2] sm:$0xff] }
  0x85   : > { %1669 = vmatprep.mubr.bf16.mxu0 %v9774_v26  ;;  %v9899_v34 = vpack.c.bf16 %v781_v33, %v780_v32  ;;  %v783_v47 = vld [vmem:[#allocation2 + $0xb2] sm:$0xff]  ;;  %v785_v55 = vld [vmem:[#allocation2 + $0xca] sm:$0xff]  ;;  %v9942_v63 = vld [vmem:[%s12868_s1 + $0x200] sm:$0xff]  }
  0x86   : > { %7384 = vmatpush3.bf16.msra.mxu1 %v8990_v42  ;;  %v9915_v49 = vpack.c.bf16 %v783_v47, %v782_v45  ;;  %v9928_v58 = vpack.c.bf16 %v785_v55, %v784_v52  ;;  %v9013_v13 = vld [vmem:[%s12868_s1 + $0x1e8] sm:$0xff]   ;;  %v9016_v28 = vld [vmem:[%s12868_s1 + $0x1f0] sm:$0xff]   ;;  %v794_v32 = vld [vmem:[#allocation2 + $0x13a] sm:$0xff] }
  0x87   : > { %7593 = vmatprep.subr.bf16.mxu1 %v8992_v44  ;;  %v582_v36 = vld [vmem:[#allocation2 + $0xd8] sm:$0xff]  ;;  %v583_v40 = vld [vmem:[#allocation2 + $0xe0] sm:$0xff]  ;;  %842 = vst [vmem:[#allocation3 + $0x190] sm:$0xff] %v9899_v34  ;;  %858 = vst [vmem:[#allocation3 + $0x160] sm:$0xff] %v9899_v34 }
  0x88   : > { %v9911_v42 = vpack.c.bf16 %v583_v40, %v582_v36  ;;  %v584_v53 = vld [vmem:[#allocation2 + $0xf0] sm:$0xff]  ;;  %859 = vst [vmem:[#allocation3 + $0x1a8] sm:$0xff] %v9915_v49  ;;  %860 = vst [vmem:[#allocation3 + $0x1f0] sm:$0xff] %v9928_v58  ;;  %v786_v6 = vld [vmem:[#allocation2 + $0xda] sm:$0xff] }
  0x89   : > { %1791 = vmatmul.mubr.bf16.vlgmr.msra.gmra.mrb[16].mxu1 %v9764_v22  ;;  %v581_v22 = vld [vmem:[#allocation2 + $0xc8] sm:$0xff]  ;;  %v9017_v29 = vld [vmem:[%s12868_s1 + $0x1b0] sm:$0xff]   ;;  %v530_v47 = vld [vmem:[%s9447_s20 + $0xf8] sm:$0xff] }
  0x8a   : > { %7594 = vmatpush3.bf16.msra.mxu1 %v8993_v50  ;;  %1798 = vmatprep.mubr.bf16.mxu1 %v9711_v57  ;;  %v9003_v57 = vld [vmem:[%s12868_s1 + $0x190] sm:$0xff]   ;;  %v9880_v24 = vpack.c.bf16 %v581_v22, %v580_v16  ;;  %v9008_v50 = vld [vmem:[%s12868_s1 + $0x178] sm:$0xff]   ;;  %v787_v8 = vld [vmem:[#allocation2 + $0xe2] sm:$0xff]  ;;  %563 = vst [vmem:[#allocation2 + $0x189] sm:$0xff] %v530_v47 }
  0x8b   : > { %7595 = vmatprep.subr.bf16.mxu1 %v8996_v46  ;;  %v585_v46 = vld [vmem:[#allocation2 + $0xf8] sm:$0xff]  ;;  %7495 = vmatprep.subr.bf16.mxu0 %v9008_v50  ;;  %v9947_v11 = vpack.c.bf16 %v787_v8, %v786_v6  ;;  %v9014_v16 = vld [vmem:[%s12868_s1 + $0x1a8] sm:$0xff]   ;;  %v529_v45 = vld [vmem:[%s9447_s20 + $0xf0] sm:$0xff] }
  0x8c   : > { %1670 = vmatmul.mubr.bf16.gmra.mrb[20].mxu0 %v9816_v48  ;;  %656 = vst [vmem:[#allocation3 + $0x1e0] sm:$0xff] %v9880_v24  ;;  %v9926_v56 = vpack.c.bf16 %v585_v46, %v584_v53  ;;  %v789_v10 = vld [vmem:[#allocation2 + $0xfa] sm:$0xff]  ;;  %v791_v20 = vld [vmem:[#allocation2 + $0x112] sm:$0xff]  ;;  %v792_v22 = vld [vmem:[#allocation2 + $0x122] sm:$0xff] }
  0x8d   : > { %1677 = vmatprep.mubr.bf16.mxu0 %v9797_v39  ;;  %7496 = vmatpush3.bf16.msra.mxu0 %v9009_v51  ;;  %861 = vst [vmem:[#allocation3 + $0x238] sm:$0xff] %v9947_v11  ;;  %v793_v25 = vld [vmem:[#allocation2 + $0x12a] sm:$0xff]  ;;  %v795_v33 = vld [vmem:[#allocation2 + $0x142] sm:$0xff]  ;;  %562 = vst [vmem:[#allocation2 + $0x181] sm:$0xff] %v529_v45 }
  0x8e   : > { %7596 = vmatpush3.bf16.msra.mxu1 %v8997_v7  ;;  %8690 = vmatprep.subr.bf16.mxu0 %v9942_v63  ;;  %v9965_v27 = vpack.c.bf16 %v793_v25, %v792_v22  ;;  %v9975_v36 = vpack.c.bf16 %v795_v33, %v794_v32  ;;  %v798_v50 = vld [vmem:[#allocation2 + $0x16a] sm:$0xff]  ;;  %v799_v51 = vld [vmem:[#allocation2 + $0x172] sm:$0xff]  ;;  %v9026_v8 = vld [vmem:[#allocation3 + $0x50] sm:$0xff] }
  0x8f   : > { %7597 = vmatprep.subr.bf16.mxu1 %v9001_v9  ;;  %v788_v9 = vld [vmem:[#allocation2 + $0xf2] sm:$0xff]  ;;  %v9992_v52 = vpack.c.bf16 %v799_v51, %v798_v50  ;;  %v9015_v6 = vld [vmem:[%s12868_s1 + $0x208] sm:$0xff]   ;;  %v9028_v33 = vld [vmem:[#allocation2] sm:$0xff] }
  0x90   : > { %v9949_v12 = vpack.c.bf16 %v789_v10, %v788_v9  ;;  %864 = vst [vmem:[#allocation3 + $0x310] sm:$0xff] %v9965_v27  ;;  %865 = vst [vmem:[#allocation3 + $0x358] sm:$0xff] %v9975_v36  ;;  %v9018_v9 = vld [vmem:[%s12868_s1 + $0x210] sm:$0xff]   ;;  %v9027_v10 = vld [vmem:[#allocation3 + $0x98] sm:$0xff] }
  0x91   : > { %1799 = vmatmul.mubr.bf16.gmra.mrb[20].mxu1 %v9779_v30  ;;  %v9025_v22 = vld [vmem:[%s12868_s1 + $0x238] sm:$0xff]   ;;  %v877_v32 = vld [vmem:[#allocation3 + $0x38] sm:$0xff] }
  0x92   : > { %1806 = vmatprep.mubr.bf16.mxu1 %v9750_v14  ;;  %7598 = vmatpush3.bf16.msra.mxu1 %v9003_v57  ;;  %v519_v14 = vld [vmem:[%s9447_s20 + $0xa0] sm:$0xff]  ;;  %862 = vst [vmem:[#allocation3 + $0x280] sm:$0xff] %v9949_v12 }
  0x93   : > { %7599 = vmatprep.subr.bf16.mxu1 %v9006_v35  ;;  %552 = vst [vmem:[#allocation2 + $0x109] sm:$0xff] %v519_v14  ;;  %v9913_v44 = vpack.c.bf16 %v520_v41, %v519_v14  ;;  %v796_v35 = vld [vmem:[#allocation2 + $0x152] sm:$0xff] }
  0x94   : > { %1678 = vmatmul.mubr.bf16.gmra.mrb[24].mxu0 %v9839_v1  ;;  %v9019_v14 = vld [vmem:[%s12868_s1 + $0x1f8] sm:$0xff]   ;;  %v596_v53 = vld [vmem:[#allocation2 + $0x180] sm:$0xff]  ;;  %v597_v46 = vld [vmem:[#allocation2 + $0x188] sm:$0xff] }
  0x95   : > { %1685 = vmatprep.mubr.bf16.mxu0 %v9833_v54  ;;  %v9020_v41 = vld [vmem:[%s12868_s1 + $0x1b8] sm:$0xff]   ;;  %v9998_v55 = vpack.c.bf16 %v597_v46, %v596_v53 }
  0x96   : > { %7600 = vmatpush3.bf16.msra.mxu1 %v9007_v37  ;;  %v797_v37 = vld [vmem:[#allocation2 + $0x15a] sm:$0xff] }
  0x97   : > { %7601 = vmatprep.subr.bf16.mxu1 %v9010_v59  ;;  %v9977_v40 = vpack.c.bf16 %v797_v37, %v796_v35  ;;  %v800_v59 = vld [vmem:[#allocation2 + $0x182] sm:$0xff]  ;;  %v10060_v35 = vpack.c.bf16 %v9028_v33, %v9028_v33  ;;  %v967_v33 = vld [vmem:[#allocation3 + $0x308] sm:$0xff] }
  0x98   : > { %v876_v37 = vld [vmem:[#allocation3 + $0x30] sm:$0xff] }
  0x99   : > { %1807 = vmatmul.mubr.bf16.gmra.mrb[24].mxu1 %v9802_v43  ;;  %665 = vst [vmem:[#allocation3 + $0x468] sm:$0xff] %v10060_v35 }
  0x9a   : > { %1814 = vmatprep.mubr.bf16.mxu1 %v9795_v38  ;;  %v586_v3 = vld [vmem:[#allocation2 + $0x108] sm:$0xff]  ;;  %v587_v4 = vld [vmem:[#allocation2 + $0x110] sm:$0xff]  ;;  %7602 = vmatpush3.bf16.msra.mxu1 %v9011_v60 }
  0x9b   : > { %v9944_v7 = vpack.c.bf16 %v587_v4, %v586_v3  ;;  %7603 = vmatprep.subr.bf16.mxu1 %v9013_v13  ;;  %v790_v57 = vld [vmem:[#allocation2 + $0x10a] sm:$0xff]  ;;  %v10006_v4 = vpack.c.bf16 %v530_v47, %v529_v45  ;;  %v972_v13 = vld [vmem:[#allocation3 + $0x330] sm:$0xff] }
  0x9c   : > { %1686 = vmatmul.mubr.bf16.gmra.mrb[28].mxu0 %v9870_v15  ;;  %v9963_v21 = vpack.c.bf16 %v791_v20, %v790_v57  ;;  %v801_v60 = vld [vmem:[#allocation2 + $0x18a] sm:$0xff] }
  0x9d   : > { %1693 = vmatprep.mubr.bf16.mxu0 %v9843_v2  ;;  %v10004_v3 = vpack.c.bf16 %v801_v60, %v800_v59  ;;  %v9024_v57 = vld [vmem:[%s12868_s1 + $0x230] sm:$0xff]   ;;  %v981_v20 = vld [vmem:[#allocation3 + $0x378] sm:$0xff] }
  0x9e   : > { %7604 = vmatpush3.bf16.msra.mxu1 %v9014_v16  ;;  %863 = vst [vmem:[#allocation3 + $0x2c8] sm:$0xff] %v9963_v21  ;;  %v9023_v16 = vld [vmem:[%s12868_s1 + $0x228] sm:$0xff]   ;;  %v982_v47 = vld [vmem:[#allocation3 + $0x380] sm:$0xff] }
  0x9f   : > { %7605 = vmatprep.subr.bf16.mxu1 %v9016_v28  ;;  %v802_v28 = vld [vmem:[#allocation2 + $0x19a] sm:$0xff]  ;;  %v973_v45 = vld [vmem:[#allocation3 + $0x338] sm:$0xff] }
  0xa1   : > { %1815 = vmatmul.mubr.bf16.gmra.mrb[28].mxu1 %v9836_v62 }
  0xa2   : > { %1822 = vmatprep.mubr.bf16.mxu1 %v9816_v48  ;;  %7606 = vmatpush3.bf16.msra.mxu1 %v9017_v29  ;;  %v803_v29 = vld [vmem:[#allocation2 + $0x1a2] sm:$0xff] }
  0xa3   : > { %7607 = vmatprep.subr.bf16.mxu1 %v9019_v14  ;;  %v886_v14 = vld [vmem:[#allocation3 + $0x80] sm:$0xff] }
  0xa4   : > { %1694 = vmatmul.mubr.bf16.gmra.mrb[32].mxu0 %v9880_v24 }
  0xa5   : > { %1701 = vmatprep.mubr.bf16.mxu0 %v9875_v18 }
  0xa6   : > { %7608 = vmatpush3.bf16.msra.mxu1 %v9020_v41  ;;  %v885_v41 = vld [vmem:[#allocation3 + $0x78] sm:$0xff] }
  0xa9   : > { %1823 = vmatmul.mubr.bf16.gmra.mrb[32].mxu1 %v9847_v5 }
  0xaa   : > { %1830 = vmatprep.mubr.bf16.mxu1 %v9839_v1 }
  0xac   : > { %1702 = vmatmul.mubr.bf16.gmra.mrb[36].mxu0 %v9911_v42 }
  0xad   : > { %1709 = vmatprep.mubr.bf16.mxu0 %v9895_v31 }
  0xb1   : > { %1831 = vmatmul.mubr.bf16.gmra.mrb[36].mxu1 %v9877_v23 }
  0xb2   : > { %1838 = vmatprep.mubr.bf16.mxu1 %v9870_v15 }
  0xb4   : > { %1710 = vmatmul.mubr.bf16.gmra.mrb[40].mxu0 %v9926_v56 }
  0xb5   : > { %1717 = vmatprep.mubr.bf16.mxu0 %v9913_v44 }
  0xb9   : > { %1839 = vmatmul.mubr.bf16.gmra.mrb[40].mxu1 %v9899_v34 }
  0xba   : > { %1846 = vmatprep.mubr.bf16.mxu1 %v9880_v24 }
  0xbc   : > { %1718 = vmatmul.mubr.bf16.gmra.mrb[44].mxu0 %v9944_v7 }
  0xbd   : > { %1951 = vmatprep.mubr.bf16.mxu0 %v9779_v30  ;;  %v9021_v30 = vld [vmem:[%s12868_s1 + $0x218] sm:$0xff]  }
  0xc1   : > { %1847 = vmatmul.mubr.bf16.gmra.mrb[44].mxu1 %v9915_v49 }
  0xc2   : > { %1854 = vmatprep.mubr.bf16.mxu1 %v9911_v42 }
  0xc4   : > { %1952 = vmatmul.mubr.bf16.vlgmr.msra.gmra.mrb[48].mxu0 %v9026_v8 }
  0xc5   : > { %8691 = vmatpush3.bf16.msra.mxu0 %v9942_v63  ;;  %1959 = vmatprep.mubr.bf16.mxu0 %v9802_v43  ;;  %v9022_v63 = vld [vmem:[%s12868_s1 + $0x220] sm:$0xff]  }
  0xc6   : > { %8692 = vmatprep.subr.bf16.mxu0 %v9015_v6 }
  0xc9   : > { %1855 = vmatmul.mubr.bf16.gmra.mrb[48].mxu1 %v9928_v58  ;;  %8693 = vmatpush3.bf16.msra.mxu0 %v9015_v6 }
  0xca   : > { %1862 = vmatprep.mubr.bf16.mxu1 %v9926_v56  ;;  %8694 = vmatprep.subr.bf16.mxu0 %v9018_v9 }
  0xcc   : > { %1960 = vmatmul.mubr.bf16.gmra.mrb[52].mxu0 %v9027_v10 }
  0xcd   : > { %1967 = vmatprep.mubr.bf16.mxu0 %v9836_v62  ;;  %8695 = vmatpush3.bf16.msra.mxu0 %v9018_v9 }
  0xce   : > { %8696 = vmatprep.subr.bf16.mxu0 %v9021_v30 }
  0xd1   : > { %1863 = vmatmul.mubr.bf16.gmra.mrb[52].mxu1 %v9947_v11  ;;  %8697 = vmatpush3.bf16.msra.mxu0 %v9021_v30 }
  0xd2   : > { %1870 = vmatprep.mubr.bf16.mxu1 %v9944_v7  ;;  %8698 = vmatprep.subr.bf16.mxu0 %v9022_v63 }
  0xd4   : > { %1968 = vmatmul.mubr.bf16.gmra.mrb[56].mxu0 %v9721_v0  ;;  %v700_v0 = vld [vmem:[#allocation2 + $0x199] sm:$0xff] }
  0xd5   : > { %1975 = vmatprep.mubr.bf16.mxu0 %v9847_v5  ;;  %8699 = vmatpush3.bf16.msra.mxu0 %v9022_v63 }
  0xd6   : > { %8700 = vmatprep.subr.bf16.mxu0 %v9023_v16 }
  0xd9   : > { %1871 = vmatmul.mubr.bf16.gmra.mrb[56].mxu1 %v9949_v12  ;;  %8701 = vmatpush3.bf16.msra.mxu0 %v9023_v16 }
  0xda   : > { %1878 = vmatprep.mubr.bf16.mxu1 %v972_v13  ;;  %8702 = vmatprep.subr.bf16.mxu0 %v9024_v57 }
  0xdc   : > { %1976 = vmatmul.mubr.bf16.gmra.mrb[60].mxu0 %v9752_v17 }
  0xdd   : > { %1983 = vmatprep.mubr.bf16.mxu0 %v9877_v23  ;;  %8703 = vmatpush3.bf16.msra.mxu0 %v9024_v57 }
  0xde   : > { %8704 = vmatprep.subr.bf16.mxu0 %v9025_v22 }
  0xe1   : > { %1879 = vmatmul.mubr.bf16.gmra.mrb[60].mxu1 %v9963_v21  ;;  %8705 = vmatpush3.bf16.msra.mxu0 %v9025_v22 }
  0xe2   : > { %1886 = vmatprep.mubr.bf16.mxu1 %v981_v20 }
  0xe4   : > { %1984 = vmatmul.mubr.bf16.gmra.mrb[64].mxu0 %v9774_v26 }
  0xe5   : > { %1991 = vmatprep.mubr.bf16.mxu0 %v9899_v34 }
  0xe9   : > { %1887 = vmatmul.mubr.bf16.gmra.mrb[64].mxu1 %v9965_v27 }
  0xea   : > { %1894 = vmatprep.mubr.bf16.mxu1 %v9716_v61  ;;  %v701_v61 = vld [vmem:[#allocation2 + $0x1a1] sm:$0xff] }
  0xeb   : > { %v10058_v25 = vpack.c.bf16 %v701_v61, %v700_v0 }
  0xec   : > { %1992 = vmatmul.mubr.bf16.gmra.mrb[68].mxu0 %v9797_v39 }
  0xed   : > { %1999 = vmatprep.mubr.bf16.mxu0 %v9915_v49  ;;  %767 = vst [vmem:[#allocation3 + $0x470] sm:$0xff] %v10058_v25 }
  0xf1   : > { %1895 = vmatmul.mubr.bf16.gmra.mrb[68].mxu1 %v9975_v36 }
  0xf2   : > { %1902 = vmatprep.mubr.bf16.mxu1 %v9754_v19  ;;  %v10062_v19 = vpack.c.bf16 %v803_v29, %v802_v28 }
  0xf4   : > { %2000 = vmatmul.mubr.bf16.gmra.mrb[72].mxu0 %v9833_v54  ;;  %869 = vst [vmem:[#allocation3 + $0x478] sm:$0xff] %v10062_v19 }
  0xf5   : > { %2007 = vmatprep.mubr.bf16.mxu0 %v9928_v58 }
  0xf9   : > { %1903 = vmatmul.mubr.bf16.gmra.mrb[72].mxu1 %v9977_v40 }
  0xfa   : > { %1910 = vmatprep.mubr.bf16.mxu1 %v9998_v55 }
  0xfc   : > { %2008 = vmatmul.mubr.bf16.gmra.mrb[76].mxu0 %v9843_v2 }
  0xfd   : > { %2015 = vmatprep.mubr.bf16.mxu0 %v9947_v11 }
 0x101   : > { %1911 = vmatmul.mubr.bf16.gmra.mrb[76].mxu1 %v9992_v52 }
 0x102   : > { %2112 = vmatprep.mubr.bf16.mxu1 %v877_v32 }
 0x104   : > { %2016 = vmatmul.mubr.bf16.gmra.mrb[80].mxu0 %v9875_v18 }
 0x105   : > { %2023 = vmatprep.mubr.bf16.mxu0 %v9949_v12 }
 0x109   : > { %2113 = vmatmul.mubr.bf16.vlgmr.msra.gmra.mrb[80].mxu1 %v876_v37 }
 0x10a   : > { %2120 = vmatprep.mubr.bf16.mxu1 %v886_v14 }
 0x10c   : > { %2024 = vmatmul.mubr.bf16.gmra.mrb[84].mxu0 %v9895_v31 }
 0x10d   : > { %2031 = vmatprep.mubr.bf16.mxu0 %v9963_v21 }
 0x111   : > { %2121 = vmatmul.mubr.bf16.gmra.mrb[84].mxu1 %v885_v41 }
 0x112   : > { %2128 = vmatprep.mubr.bf16.mxu1 %v9752_v17  ;;  %v991_v17 = vld [vmem:[#allocation3 + $0x3c8] sm:$0xff] }
 0x114   : > { %2032 = vmatmul.mubr.bf16.gmra.mrb[88].mxu0 %v9913_v44 }
 0x115   : > { %2039 = vmatprep.mubr.bf16.mxu0 %v9965_v27 }
 0x119   : > { %2129 = vmatmul.mubr.bf16.gmra.mrb[88].mxu1 %v9795_v38 }
 0x11a   : > { %2136 = vmatprep.mubr.bf16.mxu1 %v9774_v26  ;;  %v1000_v26 = vld [vmem:[#allocation3 + $0x410] sm:$0xff] }
 0x11c   : > { %2040 = vmatmul.mubr.bf16.gmra.mrb[92].mxu0 %v973_v45 }
 0x11d   : > { %2047 = vmatprep.mubr.bf16.mxu0 %v9975_v36 }
 0x121   : > { %2137 = vmatmul.mubr.bf16.gmra.mrb[92].mxu1 %v9816_v48 }
 0x122   : > { %2144 = vmatprep.mubr.bf16.mxu1 %v9797_v39  ;;  %v7273_v39 = vpop.f32.mrb[0].mxu0 }
 0x124   : > { %2048 = vmatmul.mubr.bf16.gmra.mrb[96].mxu0 %v982_v47 }
 0x125   : > { %2055 = vmatprep.mubr.bf16.mxu0 %v9977_v40 }
 0x129   : > { %2145 = vmatmul.mubr.bf16.gmra.mrb[96].mxu1 %v9839_v1 }
 0x12a   : > { %2152 = vmatprep.mubr.bf16.mxu1 %v9833_v54  ;;  %v7274_v54 = vpop.f32.mrb[1].mxu0 }
 0x12b   : > { %v7276_v51 = vpop.f32.mrb[2].mxu0 }
 0x12c   : > { %2056 = vmatmul.mubr.bf16.gmra.mrb[100].mxu0 %v991_v17 }
 0x12d   : > { %2063 = vmatprep.mubr.bf16.mxu0 %v9992_v52 }
 0x131   : > { %2153 = vmatmul.mubr.bf16.gmra.mrb[100].mxu1 %v9870_v15  ;;  %v10093_v15 = vadd.f32 %v7274_v54, %v7273_v39 }
 0x132   : > { %2160 = vmatprep.mubr.bf16.mxu1 %v9843_v2  ;;  %v7277_v2 = vpop.f32.mrb[3].mxu0 }
 0x133   : > { %v10097_v59 = vadd.f32 %v7277_v2, %v7276_v51 }
 0x134   : > { %2064 = vmatmul.mubr.bf16.gmra.mrb[104].mxu0 %v1000_v26  ;;  %v966_v26 = vld [vmem:[#allocation3 + $0x300] sm:$0xff] }
 0x135   : > { %2071 = vmatprep.mubr.bf16.mxu0 %v10004_v3 }
 0x139   : > { %2161 = vmatmul.mubr.bf16.gmra.mrb[104].mxu1 %v9880_v24 }
 0x13a   : > { %2168 = vmatprep.mubr.bf16.mxu1 %v9875_v18 }
 0x13c   : > { %v7345_v38 = vpop.f32.mrb[0].mxu1  ;;  %2072 = vmatmul.mubr.bf16.gmra.mrb[108].mxu0 %v10006_v4 }
 0x13d   : > { %v7346_v48 = vpop.f32.mrb[1].mxu1  ;;  %8706 = vmatprep.mubr.bf16.mxu0 %v9802_v43 }
 0x13e   : > { %v10091_v1 = vadd.f32 %v7346_v48, %v7345_v38  ;;  %v7348_v50 = vpop.f32.mrb[2].mxu1  ;;  %v976_v48 = vld [vmem:[#allocation3 + $0x350] sm:$0xff] }
 0x13f   : > { %v7349_v53 = vpop.f32.mrb[3].mxu1  ;;  %v7279_v24 = vpop.f32.mrb[4].mxu0 }
 0x140   : > { %v10095_v46 = vadd.f32 %v7349_v53, %v7348_v50  ;;  %v7280_v6 = vpop.f32.mrb[5].mxu0  ;;  %v10139_v50 = vld [vmem:[%s12869_s2] ss:$0 sm:$0xff] }
 0x141   : > { %2169 = vmatmul.mubr.bf16.gmra.mrb[108].mxu1 %v9911_v42  ;;  %v10105_v30 = vadd.f32 %v7280_v6, %v7279_v24  ;;  %v7282_v10 = vpop.f32.mrb[6].mxu0  ;;  %v1632_v2 = vadd.f32 %v10093_v15, %v10139_v50  ;;  %v975_v6 = vld [vmem:[#allocation3 + $0x348] sm:$0xff] }
 0x142   : > { %2176 = vmatprep.mubr.bf16.mxu1 %v9895_v31  ;;  %v7283_v13 = vpop.f32.mrb[7].mxu0 }
 0x143   : > { %v10109_v57 = vadd.f32 %v7283_v13, %v7282_v10  ;;  %v985_v10 = vld [vmem:[#allocation3 + $0x398] sm:$0xff] }
 0x144   : > { %v7351_v18 = vpop.f32.mrb[4].mxu1  ;;  %8707 = vmatmul.mubr.bf16.vlgmr.msra.gmra.mrb[112].mxu0 %v9836_v62 }
 0x145   : > { %v7352_v60 = vpop.f32.mrb[5].mxu1  ;;  %8710 = vmatprep.mubr.bf16.mxu0 %v9847_v5 }
 0x146   : > { %v10103_v8 = vadd.f32 %v7352_v60, %v7351_v18  ;;  %v7354_v9 = vpop.f32.mrb[6].mxu1 }
 0x147   : > { %v7355_v63 = vpop.f32.mrb[7].mxu1  ;;  %v7285_v31 = vpop.f32.mrb[8].mxu0 }
 0x148   : > { %v10107_v16 = vadd.f32 %v7355_v63, %v7354_v9  ;;  %v7286_v20 = vpop.f32.mrb[9].mxu0  ;;  %v1635_v63 = vadd.f32 %v10097_v59, %v10139_v50  ;;  %v1640_v59 = vadd.f32 %v10105_v30, %v10139_v50 }
 0x149   : > { %2177 = vmatmul.mubr.bf16.gmra.mrb[112].mxu1 %v9926_v56  ;;  %v10117_v61 = vadd.f32 %v7286_v20, %v7285_v31  ;;  %v7288_v28 = vpop.f32.mrb[10].mxu0 }
 0x14a   : > { %2184 = vmatprep.mubr.bf16.mxu1 %v9913_v44  ;;  %v7289_v32 = vpop.f32.mrb[11].mxu0 }
 0x14b   : > { %v10121_v62 = vadd.f32 %v7289_v32, %v7288_v28 }
 0x14c   : > { %v7357_v43 = vpop.f32.mrb[8].mxu1  ;;  %8711 = vmatmul.mubr.bf16.gmra.mrb[116].mxu0 %v9877_v23 }
 0x14d   : > { %v7358_v42 = vpop.f32.mrb[9].mxu1  ;;  %8714 = vmatprep.mubr.bf16.mxu0 %v9899_v34 }
 0x14e   : > { %v10115_v22 = vadd.f32 %v7358_v42, %v7357_v43  ;;  %v7360_v0 = vpop.f32.mrb[10].mxu1 }
 0x14f   : > { %v7361_v29 = vpop.f32.mrb[11].mxu1  ;;  %v7291_v44 = vpop.f32.mrb[12].mxu0 }
 0x150   : > { %v10119_v56 = vadd.f32 %v7361_v29, %v7360_v0  ;;  %v7292_v14 = vpop.f32.mrb[13].mxu0 }
 0x151   : > { %2185 = vmatmul.mubr.bf16.gmra.mrb[116].mxu1 %v9944_v7  ;;  %v10128_v47 = vadd.f32 %v7292_v14, %v7291_v44  ;;  %v7294_v17 = vpop.f32.mrb[14].mxu0  ;;  %v984_v44 = vld [vmem:[#allocation3 + $0x390] sm:$0xff]  ;;  %v994_v14 = vld [vmem:[#allocation3 + $0x3e0] sm:$0xff] }
 0x152   : > { %2192 = vmatprep.mubr.bf16.mxu1 %v967_v33  ;;  %v7295_v39 = vpop.f32.mrb[15].mxu0 }
 0x153   : > { %v10132_v23 = vadd.f32 %v7295_v39, %v7294_v17 }
 0x154   : > { %v7363_v5 = vpop.f32.mrb[12].mxu1  ;;  %8715 = vmatmul.mubr.bf16.gmra.mrb[120].mxu0 %v9915_v49 }
 0x155   : > { %v7364_v37 = vpop.f32.mrb[13].mxu1  ;;  %8718 = vmatprep.mubr.bf16.mxu0 %v9928_v58 }
 0x156   : > { %v10126_v41 = vadd.f32 %v7364_v37, %v7363_v5  ;;  %v7366_v45 = vpop.f32.mrb[14].mxu1 }
 0x157   : > { %v7367_v38 = vpop.f32.mrb[15].mxu1  ;;  %v7297_v54 = vpop.f32.mrb[16].mxu0 }
 0x158   : > { %v10130_v7 = vadd.f32 %v7367_v38, %v7366_v45  ;;  %v7298_v53 = vpop.f32.mrb[17].mxu0  ;;  %v1643_v45 = vadd.f32 %v10109_v57, %v10139_v50  ;;  %v1648_v57 = vadd.f32 %v10117_v61, %v10139_v50 }
 0x159   : > { %2193 = vmatmul.mubr.bf16.gmra.mrb[120].mxu1 %v966_v26  ;;  %v10143_v60 = vadd.f32 %v7298_v53, %v7297_v54  ;;  %v7300_v49 = vpop.f32.mrb[18].mxu0 }
 0x15a   : > { %2200 = vmatprep.mubr.bf16.mxu1 %v976_v48  ;;  %v7301_v58 = vpop.f32.mrb[19].mxu0 }
 0x15b   : > { %v10149_v31 = vadd.f32 %v7301_v58, %v7300_v49  ;;  %v1651_v49 = vadd.f32 %v10121_v62, %v10139_v50  ;;  %v1656_v62 = vadd.f32 %v10128_v47, %v10139_v50 }
 0x15c   : > { %v7385_v34 = vpop.f32.mrb[16].mxu1  ;;  %8719 = vmatmul.mubr.bf16.gmra.mrb[124].mxu0 %v9947_v11 }
 0x15d   : > { %v7386_v51 = vpop.f32.mrb[17].mxu1  ;;  %8722 = vmatprep.mubr.bf16.mxu0 %v9949_v12 }
 0x15e   : > { %v7387_v18 = vadd.f32 %v7386_v51, %v7385_v34  ;;  %v7388_v24 = vpop.f32.mrb[18].mxu1 }
 0x15f   : > { %v7389_v9 = vpop.f32.mrb[19].mxu1  ;;  %v7303_v20 = vpop.f32.mrb[20].mxu0 }
 0x160   : > { %v10147_v13 = vadd.f32 %v7387_v18, %v1632_v2  ;;  %v7390_v43 = vadd.f32 %v7389_v9, %v7388_v24  ;;  %v7304_v28 = vpop.f32.mrb[21].mxu0  ;;  %v993_v18 = vld [vmem:[#allocation3 + $0x3d8] sm:$0xff] }
 0x161   : > { %2201 = vmatmul.mubr.bf16.gmra.mrb[124].mxu1 %v975_v6  ;;  %v10157_v33 = vadd.f32 %v7304_v28, %v7303_v20  ;;  %v7306_v5 = vpop.f32.mrb[22].mxu0 }
 0x162   : > { %v10152_v15 = vadd.f32 %v7390_v43, %v1635_v63  ;;  %2208 = vmatprep.mubr.bf16.mxu1 %v985_v10  ;;  %v7307_v11 = vpop.f32.mrb[23].mxu0 }
 0x163   : > { %v10163_v26 = vadd.f32 %v7307_v11, %v7306_v5 }
 0x164   : > { %v7391_v42 = vpop.f32.mrb[20].mxu1  ;;  %8723 = vmatmul.mubr.bf16.gmra.mrb[128].mxu0 %v9963_v21 }
 0x165   : > { %v7392_v0 = vpop.f32.mrb[21].mxu1  ;;  %8726 = vmatprep.mubr.bf16.mxu0 %v9965_v27 }
 0x166   : > { %v7393_v29 = vadd.f32 %v7392_v0, %v7391_v42  ;;  %v7394_v32 = vpop.f32.mrb[22].mxu1 }
 0x167   : > { %v7395_v37 = vpop.f32.mrb[23].mxu1  ;;  %v7309_v39 = vpop.f32.mrb[24].mxu0 }
 0x168   : > { %v10161_v12 = vadd.f32 %v7393_v29, %v1640_v59  ;;  %v7396_v17 = vadd.f32 %v7395_v37, %v7394_v32  ;;  %v7310_v34 = vpop.f32.mrb[25].mxu0  ;;  %v1659_v29 = vadd.f32 %v10132_v23, %v10139_v50  ;;  %v1664_v23 = vadd.f32 %v10143_v60, %v10139_v50 }
 0x169   : > { %2209 = vmatmul.mubr.bf16.gmra.mrb[128].mxu1 %v984_v44  ;;  %v10171_v53 = vadd.f32 %v7310_v34, %v7309_v39  ;;  %v7312_v2 = vpop.f32.mrb[26].mxu0  ;;  %v1667_v39 = vadd.f32 %v10149_v31, %v10139_v50 }
 0x16a   : > { %v10166_v30 = vadd.f32 %v7396_v17, %v1643_v45  ;;  %2216 = vmatprep.mubr.bf16.mxu1 %v994_v14  ;;  %v7313_v21 = vpop.f32.mrb[27].mxu0 }
 0x16b   : > { %v10177_v9 = vadd.f32 %v7313_v21, %v7312_v2  ;;  %v1672_v2 = vadd.f32 %v10157_v33, %v10139_v50 }
 0x16c   : > { %v7397_v38 = vpop.f32.mrb[24].mxu1  ;;  %8727 = vmatmul.mubr.bf16.gmra.mrb[132].mxu0 %v9975_v36 }
 0x16d   : > { %v7398_v48 = vpop.f32.mrb[25].mxu1  ;;  %8730 = vmatprep.mubr.bf16.mxu0 %v9977_v40 }
 0x16e   : > { %v7399_v54 = vadd.f32 %v7398_v48, %v7397_v38  ;;  %v7400_v51 = vpop.f32.mrb[26].mxu1 }
 0x16f   : > { %v7401_v24 = vpop.f32.mrb[27].mxu1  ;;  %v7315_v10 = vpop.f32.mrb[28].mxu0 }
 0x170   : > { %v10175_v6 = vadd.f32 %v7399_v54, %v1648_v57  ;;  %v7402_v27 = vadd.f32 %v7401_v24, %v7400_v51  ;;  %v7316_v43 = vpop.f32.mrb[29].mxu0 }
 0x171   : > { %2217 = vmatmul.mubr.bf16.gmra.mrb[132].mxu1 %v993_v18  ;;  %v10186_v0 = vadd.f32 %v7316_v43, %v7315_v10  ;;  %v7318_v28 = vpop.f32.mrb[30].mxu0 }
 0x172   : > { %v10180_v61 = vadd.f32 %v7402_v27, %v1651_v49  ;;  %2224 = vmatprep.mubr.bf16.mxu1 %v10006_v4  ;;  %v7319_v36 = vpop.f32.mrb[31].mxu0 }
 0x173   : > { %v10192_v32 = vadd.f32 %v7319_v36, %v7318_v28 }
 0x174   : > { %v7403_v58 = vpop.f32.mrb[28].mxu1  ;;  %8731 = vmatmul.mubr.bf16.gmra.mrb[136].mxu0 %v9992_v52 }
 0x175   : > { %v7404_v63 = vpop.f32.mrb[29].mxu1  ;;  %8734 = vmatprep.mubr.bf16.mxu0 %v10004_v3 }
 0x176   : > { %v7405_v42 = vadd.f32 %v7404_v63, %v7403_v58  ;;  %v7406_v20 = vpop.f32.mrb[30].mxu1 }
 0x177   : > { %v7407_v59 = vpop.f32.mrb[31].mxu1  ;;  %v7321_v44 = vpop.f32.mrb[32].mxu0 }
 0x178   : > { %v10190_v4 = vadd.f32 %v7405_v42, %v1656_v62  ;;  %v7408_v40 = vadd.f32 %v7407_v59, %v7406_v20  ;;  %v7322_v11 = vpop.f32.mrb[33].mxu0  ;;  %v1680_v20 = vadd.f32 %v10171_v53, %v10139_v50 }
 0x179   : > { %2225 = vmatmul.mubr.bf16.gmra.mrb[136].mxu1 %v9998_v55  ;;  %v10202_v17 = vadd.f32 %v7322_v11, %v7321_v44  ;;  %v7324_v55 = vpop.f32.mrb[34].mxu0 }
 0x17a   : > { %v10196_v47 = vadd.f32 %v7408_v40, %v1659_v29  ;;  %2232 = vmatprep.mubr.bf16.mxu1 %v10058_v25  ;;  %v7325_v52 = vpop.f32.mrb[35].mxu0 }
 0x17b   : > { %v7326_v48 = vadd.f32 %v7325_v52, %v7324_v55 }
 0x17c   : > { %v7409_v5 = vpop.f32.mrb[32].mxu1  ;;  %8735 = vmatmul.mubr.bf16.gmra.mrb[140].mxu0 %v10062_v19 }
 0x17d   : > { %v7410_v37 = vpop.f32.mrb[33].mxu1 }
 0x17e   : > { %v7411_v14 = vadd.f32 %v7410_v37, %v7409_v5  ;;  %v7412_v45 = vpop.f32.mrb[34].mxu1  ;;  %v1683_v5 = vadd.f32 %v10177_v9, %v10139_v50 }
 0x17f   : > { %v7413_v38 = vpop.f32.mrb[35].mxu1  ;;  %v7327_v57 = vpop.f32.mrb[36].mxu0 }
 0x180   : > { %v10206_v25 = vadd.f32 %v7411_v14, %v1664_v23  ;;  %v7414_v3 = vadd.f32 %v7413_v38, %v7412_v45  ;;  %v7328_v51 = vpop.f32.mrb[37].mxu0  ;;  %v1688_v38 = vadd.f32 %v10186_v0, %v10139_v50 }
 0x181   : > { %2233 = vmatmul.mubr.bf16.gmra.mrb[140].mxu1 %v10060_v35  ;;  %v10214_v31 = vadd.f32 %v7328_v51, %v7327_v57  ;;  %v7330_v21 = vpop.f32.mrb[38].mxu0  ;;  %v1675_v35 = vadd.f32 %v10163_v26, %v10139_v50 }
 0x182   : > { %v10210_v34 = vadd.f32 %v7414_v3, %v1667_v39  ;;  %v7331_v27 = vpop.f32.mrb[39].mxu0 }
 0x183   : > { %v7332_v10 = vadd.f32 %v7331_v27, %v7330_v21 }
 0x184   : > { %v7415_v60 = vpop.f32.mrb[36].mxu1 }
 0x185   : > { %v7416_v54 = vpop.f32.mrb[37].mxu1 }
 0x186   : > { %v7417_v18 = vadd.f32 %v7416_v54, %v7415_v60  ;;  %v7418_v24 = vpop.f32.mrb[38].mxu1  ;;  %v1691_v54 = vadd.f32 %v10192_v32, %v10139_v50  ;;  %v1699_v32 = vadd.f32 %v7326_v48, %v10139_v50  ;;  %v1704_v48 = vadd.f32 %v10214_v31, %v10139_v50 }
 0x187   : > { %v7419_v49 = vpop.f32.mrb[39].mxu1  ;;  %v7333_v62 = vpop.f32.mrb[40].mxu0 }
 0x188   : > { %v10218_v19 = vadd.f32 %v7417_v18, %v1672_v2  ;;  %v7420_v58 = vadd.f32 %v7419_v49, %v7418_v24  ;;  %v7334_v33 = vpop.f32.mrb[41].mxu0 }
 0x189   : > { %v10224_v36 = vadd.f32 %v7334_v33, %v7333_v62  ;;  %v7336_v29 = vpop.f32.mrb[42].mxu0 }
 0x18a   : > { %v10220_v63 = vadd.f32 %v7420_v58, %v1675_v35  ;;  %v7337_v26 = vpop.f32.mrb[43].mxu0  ;;  %v1696_v35 = vadd.f32 %v10202_v17, %v10139_v50 }
 0x18b   : > { %v10230_v11 = vadd.f32 %v7337_v26, %v7336_v29 }
 0x18c   : > { %v7421_v43 = vpop.f32.mrb[40].mxu1 }
 0x18d   : > { %v7422_v42 = vpop.f32.mrb[41].mxu1 }
 0x18e   : > { %v7423_v28 = vadd.f32 %v7422_v42, %v7421_v43  ;;  %v7424_v59 = vpop.f32.mrb[42].mxu1 }
 0x18f   : > { %v7425_v40 = vpop.f32.mrb[43].mxu1  ;;  %v7339_v45 = vpop.f32.mrb[44].mxu0 }
 0x190   : > { %v10228_v44 = vadd.f32 %v7423_v28, %v1680_v20  ;;  %v7426_v37 = vadd.f32 %v7425_v40, %v7424_v59  ;;  %v7340_v55 = vpop.f32.mrb[45].mxu0 }
 0x191   : > { %v10236_v3 = vadd.f32 %v7340_v55, %v7339_v45  ;;  %v7342_v60 = vpop.f32.mrb[46].mxu0 }
 0x192   : > { %v10232_v23 = vadd.f32 %v7426_v37, %v1683_v5  ;;  %v7343_v57 = vpop.f32.mrb[47].mxu0 }
 0x193   : > { %v10242_v18 = vadd.f32 %v7343_v57, %v7342_v60 }
 0x194   : > { %v7427_v14 = vpop.f32.mrb[44].mxu1 }
 0x195   : > { %v7428_v53 = vpop.f32.mrb[45].mxu1 }
 0x196   : > { %v7429_v52 = vadd.f32 %v7428_v53, %v7427_v14  ;;  %v7430_v39 = vpop.f32.mrb[46].mxu1 }
 0x197   : > { %v7431_v9 = vpop.f32.mrb[47].mxu1  ;;  %v7497_v49 = vpop.f32.mrb[48].mxu0 }
 0x198   : > { %v10240_v51 = vadd.f32 %v7429_v52, %v1688_v38  ;;  %v7432_v2 = vadd.f32 %v7431_v9, %v7430_v39  ;;  %v7498_v27 = vpop.f32.mrb[49].mxu0 }
 0x199   : > { %v7499_v43 = vadd.f32 %v7498_v27, %v7497_v49  ;;  %v7500_v42 = vpop.f32.mrb[50].mxu0 }
 0x19a   : > { %v10244_v24 = vadd.f32 %v7432_v2, %v1691_v54  ;;  %v7501_v20 = vpop.f32.mrb[51].mxu0 }
 0x19b   : > { %v10252_v59 = vadd.f32 %v7499_v43, %v10147_v13  ;;  %v7502_v40 = vadd.f32 %v7501_v20, %v7500_v42  ;;  %v1707_v13 = vadd.f32 %v7332_v10, %v10139_v50  ;;  %v1712_v10 = vadd.f32 %v10224_v36, %v10139_v50 }
 0x19c   : > { %v7433_v21 = vpop.f32.mrb[48].mxu1 }
 0x19d   : > { %v7434_v0 = vpop.f32.mrb[49].mxu1  ;;  %v10257_v5 = vadd.f32 %v7502_v40, %v10152_v15 }
 0x19e   : > { %v7435_v58 = vadd.f32 %v7434_v0, %v7433_v21  ;;  %v7436_v62 = vpop.f32.mrb[50].mxu1 }
 0x19f   : > { %v7437_v33 = vpop.f32.mrb[51].mxu1  ;;  %v7503_v37 = vpop.f32.mrb[52].mxu0 }
 0x1a0   : > { %v10249_v28 = vadd.f32 %v7435_v58, %v1696_v35  ;;  %v7438_v29 = vadd.f32 %v7437_v33, %v7436_v62  ;;  %v7504_v45 = vpop.f32.mrb[53].mxu0 }
 0x1a1   : > { %v7505_v55 = vadd.f32 %v7504_v45, %v7503_v37  ;;  %v7506_v52 = vpop.f32.mrb[54].mxu0 }
 0x1a2   : > { %v10254_v26 = vadd.f32 %v7438_v29, %v1699_v32  ;;  %v7507_v60 = vpop.f32.mrb[55].mxu0 }
 0x1a3   : > { %v10265_v15 = vadd.f32 %v7505_v55, %v10161_v12  ;;  %v7508_v54 = vadd.f32 %v7507_v60, %v7506_v52  ;;  %v1715_v12 = vadd.f32 %v10230_v11, %v10139_v50  ;;  %v1720_v11 = vadd.f32 %v10236_v3, %v10139_v50 }
 0x1a4   : > { %v7439_v17 = vpop.f32.mrb[52].mxu1 }
 0x1a5   : > { %v7440_v14 = vpop.f32.mrb[53].mxu1  ;;  %v10270_v21 = vadd.f32 %v7508_v54, %v10166_v30 }
 0x1a6   : > { %v7441_v53 = vadd.f32 %v7440_v14, %v7439_v17  ;;  %v7442_v38 = vpop.f32.mrb[54].mxu1 }
 0x1a7   : > { %v7443_v39 = vpop.f32.mrb[55].mxu1  ;;  %v7509_v49 = vpop.f32.mrb[56].mxu0 }
 0x1a8   : > { %v10262_v9 = vadd.f32 %v7441_v53, %v1704_v48  ;;  %v7444_v57 = vadd.f32 %v7443_v39, %v7442_v38  ;;  %v7510_v27 = vpop.f32.mrb[57].mxu0 }
 0x1a9   : > { %v7511_v58 = vadd.f32 %v7510_v27, %v7509_v49  ;;  %v7512_v62 = vpop.f32.mrb[58].mxu0 }
 0x1aa   : > { %v10267_v2 = vadd.f32 %v7444_v57, %v1707_v13  ;;  %v7513_v32 = vpop.f32.mrb[59].mxu0 }
 0x1ab   : > { %v10279_v30 = vadd.f32 %v7511_v58, %v10175_v6  ;;  %v7514_v29 = vadd.f32 %v7513_v32, %v7512_v62  ;;  %v1723_v6 = vadd.f32 %v10242_v18, %v10139_v50  ;;  %v1728_v18 = vadd.f32 %v10091_v1, %v10139_v50 }
 0x1ac   : > { %v7445_v31 = vpop.f32.mrb[56].mxu1 }
 0x1ad   : > { %v7446_v0 = vpop.f32.mrb[57].mxu1  ;;  %v10284_v36 = vadd.f32 %v7514_v29, %v10180_v61 }
 0x1ae   : > { %v7447_v35 = vadd.f32 %v7446_v0, %v7445_v31  ;;  %v7448_v43 = vpop.f32.mrb[58].mxu1 }
 0x1af   : > { %v7449_v42 = vpop.f32.mrb[59].mxu1  ;;  %v7515_v37 = vpop.f32.mrb[60].mxu0 }
 0x1b0   : > { %v10276_v33 = vadd.f32 %v7447_v35, %v1712_v10  ;;  %v7450_v20 = vadd.f32 %v7449_v42, %v7448_v43  ;;  %v7516_v45 = vpop.f32.mrb[61].mxu0 }
 0x1b1   : > { %v7517_v53 = vadd.f32 %v7516_v45, %v7515_v37  ;;  %v7518_v38 = vpop.f32.mrb[62].mxu0 }
 0x1b2   : > { %v10281_v40 = vadd.f32 %v7450_v20, %v1715_v12  ;;  %v7519_v13 = vpop.f32.mrb[63].mxu0 }
 0x1b3   : > { %v10293_v61 = vadd.f32 %v7517_v53, %v10190_v4  ;;  %v7520_v57 = vadd.f32 %v7519_v13, %v7518_v38  ;;  %v1731_v4 = vadd.f32 %v10095_v46, %v10139_v50  ;;  %v1736_v46 = vadd.f32 %v10103_v8, %v10139_v50 }
 0x1b4   : > { %v7451_v17 = vpop.f32.mrb[60].mxu1 }
 0x1b5   : > { %v7452_v14 = vpop.f32.mrb[61].mxu1  ;;  %v10298_v3 = vadd.f32 %v7520_v57, %v10196_v47 }
 0x1b6   : > { %v7453_v48 = vadd.f32 %v7452_v14, %v7451_v17  ;;  %v7454_v55 = vpop.f32.mrb[62].mxu1 }
 0x1b7   : > { %v7455_v52 = vpop.f32.mrb[63].mxu1  ;;  %v7521_v49 = vpop.f32.mrb[64].mxu0 }
 0x1b8   : > { %v10290_v39 = vadd.f32 %v7453_v48, %v1720_v11  ;;  %v7456_v60 = vadd.f32 %v7455_v52, %v7454_v55  ;;  %v7522_v27 = vpop.f32.mrb[65].mxu0 }
 0x1b9   : > { %v7523_v35 = vadd.f32 %v7522_v27, %v7521_v49  ;;  %v7524_v43 = vpop.f32.mrb[66].mxu0 }
 0x1ba   : > { %v10295_v54 = vadd.f32 %v7456_v60, %v1723_v6  ;;  %v7525_v12 = vpop.f32.mrb[67].mxu0 }
 0x1bb   : > { %v10307_v47 = vadd.f32 %v7523_v35, %v10206_v25  ;;  %v7526_v20 = vadd.f32 %v7525_v12, %v7524_v43  ;;  %v1739_v25 = vadd.f32 %v10107_v16, %v10139_v50  ;;  %v1744_v16 = vadd.f32 %v10115_v22, %v10139_v50 }
 0x1bc   : > { %v7457_v31 = vpop.f32.mrb[64].mxu1 }
 0x1bd   : > { %v7458_v0 = vpop.f32.mrb[65].mxu1  ;;  %v10312_v1 = vadd.f32 %v7526_v20, %v10210_v34 }
 0x1be   : > { %v7459_v10 = vadd.f32 %v7458_v0, %v7457_v31  ;;  %v7460_v58 = vpop.f32.mrb[66].mxu1 }
 0x1bf   : > { %v7461_v62 = vpop.f32.mrb[67].mxu1  ;;  %v7527_v37 = vpop.f32.mrb[68].mxu0 }
 0x1c0   : > { %v10304_v42 = vadd.f32 %v7459_v10, %v1728_v18  ;;  %v7462_v32 = vadd.f32 %v7461_v62, %v7460_v58  ;;  %v7528_v45 = vpop.f32.mrb[69].mxu0 }
 0x1c1   : > { %v7529_v48 = vadd.f32 %v7528_v45, %v7527_v37  ;;  %v7530_v55 = vpop.f32.mrb[70].mxu0 }
 0x1c2   : > { %v10309_v29 = vadd.f32 %v7462_v32, %v1731_v4  ;;  %v7531_v6 = vpop.f32.mrb[71].mxu0 }
 0x1c3   : > { %v10321_v34 = vadd.f32 %v7529_v48, %v10218_v19  ;;  %v7532_v60 = vadd.f32 %v7531_v6, %v7530_v55  ;;  %v1747_v19 = vadd.f32 %v10119_v56, %v10139_v50  ;;  %v1752_v56 = vadd.f32 %v10126_v41, %v10139_v50 }
 0x1c4   : > { %v7463_v17 = vpop.f32.mrb[68].mxu1 }
 0x1c5   : > { %v7464_v14 = vpop.f32.mrb[69].mxu1  ;;  %v10326_v8 = vadd.f32 %v7532_v60, %v10220_v63 }
 0x1c6   : > { %v7465_v11 = vadd.f32 %v7464_v14, %v7463_v17  ;;  %v7466_v53 = vpop.f32.mrb[70].mxu1 }
 0x1c7   : > { %v7467_v38 = vpop.f32.mrb[71].mxu1  ;;  %v7533_v49 = vpop.f32.mrb[72].mxu0 }
 0x1c8   : > { %v10318_v52 = vadd.f32 %v7465_v11, %v1736_v46  ;;  %v7468_v13 = vadd.f32 %v7467_v38, %v7466_v53  ;;  %v7534_v27 = vpop.f32.mrb[73].mxu0 }
 0x1c9   : > { %v7535_v10 = vadd.f32 %v7534_v27, %v7533_v49  ;;  %v7536_v58 = vpop.f32.mrb[74].mxu0 }
 0x1ca   : > { %v10323_v57 = vadd.f32 %v7468_v13, %v1739_v25  ;;  %v7537_v4 = vpop.f32.mrb[75].mxu0 }
 0x1cb   : > { %v10335_v63 = vadd.f32 %v7535_v10, %v10228_v44  ;;  %v7538_v32 = vadd.f32 %v7537_v4, %v7536_v58  ;;  %v1755_v44 = vadd.f32 %v10130_v7, %v10139_v50 }
 0x1cc   : > { %v7469_v31 = vpop.f32.mrb[72].mxu1 }
 0x1cd   : > { %v7470_v0 = vpop.f32.mrb[73].mxu1  ;;  %v10340_v22 = vadd.f32 %v7538_v32, %v10232_v23 }
 0x1ce   : > { %v7471_v18 = vadd.f32 %v7470_v0, %v7469_v31  ;;  %v7472_v35 = vpop.f32.mrb[74].mxu1 }
 0x1cf   : > { %v7473_v43 = vpop.f32.mrb[75].mxu1  ;;  %v7539_v37 = vpop.f32.mrb[76].mxu0 }
 0x1d0   : > { %v10332_v62 = vadd.f32 %v7471_v18, %v1744_v16  ;;  %v7474_v12 = vadd.f32 %v7473_v43, %v7472_v35  ;;  %v7540_v45 = vpop.f32.mrb[77].mxu0 }
 0x1d1   : > { %v7541_v11 = vadd.f32 %v7540_v45, %v7539_v37  ;;  %v7542_v53 = vpop.f32.mrb[78].mxu0 }
 0x1d2   : > { %v10337_v20 = vadd.f32 %v7474_v12, %v1747_v19  ;;  %v7543_v25 = vpop.f32.mrb[79].mxu0 }
 0x1d3   : > { %v10349_v23 = vadd.f32 %v7541_v11, %v10240_v51  ;;  %v7544_v13 = vadd.f32 %v7543_v25, %v7542_v53 }
 0x1d4   : > { %v7475_v17 = vpop.f32.mrb[76].mxu1 }
 0x1d5   : > { %v7476_v14 = vpop.f32.mrb[77].mxu1  ;;  %v10354_v41 = vadd.f32 %v7544_v13, %v10244_v24 }
 0x1d6   : > { %v7477_v46 = vadd.f32 %v7476_v14, %v7475_v17  ;;  %v7478_v48 = vpop.f32.mrb[78].mxu1 }
 0x1d7   : > { %v7479_v55 = vpop.f32.mrb[79].mxu1  ;;  %v7545_v31 = vpop.f32.mrb[80].mxu0 }
 0x1d8   : > { %v10346_v38 = vadd.f32 %v7477_v46, %v1752_v56  ;;  %v7480_v6 = vadd.f32 %v7479_v55, %v7478_v48  ;;  %v7546_v0 = vpop.f32.mrb[81].mxu0 }
 0x1d9   : > { %v7547_v16 = vadd.f32 %v7546_v0, %v7545_v31  ;;  %v7548_v50 = vpop.f32.mrb[82].mxu0 }
 0x1da   : > { %v10351_v60 = vadd.f32 %v7480_v6, %v1755_v44  ;;  %v7549_v10 = vpop.f32.mrb[83].mxu0 }
 0x1db   : > { %v10357_v51 = vadd.f32 %v7547_v16, %v10249_v28  ;;  %v7550_v58 = vadd.f32 %v7549_v10, %v7548_v50 }
 0x1dc   : > { %v7609_v49 = vpop.f32.mrb[80].mxu1 }
 0x1dd   : > { %v7610_v27 = vpop.f32.mrb[81].mxu1  ;;  %v10363_v24 = vadd.f32 %v7550_v58, %v10254_v26 }
 0x1de   : > { %v7611_v7 = vadd.f32 %v7610_v27, %v7609_v49  ;;  %v7612_v18 = vpop.f32.mrb[82].mxu1 }
 0x1df   : > { %v7613_v35 = vpop.f32.mrb[83].mxu1  ;;  %v7551_v12 = vpop.f32.mrb[84].mxu0 }
 0x1e0   : > { %v7614_v19 = vadd.f32 %v7613_v35, %v7612_v18  ;;  %v10360_v43 = vadd.f32 %v7611_v7, %v10252_v59  ;;  %v7552_v17 = vpop.f32.mrb[85].mxu0 }
 0x1e1   : > { %v7553_v14 = vadd.f32 %v7552_v17, %v7551_v12  ;;  %v7554_v56 = vpop.f32.mrb[86].mxu0 }
 0x1e2   : > { %v10366_v4 = vadd.f32 %v7614_v19, %v10257_v5  ;;  %v7555_v46 = vpop.f32.mrb[87].mxu0 }
 0x1e3   : > { %v10369_v48 = vadd.f32 %v7553_v14, %v10262_v9  ;;  %v7556_v59 = vadd.f32 %v7555_v46, %v7554_v56 }
 0x1e4   : > { %v7615_v32 = vpop.f32.mrb[84].mxu1 }
 0x1e5   : > { %v7616_v37 = vpop.f32.mrb[85].mxu1  ;;  %v10375_v5 = vadd.f32 %v7556_v59, %v10267_v2 }
 0x1e6   : > { %v7617_v45 = vadd.f32 %v7616_v37, %v7615_v32  ;;  %v7618_v28 = vpop.f32.mrb[86].mxu1 }
 0x1e7   : > { %v7619_v11 = vpop.f32.mrb[87].mxu1  ;;  %v7557_v55 = vpop.f32.mrb[88].mxu0 }
 0x1e8   : > { %v7620_v53 = vadd.f32 %v7619_v11, %v7618_v28  ;;  %v10372_v26 = vadd.f32 %v7617_v45, %v10265_v15  ;;  %v7558_v6 = vpop.f32.mrb[89].mxu0 }
 0x1e9   : > { %v7559_v31 = vadd.f32 %v7558_v6, %v7557_v55  ;;  %v7560_v0 = vpop.f32.mrb[90].mxu0 }
 0x1ea   : > { %v10378_v44 = vadd.f32 %v7620_v53, %v10270_v21  ;;  %v7561_v27 = vpop.f32.mrb[91].mxu0 }
 0x1eb   : > { %v10381_v7 = vadd.f32 %v7559_v31, %v10276_v33  ;;  %v7562_v15 = vadd.f32 %v7561_v27, %v7560_v0 }
 0x1ec   : > { %v7621_v25 = vpop.f32.mrb[88].mxu1 }
 0x1ed   : > { %v7622_v13 = vpop.f32.mrb[89].mxu1  ;;  %v10387_v21 = vadd.f32 %v7562_v15, %v10281_v40 }
 0x1ee   : > { %v7623_v49 = vadd.f32 %v7622_v13, %v7621_v25  ;;  %v7624_v9 = vpop.f32.mrb[90].mxu1 }
 0x1ef   : > { %v7625_v16 = vpop.f32.mrb[91].mxu1  ;;  %v7563_v10 = vpop.f32.mrb[92].mxu0 }
 0x1f0   : > { %v7626_v50 = vadd.f32 %v7625_v16, %v7624_v9  ;;  %v10384_v2 = vadd.f32 %v7623_v49, %v10279_v30  ;;  %v7564_v58 = vpop.f32.mrb[93].mxu0 }
 0x1f1   : > { %v7565_v12 = vadd.f32 %v7564_v58, %v7563_v10  ;;  %v7566_v17 = vpop.f32.mrb[94].mxu0 }
 0x1f2   : > { %v10390_v18 = vadd.f32 %v7626_v50, %v10284_v36  ;;  %v7567_v37 = vpop.f32.mrb[95].mxu0 }
 0x1f3   : > { %v10393_v45 = vadd.f32 %v7565_v12, %v10290_v39  ;;  %v7568_v30 = vadd.f32 %v7567_v37, %v7566_v17 }
 0x1f4   : > { %v7627_v35 = vpop.f32.mrb[92].mxu1 }
 0x1f5   : > { %v7628_v19 = vpop.f32.mrb[93].mxu1  ;;  %v10399_v36 = vadd.f32 %v7568_v30, %v10295_v54 }
 0x1f6   : > { %v7629_v32 = vadd.f32 %v7628_v19, %v7627_v35  ;;  %v7630_v33 = vpop.f32.mrb[94].mxu1 }
 0x1f7   : > { %v7631_v14 = vpop.f32.mrb[95].mxu1  ;;  %v7569_v46 = vpop.f32.mrb[96].mxu0 }
 0x1f8   : > { %v7632_v56 = vadd.f32 %v7631_v14, %v7630_v33  ;;  %v10396_v40 = vadd.f32 %v7629_v32, %v10293_v61  ;;  %v7570_v59 = vpop.f32.mrb[97].mxu0 }
 0x1f9   : > { %v7571_v55 = vadd.f32 %v7570_v59, %v7569_v46  ;;  %v7572_v6 = vpop.f32.mrb[98].mxu0 }
 0x1fa   : > { %v10402_v28 = vadd.f32 %v7632_v56, %v10298_v3  ;;  %v7573_v13 = vpop.f32.mrb[99].mxu0 }
 0x1fb   : > { %v10405_v49 = vadd.f32 %v7571_v55, %v10304_v42  ;;  %v7574_v61 = vadd.f32 %v7573_v13, %v7572_v6 }
 0x1fc   : > { %v7633_v11 = vpop.f32.mrb[96].mxu1 }
 0x1fd   : > { %v7634_v53 = vpop.f32.mrb[97].mxu1  ;;  %v10411_v3 = vadd.f32 %v7574_v61, %v10309_v29 }
 0x1fe   : > { %v7635_v25 = vadd.f32 %v7634_v53, %v7633_v11  ;;  %v7636_v39 = vpop.f32.mrb[98].mxu1 }
 0x1ff   : > { %v7637_v31 = vpop.f32.mrb[99].mxu1  ;;  %v7575_v27 = vpop.f32.mrb[100].mxu0 }
 0x200   : > { %v7638_v0 = vadd.f32 %v7637_v31, %v7636_v39  ;;  %v10408_v54 = vadd.f32 %v7635_v25, %v10307_v47  ;;  %v7576_v15 = vpop.f32.mrb[101].mxu0 }
 0x201   : > { %v7577_v10 = vadd.f32 %v7576_v15, %v7575_v27  ;;  %v7578_v58 = vpop.f32.mrb[102].mxu0 }
 0x202   : > { %v10414_v9 = vadd.f32 %v7638_v0, %v10312_v1  ;;  %v7579_v19 = vpop.f32.mrb[103].mxu0 }
 0x203   : > { %v10417_v32 = vadd.f32 %v7577_v10, %v10318_v52  ;;  %v7580_v47 = vadd.f32 %v7579_v19, %v7578_v58 }
 0x204   : > { %v7639_v16 = vpop.f32.mrb[100].mxu1 }
 0x205   : > { %v7640_v50 = vpop.f32.mrb[101].mxu1  ;;  %v10423_v1 = vadd.f32 %v7580_v47, %v10323_v57 }
 0x206   : > { %v7641_v35 = vadd.f32 %v7640_v50, %v7639_v16  ;;  %v7642_v42 = vpop.f32.mrb[102].mxu1 }
 0x207   : > { %v7643_v12 = vpop.f32.mrb[103].mxu1  ;;  %v7581_v37 = vpop.f32.mrb[104].mxu0 }
 0x208   : > { %v7644_v17 = vadd.f32 %v7643_v12, %v7642_v42  ;;  %v10420_v29 = vadd.f32 %v7641_v35, %v10321_v34  ;;  %v7582_v30 = vpop.f32.mrb[105].mxu0 }
 0x209   : > { %v7583_v46 = vadd.f32 %v7582_v30, %v7581_v37  ;;  %v7584_v59 = vpop.f32.mrb[106].mxu0 }
 0x20a   : > { %v10426_v33 = vadd.f32 %v7644_v17, %v10326_v8  ;;  %v7585_v53 = vpop.f32.mrb[107].mxu0 }
 0x20b   : > { %v10429_v25 = vadd.f32 %v7583_v46, %v10332_v62  ;;  %v7586_v34 = vadd.f32 %v7585_v53, %v7584_v59 }
 0x20c   : > { %v7645_v14 = vpop.f32.mrb[104].mxu1 }
 0x20d   : > { %v7646_v56 = vpop.f32.mrb[105].mxu1  ;;  %v10435_v8 = vadd.f32 %v7586_v34, %v10337_v20 }
 0x20e   : > { %v7647_v11 = vadd.f32 %v7646_v56, %v7645_v14  ;;  %v7648_v52 = vpop.f32.mrb[106].mxu1 }
 0x20f   : > { %v7649_v55 = vpop.f32.mrb[107].mxu1  ;;  %v7587_v13 = vpop.f32.mrb[108].mxu0 }
 0x210   : > { %v7650_v6 = vadd.f32 %v7649_v55, %v7648_v52  ;;  %v10432_v57 = vadd.f32 %v7647_v11, %v10335_v63  ;;  %v7588_v61 = vpop.f32.mrb[109].mxu0 }
 0x211   : > { %v7589_v27 = vadd.f32 %v7588_v61, %v7587_v13  ;;  %v7590_v15 = vpop.f32.mrb[110].mxu0 }
 0x212   : > { %v10438_v39 = vadd.f32 %v7650_v6, %v10340_v22  ;;  %v7591_v50 = vpop.f32.mrb[111].mxu0 }
 0x213   : > { %v10441_v35 = vadd.f32 %v7589_v27, %v10346_v38  ;;  %v7592_v63 = vadd.f32 %v7591_v50, %v7590_v15 }
 0x214   : > { %v7651_v31 = vpop.f32.mrb[108].mxu1 }
 0x215   : > { %v7652_v0 = vpop.f32.mrb[109].mxu1  ;;  %v10447_v22 = vadd.f32 %v7592_v63, %v10351_v60 }
 0x216   : > { %v7653_v16 = vadd.f32 %v7652_v0, %v7651_v31  ;;  %v7654_v62 = vpop.f32.mrb[110].mxu1 }
 0x217   : > { %v7655_v10 = vpop.f32.mrb[111].mxu1  ;;  %v8708_v12 = vpop.f32.mrb[112].mxu0 }
 0x218   : > { %v7656_v58 = vadd.f32 %v7655_v10, %v7654_v62  ;;  %v10444_v20 = vadd.f32 %v7653_v16, %v10349_v23  ;;  %v2284_v47 = vadd.f32 %v8708_v12, %v10372_v26  ;;  %v2275_v37 = vpop.f32.mrb[113].mxu0 }
 0x219   : > { %v2276_v38 = vadd.f32 %v2275_v37, %v10360_v43  ;;  %v8709_v56 = vpop.f32.mrb[114].mxu0 }
 0x21a   : > { %v10450_v42 = vadd.f32 %v7656_v58, %v10354_v41  ;;  %2404 = vst [vmem:[#allocation4 + $0x10] sm:$0xff] %v2284_v47  ;;  %v2287_v23 = vadd.f32 %v8709_v56, %v10378_v44  ;;  %v2278_v60 = vpop.f32.mrb[115].mxu0 }
 0x21b   : > { %2402 = vst [vmem:[#allocation4] sm:$0xff] %v2276_v38  ;;  %v2279_v41 = vadd.f32 %v2278_v60, %v10366_v4 }
 0x21c   : > { %v7657_v19 = vpop.f32.mrb[112].mxu1  ;;  %2405 = vst [vmem:[#allocation4 + $0x18] sm:$0xff] %v2287_v23 }
 0x21d   : > { %v7658_v17 = vpop.f32.mrb[113].mxu1  ;;  %2403 = vst [vmem:[#allocation4 + $0x8] sm:$0xff] %v2279_v41 }
 0x21e   : > { %v7659_v14 = vadd.f32 %v7658_v17, %v7657_v19  ;;  %v7660_v30 = vpop.f32.mrb[114].mxu1 }
 0x21f   : > { %v7661_v46 = vpop.f32.mrb[115].mxu1  ;;  %v8712_v52 = vpop.f32.mrb[116].mxu0 }
 0x220   : > { %v7662_v11 = vadd.f32 %v7661_v46, %v7660_v30  ;;  %v10457_v59 = vadd.f32 %v7659_v14, %v10357_v51  ;;  %v2300_v53 = vadd.f32 %v8712_v52, %v10396_v40  ;;  %v2291_v44 = vpop.f32.mrb[117].mxu0 }
 0x221   : > { %v2292_v6 = vadd.f32 %v2291_v44, %v10384_v2  ;;  %v8713_v31 = vpop.f32.mrb[118].mxu0 }
 0x222   : > { %v10460_v26 = vadd.f32 %v7662_v11, %v10363_v24  ;;  %2408 = vst [vmem:[#allocation4 + $0x30] sm:$0xff] %v2300_v53  ;;  %v2303_v51 = vadd.f32 %v8713_v31, %v10402_v28  ;;  %v2294_v61 = vpop.f32.mrb[119].mxu0 }
 0x223   : > { %2406 = vst [vmem:[#allocation4 + $0x20] sm:$0xff] %v2292_v6  ;;  %v2295_v24 = vadd.f32 %v2294_v61, %v10390_v18 }
 0x224   : > { %v7663_v43 = vpop.f32.mrb[116].mxu1  ;;  %2409 = vst [vmem:[#allocation4 + $0x38] sm:$0xff] %v2303_v51 }
 0x225   : > { %v7664_v55 = vpop.f32.mrb[117].mxu1  ;;  %2407 = vst [vmem:[#allocation4 + $0x28] sm:$0xff] %v2295_v24 }
 0x226   : > { %v7665_v34 = vadd.f32 %v7664_v55, %v7663_v43  ;;  %v7666_v13 = vpop.f32.mrb[118].mxu1 }
 0x227   : > { %v7667_v4 = vpop.f32.mrb[119].mxu1  ;;  %v8716_v15 = vpop.f32.mrb[120].mxu0 }
 0x228   : > { %v7668_v0 = vadd.f32 %v7667_v4, %v7666_v13  ;;  %v2187_v27 = vadd.f32 %v7665_v34, %v10369_v48  ;;  %v2316_v2 = vadd.f32 %v8716_v15, %v10420_v29  ;;  %v2307_v50 = vpop.f32.mrb[121].mxu0 }
 0x229   : > { %v2308_v28 = vadd.f32 %v2307_v50, %v10408_v54  ;;  %v8717_v58 = vpop.f32.mrb[122].mxu0 }
 0x22a   : > { %v2190_v40 = vadd.f32 %v7668_v0, %v10375_v5  ;;  %2412 = vst [vmem:[#allocation4 + $0x50] sm:$0xff] %v2316_v2  ;;  %v2319_v18 = vadd.f32 %v8717_v58, %v10426_v33  ;;  %v2310_v48 = vpop.f32.mrb[123].mxu0 }
 0x22b   : > { %2410 = vst [vmem:[#allocation4 + $0x40] sm:$0xff] %v2308_v28  ;;  %v2311_v5 = vadd.f32 %v2310_v48, %v10414_v9 }
 0x22c   : > { %v7669_v16 = vpop.f32.mrb[120].mxu1  ;;  %2413 = vst [vmem:[#allocation4 + $0x58] sm:$0xff] %v2319_v18 }
 0x22d   : > { %v7670_v62 = vpop.f32.mrb[121].mxu1  ;;  %2411 = vst [vmem:[#allocation4 + $0x48] sm:$0xff] %v2311_v5 }
 0x22e   : > { %v7671_v10 = vadd.f32 %v7670_v62, %v7669_v16  ;;  %v7672_v63 = vpop.f32.mrb[122].mxu1 }
 0x22f   : > { %v7673_v19 = vpop.f32.mrb[123].mxu1  ;;  %v8720_v37 = vpop.f32.mrb[124].mxu0 }
 0x230   : > { %v7674_v12 = vadd.f32 %v7673_v19, %v7672_v63  ;;  %v2195_v47 = vadd.f32 %v7671_v10, %v10381_v7  ;;  %v2332_v54 = vadd.f32 %v8720_v37, %v10444_v20  ;;  %v2323_v38 = vpop.f32.mrb[125].mxu0 }
 0x231   : > { %v2324_v33 = vadd.f32 %v2323_v38, %v10432_v57  ;;  %v8721_v23 = vpop.f32.mrb[126].mxu0 }
 0x232   : > { %v2198_v29 = vadd.f32 %v7674_v12, %v10387_v21  ;;  %2416 = vst [vmem:[#allocation4 + $0x70] sm:$0xff] %v2332_v54  ;;  %v2335_v9 = vadd.f32 %v8721_v23, %v10450_v42  ;;  %v2326_v7 = vpop.f32.mrb[127].mxu0 }
 0x233   : > { %2414 = vst [vmem:[#allocation4 + $0x60] sm:$0xff] %v2324_v33  ;;  %v2327_v21 = vadd.f32 %v2326_v7, %v10438_v39 }
 0x234   : > { %v7675_v17 = vpop.f32.mrb[124].mxu1  ;;  %2417 = vst [vmem:[#allocation4 + $0x78] sm:$0xff] %v2335_v9 }
 0x235   : > { %v7676_v14 = vpop.f32.mrb[125].mxu1  ;;  %2415 = vst [vmem:[#allocation4 + $0x68] sm:$0xff] %v2327_v21 }
 0x236   : > { %v7677_v30 = vadd.f32 %v7676_v14, %v7675_v17  ;;  %v7678_v56 = vpop.f32.mrb[126].mxu1 }
 0x237   : > { %v7679_v46 = vpop.f32.mrb[127].mxu1  ;;  %v8724_v43 = vpop.f32.mrb[128].mxu0 }
 0x238   : > { %v7680_v60 = vadd.f32 %v7679_v46, %v7678_v56  ;;  %v2203_v11 = vadd.f32 %v7677_v30, %v10393_v45  ;;  %v2348_v57 = vadd.f32 %v8724_v43, %v2187_v27  ;;  %v2339_v53 = vpop.f32.mrb[129].mxu0 }
 0x239   : > { %v2340_v42 = vadd.f32 %v2339_v53, %v10457_v59  ;;  %v8725_v34 = vpop.f32.mrb[130].mxu0 }
 0x23a   : > { %v2206_v20 = vadd.f32 %v7680_v60, %v10399_v36  ;;  %2420 = vst [vmem:[#allocation4 + $0x90] sm:$0xff] %v2348_v57  ;;  %v2351_v6 = vadd.f32 %v8725_v34, %v2190_v40  ;;  %v2342_v39 = vpop.f32.mrb[131].mxu0 }
 0x23b   : > { %2418 = vst [vmem:[#allocation4 + $0x80] sm:$0xff] %v2340_v42  ;;  %v2343_v31 = vadd.f32 %v2342_v39, %v10460_v26 }
 0x23c   : > { %v7681_v41 = vpop.f32.mrb[128].mxu1  ;;  %2421 = vst [vmem:[#allocation4 + $0x98] sm:$0xff] %v2351_v6 }
 0x23d   : > { %v7682_v52 = vpop.f32.mrb[129].mxu1  ;;  %2419 = vst [vmem:[#allocation4 + $0x88] sm:$0xff] %v2343_v31 }
 0x23e   : > { %v7683_v55 = vadd.f32 %v7682_v52, %v7681_v41  ;;  %v7684_v44 = vpop.f32.mrb[130].mxu1 }
 0x23f   : > { %v7685_v13 = vpop.f32.mrb[131].mxu1  ;;  %v8728_v61 = vpop.f32.mrb[132].mxu0 }
 0x240   : > { %v7686_v45 = vadd.f32 %v7685_v13, %v7684_v44  ;;  %v2211_v36 = vadd.f32 %v7683_v55, %v10405_v49  ;;  %v2364_v0 = vadd.f32 %v8728_v61, %v2203_v11  ;;  %v2355_v24 = vpop.f32.mrb[133].mxu0 }
 0x241   : > { %v2356_v16 = vadd.f32 %v2355_v24, %v2195_v47  ;;  %v8729_v15 = vpop.f32.mrb[134].mxu0 }
 0x242   : > { %v2214_v51 = vadd.f32 %v7686_v45, %v10411_v3  ;;  %2424 = vst [vmem:[#allocation4 + $0xb0] sm:$0xff] %v2364_v0  ;;  %v2367_v2 = vadd.f32 %v8729_v15, %v2206_v20  ;;  %v2358_v50 = vpop.f32.mrb[135].mxu0 }
 0x243   : > { %2422 = vst [vmem:[#allocation4 + $0xa0] sm:$0xff] %v2356_v16  ;;  %v2359_v49 = vadd.f32 %v2358_v50, %v2198_v29 }
 0x244   : > { %v7687_v4 = vpop.f32.mrb[132].mxu1  ;;  %2425 = vst [vmem:[#allocation4 + $0xb8] sm:$0xff] %v2367_v2 }
 0x245   : > { %v7688_v59 = vpop.f32.mrb[133].mxu1  ;;  %2423 = vst [vmem:[#allocation4 + $0xa8] sm:$0xff] %v2359_v49 }
 0x246   : > { %v7689_v27 = vadd.f32 %v7688_v59, %v7687_v4  ;;  %v7690_v40 = vpop.f32.mrb[134].mxu1 }
 0x247   : > { %v7691_v62 = vpop.f32.mrb[135].mxu1  ;;  %v8732_v63 = vpop.f32.mrb[136].mxu0 }
 0x248   : > { %v7692_v26 = vadd.f32 %v7691_v62, %v7690_v40  ;;  %v2219_v10 = vadd.f32 %v7689_v27, %v10417_v32  ;;  %v2371_v19 = vpop.f32.mrb[137].mxu0 }
 0x249   : > { %v2372_v12 = vadd.f32 %v2371_v19, %v2211_v36  ;;  %v8733_v47 = vpop.f32.mrb[138].mxu0 }
 0x24a   : > { %v2222_v3 = vadd.f32 %v7692_v26, %v10423_v1  ;;  %v2380_v58 = vadd.f32 %v8732_v63, %v2219_v10  ;;  %v2374_v54 = vpop.f32.mrb[139].mxu0 }
 0x24b   : > { %2426 = vst [vmem:[#allocation4 + $0xc0] sm:$0xff] %v2372_v12  ;;  %v2375_v32 = vadd.f32 %v2374_v54, %v2214_v51 }
 0x24c   : > { %v7693_v28 = vpop.f32.mrb[136].mxu1  ;;  %2428 = vst [vmem:[#allocation4 + $0xd0] sm:$0xff] %v2380_v58  ;;  %v2383_v17 = vadd.f32 %v8733_v47, %v2222_v3 }
 0x24d   : > { %v7694_v18 = vpop.f32.mrb[137].mxu1  ;;  %2427 = vst [vmem:[#allocation4 + $0xc8] sm:$0xff] %v2375_v32 }
 0x24e   : > { %v7695_v48 = vadd.f32 %v7694_v18, %v7693_v28  ;;  %v7696_v5 = vpop.f32.mrb[138].mxu1  ;;  %2429 = vst [vmem:[#allocation4 + $0xd8] sm:$0xff] %v2383_v17 }
 0x24f   : > { %v7697_v37 = vpop.f32.mrb[139].mxu1  ;;  %v8736_v30 = vpop.f32.mrb[140].mxu0 }
 0x250   : > { %v7698_v29 = vadd.f32 %v7697_v37, %v7696_v5  ;;  %v2227_v14 = vadd.f32 %v7695_v48, %v10429_v25  ;;  %v2387_v56 = vpop.f32.mrb[141].mxu0 }
 0x251   : > { %v8737_v7 = vpop.f32.mrb[142].mxu0 }
 0x252   : > { %v2230_v1 = vadd.f32 %v7698_v29, %v10435_v8  ;;  %v2388_v9 = vadd.f32 %v2387_v56, %v2227_v14  ;;  %v2390_v21 = vpop.f32.mrb[143].mxu0 }
 0x254   : > { %v7699_v38 = vpop.f32.mrb[140].mxu1  ;;  %2430 = vst [vmem:[#allocation4 + $0xe0] sm:$0xff] %v2388_v9  ;;  %v2391_v41 = vadd.f32 %v2390_v21, %v2230_v1 }
 0x255   : > { %v7700_v33 = vpop.f32.mrb[141].mxu1 }
 0x256   : > { %v7701_v23 = vadd.f32 %v7700_v33, %v7699_v38  ;;  %v7702_v46 = vpop.f32.mrb[142].mxu1  ;;  %2431 = vst [vmem:[#allocation4 + $0xe8] sm:$0xff] %v2391_v41 }
 0x257   : > { %v7703_v60 = vpop.f32.mrb[143].mxu1 }
 0x258   : > { %v2235_v11 = vadd.f32 %v7701_v23, %v10441_v35  ;;  %v7704_v20 = vadd.f32 %v7703_v60, %v7702_v46 }
 0x25a   : > { %v2396_v25 = vadd.f32 %v8736_v30, %v2235_v11  ;;  %v2238_v43 = vadd.f32 %v7704_v20, %v10447_v22 }
 0x25c   : > { %2432 = vst [vmem:[#allocation4 + $0xf0] sm:$0xff] %v2396_v25  ;;  %v2399_v8 = vadd.f32 %v8737_v7, %v2238_v43 }
 0x25e   : > { %2433 = vst [vmem:[#allocation4 + $0xf8] sm:$0xff] %v2399_v8 }
 0x25f PF: > { %v9029_v57 = vld [vmem:[%s12870_s3 + $0x40] sm:$0xff]   ;;  %v9033_v53 = vld [vmem:[%s12870_s3 + $0x48] sm:$0xff]   ;;  %v9037_v34 = vld [vmem:[%s12870_s3 + $0x50] sm:$0xff]   ;;  %v12881_v11 = vmov 0.0   ;;  %p7253_p7 = scmp.ne.s32.totalorder %s9337_s30, 3 }
 0x260   : > { %v9030_v52 = vld [vmem:[%s12870_s3] sm:$0xff]   ;;  %7729 = vmatprep.subr.bf16.mxu0 %v9029_v57  ;;  %v9034_v55 = vld [vmem:[%s12870_s3 + $0x8] sm:$0xff]   ;;  %v9038_v6 = vld [vmem:[%s12870_s3 + $0x10] sm:$0xff]  }
 0x261   : > { %v9031_v35 = vld [vmem:[%s12870_s3 + $0xc0] sm:$0xff]   ;;  %7730 = vmatpush3.bf16.msra.mxu0 %v9030_v52  ;;  %v9035_v42 = vld [vmem:[%s12870_s3 + $0xc8] sm:$0xff]   ;;  %v9039_v13 = vld [vmem:[%s12870_s3 + $0xd0] sm:$0xff]  }
 0x262   : > { %v9032_v22 = vld [vmem:[%s12870_s3 + $0x80] sm:$0xff]   ;;  %7841 = vmatprep.subr.bf16.mxu1 %v9031_v35  ;;  %7731 = vmatprep.subr.bf16.mxu0 %v9033_v53  ;;  %v9036_v44 = vld [vmem:[%s12870_s3 + $0x88] sm:$0xff]   ;;  %v9040_v39 = vld [vmem:[%s12870_s3 + $0x90] sm:$0xff]  }
 0x263   : > { %7842 = vmatpush3.bf16.msra.mxu1 %v9032_v22  ;;  %v9041_v45 = vld [vmem:[%s12870_s3 + $0x58] sm:$0xff]   ;;  %v9045_v4 = vld [vmem:[%s12870_s3 + $0x60] sm:$0xff]   ;;  %v9049_v24 = vld [vmem:[%s12870_s3 + $0x68] sm:$0xff]  }
 0x264   : > { %7843 = vmatprep.subr.bf16.mxu1 %v9035_v42  ;;  %v9042_v31 = vld [vmem:[%s12870_s3 + $0x18] sm:$0xff]   ;;  %v9046_v61 = vld [vmem:[%s12870_s3 + $0x20] sm:$0xff]   ;;  %v9050_v27 = vld [vmem:[%s12870_s3 + $0x28] sm:$0xff]  }
 0x265   : > { %7732 = vmatpush3.bf16.msra.mxu0 %v9034_v55  ;;  %v9043_v36 = vld [vmem:[%s12870_s3 + $0xd8] sm:$0xff]   ;;  %v9047_v0 = vld [vmem:[%s12870_s3 + $0xe0] sm:$0xff]   ;;  %v9051_v16 = vld [vmem:[%s12870_s3 + $0xe8] sm:$0xff]  }
 0x266   : > { %7733 = vmatprep.subr.bf16.mxu0 %v9037_v34  ;;  %v9044_v51 = vld [vmem:[%s12870_s3 + $0x98] sm:$0xff]   ;;  %v9048_v59 = vld [vmem:[%s12870_s3 + $0xa0] sm:$0xff]   ;;  %v9052_v40 = vld [vmem:[%s12870_s3 + $0xa8] sm:$0xff]  }
 0x267   : > { %7844 = vmatpush3.bf16.msra.mxu1 %v9036_v44  ;;  %v9053_v15 = vld [vmem:[%s12870_s3 + $0x70] sm:$0xff]   ;;  %v9057_v26 = vld [vmem:[%s12870_s3 + $0x78] sm:$0xff]   ;;  %v2833_v3 = vld [vmem:[#allocation2 + $0x1] sm:$0xff] }
 0x268   : > { %7845 = vmatprep.subr.bf16.mxu1 %v9039_v13  ;;  %v9054_v2 = vld [vmem:[%s12870_s3 + $0x30] sm:$0xff]   ;;  %v9058_v49 = vld [vmem:[%s12870_s3 + $0x38] sm:$0xff]   ;;  %v2731_v18 = vld [vmem:[#allocation2] sm:$0xff] }
 0x269   : > { %7734 = vmatpush3.bf16.msra.mxu0 %v9038_v6  ;;  %v9055_v62 = vld [vmem:[%s12870_s3 + $0xf0] sm:$0xff]   ;;  %v9059_v10 = vld [vmem:[%s12870_s3 + $0xf8] sm:$0xff]   ;;  %v2732_v19 = vld [vmem:[#allocation2 + $0x8] sm:$0xff] }
 0x26a   : > { %7735 = vmatprep.subr.bf16.mxu0 %v9041_v45  ;;  %v9056_v50 = vld [vmem:[%s12870_s3 + $0xb0] sm:$0xff]   ;;  %v9060_v58 = vld [vmem:[%s12870_s3 + $0xb8] sm:$0xff]   ;;  %v2767_v48 = vpack.c.bf16 %v2732_v19, %v2731_v18  ;;  %v9061_v12 = vld [vmem:[%s12870_s3 + $0x140] sm:$0xff]  }
 0x26b   : > { %7846 = vmatpush3.bf16.msra.mxu1 %v9040_v39  ;;  %v2834_v28 = vld [vmem:[#allocation2 + $0x9] sm:$0xff]  ;;  %v2435_v47 = vld [vmem:[#allocation4 + $0x8] sm:$0xff]  ;;  %v2436_v17 = vld [vmem:[#allocation4 + $0x10] sm:$0xff] }
 0x26c   : > { %7847 = vmatprep.subr.bf16.mxu1 %v9043_v36  ;;  %v2869_v63 = vpack.c.bf16 %v2834_v28, %v2833_v3  ;;  %v2434_v5 = vld [vmem:[#allocation4] sm:$0xff]  ;;  %v2437_v37 = vld [vmem:[#allocation4 + $0x18] sm:$0xff]  ;;  %4845 = vst [vmem:[#allocation3] sm:$0xff] %v2767_v48  ;;  %v2467_v29 = vld [vmem:[#allocation5 + $0x8] sm:$0xff] }
 0x26d   : > { %7736 = vmatpush3.bf16.msra.mxu0 %v9042_v31  ;;  %v2466_v54 = vld [vmem:[#allocation5] sm:$0xff]  ;;  %v2468_v32 = vld [vmem:[#allocation5 + $0x10] sm:$0xff]  ;;  %v2469_v14 = vld [vmem:[#allocation5 + $0x18] sm:$0xff]  ;;  %v2499_v38 = vadd.f32 %v2467_v29, %v2435_v47 }
 0x26e   : > { %7737 = vmatprep.subr.bf16.mxu0 %v9045_v4  ;;  %3796 = vmatprep.mubr.bf16.mxu0 %v2869_v63  ;;  %4947 = vst [vmem:[#allocation3 + $0x8] sm:$0xff] %v2869_v63  ;;  %v2498_v1 = vadd.f32 %v2466_v54, %v2434_v5  ;;  %v10589_v30 = vadd.f32 %v2468_v32, %v2436_v17  ;;  %v9062_v56 = vld [vmem:[%s12870_s3 + $0x100] sm:$0xff]   ;;  %v2936_v9 = vld [vmem:[#allocation2 + $0xa] sm:$0xff]  ;;  %v2439_v35 = vld [vmem:[#allocation4 + $0x28] sm:$0xff] }
 0x26f   : > { %7848 = vmatpush3.bf16.msra.mxu1 %v9044_v51  ;;  %v10591_v33 = vadd.f32 %v2469_v14, %v2437_v37  ;;  %v2935_v23 = vld [vmem:[#allocation2 + $0x2] sm:$0xff]  ;;  %vm2531_vm1 = vcmp.ge.f32.partialorder %v2499_v38, 1.0  ;;  %v2438_v25 = vld [vmem:[#allocation4 + $0x20] sm:$0xff]  ;;  %v2471_v53 = vld [vmem:[#allocation5 + $0x28] sm:$0xff]  ;;  %v12879_v51 = vmov 1.0|1.0  }
 0x270   : > { %7849 = vmatprep.subr.bf16.mxu1 %v9047_v0  ;;  %vm2530_vm0 = vcmp.ge.f32.partialorder %v2498_v1, 1.0  ;;  %vm2532_vm2 = vcmp.ge.f32.partialorder %v10589_v30, 1.0  ;;  %v2563_v7 = vsel %vm2531_vm1, 0.0, %v2499_v38  ;;  %v9063_v41 = vld [vmem:[%s12870_s3 + $0x148] sm:$0xff]   ;;  %v2627_v43 = vsel %vm2531_vm1, 1.0, %v12881_v11  ;;  %v2470_v22 = vld [vmem:[#allocation5 + $0x20] sm:$0xff] }
 0x271   : > { %7738 = vmatpush3.bf16.msra.mxu0 %v9046_v61  ;;  %vm2533_vm3 = vcmp.ge.f32.partialorder %v10591_v33, 1.0  ;;  %v2562_v46 = vsel %vm2530_vm0, 0.0, %v2498_v1  ;;  %v2564_v60 = vsel %vm2532_vm2, 0.0, %v10589_v30  ;;  %v2626_v20 = vsel %vm2530_vm0, 1.0, %v12881_v11  ;;  %2595 = vst [vmem:[#allocation5 + $0x8] sm:$0xff] %v2563_v7  ;;  %2700 = vst [vmem:[#allocation2 + $0x21] sm:$0xff] %v2627_v43 }
 0x272   : > { %7739 = vmatprep.subr.bf16.mxu0 %v9049_v24  ;;  %v2565_v21 = vsel %vm2533_vm3, 0.0, %v10591_v33  ;;  %2594 = vst [vmem:[#allocation5] sm:$0xff] %v2562_v46  ;;  %2596 = vst [vmem:[#allocation5 + $0x10] sm:$0xff] %v2564_v60  ;;  %v2628_v8 = vsel %vm2532_vm2, 1.0, %v12881_v11  ;;  %v2629_v57 = vsel %vm2533_vm3, 1.0, %v12881_v11  ;;  %v10619_v52 = vpack.c.bf16 %v2936_v9, %v2935_v23  ;;  %v9064_v6 = vld [vmem:[%s12870_s3 + $0x108] sm:$0xff]  }
 0x273   : > { %7850 = vmatpush3.bf16.msra.mxu1 %v9048_v59  ;;  %2597 = vst [vmem:[#allocation5 + $0x18] sm:$0xff] %v2565_v21  ;;  %2699 = vst [vmem:[#allocation2 + $0x19] sm:$0xff] %v2626_v20  ;;  %v2659_v55 = vadd.f32 %v2627_v43, %v2626_v20  ;;  %v2870_v42 = vpack.c.bf16 %v2627_v43, %v2626_v20  ;;  %v2871_v44 = vpack.c.bf16 %v2629_v57, %v2628_v8  ;;  %v2440_v39 = vld [vmem:[#allocation4 + $0x30] sm:$0xff]  ;;  %v2441_v45 = vld [vmem:[#allocation4 + $0x38] sm:$0xff] }
 0x274   : > { %7851 = vmatprep.subr.bf16.mxu1 %v9051_v16  ;;  %2701 = vst [vmem:[#allocation2 + $0x31] sm:$0xff] %v2628_v8  ;;  %2702 = vst [vmem:[#allocation2 + $0x39] sm:$0xff] %v2629_v57  ;;  %v10621_v34 = vadd.f32 %v2470_v22, %v2438_v25  ;;  %v10627_v13 = vadd.f32 %v2471_v53, %v2439_v35  ;;  %v2472_v31 = vld [vmem:[#allocation5 + $0x30] sm:$0xff]  ;;  %v2473_v4 = vld [vmem:[#allocation5 + $0x38] sm:$0xff] }
 0x275   : > { %7740 = vmatpush3.bf16.msra.mxu0 %v9050_v27  ;;  %5049 = vst [vmem:[#allocation3 + $0x10] sm:$0xff] %v10619_v52  ;;  %v2660_v36 = vadd.f32 %v2659_v55, %v2628_v8  ;;  %vm9175_vm4 = vmpackc.low %vm2531_vm1, %vm2530_vm0  ;;  %v10633_v61 = vadd.f32 %v2472_v31, %v2440_v39  ;;  %v10642_v24 = vadd.f32 %v2473_v4, %v2441_v45  ;;  %v9065_v27 = vld [vmem:[%s12870_s3 + $0x150] sm:$0xff]   ;;  %v2445_v5 = vld [vmem:[#allocation4 + $0x58] sm:$0xff] }
 0x276   : > { %7741 = vmatprep.subr.bf16.mxu0 %v9053_v15  ;;  %2902 = vst [vmem:[#allocation3 + $0x20] sm:$0xff] %v2870_v42  ;;  %2903 = vst [vmem:[#allocation3 + $0x68] sm:$0xff] %v2871_v44  ;;  %vm2534_vm5 = vcmp.ge.f32.partialorder %v10621_v34, 1.0  ;;  %vm2535_vm6 = vcmp.ge.f32.partialorder %v10627_v13, 1.0  ;;  %v2442_v16 = vld [vmem:[#allocation4 + $0x40] sm:$0xff]  ;;  %v2476_v21 = vld [vmem:[#allocation5 + $0x50] sm:$0xff] }
 0x277   : > { %7852 = vmatpush3.bf16.msra.mxu1 %v9052_v40  ;;  %2919 = vst [vmem:[#allocation3 + $0x38] sm:$0xff] %v2871_v44  ;;  %v2566_v0 = vsel %vm2534_vm5, 0.0, %v10621_v34  ;;  %v2630_v59 = vsel %vm2534_vm5, 1.0, %v12881_v11  ;;  %v2443_v40 = vld [vmem:[#allocation4 + $0x48] sm:$0xff]  ;;  %v2661_v15 = vadd.f32 %v2660_v36, %v2629_v57  ;;  %vm2536_vm7 = vcmp.ge.f32.partialorder %v10633_v61, 1.0  ;;  %v2477_v20 = vld [vmem:[#allocation5 + $0x58] sm:$0xff]  ;;  %vm9177_vm11 = vmpackc.low %vm2533_vm3, %vm2532_vm2 }
 0x278   : > { %7853 = vmatprep.subr.bf16.mxu1 %v9055_v62  ;;  %2598 = vst [vmem:[#allocation5 + $0x20] sm:$0xff] %v2566_v0  ;;  %v2631_v62 = vsel %vm2535_vm6, 1.0, %v12881_v11  ;;  %2703 = vst [vmem:[#allocation2 + $0x49] sm:$0xff] %v2630_v59  ;;  %vm2537_vm8 = vcmp.ge.f32.partialorder %v10642_v24, 1.0  ;;  %v2568_v3 = vsel %vm2536_vm7, 0.0, %v10633_v61  ;;  %v2632_v28 = vsel %vm2536_vm7, 1.0, %v12881_v11 }
 0x279   : > { %7742 = vmatpush3.bf16.msra.mxu0 %v9054_v2  ;;  %v2567_v2 = vsel %vm2535_vm6, 0.0, %v10627_v13  ;;  %2704 = vst [vmem:[#allocation2 + $0x51] sm:$0xff] %v2631_v62  ;;  %v2569_v18 = vsel %vm2537_vm8, 0.0, %v10642_v24  ;;  %2600 = vst [vmem:[#allocation5 + $0x30] sm:$0xff] %v2568_v3  ;;  %v2633_v19 = vsel %vm2537_vm8, 1.0, %v12881_v11  ;;  %v2938_v38 = vld [vmem:[#allocation2 + $0x22] sm:$0xff]  ;;  %v10704_v53 = vadd.f32 %v2477_v20, %v2445_v5 }
 0x27a   : > { %7743 = vmatprep.subr.bf16.mxu0 %v9057_v26  ;;  %v2475_v26 = vld [vmem:[#allocation5 + $0x48] sm:$0xff]  ;;  %2599 = vst [vmem:[#allocation5 + $0x28] sm:$0xff] %v2567_v2  ;;  %2705 = vst [vmem:[#allocation2 + $0x61] sm:$0xff] %v2632_v28  ;;  %v2734_v47 = vld [vmem:[#allocation2 + $0x20] sm:$0xff]  ;;  %v2873_v54 = vpack.c.bf16 %v2633_v19, %v2632_v28 }
 0x27b   : > { %7854 = vmatpush3.bf16.msra.mxu1 %v9056_v50  ;;  %v2474_v50 = vld [vmem:[#allocation5 + $0x40] sm:$0xff]  ;;  %v2733_v63 = vld [vmem:[#allocation2 + $0x18] sm:$0xff]  ;;  %2601 = vst [vmem:[#allocation5 + $0x38] sm:$0xff] %v2569_v18  ;;  %2706 = vst [vmem:[#allocation2 + $0x69] sm:$0xff] %v2633_v19  ;;  %v10672_v29 = vadd.f32 %v2475_v26, %v2443_v40  ;;  %vm2541_vm13 = vcmp.ge.f32.partialorder %v10704_v53, 1.0 }
 0x27c   : > { %7855 = vmatprep.subr.bf16.mxu1 %v9059_v10  ;;  %v2872_v10 = vpack.c.bf16 %v2631_v62, %v2630_v59  ;;  %v2735_v17 = vld [vmem:[#allocation2 + $0x30] sm:$0xff]  ;;  %v2736_v37 = vld [vmem:[#allocation2 + $0x38] sm:$0xff]  ;;  %v2768_v32 = vpack.c.bf16 %v2734_v47, %v2733_v63  ;;  %2905 = vst [vmem:[#allocation3 + $0xf8] sm:$0xff] %v2873_v54  ;;  %2921 = vst [vmem:[#allocation3 + $0xc8] sm:$0xff] %v2873_v54  ;;  %v2573_v40 = vsel %vm2541_vm13, 0.0, %v10704_v53 }
 0x27d   : > { %7744 = vmatpush3.bf16.msra.mxu0 %v9058_v49  ;;  %v9066_v49 = vld [vmem:[%s12870_s3 + $0x110] sm:$0xff]   ;;  %v10674_v14 = vpack.c.bf16 %v2736_v37, %v2735_v17  ;;  %v2937_v1 = vld [vmem:[#allocation2 + $0x1a] sm:$0xff]  ;;  %vm2539_vm10 = vcmp.ge.f32.partialorder %v10672_v29, 1.0  ;;  %2605 = vst [vmem:[#allocation5 + $0x58] sm:$0xff] %v2573_v40  ;;  %v2449_v18 = vld [vmem:[#allocation4 + $0x78] sm:$0xff] }
 0x27e   : > { %7953 = vmatprep.subr.bf16.mxu0 %v9061_v12  ;;  %v2444_v12 = vld [vmem:[#allocation4 + $0x50] sm:$0xff]  ;;  %2904 = vst [vmem:[#allocation3 + $0xb0] sm:$0xff] %v2872_v10  ;;  %2920 = vst [vmem:[#allocation3 + $0x80] sm:$0xff] %v2872_v10  ;;  %v2939_v23 = vld [vmem:[#allocation2 + $0x32] sm:$0xff]  ;;  %v10677_v9 = vpack.c.bf16 %v2938_v38, %v2937_v1  ;;  %3957 = vmatprep.mubr.bf16.mxu1 %v2768_v32  ;;  %v2571_v43 = vsel %vm2539_vm10, 0.0, %v10672_v29  ;;  %v2635_v8 = vsel %vm2539_vm10, 1.0, %v12881_v11 }
 0x27f   : > { %7856 = vmatpush3.bf16.msra.mxu1 %v9060_v58  ;;  %v2662_v58 = vadd.f32 %v2661_v15, %v2630_v59  ;;  %v2940_v46 = vld [vmem:[#allocation2 + $0x3a] sm:$0xff]  ;;  %2817 = vst [vmem:[#allocation3 + $0x30] sm:$0xff] %v10674_v14  ;;  %v2737_v57 = vld [vmem:[#allocation2 + $0x48] sm:$0xff]  ;;  %2603 = vst [vmem:[#allocation5 + $0x48] sm:$0xff] %v2571_v43  ;;  %v10702_v22 = vadd.f32 %v2476_v21, %v2444_v12 }
 0x280   : > { %3797 = vmatmul.mubr.bf16.vlgmr.msra.gmra.mrb[0].mxu0 %v2767_v48  ;;  %v10670_v48 = vadd.f32 %v2474_v50, %v2442_v16  ;;  %3004 = vst [vmem:[#allocation3 + $0x28] sm:$0xff] %v10677_v9  ;;  %2708 = vst [vmem:[#allocation2 + $0x81] sm:$0xff] %v2635_v8  ;;  %v2446_v55 = vld [vmem:[#allocation4 + $0x60] sm:$0xff]  ;;  %v2447_v31 = vld [vmem:[#allocation4 + $0x68] sm:$0xff]  ;;  %v2637_v50 = vsel %vm2541_vm13, 1.0, %v12881_v11 }
 0x281   : > { %7954 = vmatpush3.bf16.msra.mxu0 %v9062_v56  ;;  %9176 = vmatprep.mubr.msk.bf16.mxu0 %vm9175_vm4, %v12879_v51  ;;  %v2663_v56 = vadd.f32 %v2662_v58, %v2631_v62  ;;  %v2738_v30 = vld [vmem:[#allocation2 + $0x50] sm:$0xff]  ;;  %v2739_v39 = vld [vmem:[#allocation2 + $0x60] sm:$0xff]  ;;  %vm2540_vm12 = vcmp.ge.f32.partialorder %v10702_v22, 1.0  ;;  %v2479_v26 = vld [vmem:[#allocation5 + $0x68] sm:$0xff]  ;;  %2710 = vst [vmem:[#allocation2 + $0x99] sm:$0xff] %v2637_v50 }
 0x282   : > { %7955 = vmatprep.subr.bf16.mxu0 %v9063_v41  ;;  %vm2538_vm9 = vcmp.ge.f32.partialorder %v10670_v48, 1.0  ;;  %v10687_v41 = vpack.c.bf16 %v2940_v46, %v2939_v23  ;;  %3958 = vmatmul.mubr.bf16.vlgmr.msra.gmra.mrb[0].mxu1 %v10619_v52  ;;  %v9067_v52 = vld [vmem:[%s12870_s3 + $0x158] sm:$0xff]   ;;  %v2941_v42 = vld [vmem:[#allocation2 + $0x4a] sm:$0xff]  ;;  %v2943_v59 = vld [vmem:[#allocation2 + $0x62] sm:$0xff]  ;;  %v2572_v16 = vsel %vm2540_vm12, 0.0, %v10702_v22  ;;  %v2636_v15 = vsel %vm2540_vm12, 1.0, %v12881_v11 }
 0x283   : > { %v2570_v7 = vsel %vm2538_vm9, 0.0, %v10670_v48  ;;  %v2634_v60 = vsel %vm2538_vm9, 1.0, %v12881_v11  ;;  %v2664_v25 = vadd.f32 %v2663_v56, %v2632_v28  ;;  %3965 = vmatprep.mubr.bf16.mxu1 %v10674_v14  ;;  %v2942_v44 = vld [vmem:[#allocation2 + $0x52] sm:$0xff]  ;;  %v2740_v4 = vld [vmem:[#allocation2 + $0x68] sm:$0xff]  ;;  %2604 = vst [vmem:[#allocation5 + $0x50] sm:$0xff] %v2572_v16  ;;  %2709 = vst [vmem:[#allocation2 + $0x91] sm:$0xff] %v2636_v15  ;;  %v2875_v3 = vpack.c.bf16 %v2637_v50, %v2636_v15 }
 0x284   : > { %2602 = vst [vmem:[#allocation5 + $0x40] sm:$0xff] %v2570_v7  ;;  %2707 = vst [vmem:[#allocation2 + $0x79] sm:$0xff] %v2634_v60  ;;  %v2874_v35 = vpack.c.bf16 %v2635_v8, %v2634_v60  ;;  %v10714_v45 = vpack.c.bf16 %v2942_v44, %v2941_v42  ;;  %v2478_v36 = vld [vmem:[#allocation5 + $0x60] sm:$0xff]  ;;  %v10728_v2 = vpack.c.bf16 %v2740_v4, %v2739_v39  ;;  %v9068_v63 = vld [vmem:[%s12870_s3 + $0x118] sm:$0xff]  }
 0x285   : > { %7956 = vmatpush3.bf16.msra.mxu0 %v9064_v6  ;;  %3005 = vst [vmem:[#allocation3 + $0x70] sm:$0xff] %v10687_v41  ;;  %3021 = vst [vmem:[#allocation3 + $0x40] sm:$0xff] %v10687_v41  ;;  %v2665_v33 = vadd.f32 %v2664_v25, %v2633_v19  ;;  %v10712_v6 = vpack.c.bf16 %v2738_v30, %v2737_v57  ;;  %v10739_v28 = vadd.f32 %v2479_v26, %v2447_v31  ;;  %v2448_v58 = vld [vmem:[#allocation4 + $0x70] sm:$0xff]  ;;  %v2481_v5 = vld [vmem:[#allocation5 + $0x78] sm:$0xff] }
 0x286   : > { %7957 = vmatprep.subr.bf16.mxu0 %v9065_v27  ;;  %2906 = vst [vmem:[#allocation3 + $0x140] sm:$0xff] %v2874_v35  ;;  %2922 = vst [vmem:[#allocation3 + $0x110] sm:$0xff] %v2874_v35  ;;  %v2944_v27 = vld [vmem:[#allocation2 + $0x6a] sm:$0xff]  ;;  %v2480_v12 = vld [vmem:[#allocation5 + $0x70] sm:$0xff]  ;;  %v10785_v21 = vadd.f32 %v2481_v5, %v2449_v18 }
 0x287   : > { %v2666_v0 = vadd.f32 %v2665_v33, %v2634_v60  ;;  %2818 = vst [vmem:[#allocation3 + $0x78] sm:$0xff] %v10712_v6  ;;  %3006 = vst [vmem:[#allocation3 + $0xb8] sm:$0xff] %v10714_v45  ;;  %v10732_v62 = vpack.c.bf16 %v2944_v27, %v2943_v59  ;;  %v2946_v54 = vld [vmem:[#allocation2 + $0x82] sm:$0xff]  ;;  %vm2543_vm15 = vcmp.ge.f32.partialorder %v10739_v28, 1.0  ;;  %v2450_v7 = vld [vmem:[#allocation4 + $0x80] sm:$0xff] }
 0x288   : > { %3805 = vmatmul.mubr.bf16.gmra.mrb[4].mxu0 %v2768_v32  ;;  %3022 = vst [vmem:[#allocation3 + $0x88] sm:$0xff] %v10714_v45  ;;  %2819 = vst [vmem:[#allocation3 + $0xc0] sm:$0xff] %v10728_v2  ;;  %v2575_v56 = vsel %vm2543_vm15, 0.0, %v10739_v28  ;;  %v10772_v23 = vsel %vm2543_vm15, 1.0, %v12881_v11  ;;  %v9069_v46 = vld [vmem:[%s12870_s3 + $0x160] sm:$0xff]   ;;  %v2451_v60 = vld [vmem:[#allocation4 + $0x88] sm:$0xff] }
 0x289   : > { %7958 = vmatpush3.bf16.msra.mxu0 %v9066_v49  ;;  %9178 = vmatprep.mubr.msk.bf16.mxu0 %vm9177_vm11, %v12879_v51  ;;  %v10737_v49 = vadd.f32 %v2478_v36, %v2446_v55  ;;  %v2667_v10 = vadd.f32 %v2666_v0, %v2635_v8  ;;  %3007 = vst [vmem:[#allocation3 + $0x100] sm:$0xff] %v10732_v62  ;;  %3023 = vst [vmem:[#allocation3 + $0xd0] sm:$0xff] %v10732_v62  ;;  %v2482_v20 = vld [vmem:[#allocation5 + $0x80] sm:$0xff]  ;;  %v2483_v25 = vld [vmem:[#allocation5 + $0x88] sm:$0xff]  ;;  %vm2545_vm2 = vcmp.ge.f32.partialorder %v10785_v21, 1.0 }
 0x28a   : > { %7959 = vmatprep.subr.bf16.mxu0 %v9067_v52  ;;  %2907 = vst [vmem:[#allocation3 + $0x188] sm:$0xff] %v2875_v3  ;;  %2923 = vst [vmem:[#allocation3 + $0x158] sm:$0xff] %v2875_v3  ;;  %3966 = vmatmul.mubr.bf16.gmra.mrb[4].mxu1 %v10677_v9  ;;  %v10777_v9 = vadd.f32 %v2480_v12, %v2448_v58  ;;  %v2743_v43 = vld [vmem:[#allocation2 + $0x90] sm:$0xff]  ;;  %v10790_v57 = vadd.f32 %v2482_v20, %v2450_v7  ;;  %v9070_v52 = vld [vmem:[%s12870_s3 + $0x120] sm:$0xff]   ;;  %v2577_v36 = vsel %vm2545_vm2, 0.0, %v10785_v21 }
 0x28b   : > { %v2741_v19 = vld [vmem:[#allocation2 + $0x78] sm:$0xff]  ;;  %vm2542_vm14 = vcmp.ge.f32.partialorder %v10737_v49, 1.0  ;;  %v2742_v47 = vld [vmem:[#allocation2 + $0x80] sm:$0xff]  ;;  %v2668_v17 = vadd.f32 %v2667_v10, %v2636_v15  ;;  %vm9179_vm0 = vmpackc.low %vm2535_vm6, %vm2534_vm5  ;;  %12907 = vst [vmem:[#allocation9_spill] sm:$0xff] %v10772_v23  ;;  %3973 = vmatprep.mubr.bf16.mxu1 %v10712_v6  ;;  %v10792_v35 = vadd.f32 %v2483_v25, %v2451_v60  ;;  %v10816_v4 = vsel %vm2545_vm2, 1.0, %v12881_v11 }
 0x28c   : > { %v2945_v37 = vld [vmem:[#allocation2 + $0x7a] sm:$0xff]  ;;  %v2574_v32 = vsel %vm2542_vm14, 0.0, %v10737_v49  ;;  %v2638_v1 = vsel %vm2542_vm14, 1.0, %v12881_v11  ;;  %2607 = vst [vmem:[#allocation5 + $0x68] sm:$0xff] %v2575_v56  ;;  %2712 = vst [vmem:[#allocation2 + $0xb1] sm:$0xff] %v10772_v23  ;;  %vm2544_vm1 = vcmp.ge.f32.partialorder %v10777_v9, 1.0 }
 0x28d   : > { %v10764_v38 = vpack.c.bf16 %v2946_v54, %v2945_v37  ;;  %2606 = vst [vmem:[#allocation5 + $0x60] sm:$0xff] %v2574_v32  ;;  %2711 = vst [vmem:[#allocation2 + $0xa9] sm:$0xff] %v2638_v1  ;;  %v2669_v34 = vadd.f32 %v2668_v17, %v2637_v50  ;;  %7960 = vmatpush3.bf16.msra.mxu0 %v9068_v63  ;;  %v2876_v13 = vpack.c.bf16 %v10772_v23, %v2638_v1  ;;  %v2744_v55 = vld [vmem:[#allocation2 + $0x98] sm:$0xff]  ;;  %v2452_v0 = vld [vmem:[#allocation4 + $0x90] sm:$0xff] }
 0x28e   : > { %7961 = vmatprep.subr.bf16.mxu0 %v9069_v46  ;;  %v2947_v30 = vld [vmem:[#allocation2 + $0x92] sm:$0xff]  ;;  %v2948_v33 = vld [vmem:[#allocation2 + $0x9a] sm:$0xff]  ;;  %v2576_v42 = vsel %vm2544_vm1, 0.0, %v10777_v9  ;;  %v10804_v44 = vsel %vm2544_vm1, 1.0, %v12881_v11  ;;  %v10806_v39 = vpack.c.bf16 %v2744_v55, %v2743_v43  ;;  %12910 = vst [vmem:[#allocation12_spill] sm:$0xff] %v10816_v4  ;;  %v2453_v59 = vld [vmem:[#allocation4 + $0x98] sm:$0xff] }
 0x28f   : > { %3008 = vst [vmem:[#allocation3 + $0x148] sm:$0xff] %v10764_v38  ;;  %3024 = vst [vmem:[#allocation3 + $0x118] sm:$0xff] %v10764_v38  ;;  %v10787_v8 = vadd.f32 %v2669_v34, %v2638_v1  ;;  %v10808_v31 = vpack.c.bf16 %v2948_v33, %v2947_v30  ;;  %v2484_v27 = vld [vmem:[#allocation5 + $0x90] sm:$0xff]  ;;  %vm2546_vm3 = vcmp.ge.f32.partialorder %v10790_v57, 1.0  ;;  %vm2547_vm4 = vcmp.ge.f32.partialorder %v10792_v35, 1.0  ;;  %v2485_v16 = vld [vmem:[#allocation5 + $0x98] sm:$0xff] }
 0x290   : > { %3813 = vmatmul.mubr.bf16.gmra.mrb[8].mxu0 %v10674_v14  ;;  %v10762_v14 = vpack.c.bf16 %v2742_v47, %v2741_v19  ;;  %2908 = vst [vmem:[#allocation3 + $0x1d0] sm:$0xff] %v2876_v13  ;;  %2924 = vst [vmem:[#allocation3 + $0x1a0] sm:$0xff] %v2876_v13  ;;  %v10822_v40 = vadd.f32 %v2484_v27, %v2452_v0  ;;  %v9071_v15 = vld [vmem:[%s12870_s3 + $0x168] sm:$0xff]   ;;  %v2578_v26 = vsel %vm2546_vm3, 0.0, %v10790_v57  ;;  %v2579_v10 = vsel %vm2547_vm4, 0.0, %v10792_v35  ;;  %v2454_v63 = vld [vmem:[#allocation4 + $0xa0] sm:$0xff] }
 0x291   : > { %9180 = vmatprep.mubr.msk.bf16.mxu0 %vm9179_vm0, %v12879_v51  ;;  %12908 = vst [vmem:[#allocation10_spill] sm:$0xff] %v10787_v8  ;;  %12909 = vst [vmem:[#allocation11_spill] sm:$0xff] %v10804_v44  ;;  %7962 = vmatpush3.bf16.msra.mxu0 %v9070_v52  ;;  %v10840_v3 = vsel %vm2546_vm3, 1.0, %v12881_v11  ;;  %v10855_v12 = vadd.f32 %v2485_v16, %v2453_v59  ;;  %v2455_v47 = vld [vmem:[#allocation4 + $0xa8] sm:$0xff]  ;;  %v2486_v17 = vld [vmem:[#allocation5 + $0xa0] sm:$0xff] }
 0x292   : > { %2820 = vst [vmem:[#allocation3 + $0x108] sm:$0xff] %v10762_v14  ;;  %2608 = vst [vmem:[#allocation5 + $0x70] sm:$0xff] %v2576_v42  ;;  %3974 = vmatmul.mubr.bf16.gmra.mrb[8].mxu1 %v10687_v41  ;;  %vm2548_vm6 = vcmp.ge.f32.partialorder %v10822_v40, 1.0  ;;  %7963 = vmatprep.subr.bf16.mxu0 %v9071_v15  ;;  %v2487_v37 = vld [vmem:[#allocation5 + $0xa8] sm:$0xff]  ;;  %v10873_v54 = vadd.f32 %v2486_v17, %v2454_v63  ;;  %v9072_v34 = vld [vmem:[%s12870_s3 + $0x128] sm:$0xff]  }
 0x293   : > { %2713 = vst [vmem:[#allocation2 + $0xc1] sm:$0xff] %v10804_v44  ;;  %2609 = vst [vmem:[#allocation5 + $0x78] sm:$0xff] %v2577_v36  ;;  %v2950_v19 = vld [vmem:[#allocation2 + $0xb2] sm:$0xff]  ;;  %3981 = vmatprep.mubr.bf16.mxu1 %v10728_v2  ;;  %v2580_v41 = vsel %vm2548_vm6, 0.0, %v10822_v40  ;;  %v10869_v5 = vsel %vm2548_vm6, 1.0, %v12881_v11  ;;  %v10885_v56 = vadd.f32 %v2487_v37, %v2455_v47  ;;  %v2456_v13 = vld [vmem:[#allocation4 + $0xb0] sm:$0xff] }
 0x294   : > { %2714 = vst [vmem:[#allocation2 + $0xc9] sm:$0xff] %v10816_v4  ;;  %2821 = vst [vmem:[#allocation3 + $0x150] sm:$0xff] %v10806_v39  ;;  %v2745_v50 = vld [vmem:[#allocation2 + $0xa8] sm:$0xff]  ;;  %v2746_v58 = vld [vmem:[#allocation2 + $0xb0] sm:$0xff] }
 0x295   : > { %3009 = vst [vmem:[#allocation3 + $0x190] sm:$0xff] %v10808_v31  ;;  %3025 = vst [vmem:[#allocation3 + $0x160] sm:$0xff] %v10808_v31  ;;  %v2949_v18 = vld [vmem:[#allocation2 + $0xaa] sm:$0xff]  ;;  %v10859_v61 = vpack.c.bf16 %v2746_v58, %v2745_v50  ;;  %v2488_v60 = vld [vmem:[#allocation5 + $0xb0] sm:$0xff]  ;;  %vm2551_vm11 = vcmp.ge.f32.partialorder %v10885_v56, 1.0  ;;  %7964 = vmatpush3.bf16.msra.mxu0 %v9072_v34 }
 0x296   : > { %12911 = vst [vmem:[#allocation13_spill] sm:$0xff] %v10840_v3  ;;  %vm9181_vm5 = vmpackc.low %vm2537_vm8, %vm2536_vm7  ;;  %v10861_v24 = vpack.c.bf16 %v2950_v19, %v2949_v18  ;;  %vm2549_vm7 = vcmp.ge.f32.partialorder %v10855_v12, 1.0  ;;  %v2457_v46 = vld [vmem:[#allocation4 + $0xb8] sm:$0xff]  ;;  %vm2550_vm8 = vcmp.ge.f32.partialorder %v10873_v54, 1.0  ;;  %v10901_v33 = vadd.f32 %v2488_v60, %v2456_v13  ;;  %v9073_v48 = vld [vmem:[%s12870_s3 + $0x170] sm:$0xff]  }
 0x297   : > { %2610 = vst [vmem:[#allocation5 + $0x80] sm:$0xff] %v2578_v26  ;;  %2611 = vst [vmem:[#allocation5 + $0x88] sm:$0xff] %v2579_v10  ;;  %v2581_v32 = vsel %vm2549_vm7, 0.0, %v10855_v12  ;;  %v10883_v1 = vsel %vm2549_vm7, 1.0, %v12881_v11  ;;  %v2489_v20 = vld [vmem:[#allocation5 + $0xb8] sm:$0xff]  ;;  %v2582_v55 = vsel %vm2550_vm8, 0.0, %v10873_v54  ;;  %7965 = vmatprep.subr.bf16.mxu0 %v9073_v48 }
 0x298   : > { %3821 = vmatmul.mubr.bf16.gmra.mrb[12].mxu0 %v10712_v6  ;;  %v10845_v6 = vsel %vm2547_vm4, 1.0, %v12881_v11  ;;  %2715 = vst [vmem:[#allocation2 + $0xd9] sm:$0xff] %v10840_v3  ;;  %12913 = vst [vmem:[#allocation15_spill] sm:$0xff] %v10869_v5  ;;  %v10899_v30 = vsel %vm2550_vm8, 1.0, %v12881_v11  ;;  %v2583_v0 = vsel %vm2551_vm11, 0.0, %v10885_v56  ;;  %v10913_v59 = vsel %vm2551_vm11, 1.0, %v12881_v11 }
 0x299   : > { %12912 = vst [vmem:[#allocation14_spill] sm:$0xff] %v10845_v6  ;;  %9182 = vmatprep.mubr.msk.bf16.mxu0 %vm9181_vm5, %v12879_v51  ;;  %2716 = vst [vmem:[#allocation2 + $0xe1] sm:$0xff] %v10845_v6  ;;  %v10918_v16 = vadd.f32 %v2489_v20, %v2457_v46  ;;  %vm2552_vm0 = vcmp.ge.f32.partialorder %v10901_v33, 1.0  ;;  %v2458_v29 = vld [vmem:[#allocation4 + $0xc0] sm:$0xff]  ;;  %v2459_v26 = vld [vmem:[#allocation4 + $0xc8] sm:$0xff] }
 0x29a   : > { %2612 = vst [vmem:[#allocation5 + $0x90] sm:$0xff] %v2580_v41  ;;  %2717 = vst [vmem:[#allocation2 + $0xf1] sm:$0xff] %v10869_v5  ;;  %v2747_v7 = vld [vmem:[#allocation2 + $0xc0] sm:$0xff]  ;;  %3982 = vmatmul.mubr.bf16.gmra.mrb[12].mxu1 %v10714_v45  ;;  %v2584_v15 = vsel %vm2552_vm0, 0.0, %v10901_v33  ;;  %v10935_v45 = vsel %vm2552_vm0, 1.0, %v12881_v11  ;;  %v2490_v10 = vld [vmem:[#allocation5 + $0xc0] sm:$0xff] }
 0x29b   : > { %2822 = vst [vmem:[#allocation3 + $0x198] sm:$0xff] %v10859_v61  ;;  %3026 = vst [vmem:[#allocation3 + $0x1a8] sm:$0xff] %v10861_v24  ;;  %v2748_v25 = vld [vmem:[#allocation2 + $0xc8] sm:$0xff]  ;;  %3989 = vmatprep.mubr.bf16.mxu1 %v10762_v14  ;;  %v2491_v18 = vld [vmem:[#allocation5 + $0xc8] sm:$0xff]  ;;  %v10953_v19 = vadd.f32 %v2490_v10, %v2458_v29 }
 0x29c   : > { %12914 = vst [vmem:[#allocation16_spill] sm:$0xff] %v10883_v1  ;;  %2613 = vst [vmem:[#allocation5 + $0x98] sm:$0xff] %v2581_v32  ;;  %v2951_v43 = vld [vmem:[#allocation2 + $0xc2] sm:$0xff]  ;;  %v2952_v52 = vld [vmem:[#allocation2 + $0xca] sm:$0xff]  ;;  %v10903_v42 = vpack.c.bf16 %v2748_v25, %v2747_v7  ;;  %v10960_v37 = vadd.f32 %v2491_v18, %v2459_v26 }
 0x29d   : > { %2718 = vst [vmem:[#allocation2 + $0xf9] sm:$0xff] %v10883_v1  ;;  %12915 = vst [vmem:[#allocation17_spill] sm:$0xff] %v10899_v30  ;;  %v10905_v36 = vpack.c.bf16 %v2952_v52, %v2951_v43  ;;  %v9074_v41 = vld [vmem:[%s12870_s3 + $0x130] sm:$0xff]   ;;  %v9075_v34 = vld [vmem:[%s12870_s3 + $0x1c0] sm:$0xff]  }
 0x29e   : > { %2614 = vst [vmem:[#allocation5 + $0xa0] sm:$0xff] %v2582_v55  ;;  %12916 = vst [vmem:[#allocation18_spill] sm:$0xff] %v10913_v59  ;;  %7966 = vmatpush3.bf16.msra.mxu0 %v9074_v41  ;;  %8065 = vmatprep.subr.bf16.mxu1 %v9075_v34  ;;  %v9076_v52 = vld [vmem:[%s12870_s3 + $0x180] sm:$0xff]   ;;  %v9078_v22 = vld [vmem:[%s12870_s3 + $0x188] sm:$0xff]  }
 0x29f   : > { %2719 = vst [vmem:[#allocation2 + $0x109] sm:$0xff] %v10899_v30  ;;  %2615 = vst [vmem:[#allocation5 + $0xa8] sm:$0xff] %v2583_v0  ;;  %8066 = vmatpush3.bf16.msra.mxu1 %v9076_v52  ;;  %v2460_v53 = vld [vmem:[#allocation4 + $0xd0] sm:$0xff]  ;;  %v9079_v26 = vld [vmem:[%s12870_s3 + $0x1d0] sm:$0xff]  }
 0x2a0   : > { %3829 = vmatmul.mubr.bf16.gmra.mrb[16].mxu0 %v10728_v2  ;;  %v2953_v27 = vld [vmem:[#allocation2 + $0xda] sm:$0xff]  ;;  %2720 = vst [vmem:[#allocation2 + $0x111] sm:$0xff] %v10913_v59  ;;  %vm9183_vm5 = vmpackc.low %vm2539_vm10, %vm2538_vm9  ;;  %v2954_v2 = vld [vmem:[#allocation2 + $0xe2] sm:$0xff]  ;;  %vm2553_vm9 = vcmp.ge.f32.partialorder %v10918_v16, 1.0  ;;  %vm2554_vm10 = vcmp.ge.f32.partialorder %v10953_v19, 1.0 }
 0x2a1   : > { %9184 = vmatprep.mubr.msk.bf16.mxu0 %vm9183_vm5, %v12879_v51  ;;  %2823 = vst [vmem:[#allocation3 + $0x1e0] sm:$0xff] %v10903_v42  ;;  %3027 = vst [vmem:[#allocation3 + $0x1f0] sm:$0xff] %v10905_v36  ;;  %v10941_v50 = vpack.c.bf16 %v2954_v2, %v2953_v27  ;;  %v2585_v63 = vsel %vm2553_vm9, 0.0, %v10918_v16  ;;  %v10951_v58 = vsel %vm2553_vm9, 1.0, %v12881_v11  ;;  %vm12877_vm5 = vcmp.ge.f32.partialorder %v10960_v37, 1.0  ;;  %v2492_v2 = vld [vmem:[#allocation5 + $0xd0] sm:$0xff] }
 0x2a2   : > { %12917 = vst [vmem:[#allocation19_spill] sm:$0xff] %v10935_v45  ;;  %2616 = vst [vmem:[#allocation5 + $0xb0] sm:$0xff] %v2584_v15  ;;  %v2586_v13 = vsel %vm2554_vm10, 0.0, %v10953_v19  ;;  %v10975_v46 = vsel %vm2554_vm10, 1.0, %v12881_v11  ;;  %v2587_v20 = vsel %vm12877_vm5, 0.0, %v10960_v37  ;;  %v10984_v25 = vsel %vm12877_vm5, 1.0, %v12881_v11  ;;  %3990 = vmatmul.mubr.bf16.gmra.mrb[16].mxu1 %v10732_v62 }
 0x2a3   : > { %2721 = vst [vmem:[#allocation2 + $0x121] sm:$0xff] %v10935_v45  ;;  %12918 = vst [vmem:[#allocation20_spill] sm:$0xff] %v10951_v58  ;;  %3997 = vmatprep.mubr.bf16.mxu1 %v10806_v39  ;;  %v2461_v62 = vld [vmem:[#allocation4 + $0xd8] sm:$0xff]  ;;  %v11011_v48 = vadd.f32 %v2492_v2, %v2460_v53  ;;  %v9080_v28 = vld [vmem:[%s12870_s3 + $0x190] sm:$0xff]  }
 0x2a4   : > { %3028 = vst [vmem:[#allocation3 + $0x238] sm:$0xff] %v10941_v50  ;;  %v2955_v47 = vld [vmem:[#allocation2 + $0xf2] sm:$0xff]  ;;  %v2956_v17 = vld [vmem:[#allocation2 + $0xfa] sm:$0xff]  ;;  %2617 = vst [vmem:[#allocation5 + $0xb8] sm:$0xff] %v2585_v63 }
 0x2a5   : > { %2722 = vst [vmem:[#allocation2 + $0x129] sm:$0xff] %v10951_v58  ;;  %v10962_v32 = vpack.c.bf16 %v2956_v17, %v2955_v47  ;;  %12919 = vst [vmem:[#allocation21_spill] sm:$0xff] %v10975_v46  ;;  %v2493_v15 = vld [vmem:[#allocation5 + $0xd8] sm:$0xff]  ;;  %v9082_v17 = vld [vmem:[%s12870_s3 + $0x198] sm:$0xff]  }
 0x2a6   : > { %2618 = vst [vmem:[#allocation5 + $0xc0] sm:$0xff] %v2586_v13  ;;  %12920 = vst [vmem:[#allocation22_spill] sm:$0xff] %v10984_v25  ;;  %v11013_v29 = vadd.f32 %v2493_v15, %v2461_v62  ;;  %v9083_v34 = vld [vmem:[%s12870_s3 + $0x178] sm:$0xff]   ;;  %v2462_v13 = vld [vmem:[#allocation4 + $0xe0] sm:$0xff] }
 0x2a7   : > { %3029 = vst [vmem:[#allocation3 + $0x280] sm:$0xff] %v10962_v32  ;;  %v2957_v7 = vld [vmem:[#allocation2 + $0x10a] sm:$0xff]  ;;  %v2958_v60 = vld [vmem:[#allocation2 + $0x112] sm:$0xff]  ;;  %2723 = vst [vmem:[#allocation2 + $0x139] sm:$0xff] %v10975_v46  ;;  %7967 = vmatprep.subr.bf16.mxu0 %v9083_v34 }
 0x2a8   : > { %3837 = vmatmul.mubr.bf16.gmra.mrb[20].mxu0 %v10762_v14  ;;  %v10988_v43 = vpack.c.bf16 %v2958_v60, %v2957_v7  ;;  %2619 = vst [vmem:[#allocation5 + $0xc8] sm:$0xff] %v2587_v20  ;;  %2724 = vst [vmem:[#allocation2 + $0x141] sm:$0xff] %v10984_v25  ;;  %v9077_v14 = vld [vmem:[%s12870_s3 + $0x1c8] sm:$0xff]   ;;  %v2463_v7 = vld [vmem:[#allocation4 + $0xe8] sm:$0xff] }
 0x2a9   : > { %vm9185_vm5 = vmpackc.low %vm2541_vm13, %vm2540_vm12  ;;  %8067 = vmatprep.subr.bf16.mxu1 %v9077_v14  ;;  %vm2556_vm12 = vcmp.ge.f32.partialorder %v11011_v48, 1.0  ;;  %vm2557_vm13 = vcmp.ge.f32.partialorder %v11013_v29, 1.0  ;;  %v2494_v60 = vld [vmem:[#allocation5 + $0xe0] sm:$0xff]  ;;  %v2495_v20 = vld [vmem:[#allocation5 + $0xe8] sm:$0xff] }
 0x2aa   : > { %9186 = vmatprep.mubr.msk.bf16.mxu0 %vm9185_vm5, %v12879_v51  ;;  %3030 = vst [vmem:[#allocation3 + $0x2c8] sm:$0xff] %v10988_v43  ;;  %8068 = vmatpush3.bf16.msra.mxu1 %v9078_v22  ;;  %vm9187_vm5 = vmpackc.low %vm2543_vm15, %vm2542_vm14  ;;  %v2589_v41 = vsel %vm2557_vm13, 0.0, %v11013_v29  ;;  %v11038_v47 = vsel %vm2556_vm12, 1.0, %v12881_v11  ;;  %v11043_v49 = vsel %vm2557_vm13, 1.0, %v12881_v11  ;;  %v11061_v52 = vadd.f32 %v2494_v60, %v2462_v13  ;;  %v2749_v53 = vld [vmem:[#allocation2 + $0xd8] sm:$0xff]  ;;  %v2750_v62 = vld [vmem:[#allocation2 + $0xe0] sm:$0xff] }
 0x2ab   : > { %8069 = vmatprep.subr.bf16.mxu1 %v9079_v26  ;;  %3998 = vmatmul.mubr.bf16.gmra.mrb[20].mxu1 %v10764_v38  ;;  %12921 = vst [vmem:[#allocation23_spill] sm:$0xff] %v11038_v47  ;;  %12922 = vst [vmem:[#allocation24_spill] sm:$0xff] %v11043_v49  ;;  %v9081_v38 = vld [vmem:[%s12870_s3 + $0x1d8] sm:$0xff]   ;;  %v11063_v14 = vadd.f32 %v2495_v20, %v2463_v7  ;;  %v9086_v2 = vld [vmem:[%s12870_s3 + $0x1a0] sm:$0xff]  }
 0x2ac   : > { %v2959_v55 = vld [vmem:[#allocation2 + $0x122] sm:$0xff]  ;;  %v2960_v0 = vld [vmem:[#allocation2 + $0x12a] sm:$0xff]  ;;  %4005 = vmatprep.mubr.bf16.mxu1 %v10859_v61  ;;  %2621 = vst [vmem:[#allocation5 + $0xd8] sm:$0xff] %v2589_v41  ;;  %2725 = vst [vmem:[#allocation2 + $0x151] sm:$0xff] %v11038_v47  ;;  %vm2558_vm14 = vcmp.ge.f32.partialorder %v11061_v52, 1.0  ;;  %v11114_v41 = vpack.c.bf16 %v2750_v62, %v2749_v53 }
 0x2ad   : > { %v11005_v27 = vpack.c.bf16 %v2960_v0, %v2959_v55  ;;  %2726 = vst [vmem:[#allocation2 + $0x159] sm:$0xff] %v11043_v49  ;;  %v9084_v55 = vld [vmem:[%s12870_s3 + $0x138] sm:$0xff]   ;;  %v9085_v0 = vld [vmem:[%s12870_s3 + $0x1e0] sm:$0xff]   ;;  %vm12878_vm15 = vcmp.ge.f32.partialorder %v11063_v14, 1.0  ;;  %v11095_v9 = vsel %vm2558_vm14, 1.0, %v12881_v11  ;;  %v9087_v15 = vld [vmem:[%s12870_s3 + $0x1e8] sm:$0xff]  }
 0x2ae   : > { %8070 = vmatpush3.bf16.msra.mxu1 %v9080_v28  ;;  %12925 = vst [vmem:[#allocation25_spill] sm:$0xff] %v11095_v9  ;;  %v11100_v21 = vsel %vm12878_vm15, 1.0, %v12881_v11  ;;  %2727 = vst [vmem:[#allocation2 + $0x169] sm:$0xff] %v11095_v9  ;;  %7968 = vmatpush3.bf16.msra.mxu0 %v9084_v55  ;;  %v9088_v26 = vld [vmem:[%s12870_s3 + $0x1a8] sm:$0xff]   ;;  %v9089_v34 = vld [vmem:[%s12870_s3 + $0x1f0] sm:$0xff]  }
 0x2af   : > { %3031 = vst [vmem:[#allocation3 + $0x310] sm:$0xff] %v11005_v27  ;;  %v2961_v10 = vld [vmem:[#allocation2 + $0x13a] sm:$0xff]  ;;  %v2962_v63 = vld [vmem:[#allocation2 + $0x142] sm:$0xff]  ;;  %8071 = vmatprep.subr.bf16.mxu1 %v9081_v38  ;;  %12926 = vst [vmem:[#allocation26_spill] sm:$0xff] %v11100_v21 }
 0x2b0   : > { %3845 = vmatmul.mubr.bf16.gmra.mrb[24].mxu0 %v10806_v39  ;;  %v11021_v18 = vpack.c.bf16 %v2962_v63, %v2961_v10  ;;  %v2588_v39 = vsel %vm2556_vm12, 0.0, %v11011_v48  ;;  %2728 = vst [vmem:[#allocation2 + $0x171] sm:$0xff] %v11100_v21  ;;  %v2464_v10 = vld [vmem:[#allocation4 + $0xf0] sm:$0xff]  ;;  %v2465_v63 = vld [vmem:[#allocation4 + $0xf8] sm:$0xff]  ;;  %v9090_v13 = vld [vmem:[%s12870_s3 + $0x1b0] sm:$0xff]  }
 0x2b1   : > { %9188 = vmatprep.mubr.msk.bf16.mxu0 %vm9187_vm5, %v12879_v51  ;;  %2620 = vst [vmem:[#allocation5 + $0xd0] sm:$0xff] %v2588_v39  ;;  %vm11079_vm5 = vmpackc.low %vm2545_vm2, %vm2544_vm1  ;;  %v2496_v39 = vld [vmem:[#allocation5 + $0xf0] sm:$0xff]  ;;  %v2497_v28 = vld [vmem:[#allocation5 + $0xf8] sm:$0xff] }
 0x2b2   : > { %3032 = vst [vmem:[#allocation3 + $0x358] sm:$0xff] %v11021_v18  ;;  %8072 = vmatpush3.bf16.msra.mxu1 %v9082_v17  ;;  %v11116_v38 = vadd.f32 %v2496_v39, %v2464_v10  ;;  %v11118_v17 = vadd.f32 %v2497_v28, %v2465_v63  ;;  %vm11133_vm2 = vmpackc.low %vm2547_vm4, %vm2546_vm3  ;;  %v2751_v35 = vld [vmem:[#allocation2 + $0xf0] sm:$0xff]  ;;  %v9091_v20 = vld [vmem:[%s12870_s3 + $0x1f8] sm:$0xff]  }
 0x2b3   : > { %4006 = vmatmul.mubr.bf16.gmra.mrb[24].mxu1 %v10808_v31  ;;  %v2591_v31 = vsel %vm12878_vm15, 0.0, %v11063_v14  ;;  %8073 = vmatprep.subr.bf16.mxu1 %v9085_v0  ;;  %v2752_v55 = vld [vmem:[#allocation2 + $0xf8] sm:$0xff]  ;;  %vm11180_vm3 = vmpackc.low %vm2549_vm7, %vm2548_vm6  ;;  %v2753_v62 = vld [vmem:[#allocation2 + $0x108] sm:$0xff]  ;;  %vm12937_vm7 = vcmp.ge.f32.partialorder %v10960_v37, 1.0 }
 0x2b4   : > { %4013 = vmatprep.mubr.bf16.mxu1 %v10903_v42  ;;  %2623 = vst [vmem:[#allocation5 + $0xe8] sm:$0xff] %v2591_v31  ;;  %vm2560_vm1 = vcmp.ge.f32.partialorder %v11116_v38, 1.0  ;;  %vm2561_vm15 = vcmp.ge.f32.partialorder %v11118_v17, 1.0  ;;  %v9092_v0 = vld [vmem:[%s12870_s3 + $0x1b8] sm:$0xff]   ;;  %v11171_v31 = vpack.c.bf16 %v2752_v55, %v2751_v35  ;;  %vm11196_vm4 = vmpackc.low %vm2551_vm11, %vm2550_vm8  ;;  %v2755_v12 = vld [vmem:[#allocation2 + $0x120] sm:$0xff] }
 0x2b5   : > { %v11147_v57 = vsel %vm2560_vm1, 1.0, %v12881_v11  ;;  %v11156_v60 = vsel %vm2561_vm15, 1.0, %v12881_v11  ;;  %vm11212_vm6 = vmpackc.low %vm2553_vm9, %vm2552_vm0  ;;  %v2757_v56 = vld [vmem:[#allocation2 + $0x138] sm:$0xff]  ;;  %v2758_v63 = vld [vmem:[#allocation2 + $0x140] sm:$0xff]  ;;  %vm12942_vm0 = vcmp.ge.f32.partialorder %v11063_v14, 1.0 }
 0x2b6   : > { %8074 = vmatpush3.bf16.msra.mxu1 %v9086_v2  ;;  %12929 = vst [vmem:[#allocation27_spill] sm:$0xff] %v11147_v57  ;;  %12930 = vst [vmem:[#allocation28_spill] sm:$0xff] %v11156_v60  ;;  %v2754_v2 = vld [vmem:[#allocation2 + $0x110] sm:$0xff]  ;;  %v11220_v39 = vpack.c.bf16 %v2758_v63, %v2757_v56  ;;  %v2760_v28 = vld [vmem:[#allocation2 + $0x158] sm:$0xff] }
 0x2b7   : > { %8075 = vmatprep.subr.bf16.mxu1 %v9087_v15  ;;  %2729 = vst [vmem:[#allocation2 + $0x181] sm:$0xff] %v11147_v57  ;;  %2730 = vst [vmem:[#allocation2 + $0x189] sm:$0xff] %v11156_v60  ;;  %v11188_v15 = vpack.c.bf16 %v2754_v2, %v2753_v62  ;;  %v2759_v16 = vld [vmem:[#allocation2 + $0x150] sm:$0xff]  ;;  %v2761_v37 = vld [vmem:[#allocation2 + $0x168] sm:$0xff] }
 0x2b8   : > { %3853 = vmatmul.mubr.bf16.gmra.mrb[28].mxu0 %v10859_v61  ;;  %v2590_v61 = vsel %vm2558_vm14, 0.0, %v11061_v52  ;;  %vm11228_vm8 = vmpackc.low %vm12937_vm7, %vm2554_vm10  ;;  %v2963_v35 = vld [vmem:[#allocation2 + $0x152] sm:$0xff]  ;;  %v2964_v48 = vld [vmem:[#allocation2 + $0x15a] sm:$0xff] }
 0x2b9   : > { %9190 = vmatprep.mubr.msk.bf16.mxu0 %vm11079_vm5, %v12879_v51  ;;  %2622 = vst [vmem:[#allocation5 + $0xe0] sm:$0xff] %v2590_v61  ;;  %v11169_v61 = vld [vmem:[%s12870_s3 + $0x200] sm:$0xff]   ;;  %vm11244_vm11 = vmpackc.low %vm2557_vm13, %vm2556_vm12  ;;  %v3042_v55 = vld [vmem:[#allocation3 + $0x28] sm:$0xff] }
 0x2ba   : > { %8076 = vmatpush3.bf16.msra.mxu1 %v9088_v26  ;;  %8738 = vmatprep.subr.bf16.mxu0 %v11169_v61  ;;  %v2756_v26 = vld [vmem:[#allocation2 + $0x128] sm:$0xff]  ;;  %vm11260_vm9 = vmpackc.low %vm12942_vm0, %vm2558_vm14  ;;  %v2966_v14 = vld [vmem:[#allocation2 + $0x172] sm:$0xff] }
 0x2bb   : > { %4014 = vmatmul.mubr.bf16.gmra.mrb[28].mxu1 %v10861_v24  ;;  %v2593_v24 = vsel %vm2561_vm15, 0.0, %v11118_v17  ;;  %8077 = vmatprep.subr.bf16.mxu1 %v9089_v34  ;;  %v11204_v10 = vpack.c.bf16 %v2756_v26, %v2755_v12  ;;  %v11236_v34 = vpack.c.bf16 %v2760_v28, %v2759_v16  ;;  %v2965_v52 = vld [vmem:[#allocation2 + $0x16a] sm:$0xff]  ;;  %v3051_v56 = vld [vmem:[#allocation3 + $0x70] sm:$0xff]  ;;  %vm11406_vm10 = vmpackc.low %vm2561_vm15, %vm2560_vm1 }
 0x2bc   : > { %4021 = vmatprep.mubr.bf16.mxu1 %v11114_v41  ;;  %2625 = vst [vmem:[#allocation5 + $0xf8] sm:$0xff] %v2593_v24  ;;  %v3041_v2 = vld [vmem:[#allocation3 + $0x20] sm:$0xff]  ;;  %v11275_v12 = vpack.c.bf16 %v2966_v14, %v2965_v52  ;;  %v3044_v26 = vld [vmem:[#allocation3 + $0x38] sm:$0xff]  ;;  %v2867_v16 = vld [vmem:[#allocation2 + $0x199] sm:$0xff] }
 0x2bd   : > { %v9094_v63 = vld [vmem:[%s12870_s3 + $0x208] sm:$0xff]   ;;  %v3053_v52 = vld [vmem:[#allocation3 + $0x80] sm:$0xff] }
 0x2be   : > { %8078 = vmatpush3.bf16.msra.mxu1 %v9090_v13  ;;  %v2762_v13 = vld [vmem:[#allocation2 + $0x170] sm:$0xff]  ;;  %v2763_v24 = vld [vmem:[#allocation2 + $0x180] sm:$0xff]  ;;  %v3060_v14 = vld [vmem:[#allocation3 + $0xb8] sm:$0xff] }
 0x2bf   : > { %8079 = vmatprep.subr.bf16.mxu1 %v9091_v20  ;;  %v2764_v20 = vld [vmem:[#allocation2 + $0x188] sm:$0xff] }
 0x2c0   : > { %3861 = vmatmul.mubr.bf16.gmra.mrb[32].mxu0 %v10903_v42  ;;  %v2592_v42 = vsel %vm2560_vm1, 0.0, %v11116_v38  ;;  %v11270_v62 = vpack.c.bf16 %v2764_v20, %v2763_v24  ;;  %v2868_v28 = vld [vmem:[#allocation2 + $0x1a1] sm:$0xff]  ;;  %v9095_v24 = vld [vmem:[%s12870_s3 + $0x210] sm:$0xff]   ;;  %v3050_v20 = vld [vmem:[#allocation3 + $0x68] sm:$0xff] }
 0x2c1   : > { %9192 = vmatprep.mubr.msk.bf16.mxu0 %vm11133_vm2, %v12879_v51  ;;  %2624 = vst [vmem:[#allocation5 + $0xf0] sm:$0xff] %v2592_v42  ;;  %v11252_v42 = vpack.c.bf16 %v2762_v13, %v2761_v37  ;;  %v11280_v37 = vpack.c.bf16 %v2868_v28, %v2867_v16  ;;  %v2765_v13 = vld [vmem:[#allocation2 + $0x198] sm:$0xff]  ;;  %v3069_v16 = vld [vmem:[#allocation3 + $0x100] sm:$0xff]  ;;  %v9098_v28 = vld [vmem:[%s12870_s3 + $0x228] sm:$0xff]  }
 0x2c2   : > { %8080 = vmatpush3.bf16.msra.mxu1 %v9092_v0  ;;  %v11268_v0 = vpack.c.bf16 %v2964_v48, %v2963_v35  ;;  %v2766_v35 = vld [vmem:[#allocation2 + $0x1a0] sm:$0xff] }
 0x2c3   : > { %4022 = vmatmul.mubr.bf16.gmra.mrb[32].mxu1 %v10905_v36  ;;  %v11282_v48 = vpack.c.bf16 %v2766_v35, %v2765_v13  ;;  %4996 = vst [vmem:[#allocation3 + $0x470] sm:$0xff] %v11280_v37  ;;  %v9099_v13 = vld [vmem:[%s12870_s3 + $0x230] sm:$0xff]   ;;  %v3068_v35 = vld [vmem:[#allocation3 + $0xf8] sm:$0xff] }
 0x2c4   : > { %4029 = vmatprep.mubr.bf16.mxu1 %v11171_v31 }
 0x2c5   : > { %4894 = vst [vmem:[#allocation3 + $0x468] sm:$0xff] %v11282_v48 }
 0x2c8   : > { %3869 = vmatmul.mubr.bf16.gmra.mrb[36].mxu0 %v11114_v41 }
 0x2c9   : > { %9194 = vmatprep.mubr.msk.bf16.mxu0 %vm11180_vm3, %v12879_v51 }
 0x2cb   : > { %4030 = vmatmul.mubr.bf16.gmra.mrb[36].mxu1 %v10941_v50 }
 0x2cc   : > { %4037 = vmatprep.mubr.bf16.mxu1 %v11188_v15 }
 0x2d0   : > { %3877 = vmatmul.mubr.bf16.gmra.mrb[40].mxu0 %v11171_v31 }
 0x2d1   : > { %9196 = vmatprep.mubr.msk.bf16.mxu0 %vm11196_vm4, %v12879_v51 }
 0x2d3   : > { %4038 = vmatmul.mubr.bf16.gmra.mrb[40].mxu1 %v10962_v32 }
 0x2d4   : > { %4045 = vmatprep.mubr.bf16.mxu1 %v11204_v10 }
 0x2d8   : > { %3885 = vmatmul.mubr.bf16.gmra.mrb[44].mxu0 %v11188_v15 }
 0x2d9   : > { %9198 = vmatprep.mubr.msk.bf16.mxu0 %vm11212_vm6, %v12879_v51 }
 0x2db   : > { %4046 = vmatmul.mubr.bf16.gmra.mrb[44].mxu1 %v10988_v43 }
 0x2dc   : > { %4053 = vmatprep.mubr.bf16.mxu1 %v11220_v39 }
 0x2e0   : > { %3893 = vmatmul.mubr.bf16.gmra.mrb[48].mxu0 %v11204_v10 }
 0x2e1   : > { %9200 = vmatprep.mubr.msk.bf16.mxu0 %vm11228_vm8, %v12879_v51 }
 0x2e3   : > { %4054 = vmatmul.mubr.bf16.gmra.mrb[48].mxu1 %v11005_v27 }
 0x2e4   : > { %4061 = vmatprep.mubr.bf16.mxu1 %v11236_v34 }
 0x2e8   : > { %3901 = vmatmul.mubr.bf16.gmra.mrb[52].mxu0 %v11220_v39 }
 0x2e9   : > { %9202 = vmatprep.mubr.msk.bf16.mxu0 %vm11244_vm11, %v12879_v51 }
 0x2eb   : > { %4062 = vmatmul.mubr.bf16.gmra.mrb[52].mxu1 %v11021_v18 }
 0x2ec   : > { %4069 = vmatprep.mubr.bf16.mxu1 %v11252_v42 }
 0x2f0   : > { %3909 = vmatmul.mubr.bf16.gmra.mrb[56].mxu0 %v11236_v34 }
 0x2f1   : > { %9204 = vmatprep.mubr.msk.bf16.mxu0 %vm11260_vm9, %v12879_v51 }
 0x2f3   : > { %4070 = vmatmul.mubr.bf16.gmra.mrb[56].mxu1 %v11268_v0 }
 0x2f4   : > { %4077 = vmatprep.mubr.bf16.mxu1 %v11270_v62 }
 0x2f8   : > { %3917 = vmatmul.mubr.bf16.gmra.mrb[60].mxu0 %v11252_v42 }
 0x2f9   : > { %4118 = vmatprep.mubr.bf16.mxu0 %v3042_v55  ;;  %v3043_v55 = vld [vmem:[#allocation3 + $0x30] sm:$0xff] }
 0x2fb   : > { %4078 = vmatmul.mubr.bf16.gmra.mrb[60].mxu1 %v11275_v12 }
 0x2fc   : > { %4279 = vmatprep.mubr.bf16.mxu1 %v3044_v26  ;;  %v3059_v26 = vld [vmem:[#allocation3 + $0xb0] sm:$0xff] }
 0x300   : > { %4119 = vmatmul.mubr.bf16.vlgmr.msra.gmra.mrb[64].mxu0 %v3041_v2  ;;  %v9096_v2 = vld [vmem:[%s12870_s3 + $0x218] sm:$0xff]  }
 0x301   : > { %8739 = vmatpush3.bf16.msra.mxu0 %v11169_v61  ;;  %4126 = vmatprep.mubr.bf16.mxu0 %v3051_v56  ;;  %v9097_v61 = vld [vmem:[%s12870_s3 + $0x220] sm:$0xff]   ;;  %v3052_v56 = vld [vmem:[#allocation3 + $0x78] sm:$0xff] }
 0x302   : > { %8740 = vmatprep.subr.bf16.mxu0 %v9094_v63 }
 0x303   : > { %4280 = vmatmul.mubr.bf16.vlgmr.msra.gmra.mrb[64].mxu1 %v3043_v55  ;;  %v3071_v55 = vld [vmem:[#allocation3 + $0x110] sm:$0xff] }
 0x304   : > { %4287 = vmatprep.mubr.bf16.mxu1 %v3053_v52  ;;  %v9100_v52 = vld [vmem:[%s12870_s3 + $0x238] sm:$0xff]  }
 0x305   : > { %8741 = vmatpush3.bf16.msra.mxu0 %v9094_v63  ;;  %v3062_v63 = vld [vmem:[#allocation3 + $0xc8] sm:$0xff] }
 0x306   : > { %8742 = vmatprep.subr.bf16.mxu0 %v9095_v24 }
 0x308   : > { %4127 = vmatmul.mubr.bf16.gmra.mrb[68].mxu0 %v3050_v20  ;;  %v3078_v20 = vld [vmem:[#allocation3 + $0x148] sm:$0xff] }
 0x309   : > { %4134 = vmatprep.mubr.bf16.mxu0 %v3060_v14  ;;  %8743 = vmatpush3.bf16.msra.mxu0 %v9095_v24  ;;  %v3061_v24 = vld [vmem:[#allocation3 + $0xc0] sm:$0xff] }
 0x30a   : > { %8744 = vmatprep.subr.bf16.mxu0 %v9096_v2  ;;  %v3077_v14 = vld [vmem:[#allocation3 + $0x140] sm:$0xff] }
 0x30b   : > { %4288 = vmatmul.mubr.bf16.gmra.mrb[68].mxu1 %v3052_v56  ;;  %v3086_v56 = vld [vmem:[#allocation3 + $0x188] sm:$0xff] }
 0x30c   : > { %4295 = vmatprep.mubr.bf16.mxu1 %v3062_v63  ;;  %v3089_v63 = vld [vmem:[#allocation3 + $0x1a0] sm:$0xff] }
 0x30d   : > { %8745 = vmatpush3.bf16.msra.mxu0 %v9096_v2  ;;  %v3070_v2 = vld [vmem:[#allocation3 + $0x108] sm:$0xff] }
 0x30e   : > { %8746 = vmatprep.subr.bf16.mxu0 %v9097_v61 }
 0x310   : > { %4135 = vmatmul.mubr.bf16.gmra.mrb[72].mxu0 %v3059_v26  ;;  %v3080_v26 = vld [vmem:[#allocation3 + $0x158] sm:$0xff] }
 0x311   : > { %4142 = vmatprep.mubr.bf16.mxu0 %v3069_v16  ;;  %8747 = vmatpush3.bf16.msra.mxu0 %v9097_v61  ;;  %v3087_v61 = vld [vmem:[#allocation3 + $0x190] sm:$0xff] }
 0x312   : > { %8748 = vmatprep.subr.bf16.mxu0 %v9098_v28  ;;  %v3079_v16 = vld [vmem:[#allocation3 + $0x150] sm:$0xff] }
 0x313   : > { %4296 = vmatmul.mubr.bf16.gmra.mrb[72].mxu1 %v3061_v24  ;;  %v3097_v24 = vld [vmem:[#allocation3 + $0x1e0] sm:$0xff] }
 0x314   : > { %4303 = vmatprep.mubr.bf16.mxu1 %v3071_v55  ;;  %v2970_v55 = vld [vmem:[#allocation2 + $0x1a2] sm:$0xff] }
 0x315   : > { %8749 = vmatpush3.bf16.msra.mxu0 %v9098_v28  ;;  %v9173_v28 = vld [vmem:[#allocation3 + $0x1a8] sm:$0xff] }
 0x316   : > { %8750 = vmatprep.subr.bf16.mxu0 %v9099_v13 }
 0x318   : > { %4143 = vmatmul.mubr.bf16.gmra.mrb[76].mxu0 %v3068_v35  ;;  %v3095_v35 = vld [vmem:[#allocation3 + $0x1d0] sm:$0xff] }
 0x319   : > { %4150 = vmatprep.mubr.bf16.mxu0 %v3078_v20  ;;  %8751 = vmatpush3.bf16.msra.mxu0 %v9099_v13  ;;  %v3088_v13 = vld [vmem:[#allocation3 + $0x198] sm:$0xff]  ;;  %v2969_v20 = vld [vmem:[#allocation2 + $0x19a] sm:$0xff] }
 0x31a   : > { %8752 = vmatprep.subr.bf16.mxu0 %v9100_v52 }
 0x31b   : > { %4304 = vmatmul.mubr.bf16.gmra.mrb[76].mxu1 %v3070_v2 }
 0x31c   : > { %4311 = vmatprep.mubr.bf16.mxu1 %v3080_v26 }
 0x31d   : > { %8753 = vmatpush3.bf16.msra.mxu0 %v9100_v52  ;;  %v11317_v52 = vpack.c.bf16 %v2970_v55, %v2969_v20 }
 0x31f   : > { %5098 = vst [vmem:[#allocation3 + $0x478] sm:$0xff] %v11317_v52 }
 0x320   : > { %4151 = vmatmul.mubr.bf16.gmra.mrb[80].mxu0 %v3077_v14 }
 0x321   : > { %4158 = vmatprep.mubr.bf16.mxu0 %v3087_v61 }
 0x323   : > { %4312 = vmatmul.mubr.bf16.gmra.mrb[80].mxu1 %v3079_v16 }
 0x324   : > { %4319 = vmatprep.mubr.bf16.mxu1 %v3089_v63 }
 0x328   : > { %4159 = vmatmul.mubr.bf16.gmra.mrb[84].mxu0 %v3086_v56 }
 0x329   : > { %4166 = vmatprep.mubr.bf16.mxu0 %v9173_v28 }
 0x32b   : > { %4320 = vmatmul.mubr.bf16.gmra.mrb[84].mxu1 %v3088_v13 }
 0x32c   : > { %9206 = vmatprep.mubr.msk.bf16.mxu1 %vm11079_vm5, %v12879_v51 }
 0x330   : > { %4167 = vmatmul.mubr.bf16.gmra.mrb[88].mxu0 %v3095_v35 }
 0x331   : > { %4174 = vmatprep.mubr.bf16.mxu0 %v10905_v36 }
 0x333   : > { %4328 = vmatmul.mubr.bf16.gmra.mrb[88].mxu1 %v3097_v24 }
 0x334   : > { %9210 = vmatprep.mubr.msk.bf16.mxu1 %vm11133_vm2, %v12879_v51 }
 0x338   : > { %9208 = vmatmul.mubr.msk.bf16.gmra.mrb[92].mxu0 %vm11079_vm5, %v12879_v51 }
 0x339   : > { %4182 = vmatprep.mubr.bf16.mxu0 %v10941_v50 }
 0x33b   : > { %4336 = vmatmul.mubr.bf16.gmra.mrb[92].mxu1 %v11114_v41 }
 0x33c   : > { %9214 = vmatprep.mubr.msk.bf16.mxu1 %vm11180_vm3, %v12879_v51 }
 0x340   : > { %9212 = vmatmul.mubr.msk.bf16.gmra.mrb[96].mxu0 %vm11133_vm2, %v12879_v51 }
 0x341   : > { %4190 = vmatprep.mubr.bf16.mxu0 %v10962_v32 }
 0x343   : > { %4344 = vmatmul.mubr.bf16.gmra.mrb[96].mxu1 %v11171_v31 }
 0x344   : > { %9218 = vmatprep.mubr.msk.bf16.mxu1 %vm11196_vm4, %v12879_v51 }
 0x348   : > { %9216 = vmatmul.mubr.msk.bf16.gmra.mrb[100].mxu0 %vm11180_vm3, %v12879_v51 }
 0x349   : > { %4198 = vmatprep.mubr.bf16.mxu0 %v10988_v43  ;;  %v11351_v43 = vld [vmem:[%s12871_s4] ss:$0 sm:$0xff] }
 0x34b   : > { %4352 = vmatmul.mubr.bf16.gmra.mrb[100].mxu1 %v11188_v15 }
 0x34c   : > { %9222 = vmatprep.mubr.msk.bf16.mxu1 %vm11212_vm6, %v12879_v51 }
 0x350   : > { %9220 = vmatmul.mubr.msk.bf16.gmra.mrb[104].mxu0 %vm11196_vm4, %v12879_v51 }
 0x351   : > { %4206 = vmatprep.mubr.bf16.mxu0 %v11005_v27 }
 0x353   : > { %v7745_v36 = vpop.f32.mrb[0].mxu0  ;;  %4360 = vmatmul.mubr.bf16.gmra.mrb[104].mxu1 %v11204_v10 }
 0x354   : > { %v7746_v50 = vpop.f32.mrb[1].mxu0  ;;  %9226 = vmatprep.mubr.msk.bf16.mxu1 %vm11228_vm8, %v12879_v51 }
 0x355   : > { %v7747_v22 = vadd.f32 %v7746_v50, %v7745_v36  ;;  %v7748_v32 = vpop.f32.mrb[2].mxu0  ;;  %v7857_v53 = vpop.f32.mrb[0].mxu1 }
 0x356   : > { %v7749_v41 = vpop.f32.mrb[3].mxu0  ;;  %v7858_v40 = vpop.f32.mrb[1].mxu1 }
 0x357   : > { %v7750_v7 = vadd.f32 %v7749_v41, %v7748_v32  ;;  %v3799_v31 = vadd.f32 %v7747_v22, %v11351_v43  ;;  %v7859_v2 = vadd.f32 %v7858_v40, %v7857_v53  ;;  %v7860_v61 = vpop.f32.mrb[2].mxu1  ;;  %v2967_v53 = vld [vmem:[#allocation2 + $0x182] sm:$0xff] }
 0x358   : > { %9224 = vmatmul.mubr.msk.bf16.gmra.mrb[108].mxu0 %vm11212_vm6, %v12879_v51  ;;  %v7861_v56 = vpop.f32.mrb[3].mxu1 }
 0x359   : > { %4214 = vmatprep.mubr.bf16.mxu0 %v11021_v18  ;;  %v3802_v10 = vadd.f32 %v7750_v7, %v11351_v43  ;;  %v7862_v18 = vadd.f32 %v7861_v56, %v7860_v61  ;;  %v11362_v63 = vadd.f32 %v7859_v2, %v3799_v31 }
 0x35b   : > { %v7751_v27 = vpop.f32.mrb[4].mxu0  ;;  %4368 = vmatmul.mubr.bf16.gmra.mrb[108].mxu1 %v11220_v39  ;;  %v11369_v28 = vadd.f32 %v7862_v18, %v3802_v10 }
 0x35c   : > { %v7752_v15 = vpop.f32.mrb[5].mxu0  ;;  %9230 = vmatprep.mubr.msk.bf16.mxu1 %vm11244_vm11, %v12879_v51 }
 0x35d   : > { %v7753_v54 = vadd.f32 %v7752_v15, %v7751_v27  ;;  %v7754_v14 = vpop.f32.mrb[6].mxu0  ;;  %v7863_v24 = vpop.f32.mrb[4].mxu1  ;;  %v2968_v15 = vld [vmem:[#allocation2 + $0x18a] sm:$0xff] }
 0x35e   : > { %v7755_v26 = vpop.f32.mrb[7].mxu0  ;;  %v7864_v55 = vpop.f32.mrb[5].mxu1  ;;  %v11386_v56 = vpack.c.bf16 %v2968_v15, %v2967_v53 }
 0x35f   : > { %v7756_v16 = vadd.f32 %v7755_v26, %v7754_v14  ;;  %v3807_v13 = vadd.f32 %v7753_v54, %v11351_v43  ;;  %v7865_v22 = vadd.f32 %v7864_v55, %v7863_v24  ;;  %v7866_v39 = vpop.f32.mrb[6].mxu1 }
 0x360   : > { %9228 = vmatmul.mubr.msk.bf16.gmra.mrb[112].mxu0 %vm11228_vm8, %v12879_v51  ;;  %v7867_v41 = vpop.f32.mrb[7].mxu1 }
 0x361   : > { %4222 = vmatprep.mubr.bf16.mxu0 %v11268_v0  ;;  %v3810_v50 = vadd.f32 %v7756_v16, %v11351_v43  ;;  %v7868_v27 = vadd.f32 %v7867_v41, %v7866_v39  ;;  %v11376_v31 = vadd.f32 %v7865_v22, %v3807_v13 }
 0x363   : > { %v7757_v35 = vpop.f32.mrb[8].mxu0  ;;  %4376 = vmatmul.mubr.bf16.gmra.mrb[112].mxu1 %v11236_v34  ;;  %v11383_v40 = vadd.f32 %v7868_v27, %v3810_v50 }
 0x364   : > { %v7758_v20 = vpop.f32.mrb[9].mxu0  ;;  %9234 = vmatprep.mubr.msk.bf16.mxu1 %vm11260_vm9, %v12879_v51 }
 0x365   : > { %v7759_v33 = vadd.f32 %v7758_v20, %v7757_v35  ;;  %v7760_v36 = vpop.f32.mrb[10].mxu0  ;;  %v7869_v10 = vpop.f32.mrb[8].mxu1 }
 0x366   : > { %v7761_v32 = vpop.f32.mrb[11].mxu0  ;;  %v7870_v2 = vpop.f32.mrb[9].mxu1 }
 0x367   : > { %v7762_v7 = vadd.f32 %v7761_v32, %v7760_v36  ;;  %v3815_v14 = vadd.f32 %v7759_v33, %v11351_v43  ;;  %v7871_v16 = vadd.f32 %v7870_v2, %v7869_v10  ;;  %v7872_v18 = vpop.f32.mrb[10].mxu1  ;;  %v9101_v33 = vld [vmem:[%s12872_s5 + $0x40] sm:$0xff]  }
 0x368   : > { %9232 = vmatmul.mubr.msk.bf16.gmra.mrb[116].mxu0 %vm11244_vm11, %v12879_v51  ;;  %v7873_v13 = vpop.f32.mrb[11].mxu1  ;;  %v9102_v36 = vld [vmem:[%s12872_s5] sm:$0xff]   ;;  %8201 = vmatprep.subr.bf16.mxu1 %v9101_v33 }
 0x369   : > { %4230 = vmatprep.mubr.bf16.mxu0 %v11275_v12  ;;  %v3818_v34 = vadd.f32 %v7762_v7, %v11351_v43  ;;  %v7874_v20 = vadd.f32 %v7873_v13, %v7872_v18  ;;  %v11392_v55 = vadd.f32 %v7871_v16, %v3815_v14  ;;  %8202 = vmatpush3.bf16.msra.mxu1 %v9102_v36 }
 0x36b   : > { %v7763_v54 = vpop.f32.mrb[12].mxu0  ;;  %4384 = vmatmul.mubr.bf16.gmra.mrb[116].mxu1 %v11252_v42  ;;  %v11413_v50 = vadd.f32 %v7874_v20, %v3818_v34  ;;  %v3054_v20 = vld [vmem:[#allocation3 + $0x88] sm:$0xff] }
 0x36c   : > { %v7764_v19 = vpop.f32.mrb[13].mxu0  ;;  %9238 = vmatprep.mubr.msk.bf16.mxu1 %vm11406_vm10, %v12879_v51 }
 0x36d   : > { %v7765_v61 = vadd.f32 %v7764_v19, %v7763_v54  ;;  %v7766_v26 = vpop.f32.mrb[14].mxu0  ;;  %v7875_v39 = vpop.f32.mrb[12].mxu1  ;;  %v3045_v54 = vld [vmem:[#allocation3 + $0x40] sm:$0xff] }
 0x36e   : > { %v7767_v35 = vpop.f32.mrb[15].mxu0  ;;  %v7876_v38 = vpop.f32.mrb[13].mxu1 }
 0x36f   : > { %v7768_v24 = vadd.f32 %v7767_v35, %v7766_v26  ;;  %v3823_v42 = vadd.f32 %v7765_v61, %v11351_v43  ;;  %v7877_v27 = vadd.f32 %v7876_v38, %v7875_v39  ;;  %v7878_v53 = vpop.f32.mrb[14].mxu1  ;;  %v9103_v38 = vld [vmem:[%s12872_s5 + $0x48] sm:$0xff]  }
 0x370   : > { %9236 = vmatmul.mubr.msk.bf16.gmra.mrb[120].mxu0 %vm11260_vm9, %v12879_v51  ;;  %v7879_v14 = vpop.f32.mrb[15].mxu1  ;;  %8203 = vmatprep.subr.bf16.mxu1 %v9103_v38  ;;  %v3090_v38 = vld [vmem:[#allocation3 + $0x1a8] sm:$0xff] }
 0x371   : > { %4238 = vmatprep.mubr.bf16.mxu0 %v11386_v56  ;;  %v3826_v7 = vadd.f32 %v7768_v24, %v11351_v43  ;;  %v7880_v19 = vadd.f32 %v7879_v14, %v7878_v53  ;;  %v11420_v2 = vadd.f32 %v7877_v27, %v3823_v42 }
 0x373   : > { %v7769_v22 = vpop.f32.mrb[16].mxu0  ;;  %4392 = vmatmul.mubr.bf16.gmra.mrb[120].mxu1 %v11270_v62  ;;  %v11424_v61 = vadd.f32 %v7880_v19, %v3826_v7  ;;  %v3063_v62 = vld [vmem:[#allocation3 + $0xd0] sm:$0xff]  ;;  %v3072_v19 = vld [vmem:[#allocation3 + $0x118] sm:$0xff] }
 0x374   : > { %v7770_v32 = vpop.f32.mrb[17].mxu0  ;;  %4399 = vmatprep.mubr.bf16.mxu1 %v11280_v37 }
 0x375   : > { %v7771_v41 = vadd.f32 %v7770_v32, %v7769_v22  ;;  %v7772_v17 = vpop.f32.mrb[18].mxu0  ;;  %v7881_v16 = vpop.f32.mrb[16].mxu1 }
 0x376   : > { %v7773_v15 = vpop.f32.mrb[19].mxu0  ;;  %v7882_v35 = vpop.f32.mrb[17].mxu1 }
 0x377   : > { %v7774_v10 = vadd.f32 %v7773_v15, %v7772_v17  ;;  %v3831_v34 = vadd.f32 %v7771_v41, %v11351_v43  ;;  %v7883_v36 = vadd.f32 %v7882_v35, %v7881_v16  ;;  %v7884_v29 = vpop.f32.mrb[18].mxu1  ;;  %v9104_v41 = vld [vmem:[%s12872_s5 + $0x8] sm:$0xff]  }
 0x378   : > { %9240 = vmatmul.mubr.msk.bf16.gmra.mrb[124].mxu0 %vm11406_vm10, %v12879_v51  ;;  %v7885_v42 = vpop.f32.mrb[19].mxu1  ;;  %8204 = vmatpush3.bf16.msra.mxu1 %v9104_v41 }
 0x379   : > { %8754 = vmatprep.mubr.bf16.mxu0 %v3045_v54  ;;  %v3834_v33 = vadd.f32 %v7774_v10, %v11351_v43  ;;  %v7886_v37 = vadd.f32 %v7885_v42, %v7884_v29  ;;  %v11428_v32 = vadd.f32 %v7883_v36, %v3831_v34 }
 0x37b   : > { %v7775_v26 = vpop.f32.mrb[20].mxu0  ;;  %4400 = vmatmul.mubr.bf16.gmra.mrb[124].mxu1 %v11282_v48  ;;  %v11437_v17 = vadd.f32 %v7886_v37, %v3834_v33  ;;  %v3081_v48 = vld [vmem:[#allocation3 + $0x160] sm:$0xff] }
 0x37c   : > { %v7776_v18 = vpop.f32.mrb[21].mxu0 }
 0x37d   : > { %v7777_v13 = vadd.f32 %v7776_v18, %v7775_v26  ;;  %v7778_v24 = vpop.f32.mrb[22].mxu0 }
 0x37e   : > { %v7779_v22 = vpop.f32.mrb[23].mxu0  ;;  %v7887_v53 = vpop.f32.mrb[20].mxu1 }
 0x37f   : > { %v7780_v39 = vadd.f32 %v7779_v22, %v7778_v24  ;;  %v3839_v27 = vadd.f32 %v7777_v13, %v11351_v43  ;;  %v7888_v54 = vpop.f32.mrb[21].mxu1 }
 0x380   : > { %8755 = vmatmul.mubr.bf16.vlgmr.msra.gmra.mrb[128].mxu0 %v3054_v20  ;;  %v7889_v34 = vadd.f32 %v7888_v54, %v7887_v53  ;;  %v7890_v16 = vpop.f32.mrb[22].mxu1  ;;  %v3099_v54 = vld [vmem:[#allocation3 + $0x1f0] sm:$0xff] }
 0x381   : > { %8758 = vmatprep.mubr.bf16.mxu0 %v3063_v62  ;;  %v3842_v26 = vadd.f32 %v7780_v39, %v11351_v43  ;;  %v7891_v35 = vpop.f32.mrb[23].mxu1 }
 0x382   : > { %v7892_v20 = vadd.f32 %v7891_v35, %v7890_v16  ;;  %v11441_v33 = vadd.f32 %v7889_v34, %v3839_v27  ;;  %v9106_v34 = vld [vmem:[%s12872_s5 + $0x10] sm:$0xff]  }
 0x383   : > { %v7781_v7 = vpop.f32.mrb[24].mxu0 }
 0x384   : > { %v7782_v15 = vpop.f32.mrb[25].mxu0  ;;  %v11443_v13 = vadd.f32 %v7892_v20, %v3842_v26 }
 0x385   : > { %v7783_v14 = vadd.f32 %v7782_v15, %v7781_v7  ;;  %v7784_v10 = vpop.f32.mrb[26].mxu0 }
 0x386   : > { %v7785_v18 = vpop.f32.mrb[27].mxu0  ;;  %v7893_v22 = vpop.f32.mrb[24].mxu1 }
 0x387   : > { %v7786_v24 = vadd.f32 %v7785_v18, %v7784_v10  ;;  %v3847_v29 = vadd.f32 %v7783_v14, %v11351_v43  ;;  %v7894_v42 = vpop.f32.mrb[25].mxu1  ;;  %v9105_v14 = vld [vmem:[%s12872_s5 + $0x50] sm:$0xff]  }
 0x388   : > { %8759 = vmatmul.mubr.bf16.gmra.mrb[132].mxu0 %v3072_v19  ;;  %v7895_v7 = vadd.f32 %v7894_v42, %v7893_v22  ;;  %v7896_v53 = vpop.f32.mrb[26].mxu1  ;;  %8205 = vmatprep.subr.bf16.mxu1 %v9105_v14  ;;  %v3108_v22 = vld [vmem:[#allocation3 + $0x238] sm:$0xff] }
 0x389   : > { %8762 = vmatprep.mubr.bf16.mxu0 %v3081_v48  ;;  %v3850_v41 = vadd.f32 %v7786_v24, %v11351_v43  ;;  %v7897_v27 = vpop.f32.mrb[27].mxu1  ;;  %8206 = vmatpush3.bf16.msra.mxu1 %v9106_v34 }
 0x38a   : > { %v7898_v19 = vadd.f32 %v7897_v27, %v7896_v53  ;;  %v11447_v26 = vadd.f32 %v7895_v7, %v3847_v29  ;;  %v3117_v7 = vld [vmem:[#allocation3 + $0x280] sm:$0xff] }
 0x38b   : > { %v7787_v36 = vpop.f32.mrb[28].mxu0 }
 0x38c   : > { %v7788_v62 = vpop.f32.mrb[29].mxu0  ;;  %v11455_v16 = vadd.f32 %v7898_v19, %v3850_v41 }
 0x38d   : > { %v7789_v39 = vadd.f32 %v7788_v62, %v7787_v36  ;;  %v7790_v37 = vpop.f32.mrb[30].mxu0 }
 0x38e   : > { %v7791_v15 = vpop.f32.mrb[31].mxu0  ;;  %v7899_v35 = vpop.f32.mrb[28].mxu1 }
 0x38f   : > { %v7792_v10 = vadd.f32 %v7791_v15, %v7790_v37  ;;  %v3855_v48 = vadd.f32 %v7789_v39, %v11351_v43  ;;  %v7900_v20 = vpop.f32.mrb[29].mxu1 }
 0x390   : > { %8763 = vmatmul.mubr.bf16.gmra.mrb[136].mxu0 %v3090_v38  ;;  %v7901_v42 = vadd.f32 %v7900_v20, %v7899_v35  ;;  %v7902_v37 = vpop.f32.mrb[30].mxu1 }
 0x391   : > { %8766 = vmatprep.mubr.bf16.mxu0 %v3099_v54  ;;  %v3858_v62 = vadd.f32 %v7792_v10, %v11351_v43  ;;  %v7903_v53 = vpop.f32.mrb[31].mxu1 }
 0x392   : > { %v7904_v15 = vadd.f32 %v7903_v53, %v7902_v37  ;;  %v11459_v54 = vadd.f32 %v7901_v42, %v3855_v48 }
 0x393   : > { %v7793_v18 = vpop.f32.mrb[32].mxu0 }
 0x394   : > { %v7794_v24 = vpop.f32.mrb[33].mxu0  ;;  %v11461_v39 = vadd.f32 %v7904_v15, %v3858_v62 }
 0x395   : > { %v7795_v36 = vadd.f32 %v7794_v24, %v7793_v18  ;;  %v7796_v29 = vpop.f32.mrb[34].mxu0  ;;  %v3126_v24 = vld [vmem:[#allocation3 + $0x2c8] sm:$0xff] }
 0x396   : > { %v7797_v38 = vpop.f32.mrb[35].mxu0  ;;  %v7905_v14 = vpop.f32.mrb[32].mxu1 }
 0x397   : > { %v7798_v41 = vadd.f32 %v7797_v38, %v7796_v29  ;;  %v3863_v19 = vadd.f32 %v7795_v36, %v11351_v43  ;;  %v7906_v18 = vpop.f32.mrb[33].mxu1  ;;  %v9107_v36 = vld [vmem:[%s12872_s5 + $0x58] sm:$0xff]  }
 0x398   : > { %8767 = vmatmul.mubr.bf16.gmra.mrb[140].mxu0 %v3108_v22  ;;  %v7907_v51 = vadd.f32 %v7906_v18, %v7905_v14  ;;  %v7908_v29 = vpop.f32.mrb[34].mxu1  ;;  %v3135_v22 = vld [vmem:[#allocation3 + $0x310] sm:$0xff]  ;;  %8207 = vmatprep.subr.bf16.mxu1 %v9107_v36  ;;  %v3144_v18 = vld [vmem:[#allocation3 + $0x358] sm:$0xff] }
 0x399   : > { %8770 = vmatprep.mubr.bf16.mxu0 %v3117_v7  ;;  %v3866_v20 = vadd.f32 %v7798_v41, %v11351_v43  ;;  %v7909_v48 = vpop.f32.mrb[35].mxu1  ;;  %v9108_v7 = vld [vmem:[%s12872_s5 + $0x18] sm:$0xff]  }
 0x39a   : > { %v11465_v38 = vadd.f32 %v7907_v51, %v3863_v19  ;;  %v7910_v62 = vadd.f32 %v7909_v48, %v7908_v29  ;;  %8208 = vmatpush3.bf16.msra.mxu1 %v9108_v7 }
 0x39b   : > { %v7799_v27 = vpop.f32.mrb[36].mxu0 }
 0x39c   : > { %v7800_v34 = vpop.f32.mrb[37].mxu0  ;;  %v11473_v53 = vadd.f32 %v7910_v62, %v3866_v20 }
 0x39d   : > { %v7801_v10 = vadd.f32 %v7800_v34, %v7799_v27  ;;  %v7802_v35 = vpop.f32.mrb[38].mxu0 }
 0x39e   : > { %v7803_v37 = vpop.f32.mrb[39].mxu0  ;;  %v7911_v51 = vpop.f32.mrb[36].mxu1 }
 0x39f   : > { %v7804_v42 = vadd.f32 %v7803_v37, %v7802_v35  ;;  %v3871_v15 = vadd.f32 %v7801_v10, %v11351_v43  ;;  %v7912_v19 = vpop.f32.mrb[37].mxu1 }
 0x3a0   : > { %8771 = vmatmul.mubr.bf16.gmra.mrb[144].mxu0 %v3126_v24  ;;  %v7913_v24 = vadd.f32 %v7912_v19, %v7911_v51  ;;  %v7914_v29 = vpop.f32.mrb[38].mxu1 }
 0x3a1   : > { %8774 = vmatprep.mubr.bf16.mxu0 %v3135_v22  ;;  %v3874_v35 = vadd.f32 %v7804_v42, %v11351_v43  ;;  %v7915_v48 = vpop.f32.mrb[39].mxu1 }
 0x3a2   : > { %v11477_v20 = vadd.f32 %v7913_v24, %v3871_v15  ;;  %v7916_v62 = vadd.f32 %v7915_v48, %v7914_v29 }
 0x3a3   : > { %v7805_v41 = vpop.f32.mrb[40].mxu0 }
 0x3a4   : > { %v7806_v27 = vpop.f32.mrb[41].mxu0  ;;  %v11480_v10 = vadd.f32 %v7916_v62, %v3874_v35  ;;  %v9110_v35 = vld [vmem:[%s12872_s5 + $0x20] sm:$0xff]  }
 0x3a5   : > { %v7807_v14 = vadd.f32 %v7806_v27, %v7805_v41  ;;  %v7808_v34 = vpop.f32.mrb[42].mxu0 }
 0x3a6   : > { %v7809_v37 = vpop.f32.mrb[43].mxu0  ;;  %v7917_v41 = vpop.f32.mrb[40].mxu1 }
 0x3a7   : > { %v7810_v22 = vadd.f32 %v7809_v37, %v7808_v34  ;;  %v3879_v7 = vadd.f32 %v7807_v14, %v11351_v43  ;;  %v7918_v11 = vpop.f32.mrb[41].mxu1  ;;  %v9109_v14 = vld [vmem:[%s12872_s5 + $0x60] sm:$0xff]  }
 0x3a8   : > { %8775 = vmatmul.mubr.bf16.gmra.mrb[148].mxu0 %v3144_v18  ;;  %v7919_v60 = vadd.f32 %v7918_v11, %v7917_v41  ;;  %v7920_v34 = vpop.f32.mrb[42].mxu1  ;;  %8209 = vmatprep.subr.bf16.mxu1 %v9109_v14 }
 0x3a9   : > { %8778 = vmatprep.mubr.bf16.mxu0 %v11268_v0  ;;  %v3882_v19 = vadd.f32 %v7810_v22, %v11351_v43  ;;  %v7921_v24 = vpop.f32.mrb[43].mxu1  ;;  %8210 = vmatpush3.bf16.msra.mxu1 %v9110_v35 }
 0x3aa   : > { %v11484_v18 = vadd.f32 %v7919_v60, %v3879_v7  ;;  %v7922_v0 = vadd.f32 %v7921_v24, %v7920_v34 }
 0x3ab   : > { %v7811_v36 = vpop.f32.mrb[44].mxu0 }
 0x3ac   : > { %v7812_v27 = vpop.f32.mrb[45].mxu0  ;;  %v11494_v11 = vadd.f32 %v7922_v0, %v3882_v19 }
 0x3ad   : > { %v7813_v42 = vadd.f32 %v7812_v27, %v7811_v36  ;;  %v7814_v51 = vpop.f32.mrb[46].mxu0 }
 0x3ae   : > { %v7815_v15 = vpop.f32.mrb[47].mxu0  ;;  %v7923_v48 = vpop.f32.mrb[44].mxu1 }
 0x3af   : > { %v7816_v29 = vadd.f32 %v7815_v15, %v7814_v51  ;;  %v3887_v60 = vadd.f32 %v7813_v42, %v11351_v43 }
 0x3b0   : > { %8779 = vmatmul.mubr.bf16.gmra.mrb[152].mxu0 %v11275_v12  ;;  %v7924_v12 = vpop.f32.mrb[45].mxu1 }
 0x3b1   : > { %8782 = vmatprep.mubr.bf16.mxu0 %v11386_v56  ;;  %v3890_v7 = vadd.f32 %v7816_v29, %v11351_v43  ;;  %v7925_v41 = vadd.f32 %v7924_v12, %v7923_v48  ;;  %v7926_v27 = vpop.f32.mrb[46].mxu1 }
 0x3b2   : > { %v7927_v34 = vpop.f32.mrb[47].mxu1 }
 0x3b3   : > { %v7817_v37 = vpop.f32.mrb[48].mxu0  ;;  %v11498_v56 = vadd.f32 %v7925_v41, %v3887_v60  ;;  %v7928_v19 = vadd.f32 %v7927_v34, %v7926_v27 }
 0x3b4   : > { %v7818_v22 = vpop.f32.mrb[49].mxu0 }
 0x3b5   : > { %v7819_v62 = vadd.f32 %v7818_v22, %v7817_v37  ;;  %v7820_v36 = vpop.f32.mrb[50].mxu0  ;;  %v11501_v24 = vadd.f32 %v7928_v19, %v3890_v7  ;;  %v9111_v7 = vld [vmem:[%s12872_s5 + $0x68] sm:$0xff]  }
 0x3b6   : > { %v7821_v51 = vpop.f32.mrb[51].mxu0  ;;  %v7929_v14 = vpop.f32.mrb[48].mxu1  ;;  %8211 = vmatprep.subr.bf16.mxu1 %v9111_v7 }
 0x3b7   : > { %v7822_v15 = vadd.f32 %v7821_v51, %v7820_v36  ;;  %v3895_v0 = vadd.f32 %v7819_v62, %v11351_v43  ;;  %v7930_v37 = vpop.f32.mrb[49].mxu1  ;;  %v9112_v62 = vld [vmem:[%s12872_s5 + $0x28] sm:$0xff]  }
 0x3b8   : > { %8783 = vmatmul.mubr.bf16.gmra.mrb[156].mxu0 %v11317_v52  ;;  %v7931_v12 = vadd.f32 %v7930_v37, %v7929_v14  ;;  %v7932_v57 = vpop.f32.mrb[50].mxu1  ;;  %8212 = vmatpush3.bf16.msra.mxu1 %v9112_v62 }
 0x3b9   : > { %v3898_v48 = vadd.f32 %v7822_v15, %v11351_v43  ;;  %v7933_v60 = vpop.f32.mrb[51].mxu1 }
 0x3ba   : > { %v11505_v27 = vadd.f32 %v7931_v12, %v3895_v0  ;;  %v7934_v52 = vadd.f32 %v7933_v60, %v7932_v57 }
 0x3bb   : > { %v7823_v42 = vpop.f32.mrb[52].mxu0 }
 0x3bc   : > { %v7824_v35 = vpop.f32.mrb[53].mxu0  ;;  %v11513_v51 = vadd.f32 %v7934_v52, %v3898_v48 }
 0x3bd   : > { %v7825_v22 = vadd.f32 %v7824_v35, %v7823_v42  ;;  %v7826_v29 = vpop.f32.mrb[54].mxu0 }
 0x3be   : > { %v7827_v36 = vpop.f32.mrb[55].mxu0  ;;  %v7935_v19 = vpop.f32.mrb[52].mxu1 }
 0x3bf   : > { %v7828_v41 = vadd.f32 %v7827_v36, %v7826_v29  ;;  %v3903_v15 = vadd.f32 %v7825_v22, %v11351_v43  ;;  %v7936_v0 = vpop.f32.mrb[53].mxu1 }
 0x3c0   : > { %v7937_v37 = vadd.f32 %v7936_v0, %v7935_v19  ;;  %v7938_v29 = vpop.f32.mrb[54].mxu1 }
 0x3c1   : > { %v3906_v35 = vadd.f32 %v7828_v41, %v11351_v43  ;;  %v7939_v36 = vpop.f32.mrb[55].mxu1  ;;  %v9115_v41 = vld [vmem:[%s12872_s5 + $0xc0] sm:$0xff]  }
 0x3c2   : > { %v11517_v21 = vadd.f32 %v7937_v37, %v3903_v15  ;;  %v7940_v48 = vadd.f32 %v7939_v36, %v7938_v29  ;;  %8313 = vmatprep.subr.bf16.mxu0 %v9115_v41  ;;  %v9117_v36 = vld [vmem:[%s12872_s5 + $0xc8] sm:$0xff]  }
 0x3c3   : > { %v7829_v34 = vpop.f32.mrb[56].mxu0 }
 0x3c4   : > { %v7830_v42 = vpop.f32.mrb[57].mxu0  ;;  %v11519_v52 = vadd.f32 %v7940_v48, %v3906_v35  ;;  %v9116_v35 = vld [vmem:[%s12872_s5 + $0x80] sm:$0xff]   ;;  %v9118_v48 = vld [vmem:[%s12872_s5 + $0x88] sm:$0xff]  }
 0x3c5   : > { %v7831_v14 = vadd.f32 %v7830_v42, %v7829_v34  ;;  %v7832_v57 = vpop.f32.mrb[58].mxu0  ;;  %8314 = vmatpush3.bf16.msra.mxu0 %v9116_v35 }
 0x3c6   : > { %v7833_v12 = vpop.f32.mrb[59].mxu0  ;;  %v7941_v62 = vpop.f32.mrb[56].mxu1  ;;  %8315 = vmatprep.subr.bf16.mxu0 %v9117_v36 }
 0x3c7   : > { %v7834_v60 = vadd.f32 %v7833_v12, %v7832_v57  ;;  %v3911_v22 = vadd.f32 %v7831_v14, %v11351_v43  ;;  %v7942_v49 = vpop.f32.mrb[57].mxu1  ;;  %v9113_v12 = vld [vmem:[%s12872_s5 + $0x70] sm:$0xff]  }
 0x3c8   : > { %v7943_v0 = vadd.f32 %v7942_v49, %v7941_v62  ;;  %v7944_v15 = vpop.f32.mrb[58].mxu1  ;;  %v9114_v49 = vld [vmem:[%s12872_s5 + $0x30] sm:$0xff]   ;;  %8213 = vmatprep.subr.bf16.mxu1 %v9113_v12 }
 0x3c9   : > { %v3914_v19 = vadd.f32 %v7834_v60, %v11351_v43  ;;  %v7945_v37 = vpop.f32.mrb[59].mxu1  ;;  %8214 = vmatpush3.bf16.msra.mxu1 %v9114_v49  ;;  %8316 = vmatpush3.bf16.msra.mxu0 %v9118_v48  ;;  %v9122_v12 = vld [vmem:[%s12872_s5 + $0x90] sm:$0xff]  }
 0x3ca   : > { %v11529_v29 = vadd.f32 %v7943_v0, %v3911_v22 }
 0x3cb   : > { %v7835_v7 = vpop.f32.mrb[60].mxu0 }
 0x3cc   : > { %v7836_v9 = vpop.f32.mrb[61].mxu0 }
 0x3cd   : > { %v7837_v34 = vadd.f32 %v7836_v9, %v7835_v7  ;;  %v7838_v42 = vpop.f32.mrb[62].mxu0  ;;  %v7946_v9 = vadd.f32 %v7945_v37, %v7944_v15 }
 0x3ce   : > { %v7839_v57 = vpop.f32.mrb[63].mxu0  ;;  %v7947_v62 = vpop.f32.mrb[60].mxu1 }
 0x3cf   : > { %v7840_v14 = vadd.f32 %v7839_v57, %v7838_v42  ;;  %v11540_v60 = vadd.f32 %v7946_v9, %v3914_v19  ;;  %v3919_v22 = vadd.f32 %v7837_v34, %v11351_v43  ;;  %v7948_v41 = vpop.f32.mrb[61].mxu1  ;;  %v9120_v19 = vld [vmem:[%s12872_s5 + $0xd0] sm:$0xff]  }
 0x3d0   : > { %v7949_v35 = vadd.f32 %v7948_v41, %v7947_v62  ;;  %v7950_v37 = vpop.f32.mrb[62].mxu1  ;;  %8317 = vmatprep.subr.bf16.mxu0 %v9120_v19  ;;  %v9124_v62 = vld [vmem:[%s12872_s5 + $0x98] sm:$0xff]  }
 0x3d1   : > { %v3922_v57 = vadd.f32 %v7840_v14, %v11351_v43  ;;  %v7951_v34 = vpop.f32.mrb[63].mxu1  ;;  %8318 = vmatpush3.bf16.msra.mxu0 %v9122_v12  ;;  %v9123_v43 = vld [vmem:[%s12872_s5 + $0xd8] sm:$0xff]   ;;  %v9125_v12 = vld [vmem:[%s12872_s5 + $0xe0] sm:$0xff]  }
 0x3d2   : > { %v11554_v48 = vadd.f32 %v7949_v35, %v3919_v22  ;;  %8319 = vmatprep.subr.bf16.mxu0 %v9123_v43 }
 0x3d3   : > { %v7969_v7 = vpop.f32.mrb[64].mxu0 }
 0x3d4   : > { %v7970_v42 = vpop.f32.mrb[65].mxu0 }
 0x3d5   : > { %v7971_v0 = vadd.f32 %v7970_v42, %v7969_v7  ;;  %v7972_v15 = vpop.f32.mrb[66].mxu0  ;;  %v7952_v7 = vadd.f32 %v7951_v34, %v7950_v37  ;;  %8320 = vmatpush3.bf16.msra.mxu0 %v9124_v62  ;;  %v9126_v34 = vld [vmem:[%s12872_s5 + $0xa0] sm:$0xff]  }
 0x3d6   : > { %v7973_v9 = vpop.f32.mrb[67].mxu0  ;;  %8321 = vmatprep.subr.bf16.mxu0 %v9125_v12 }
 0x3d7   : > { %v4121_v49 = vadd.f32 %v7971_v0, %v11362_v63  ;;  %v7974_v36 = vadd.f32 %v7973_v9, %v7972_v15  ;;  %v11560_v14 = vadd.f32 %v7952_v7, %v3922_v57  ;;  %v8081_v63 = vpop.f32.mrb[64].mxu1  ;;  %v9121_v57 = vld [vmem:[%s12872_s5 + $0x38] sm:$0xff]  }
 0x3d8   : > { %v8082_v22 = vpop.f32.mrb[65].mxu1 }
 0x3d9   : > { %v4124_v42 = vadd.f32 %v7974_v36, %v11369_v28  ;;  %v9119_v28 = vld [vmem:[%s12872_s5 + $0x78] sm:$0xff]   ;;  %v8083_v35 = vadd.f32 %v8082_v22, %v8081_v63  ;;  %v8084_v37 = vpop.f32.mrb[66].mxu1  ;;  %8322 = vmatpush3.bf16.msra.mxu0 %v9126_v34  ;;  %v9131_v34 = vld [vmem:[%s12872_s5 + $0xb0] sm:$0xff]  }
 0x3da   : > { %v8085_v36 = vpop.f32.mrb[67].mxu1  ;;  %8215 = vmatprep.subr.bf16.mxu1 %v9119_v28  ;;  %v5100_v22 = vld [vmem:[#allocation3 + $0x8] sm:$0xff] }
 0x3db   : > { %v7975_v41 = vpop.f32.mrb[68].mxu0  ;;  %v8086_v62 = vadd.f32 %v8085_v36, %v8084_v37  ;;  %8216 = vmatpush3.bf16.msra.mxu1 %v9121_v57  ;;  %5858 = vmatprep.mubr.bf16.mxu1 %v5100_v22 }
 0x3dc   : > { %v7976_v0 = vpop.f32.mrb[69].mxu0 }
 0x3dd   : > { %v7977_v15 = vadd.f32 %v7976_v0, %v7975_v41  ;;  %v7978_v19 = vpop.f32.mrb[70].mxu0  ;;  %v11578_v41 = vadd.f32 %v8083_v35, %v4121_v49  ;;  %v9127_v0 = vld [vmem:[%s12872_s5 + $0xe8] sm:$0xff]   ;;  %v11584_v47 = vadd.f32 %v8086_v62, %v4124_v42  ;;  %v9129_v42 = vld [vmem:[%s12872_s5 + $0xf0] sm:$0xff]  }
 0x3de   : > { %v7979_v9 = vpop.f32.mrb[71].mxu0  ;;  %8323 = vmatprep.subr.bf16.mxu0 %v9127_v0 }
 0x3df   : > { %v4129_v7 = vadd.f32 %v7977_v15, %v11376_v31  ;;  %v7980_v43 = vadd.f32 %v7979_v9, %v7978_v19  ;;  %v9128_v31 = vld [vmem:[%s12872_s5 + $0xa8] sm:$0xff]   ;;  %v5099_v15 = vld [vmem:[#allocation3] sm:$0xff]  ;;  %v8087_v19 = vpop.f32.mrb[68].mxu1 }
 0x3e0   : > { %5859 = vmatmul.mubr.bf16.vlgmr.msra.gmra.mrb[128].mxu1 %v5099_v15  ;;  %8324 = vmatpush3.bf16.msra.mxu0 %v9128_v31  ;;  %v9133_v15 = vld [vmem:[%s12872_s5 + $0xf8] sm:$0xff]  }
 0x3e1   : > { %v4132_v63 = vadd.f32 %v7980_v43, %v11383_v40  ;;  %v8088_v40 = vpop.f32.mrb[69].mxu1  ;;  %8325 = vmatprep.subr.bf16.mxu0 %v9129_v42 }
 0x3e2   : > { %v8089_v37 = vadd.f32 %v8088_v40, %v8087_v19  ;;  %v8090_v9 = vpop.f32.mrb[70].mxu1  ;;  %v9134_v19 = vld [vmem:[%s12872_s5 + $0xb8] sm:$0xff]  }
 0x3e3   : > { %v7981_v49 = vpop.f32.mrb[72].mxu0  ;;  %v8091_v36 = vpop.f32.mrb[71].mxu1 }
 0x3e4   : > { %v7982_v28 = vpop.f32.mrb[73].mxu0  ;;  %v8092_v0 = vadd.f32 %v8091_v36, %v8090_v9  ;;  %v11596_v22 = vadd.f32 %v8089_v37, %v4129_v7  ;;  %8326 = vmatpush3.bf16.msra.mxu0 %v9131_v34 }
 0x3e5   : > { %v7983_v57 = vadd.f32 %v7982_v28, %v7981_v49  ;;  %v7984_v35 = vpop.f32.mrb[74].mxu0  ;;  %8327 = vmatprep.subr.bf16.mxu0 %v9133_v15 }
 0x3e6   : > { %v7985_v12 = vpop.f32.mrb[75].mxu0  ;;  %v11602_v49 = vadd.f32 %v8092_v0, %v4132_v63  ;;  %v9132_v63 = vld [vmem:[%s12872_s5 + $0x100] sm:$0xff]  }
 0x3e7   : > { %v4137_v43 = vadd.f32 %v7983_v57, %v11392_v55  ;;  %v7986_v62 = vadd.f32 %v7985_v12, %v7984_v35  ;;  %v8093_v55 = vpop.f32.mrb[72].mxu1 }
 0x3e8   : > { %v8094_v57 = vpop.f32.mrb[73].mxu1  ;;  %8328 = vmatpush3.bf16.msra.mxu0 %v9134_v19 }
 0x3e9   : > { %v4140_v31 = vadd.f32 %v7986_v62, %v11413_v50  ;;  %v9130_v50 = vld [vmem:[%s12872_s5 + $0x140] sm:$0xff]   ;;  %v8095_v42 = vadd.f32 %v8094_v57, %v8093_v55  ;;  %v8096_v37 = vpop.f32.mrb[74].mxu1 }
 0x3ea   : > { %v8097_v12 = vpop.f32.mrb[75].mxu1  ;;  %8425 = vmatprep.subr.bf16.mxu1 %v9130_v50 }
 0x3eb   : > { %v7987_v28 = vpop.f32.mrb[76].mxu0  ;;  %v8098_v62 = vadd.f32 %v8097_v12, %v8096_v37  ;;  %v11614_v0 = vadd.f32 %v8095_v42, %v4137_v43  ;;  %8426 = vmatpush3.bf16.msra.mxu1 %v9132_v63 }
 0x3ec   : > { %v7988_v40 = vpop.f32.mrb[77].mxu0 }
 0x3ed   : > { %v7989_v7 = vadd.f32 %v7988_v40, %v7987_v28  ;;  %v7990_v35 = vpop.f32.mrb[78].mxu0  ;;  %v11617_v28 = vadd.f32 %v8098_v62, %v4140_v31 }
 0x3ee   : > { %v7991_v9 = vpop.f32.mrb[79].mxu0  ;;  %v8099_v25 = vpop.f32.mrb[76].mxu1 }
 0x3ef   : > { %v4145_v34 = vadd.f32 %v7989_v7, %v11420_v2  ;;  %v7992_v36 = vadd.f32 %v7991_v9, %v7990_v35  ;;  %v8100_v19 = vpop.f32.mrb[77].mxu1 }
 0x3f0   : > { %v8101_v58 = vadd.f32 %v8100_v19, %v8099_v25  ;;  %v8102_v45 = vpop.f32.mrb[78].mxu1  ;;  %v9135_v25 = vld [vmem:[%s12872_s5 + $0x148] sm:$0xff]  }
 0x3f1   : > { %v4148_v15 = vadd.f32 %v7992_v36, %v11424_v61  ;;  %v8103_v2 = vpop.f32.mrb[79].mxu1  ;;  %8427 = vmatprep.subr.bf16.mxu1 %v9135_v25 }
 0x3f2   : > { %v8104_v43 = vadd.f32 %v8103_v2, %v8102_v45  ;;  %v11620_v50 = vadd.f32 %v8101_v58, %v4145_v34 }
 0x3f3   : > { %v7993_v40 = vpop.f32.mrb[80].mxu0 }
 0x3f4   : > { %v7994_v46 = vpop.f32.mrb[81].mxu0  ;;  %v11623_v31 = vadd.f32 %v8104_v43, %v4148_v15 }
 0x3f5   : > { %v7995_v55 = vadd.f32 %v7994_v46, %v7993_v40  ;;  %v7996_v57 = vpop.f32.mrb[82].mxu0 }
 0x3f6   : > { %v7997_v59 = vpop.f32.mrb[83].mxu0  ;;  %v8105_v42 = vpop.f32.mrb[80].mxu1 }
 0x3f7   : > { %v4153_v7 = vadd.f32 %v7995_v55, %v11428_v32  ;;  %v7998_v35 = vadd.f32 %v7997_v59, %v7996_v57  ;;  %v8106_v9 = vpop.f32.mrb[81].mxu1  ;;  %v9136_v59 = vld [vmem:[%s12872_s5 + $0x108] sm:$0xff]  }
 0x3f8   : > { %v8107_v45 = vadd.f32 %v8106_v9, %v8105_v42  ;;  %v8108_v58 = vpop.f32.mrb[82].mxu1  ;;  %8428 = vmatpush3.bf16.msra.mxu1 %v9136_v59 }
 0x3f9   : > { %v4156_v61 = vadd.f32 %v7998_v35, %v11437_v17  ;;  %v8109_v17 = vpop.f32.mrb[83].mxu1 }
 0x3fa   : > { %v8110_v62 = vadd.f32 %v8109_v17, %v8108_v58  ;;  %v11632_v15 = vadd.f32 %v8107_v45, %v4153_v7 }
 0x3fb   : > { %v7999_v63 = vpop.f32.mrb[84].mxu0 }
 0x3fc   : > { %v8000_v37 = vpop.f32.mrb[85].mxu0  ;;  %v11635_v19 = vadd.f32 %v8110_v62, %v4156_v61  ;;  %v9137_v62 = vld [vmem:[%s12872_s5 + $0x150] sm:$0xff]  }
 0x3fd   : > { %v8001_v46 = vadd.f32 %v8000_v37, %v7999_v63  ;;  %v8002_v12 = vpop.f32.mrb[86].mxu0  ;;  %8429 = vmatprep.subr.bf16.mxu1 %v9137_v62 }
 0x3fe   : > { %v8003_v32 = vpop.f32.mrb[87].mxu0  ;;  %v8111_v57 = vpop.f32.mrb[84].mxu1 }
 0x3ff   : > { %v4161_v34 = vadd.f32 %v8001_v46, %v11441_v33  ;;  %v8004_v36 = vadd.f32 %v8003_v32, %v8002_v12  ;;  %v8112_v35 = vpop.f32.mrb[85].mxu1 }
 0x400   : > { %v8113_v42 = vadd.f32 %v8112_v35, %v8111_v57  ;;  %v8114_v37 = vpop.f32.mrb[86].mxu1 }
 0x401   : > { %v4164_v40 = vadd.f32 %v8004_v36, %v11443_v13  ;;  %v8115_v33 = vpop.f32.mrb[87].mxu1 }
 0x402   : > { %v8116_v7 = vadd.f32 %v8115_v33, %v8114_v37  ;;  %v11638_v25 = vadd.f32 %v8113_v42, %v4161_v34 }
 0x403   : > { %v8005_v55 = vpop.f32.mrb[88].mxu0 }
 0x404   : > { %v8006_v2 = vpop.f32.mrb[89].mxu0  ;;  %v11641_v61 = vadd.f32 %v8116_v7, %v4164_v40 }
 0x405   : > { %v8007_v43 = vadd.f32 %v8006_v2, %v8005_v55  ;;  %v8008_v63 = vpop.f32.mrb[90].mxu0 }
 0x406   : > { %v8009_v9 = vpop.f32.mrb[91].mxu0  ;;  %v8117_v45 = vpop.f32.mrb[88].mxu1 }
 0x407   : > { %v4169_v46 = vadd.f32 %v8007_v43, %v11447_v26  ;;  %v8010_v12 = vadd.f32 %v8009_v9, %v8008_v63  ;;  %v8118_v32 = vpop.f32.mrb[89].mxu1  ;;  %v9138_v26 = vld [vmem:[%s12872_s5 + $0x110] sm:$0xff]  }
 0x408   : > { %v8119_v34 = vadd.f32 %v8118_v32, %v8117_v45  ;;  %v8120_v55 = vpop.f32.mrb[90].mxu1  ;;  %8430 = vmatpush3.bf16.msra.mxu1 %v9138_v26 }
 0x409   : > { %v4172_v13 = vadd.f32 %v8010_v12, %v11455_v16  ;;  %v8121_v16 = vpop.f32.mrb[91].mxu1 }
 0x40a   : > { %v8122_v35 = vadd.f32 %v8121_v16, %v8120_v55  ;;  %v11650_v43 = vadd.f32 %v8119_v34, %v4169_v46  ;;  %v9140_v46 = vld [vmem:[%s12872_s5 + $0x118] sm:$0xff]  }
 0x40b   : > { %v8011_v59 = vpop.f32.mrb[92].mxu0 }
 0x40c   : > { %v8012_v58 = vpop.f32.mrb[93].mxu0  ;;  %v11653_v42 = vadd.f32 %v8122_v35, %v4172_v13 }
 0x40d   : > { %v8013_v17 = vadd.f32 %v8012_v58, %v8011_v59  ;;  %v8014_v36 = vpop.f32.mrb[94].mxu0 }
 0x40e   : > { %v8015_v57 = vpop.f32.mrb[95].mxu0  ;;  %v8123_v9 = vpop.f32.mrb[92].mxu1 }
 0x40f   : > { %v4177_v40 = vadd.f32 %v8013_v17, %v11459_v54  ;;  %v8016_v2 = vadd.f32 %v8015_v57, %v8014_v36  ;;  %v8124_v12 = vpop.f32.mrb[93].mxu1  ;;  %v9139_v54 = vld [vmem:[%s12872_s5 + $0x158] sm:$0xff]  }
 0x410   : > { %v8125_v45 = vadd.f32 %v8124_v12, %v8123_v9  ;;  %v8126_v58 = vpop.f32.mrb[94].mxu1  ;;  %8431 = vmatprep.subr.bf16.mxu1 %v9139_v54 }
 0x411   : > { %v4180_v63 = vadd.f32 %v8016_v2, %v11461_v39  ;;  %v8127_v39 = vpop.f32.mrb[95].mxu1  ;;  %8432 = vmatpush3.bf16.msra.mxu1 %v9140_v46 }
 0x412   : > { %v8128_v36 = vadd.f32 %v8127_v39, %v8126_v58  ;;  %v11662_v62 = vadd.f32 %v8125_v45, %v4177_v40  ;;  %v9143_v45 = vld [vmem:[%s12872_s5 + $0x120] sm:$0xff]  }
 0x413   : > { %v8017_v37 = vpop.f32.mrb[96].mxu0 }
 0x414   : > { %v8018_v33 = vpop.f32.mrb[97].mxu0  ;;  %v11665_v34 = vadd.f32 %v8128_v36, %v4180_v63  ;;  %v9142_v63 = vld [vmem:[%s12872_s5 + $0x1c0] sm:$0xff]  }
 0x415   : > { %v8019_v7 = vadd.f32 %v8018_v33, %v8017_v37  ;;  %v8020_v59 = vpop.f32.mrb[98].mxu0  ;;  %8537 = vmatprep.subr.bf16.mxu0 %v9142_v63 }
 0x416   : > { %v8021_v32 = vpop.f32.mrb[99].mxu0  ;;  %v8129_v57 = vpop.f32.mrb[96].mxu1 }
 0x417   : > { %v4185_v13 = vadd.f32 %v8019_v7, %v11465_v38  ;;  %v8022_v17 = vadd.f32 %v8021_v32, %v8020_v59  ;;  %v8130_v2 = vpop.f32.mrb[97].mxu1 }
 0x418   : > { %v8131_v9 = vadd.f32 %v8130_v2, %v8129_v57  ;;  %v8132_v33 = vpop.f32.mrb[98].mxu1 }
 0x419   : > { %v4188_v26 = vadd.f32 %v8022_v17, %v11473_v53  ;;  %v8133_v38 = vpop.f32.mrb[99].mxu1  ;;  %v9141_v53 = vld [vmem:[%s12872_s5 + $0x160] sm:$0xff]  }
 0x41a   : > { %v8134_v40 = vadd.f32 %v8133_v38, %v8132_v33  ;;  %v11668_v54 = vadd.f32 %v8131_v9, %v4185_v13  ;;  %8433 = vmatprep.subr.bf16.mxu1 %v9141_v53 }
 0x41b   : > { %v8023_v55 = vpop.f32.mrb[100].mxu0  ;;  %8434 = vmatpush3.bf16.msra.mxu1 %v9143_v45 }
 0x41c   : > { %v8024_v16 = vpop.f32.mrb[101].mxu0  ;;  %v11680_v58 = vadd.f32 %v8134_v40, %v4188_v26 }
 0x41d   : > { %v8025_v35 = vadd.f32 %v8024_v16, %v8023_v55  ;;  %v8026_v37 = vpop.f32.mrb[102].mxu0 }
 0x41e   : > { %v8027_v12 = vpop.f32.mrb[103].mxu0  ;;  %v8135_v32 = vpop.f32.mrb[100].mxu1 }
 0x41f   : > { %v4193_v7 = vadd.f32 %v8025_v35, %v11477_v20  ;;  %v8028_v59 = vadd.f32 %v8027_v12, %v8026_v37  ;;  %v8136_v13 = vpop.f32.mrb[101].mxu1 }
 0x420   : > { %v8137_v55 = vadd.f32 %v8136_v13, %v8135_v32  ;;  %v8138_v57 = vpop.f32.mrb[102].mxu1 }
 0x421   : > { %v4196_v46 = vadd.f32 %v8028_v59, %v11480_v10  ;;  %v8139_v2 = vpop.f32.mrb[103].mxu1 }
 0x422   : > { %v8140_v37 = vadd.f32 %v8139_v2, %v8138_v57  ;;  %v11683_v9 = vadd.f32 %v8137_v55, %v4193_v7 }
 0x423   : > { %v8029_v20 = vpop.f32.mrb[104].mxu0 }
 0x424   : > { %v8030_v39 = vpop.f32.mrb[105].mxu0  ;;  %v11686_v33 = vadd.f32 %v8140_v37, %v4196_v46 }
 0x425   : > { %v8031_v17 = vadd.f32 %v8030_v39, %v8029_v20  ;;  %v8032_v36 = vpop.f32.mrb[106].mxu0 }
 0x426   : > { %v8033_v16 = vpop.f32.mrb[107].mxu0  ;;  %v8141_v38 = vpop.f32.mrb[104].mxu1 }
 0x427   : > { %v4201_v10 = vadd.f32 %v8031_v17, %v11484_v18  ;;  %v8034_v35 = vadd.f32 %v8033_v16, %v8032_v36  ;;  %v8142_v40 = vpop.f32.mrb[105].mxu1  ;;  %v9147_v36 = vld [vmem:[%s12872_s5 + $0x128] sm:$0xff]  }
 0x428   : > { %v8143_v45 = vadd.f32 %v8142_v40, %v8141_v38  ;;  %v8144_v20 = vpop.f32.mrb[106].mxu1 }
 0x429   : > { %v4204_v26 = vadd.f32 %v8034_v35, %v11494_v11  ;;  %v8145_v39 = vpop.f32.mrb[107].mxu1  ;;  %v9145_v11 = vld [vmem:[%s12872_s5 + $0x168] sm:$0xff]  }
 0x42a   : > { %v8146_v17 = vadd.f32 %v8145_v39, %v8144_v20  ;;  %v11689_v7 = vadd.f32 %v8143_v45, %v4201_v10  ;;  %8435 = vmatprep.subr.bf16.mxu1 %v9145_v11 }
 0x42b   : > { %v8035_v12 = vpop.f32.mrb[108].mxu0  ;;  %8436 = vmatpush3.bf16.msra.mxu1 %v9147_v36 }
 0x42c   : > { %v8036_v59 = vpop.f32.mrb[109].mxu0  ;;  %v11698_v55 = vadd.f32 %v8146_v17, %v4204_v26 }
 0x42d   : > { %v8037_v53 = vadd.f32 %v8036_v59, %v8035_v12  ;;  %v8038_v63 = vpop.f32.mrb[110].mxu0 }
 0x42e   : > { %v8039_v32 = vpop.f32.mrb[111].mxu0 }
 0x42f   : > { %v4209_v18 = vadd.f32 %v8037_v53, %v11498_v56  ;;  %v8040_v13 = vadd.f32 %v8039_v32, %v8038_v63  ;;  %v8147_v56 = vpop.f32.mrb[108].mxu1 }
 0x430   : > { %v8148_v2 = vpop.f32.mrb[109].mxu1 }
 0x431   : > { %v4212_v46 = vadd.f32 %v8040_v13, %v11501_v24  ;;  %v8149_v37 = vadd.f32 %v8148_v2, %v8147_v56  ;;  %v8150_v12 = vpop.f32.mrb[110].mxu1 }
 0x432   : > { %v8151_v59 = vpop.f32.mrb[111].mxu1 }
 0x433   : > { %v8041_v57 = vpop.f32.mrb[112].mxu0  ;;  %v8152_v53 = vadd.f32 %v8151_v59, %v8150_v12  ;;  %v11701_v63 = vadd.f32 %v8149_v37, %v4209_v18 }
 0x434   : > { %v8042_v16 = vpop.f32.mrb[113].mxu0 }
 0x435   : > { %v8043_v10 = vadd.f32 %v8042_v16, %v8041_v57  ;;  %v8044_v35 = vpop.f32.mrb[114].mxu0  ;;  %v11704_v45 = vadd.f32 %v8152_v53, %v4212_v46 }
 0x436   : > { %v8045_v38 = vpop.f32.mrb[115].mxu0  ;;  %v8153_v32 = vpop.f32.mrb[112].mxu1 }
 0x437   : > { %v4217_v24 = vadd.f32 %v8043_v10, %v11505_v27  ;;  %v8046_v40 = vadd.f32 %v8045_v38, %v8044_v35  ;;  %v8154_v13 = vpop.f32.mrb[113].mxu1  ;;  %v9151_v35 = vld [vmem:[%s12872_s5 + $0x130] sm:$0xff]  }
 0x438   : > { %v8155_v36 = vadd.f32 %v8154_v13, %v8153_v32  ;;  %v8156_v57 = vpop.f32.mrb[114].mxu1 }
 0x439   : > { %v4220_v26 = vadd.f32 %v8046_v40, %v11513_v51  ;;  %v8157_v16 = vpop.f32.mrb[115].mxu1  ;;  %v9149_v51 = vld [vmem:[%s12872_s5 + $0x170] sm:$0xff]  }
 0x43a   : > { %v8158_v10 = vadd.f32 %v8157_v16, %v8156_v57  ;;  %v11707_v18 = vadd.f32 %v8155_v36, %v4217_v24  ;;  %8437 = vmatprep.subr.bf16.mxu1 %v9149_v51 }
 0x43b   : > { %v8047_v20 = vpop.f32.mrb[116].mxu0  ;;  %8438 = vmatpush3.bf16.msra.mxu1 %v9151_v35 }
 0x43c   : > { %v8048_v39 = vpop.f32.mrb[117].mxu0  ;;  %v11716_v37 = vadd.f32 %v8158_v10, %v4220_v26 }
 0x43d   : > { %v8049_v17 = vadd.f32 %v8048_v39, %v8047_v20  ;;  %v8050_v11 = vpop.f32.mrb[118].mxu0 }
 0x43e   : > { %v8051_v56 = vpop.f32.mrb[119].mxu0 }
 0x43f   : > { %v4225_v27 = vadd.f32 %v8049_v17, %v11517_v21  ;;  %v8052_v2 = vadd.f32 %v8051_v56, %v8050_v11  ;;  %v8159_v21 = vpop.f32.mrb[116].mxu1 }
 0x440   : > { %v8160_v59 = vpop.f32.mrb[117].mxu1 }
 0x441   : > { %v4228_v46 = vadd.f32 %v8052_v2, %v11519_v52  ;;  %v8161_v53 = vadd.f32 %v8160_v59, %v8159_v21  ;;  %v8162_v20 = vpop.f32.mrb[118].mxu1 }
 0x442   : > { %v8163_v39 = vpop.f32.mrb[119].mxu1 }
 0x443   : > { %v8053_v12 = vpop.f32.mrb[120].mxu0  ;;  %v8164_v17 = vadd.f32 %v8163_v39, %v8162_v20  ;;  %v11719_v11 = vadd.f32 %v8161_v53, %v4225_v27 }
 0x444   : > { %v8054_v38 = vpop.f32.mrb[121].mxu0 }
 0x445   : > { %v8055_v24 = vadd.f32 %v8054_v38, %v8053_v12  ;;  %v8056_v40 = vpop.f32.mrb[122].mxu0  ;;  %v11722_v36 = vadd.f32 %v8164_v17, %v4228_v46 }
 0x446   : > { %v8057_v32 = vpop.f32.mrb[123].mxu0  ;;  %v8165_v56 = vpop.f32.mrb[120].mxu1 }
 0x447   : > { %v4233_v52 = vadd.f32 %v8055_v24, %v11529_v29  ;;  %v8058_v13 = vadd.f32 %v8057_v32, %v8056_v40  ;;  %v8166_v2 = vpop.f32.mrb[121].mxu1  ;;  %v9155_v40 = vld [vmem:[%s12872_s5 + $0x138] sm:$0xff]   ;;  %v4571_v32 = vld [vmem:[#allocation6 + $0x10] sm:$0xff] }
 0x448   : > { %v8167_v35 = vadd.f32 %v8166_v2, %v8165_v56  ;;  %v8168_v12 = vpop.f32.mrb[122].mxu1 }
 0x449   : > { %v4236_v26 = vadd.f32 %v8058_v13, %v11540_v60  ;;  %v8169_v38 = vpop.f32.mrb[123].mxu1  ;;  %v9153_v60 = vld [vmem:[%s12872_s5 + $0x178] sm:$0xff]   ;;  %v4569_v13 = vld [vmem:[#allocation6] sm:$0xff] }
 0x44a   : > { %v8170_v24 = vadd.f32 %v8169_v38, %v8168_v12  ;;  %v11725_v27 = vadd.f32 %v8167_v35, %v4233_v52  ;;  %8439 = vmatprep.subr.bf16.mxu1 %v9153_v60  ;;  %v4570_v35 = vld [vmem:[#allocation6 + $0x8] sm:$0xff]  ;;  %v12947_v60 = vmov 0.0  }
 0x44b   : > { %v8059_v57 = vpop.f32.mrb[124].mxu0  ;;  %8440 = vmatpush3.bf16.msra.mxu1 %v9155_v40 }
 0x44c   : > { %v8060_v16 = vpop.f32.mrb[125].mxu0  ;;  %v11734_v53 = vadd.f32 %v8170_v24, %v4236_v26 }
 0x44d   : > { %v8061_v10 = vadd.f32 %v8060_v16, %v8059_v57  ;;  %v8062_v51 = vpop.f32.mrb[126].mxu0 }
 0x44e   : > { %v8063_v21 = vpop.f32.mrb[127].mxu0 }
 0x44f   : > { %v4241_v29 = vadd.f32 %v8061_v10, %v11554_v48  ;;  %v8064_v59 = vadd.f32 %v8063_v21, %v8062_v51  ;;  %v8171_v48 = vpop.f32.mrb[124].mxu1 }
 0x450   : > { %v8172_v17 = vpop.f32.mrb[125].mxu1 }
 0x451   : > { %v4244_v46 = vadd.f32 %v8064_v59, %v11560_v14  ;;  %v4572_v14 = vld [vmem:[#allocation6 + $0x18] sm:$0xff]  ;;  %v8173_v16 = vadd.f32 %v8172_v17, %v8171_v48  ;;  %v8174_v2 = vpop.f32.mrb[126].mxu1 }
 0x452   : > { %v8175_v12 = vpop.f32.mrb[127].mxu1 }
 0x453   : > { %v8756_v20 = vpop.f32.mrb[128].mxu0 }
 0x454   : > { %v4451_v39 = vadd.f32 %v8756_v20, %v11596_v22  ;;  %v4442_v52 = vpop.f32.mrb[129].mxu0  ;;  %v8176_v22 = vadd.f32 %v8175_v12, %v8174_v2 }
 0x455   : > { %v4443_v57 = vadd.f32 %v4442_v52, %v11578_v41  ;;  %v8757_v56 = vpop.f32.mrb[130].mxu0  ;;  %v11745_v41 = vadd.f32 %v8173_v16, %v4241_v29  ;;  %v4575_v52 = vld [vmem:[#allocation6 + $0x30] sm:$0xff] }
 0x456   : > { %v11738_v10 = vadd.f32 %v4571_v32, %v4451_v39  ;;  %v4454_v26 = vadd.f32 %v8757_v56, %v11602_v49  ;;  %v4445_v51 = vpop.f32.mrb[131].mxu0  ;;  %v11757_v29 = vadd.f32 %v8176_v22, %v4244_v46  ;;  %v4573_v56 = vld [vmem:[#allocation6 + $0x20] sm:$0xff]  ;;  %v4574_v22 = vld [vmem:[#allocation6 + $0x28] sm:$0xff] }
 0x457   : > { %v4601_v21 = vadd.f32 %v4569_v13, %v4443_v57  ;;  %v4446_v38 = vadd.f32 %v4445_v51, %v11584_v47 }
 0x458   : > { %vm4635_vm12 = vcmp.ge.f32.partialorder %v11738_v10, 1.0  ;;  %v11743_v59 = vadd.f32 %v4572_v14, %v4454_v26  ;;  %v4576_v26 = vld [vmem:[#allocation6 + $0x38] sm:$0xff] }
 0x459   : > { %v4667_v24 = vsel %vm4635_vm12, 0.0, %v11738_v10  ;;  %v4731_v49 = vsel %vm4635_vm12, 1.0, %v12947_v60  ;;  %vm4633_vm13 = vcmp.ge.f32.partialorder %v4601_v21, 1.0  ;;  %v4602_v40 = vadd.f32 %v4570_v35, %v4446_v38  ;;  %v4583_v10 = vld [vmem:[#allocation6 + $0x70] sm:$0xff] }
 0x45a   : > { %4699 = vst [vmem:[#allocation6 + $0x10] sm:$0xff] %v4667_v24  ;;  %4763 = vst [vmem:[#allocation2 + $0x31] sm:$0xff] %v4731_v49  ;;  %v4665_v47 = vsel %vm4633_vm13, 0.0, %v4601_v21  ;;  %v4729_v20 = vsel %vm4633_vm13, 1.0, %v12947_v60  ;;  %vm4636_vm14 = vcmp.ge.f32.partialorder %v11743_v59, 1.0 }
 0x45b   : > { %4697 = vst [vmem:[#allocation6] sm:$0xff] %v4665_v47  ;;  %4761 = vst [vmem:[#allocation2 + $0x19] sm:$0xff] %v4729_v20  ;;  %v4668_v32 = vsel %vm4636_vm14, 0.0, %v11743_v59  ;;  %v4732_v48 = vsel %vm4636_vm14, 1.0, %v12947_v60  ;;  %vm4634_vm15 = vcmp.ge.f32.partialorder %v4602_v40, 1.0  ;;  %v8760_v39 = vpop.f32.mrb[132].mxu0 }
 0x45c   : > { %4700 = vst [vmem:[#allocation6 + $0x18] sm:$0xff] %v4668_v32  ;;  %4764 = vst [vmem:[#allocation2 + $0x39] sm:$0xff] %v4732_v48  ;;  %v4666_v13 = vsel %vm4634_vm15, 0.0, %v4602_v40  ;;  %v4730_v46 = vsel %vm4634_vm15, 1.0, %v12947_v60  ;;  %v4467_v17 = vadd.f32 %v8760_v39, %v11620_v50  ;;  %v4458_v57 = vpop.f32.mrb[133].mxu0  ;;  %v4933_v14 = vpack.c.bf16 %v4732_v48, %v4731_v49  ;;  %v4579_v40 = vld [vmem:[#allocation6 + $0x50] sm:$0xff] }
 0x45d   : > { %4698 = vst [vmem:[#allocation6 + $0x8] sm:$0xff] %v4666_v13  ;;  %4762 = vst [vmem:[#allocation2 + $0x21] sm:$0xff] %v4730_v46  ;;  %v4459_v16 = vadd.f32 %v4458_v57, %v11614_v0  ;;  %v8761_v2 = vpop.f32.mrb[134].mxu0  ;;  %v4932_v51 = vpack.c.bf16 %v4730_v46, %v4729_v20  ;;  %v12948_v0 = vmov 1.0|1.0   ;;  %v4577_v48 = vld [vmem:[#allocation6 + $0x40] sm:$0xff] }
 0x45e   : > { %v11770_v35 = vadd.f32 %v4575_v52, %v4467_v17  ;;  %v4470_v12 = vadd.f32 %v8761_v2, %v11623_v31  ;;  %v4461_v38 = vpop.f32.mrb[135].mxu0  ;;  %4949 = vst [vmem:[#allocation3 + $0x98] sm:$0xff] %v4933_v14  ;;  %4965 = vst [vmem:[#allocation3 + $0x68] sm:$0xff] %v4933_v14  ;;  %v9162_v31 = vld [vmem:[%s12872_s5 + $0x200] sm:$0xff]   ;;  %v4580_v57 = vld [vmem:[#allocation6 + $0x58] sm:$0xff] }
 0x45f   : > { %4981 = vst [vmem:[#allocation3 + $0x38] sm:$0xff] %v4933_v14  ;;  %v11773_v50 = vadd.f32 %v4573_v56, %v4459_v16  ;;  %v4462_v24 = vadd.f32 %v4461_v38, %v11617_v28  ;;  %4948 = vst [vmem:[#allocation3 + $0x50] sm:$0xff] %v4932_v51  ;;  %8786 = vmatprep.subr.bf16.mxu1 %v9162_v31  ;;  %v9148_v59 = vld [vmem:[%s12872_s5 + $0x188] sm:$0xff]  }
 0x460   : > { %vm9241_vm5 = vmpackc.low %vm4634_vm15, %vm4633_vm13  ;;  %4964 = vst [vmem:[#allocation3 + $0x20] sm:$0xff] %v4932_v51  ;;  %vm4639_vm1 = vcmp.ge.f32.partialorder %v11770_v35, 1.0  ;;  %v11780_v49 = vadd.f32 %v4576_v26, %v4470_v12 }
 0x461   : > { %9242 = vmatprep.mubr.msk.bf16.mxu1 %vm9241_vm5, %v12948_v0  ;;  %v4671_v47 = vsel %vm4639_vm1, 0.0, %v11770_v35  ;;  %v4735_v28 = vsel %vm4639_vm1, 1.0, %v12947_v60  ;;  %vm4637_vm2 = vcmp.ge.f32.partialorder %v11773_v50, 1.0  ;;  %v11792_v21 = vadd.f32 %v4574_v22, %v4462_v24  ;;  %v4797_v52 = vld [vmem:[#allocation2 + $0x30] sm:$0xff]  ;;  %vm9243_vm7 = vmpackc.low %vm4636_vm14, %vm4635_vm12 }
 0x462   : > { %4703 = vst [vmem:[#allocation6 + $0x30] sm:$0xff] %v4671_v47  ;;  %4767 = vst [vmem:[#allocation2 + $0x61] sm:$0xff] %v4735_v28  ;;  %v4669_v20 = vsel %vm4637_vm2, 0.0, %v11773_v50  ;;  %v4733_v32 = vsel %vm4637_vm2, 1.0, %v12947_v60  ;;  %vm4640_vm3 = vcmp.ge.f32.partialorder %v11780_v49, 1.0  ;;  %v4795_v39 = vld [vmem:[#allocation2 + $0x18] sm:$0xff] }
 0x463   : > { %4701 = vst [vmem:[#allocation6 + $0x20] sm:$0xff] %v4669_v20  ;;  %4765 = vst [vmem:[#allocation2 + $0x49] sm:$0xff] %v4733_v32  ;;  %v4672_v13 = vsel %vm4640_vm3, 0.0, %v11780_v49  ;;  %v4736_v46 = vsel %vm4640_vm3, 1.0, %v12947_v60  ;;  %vm4638_vm4 = vcmp.ge.f32.partialorder %v11792_v21, 1.0  ;;  %v8764_v17 = vpop.f32.mrb[136].mxu0 }
 0x464   : > { %v4798_v56 = vld [vmem:[#allocation2 + $0x38] sm:$0xff]  ;;  %4704 = vst [vmem:[#allocation6 + $0x38] sm:$0xff] %v4672_v13  ;;  %4768 = vst [vmem:[#allocation2 + $0x69] sm:$0xff] %v4736_v46  ;;  %v4670_v16 = vsel %vm4638_vm4, 0.0, %v11792_v21  ;;  %v4734_v2 = vsel %vm4638_vm4, 1.0, %v12947_v60  ;;  %v4483_v26 = vadd.f32 %v8764_v17, %v11638_v25  ;;  %v4474_v51 = vpop.f32.mrb[137].mxu0 }
 0x465   : > { %v5001_v14 = vld [vmem:[#allocation2 + $0x32] sm:$0xff]  ;;  %v4796_v12 = vld [vmem:[#allocation2 + $0x20] sm:$0xff]  ;;  %v11815_v38 = vpack.c.bf16 %v4798_v56, %v4797_v52  ;;  %4702 = vst [vmem:[#allocation6 + $0x28] sm:$0xff] %v4670_v16  ;;  %4766 = vst [vmem:[#allocation2 + $0x51] sm:$0xff] %v4734_v2  ;;  %v4475_v31 = vadd.f32 %v4474_v51, %v11632_v15  ;;  %v8765_v47 = vpop.f32.mrb[138].mxu0  ;;  %v4934_v1 = vpack.c.bf16 %v4734_v2, %v4733_v32 }
 0x466   : > { %v4999_v22 = vld [vmem:[#allocation2 + $0x1a] sm:$0xff]  ;;  %v5000_v24 = vld [vmem:[#allocation2 + $0x22] sm:$0xff]  ;;  %v4830_v20 = vpack.c.bf16 %v4796_v12, %v4795_v39  ;;  %v11823_v17 = vadd.f32 %v4579_v40, %v4483_v26  ;;  %v4486_v52 = vadd.f32 %v8765_v47, %v11641_v61  ;;  %v4477_v56 = vpop.f32.mrb[139].mxu0  ;;  %v4935_v39 = vpack.c.bf16 %v4736_v46, %v4735_v28  ;;  %vm9245_vm10 = vmpackc.low %vm4638_vm4, %vm4637_vm2 }
 0x467   : > { %v5101_v13 = vld [vmem:[#allocation3 + $0x10] sm:$0xff]  ;;  %v11818_v30 = vpack.c.bf16 %v5000_v24, %v4999_v22  ;;  %v4578_v16 = vld [vmem:[#allocation6 + $0x48] sm:$0xff]  ;;  %4879 = vst [vmem:[#allocation3 + $0x30] sm:$0xff] %v11815_v38  ;;  %v9146_v32 = vld [vmem:[%s12872_s5 + $0x1c8] sm:$0xff]   ;;  %v11832_v2 = vadd.f32 %v4577_v48, %v4475_v31  ;;  %v4478_v51 = vadd.f32 %v4477_v56, %v11635_v19 }
 0x468   : > { %v5002_v5 = vld [vmem:[#allocation2 + $0x3a] sm:$0xff]  ;;  %6019 = vmatprep.mubr.bf16.mxu0 %v4830_v20  ;;  %5867 = vmatmul.mubr.bf16.gmra.mrb[132].mxu1 %v4830_v20  ;;  %4966 = vst [vmem:[#allocation3 + $0xb0] sm:$0xff] %v4934_v1  ;;  %4982 = vst [vmem:[#allocation3 + $0x80] sm:$0xff] %v4934_v1  ;;  %vm4643_vm6 = vcmp.ge.f32.partialorder %v11823_v17, 1.0  ;;  %v11837_v61 = vadd.f32 %v4580_v57, %v4486_v52  ;;  %v4581_v48 = vld [vmem:[#allocation6 + $0x60] sm:$0xff] }
 0x469   : > { %v9144_v25 = vld [vmem:[%s12872_s5 + $0x180] sm:$0xff]   ;;  %v11827_v15 = vpack.c.bf16 %v5002_v5, %v5001_v14  ;;  %5066 = vst [vmem:[#allocation3 + $0x28] sm:$0xff] %v11818_v30  ;;  %6020 = vmatmul.mubr.bf16.vlgmr.msra.gmra.mrb[160].mxu0 %v5101_v13  ;;  %9244 = vmatprep.mubr.msk.bf16.mxu1 %vm9243_vm7, %v12948_v0  ;;  %4967 = vst [vmem:[#allocation3 + $0xf8] sm:$0xff] %v4935_v39  ;;  %v4675_v5 = vsel %vm4643_vm6, 0.0, %v11823_v17  ;;  %v4739_v1 = vsel %vm4643_vm6, 1.0, %v12947_v60  ;;  %vm4641_vm8 = vcmp.ge.f32.partialorder %v11832_v2, 1.0 }
 0x46a   : > { %4983 = vst [vmem:[#allocation3 + $0xc8] sm:$0xff] %v4935_v39  ;;  %v11853_v19 = vadd.f32 %v4578_v16, %v4478_v51  ;;  %6027 = vmatprep.mubr.bf16.mxu0 %v11815_v38  ;;  %8538 = vmatpush3.bf16.msra.mxu0 %v9144_v25  ;;  %4707 = vst [vmem:[#allocation6 + $0x50] sm:$0xff] %v4675_v5  ;;  %v4673_v28 = vsel %vm4641_vm8, 0.0, %v11832_v2  ;;  %v4737_v40 = vsel %vm4641_vm8, 1.0, %v12947_v60  ;;  %vm4644_vm11 = vcmp.ge.f32.partialorder %v11837_v61, 1.0  ;;  %v4799_v46 = vld [vmem:[#allocation2 + $0x48] sm:$0xff] }
 0x46b   : > { %5067 = vst [vmem:[#allocation3 + $0x70] sm:$0xff] %v11827_v15  ;;  %5083 = vst [vmem:[#allocation3 + $0x40] sm:$0xff] %v11827_v15  ;;  %v4801_v57 = vld [vmem:[#allocation2 + $0x60] sm:$0xff]  ;;  %8539 = vmatprep.subr.bf16.mxu0 %v9146_v32  ;;  %v9150_v14 = vld [vmem:[%s12872_s5 + $0x1d0] sm:$0xff]   ;;  %v4676_v26 = vsel %vm4644_vm11, 0.0, %v11837_v61  ;;  %v4740_v12 = vsel %vm4644_vm11, 1.0, %v12947_v60 }
 0x46c   : > { %4771 = vst [vmem:[#allocation2 + $0x91] sm:$0xff] %v4739_v1  ;;  %4705 = vst [vmem:[#allocation6 + $0x40] sm:$0xff] %v4673_v28  ;;  %vm4642_vm0 = vcmp.ge.f32.partialorder %v11853_v19, 1.0  ;;  %v8768_v22 = vpop.f32.mrb[140].mxu0  ;;  %v4802_v24 = vld [vmem:[#allocation2 + $0x68] sm:$0xff]  ;;  %v4800_v52 = vld [vmem:[#allocation2 + $0x50] sm:$0xff] }
 0x46d   : > { %4769 = vst [vmem:[#allocation2 + $0x79] sm:$0xff] %v4737_v40  ;;  %v5005_v31 = vld [vmem:[#allocation2 + $0x62] sm:$0xff]  ;;  %4708 = vst [vmem:[#allocation6 + $0x58] sm:$0xff] %v4676_v26  ;;  %v4674_v47 = vsel %vm4642_vm0, 0.0, %v11853_v19  ;;  %v4738_v20 = vsel %vm4642_vm0, 1.0, %v12947_v60  ;;  %v4499_v13 = vadd.f32 %v8768_v22, %v11662_v62  ;;  %v4490_v25 = vpop.f32.mrb[141].mxu0  ;;  %v11883_v56 = vpack.c.bf16 %v4802_v24, %v4801_v57 }
 0x46e   : > { %4772 = vst [vmem:[#allocation2 + $0x99] sm:$0xff] %v4740_v12  ;;  %v5003_v16 = vld [vmem:[#allocation2 + $0x4a] sm:$0xff]  ;;  %v5004_v39 = vld [vmem:[#allocation2 + $0x52] sm:$0xff]  ;;  %4706 = vst [vmem:[#allocation6 + $0x48] sm:$0xff] %v4674_v47  ;;  %v4491_v32 = vadd.f32 %v4490_v25, %v11650_v43  ;;  %v8769_v51 = vpop.f32.mrb[142].mxu0  ;;  %v11886_v28 = vpack.c.bf16 %v4800_v52, %v4799_v46  ;;  %v4936_v6 = vpack.c.bf16 %v4738_v20, %v4737_v40  ;;  %8540 = vmatpush3.bf16.msra.mxu0 %v9148_v59 }
 0x46f   : > { %4770 = vst [vmem:[#allocation2 + $0x81] sm:$0xff] %v4738_v20  ;;  %v4584_v5 = vld [vmem:[#allocation6 + $0x78] sm:$0xff]  ;;  %v11888_v26 = vpack.c.bf16 %v5004_v39, %v5003_v16  ;;  %v9152_v62 = vld [vmem:[%s12872_s5 + $0x190] sm:$0xff]   ;;  %v11893_v57 = vadd.f32 %v4583_v10, %v4499_v13  ;;  %v4502_v22 = vadd.f32 %v8769_v51, %v11665_v34  ;;  %v4493_v24 = vpop.f32.mrb[143].mxu0  ;;  %v4582_v47 = vld [vmem:[#allocation6 + $0x68] sm:$0xff]  ;;  %v4937_v46 = vpack.c.bf16 %v4740_v12, %v4739_v1 }
 0x470   : > { %v5006_v3 = vld [vmem:[#allocation2 + $0x6a] sm:$0xff]  ;;  %4881 = vst [vmem:[#allocation3 + $0xc0] sm:$0xff] %v11883_v56  ;;  %8541 = vmatprep.subr.bf16.mxu0 %v9150_v14  ;;  %v9154_v59 = vld [vmem:[%s12872_s5 + $0x1d8] sm:$0xff]   ;;  %v11902_v40 = vadd.f32 %v4581_v48, %v4491_v32  ;;  %v4494_v20 = vadd.f32 %v4493_v24, %v11653_v42  ;;  %5875 = vmatmul.mubr.bf16.gmra.mrb[136].mxu1 %v11815_v38  ;;  %4880 = vst [vmem:[#allocation3 + $0x78] sm:$0xff] %v11886_v28 }
 0x471   : > { %v11897_v43 = vpack.c.bf16 %v5006_v3, %v5005_v31  ;;  %5084 = vst [vmem:[#allocation3 + $0x88] sm:$0xff] %v11888_v26  ;;  %5068 = vst [vmem:[#allocation3 + $0xb8] sm:$0xff] %v11888_v26  ;;  %vm4647_vm9 = vcmp.ge.f32.partialorder %v11893_v57, 1.0  ;;  %v11910_v3 = vadd.f32 %v4584_v5, %v4502_v22  ;;  %6028 = vmatmul.mubr.bf16.gmra.mrb[164].mxu0 %v11818_v30  ;;  %9246 = vmatprep.mubr.msk.bf16.mxu1 %vm9245_vm10, %v12948_v0  ;;  %v4587_v34 = vld [vmem:[#allocation6 + $0x90] sm:$0xff]  ;;  %v9156_v50 = vld [vmem:[%s12872_s5 + $0x198] sm:$0xff]  }
 0x472   : > { %4968 = vst [vmem:[#allocation3 + $0x140] sm:$0xff] %v4936_v6  ;;  %4984 = vst [vmem:[#allocation3 + $0x110] sm:$0xff] %v4936_v6  ;;  %v4679_v6 = vsel %vm4647_vm9, 0.0, %v11893_v57  ;;  %v4743_v30 = vsel %vm4647_vm9, 1.0, %v12947_v60  ;;  %vm4645_vm12 = vcmp.ge.f32.partialorder %v11902_v40, 1.0  ;;  %v11927_v42 = vadd.f32 %v4582_v47, %v4494_v20  ;;  %6035 = vmatprep.mubr.bf16.mxu0 %v11886_v28  ;;  %8542 = vmatpush3.bf16.msra.mxu0 %v9152_v62  ;;  %v4585_v1 = vld [vmem:[#allocation6 + $0x80] sm:$0xff] }
 0x473   : > { %5069 = vst [vmem:[#allocation3 + $0x100] sm:$0xff] %v11897_v43  ;;  %5085 = vst [vmem:[#allocation3 + $0xd0] sm:$0xff] %v11897_v43  ;;  %v4677_v21 = vsel %vm4645_vm12, 0.0, %v11902_v40  ;;  %v4741_v38 = vsel %vm4645_vm12, 1.0, %v12947_v60  ;;  %vm4648_vm13 = vcmp.ge.f32.partialorder %v11910_v3, 1.0  ;;  %v4805_v48 = vld [vmem:[#allocation2 + $0x90] sm:$0xff]  ;;  %8543 = vmatprep.subr.bf16.mxu0 %v9154_v59 }
 0x474   : > { %4969 = vst [vmem:[#allocation3 + $0x188] sm:$0xff] %v4937_v46  ;;  %4985 = vst [vmem:[#allocation3 + $0x158] sm:$0xff] %v4937_v46  ;;  %v4803_v10 = vld [vmem:[#allocation2 + $0x78] sm:$0xff]  ;;  %v9157_v14 = vld [vmem:[%s12872_s5 + $0x1e0] sm:$0xff]   ;;  %v4680_v12 = vsel %vm4648_vm13, 0.0, %v11910_v3  ;;  %v4744_v31 = vsel %vm4648_vm13, 1.0, %v12947_v60 }
 0x475   : > { %4711 = vst [vmem:[#allocation6 + $0x70] sm:$0xff] %v4679_v6  ;;  %4775 = vst [vmem:[#allocation2 + $0xc1] sm:$0xff] %v4743_v30  ;;  %vm4646_vm14 = vcmp.ge.f32.partialorder %v11927_v42, 1.0  ;;  %v8772_v13 = vpop.f32.mrb[144].mxu0  ;;  %v4806_v25 = vld [vmem:[#allocation2 + $0x98] sm:$0xff]  ;;  %v4588_v59 = vld [vmem:[#allocation6 + $0x98] sm:$0xff] }
 0x476   : > { %4709 = vst [vmem:[#allocation6 + $0x60] sm:$0xff] %v4677_v21  ;;  %4773 = vst [vmem:[#allocation2 + $0xa9] sm:$0xff] %v4741_v38  ;;  %v5009_v52 = vld [vmem:[#allocation2 + $0x92] sm:$0xff]  ;;  %v4678_v16 = vsel %vm4646_vm14, 0.0, %v11927_v42  ;;  %v4742_v39 = vsel %vm4646_vm14, 1.0, %v12947_v60  ;;  %v4515_v32 = vadd.f32 %v8772_v13, %v11683_v9  ;;  %v4506_v51 = vpop.f32.mrb[145].mxu0  ;;  %v11957_v62 = vpack.c.bf16 %v4806_v25, %v4805_v48  ;;  %8544 = vmatpush3.bf16.msra.mxu0 %v9156_v50 }
 0x477   : > { %4712 = vst [vmem:[#allocation6 + $0x78] sm:$0xff] %v4680_v12  ;;  %4776 = vst [vmem:[#allocation2 + $0xc9] sm:$0xff] %v4744_v31  ;;  %v4804_v5 = vld [vmem:[#allocation2 + $0x80] sm:$0xff]  ;;  %v4507_v47 = vadd.f32 %v4506_v51, %v11668_v54  ;;  %v8773_v46 = vpop.f32.mrb[146].mxu0  ;;  %v4938_v30 = vpack.c.bf16 %v4742_v39, %v4741_v38  ;;  %v4586_v13 = vld [vmem:[#allocation6 + $0x88] sm:$0xff]  ;;  %8545 = vmatprep.subr.bf16.mxu0 %v9157_v14 }
 0x478   : > { %v5007_v22 = vld [vmem:[#allocation2 + $0x7a] sm:$0xff]  ;;  %v5008_v24 = vld [vmem:[#allocation2 + $0x82] sm:$0xff]  ;;  %4710 = vst [vmem:[#allocation6 + $0x68] sm:$0xff] %v4678_v16  ;;  %4774 = vst [vmem:[#allocation2 + $0xb1] sm:$0xff] %v4742_v39  ;;  %v11960_v20 = vpack.c.bf16 %v4804_v5, %v4803_v10  ;;  %v11967_v48 = vadd.f32 %v4587_v34, %v4515_v32  ;;  %v4518_v12 = vadd.f32 %v8773_v46, %v11686_v33  ;;  %v4509_v31 = vpop.f32.mrb[147].mxu0  ;;  %5883 = vmatmul.mubr.bf16.gmra.mrb[140].mxu1 %v11886_v28 }
 0x479   : > { %v11962_v6 = vpack.c.bf16 %v5008_v24, %v5007_v22  ;;  %v5010_v21 = vld [vmem:[#allocation2 + $0x9a] sm:$0xff]  ;;  %4883 = vst [vmem:[#allocation3 + $0x150] sm:$0xff] %v11957_v62  ;;  %v9159_v38 = vld [vmem:[%s12872_s5 + $0x1e8] sm:$0xff]   ;;  %v11976_v50 = vadd.f32 %v4585_v1, %v4507_v47  ;;  %v4510_v10 = vadd.f32 %v4509_v31, %v11680_v58  ;;  %4970 = vst [vmem:[#allocation3 + $0x1d0] sm:$0xff] %v4938_v30  ;;  %6036 = vmatmul.mubr.bf16.gmra.mrb[168].mxu0 %v11827_v15 }
 0x47a   : > { %v9158_v9 = vld [vmem:[%s12872_s5 + $0x1a0] sm:$0xff]   ;;  %v11971_v54 = vpack.c.bf16 %v5010_v21, %v5009_v52  ;;  %4882 = vst [vmem:[#allocation3 + $0x108] sm:$0xff] %v11960_v20  ;;  %4986 = vst [vmem:[#allocation3 + $0x1a0] sm:$0xff] %v4938_v30  ;;  %vm4651_vm15 = vcmp.ge.f32.partialorder %v11967_v48, 1.0  ;;  %v11984_v33 = vadd.f32 %v4588_v59, %v4518_v12  ;;  %6043 = vmatprep.mubr.bf16.mxu0 %v11883_v56  ;;  %v9160_v15 = vld [vmem:[%s12872_s5 + $0x1a8] sm:$0xff]  }
 0x47b   : > { %5086 = vst [vmem:[#allocation3 + $0x118] sm:$0xff] %v11962_v6  ;;  %5070 = vst [vmem:[#allocation3 + $0x148] sm:$0xff] %v11962_v6  ;;  %v4683_v58 = vsel %vm4651_vm15, 0.0, %v11967_v48  ;;  %v4747_v28 = vsel %vm4651_vm15, 1.0, %v12947_v60  ;;  %vm4649_vm2 = vcmp.ge.f32.partialorder %v11976_v50, 1.0  ;;  %v12001_v35 = vadd.f32 %v4586_v13, %v4510_v10  ;;  %v4591_v49 = vld [vmem:[#allocation6 + $0xb0] sm:$0xff]  ;;  %8546 = vmatpush3.bf16.msra.mxu0 %v9158_v9 }
 0x47c   : > { %vm9247_vm5 = vmpackc.low %vm4640_vm3, %vm4639_vm1  ;;  %5071 = vst [vmem:[#allocation3 + $0x190] sm:$0xff] %v11971_v54  ;;  %v4681_v34 = vsel %vm4649_vm2, 0.0, %v11976_v50  ;;  %v4745_v1 = vsel %vm4649_vm2, 1.0, %v12947_v60  ;;  %vm4652_vm1 = vcmp.ge.f32.partialorder %v11984_v33, 1.0  ;;  %v4589_v14 = vld [vmem:[#allocation6 + $0xa0] sm:$0xff]  ;;  %v4809_v52 = vld [vmem:[#allocation2 + $0xc0] sm:$0xff]  ;;  %8547 = vmatprep.subr.bf16.mxu0 %v9159_v38 }
 0x47d   : > { %9248 = vmatprep.mubr.msk.bf16.mxu1 %vm9247_vm5, %v12948_v0  ;;  %5087 = vst [vmem:[#allocation3 + $0x160] sm:$0xff] %v11971_v54  ;;  %4715 = vst [vmem:[#allocation6 + $0x90] sm:$0xff] %v4683_v58  ;;  %v4807_v25 = vld [vmem:[#allocation2 + $0xa8] sm:$0xff]  ;;  %v9161_v16 = vld [vmem:[%s12872_s5 + $0x1f0] sm:$0xff]   ;;  %v4684_v39 = vsel %vm4652_vm1, 0.0, %v11984_v33  ;;  %v4748_v32 = vsel %vm4652_vm1, 1.0, %v12947_v60 }
 0x47e   : > { %4779 = vst [vmem:[#allocation2 + $0xf1] sm:$0xff] %v4747_v28  ;;  %4713 = vst [vmem:[#allocation6 + $0x80] sm:$0xff] %v4681_v34  ;;  %vm4650_vm3 = vcmp.ge.f32.partialorder %v12001_v35, 1.0  ;;  %v8776_v51 = vpop.f32.mrb[148].mxu0  ;;  %v4810_v5 = vld [vmem:[#allocation2 + $0xc8] sm:$0xff] }
 0x47f   : > { %4777 = vst [vmem:[#allocation2 + $0xd9] sm:$0xff] %v4745_v1  ;;  %v5013_v22 = vld [vmem:[#allocation2 + $0xc2] sm:$0xff]  ;;  %4716 = vst [vmem:[#allocation6 + $0x98] sm:$0xff] %v4684_v39  ;;  %v4682_v24 = vsel %vm4650_vm3, 0.0, %v12001_v35  ;;  %v4746_v47 = vsel %vm4650_vm3, 1.0, %v12947_v60  ;;  %v4531_v46 = vadd.f32 %v8776_v51, %v11701_v63  ;;  %v4522_v59 = vpop.f32.mrb[149].mxu0  ;;  %v12031_v21 = vpack.c.bf16 %v4810_v5, %v4809_v52  ;;  %8548 = vmatpush3.bf16.msra.mxu0 %v9160_v15 }
 0x480   : > { %4780 = vst [vmem:[#allocation2 + $0xf9] sm:$0xff] %v4748_v32  ;;  %v4808_v30 = vld [vmem:[#allocation2 + $0xb0] sm:$0xff]  ;;  %4714 = vst [vmem:[#allocation6 + $0x88] sm:$0xff] %v4682_v24  ;;  %v4523_v31 = vadd.f32 %v4522_v59, %v11689_v7  ;;  %v8777_v13 = vpop.f32.mrb[150].mxu0  ;;  %v4592_v38 = vld [vmem:[#allocation6 + $0xb8] sm:$0xff]  ;;  %8549 = vmatprep.subr.bf16.mxu0 %v9161_v16  ;;  %5891 = vmatmul.mubr.bf16.gmra.mrb[144].mxu1 %v11883_v56 }
 0x481   : > { %v5011_v9 = vld [vmem:[#allocation2 + $0xaa] sm:$0xff]  ;;  %v5012_v12 = vld [vmem:[#allocation2 + $0xb2] sm:$0xff]  ;;  %4778 = vst [vmem:[#allocation2 + $0xe1] sm:$0xff] %v4746_v47  ;;  %v12034_v10 = vpack.c.bf16 %v4808_v30, %v4807_v25  ;;  %v12041_v34 = vadd.f32 %v4591_v49, %v4531_v46  ;;  %v4534_v1 = vadd.f32 %v8777_v13, %v11704_v45  ;;  %v4525_v52 = vpop.f32.mrb[151].mxu0  ;;  %4885 = vst [vmem:[#allocation3 + $0x1e0] sm:$0xff] %v12031_v21  ;;  %6044 = vmatmul.mubr.bf16.gmra.mrb[172].mxu0 %v11888_v26 }
 0x482   : > { %v12036_v58 = vpack.c.bf16 %v5012_v12, %v5011_v9  ;;  %v5014_v28 = vld [vmem:[#allocation2 + $0xca] sm:$0xff]  ;;  %v4590_v39 = vld [vmem:[#allocation6 + $0xa8] sm:$0xff]  ;;  %v12050_v15 = vadd.f32 %v4589_v14, %v4523_v31  ;;  %v4526_v32 = vadd.f32 %v4525_v52, %v11698_v55  ;;  %vm12064_vm7 = vmpackc.low %vm4642_vm0, %vm4641_vm8  ;;  %6051 = vmatprep.mubr.bf16.mxu0 %v11960_v20 }
 0x483   : > { %v9163_v63 = vld [vmem:[%s12872_s5 + $0x1b0] sm:$0xff]   ;;  %v12045_v7 = vpack.c.bf16 %v5014_v28, %v5013_v22  ;;  %v9164_v25 = vld [vmem:[%s12872_s5 + $0x1f8] sm:$0xff]   ;;  %4884 = vst [vmem:[#allocation3 + $0x198] sm:$0xff] %v12034_v10  ;;  %vm4655_vm4 = vcmp.ge.f32.partialorder %v12041_v34, 1.0  ;;  %v12057_v45 = vadd.f32 %v4592_v38, %v4534_v1  ;;  %9250 = vmatprep.mubr.msk.bf16.mxu1 %vm12064_vm7, %v12948_v0  ;;  %v4595_v56 = vld [vmem:[#allocation6 + $0xd0] sm:$0xff]  ;;  %v8780_v59 = vpop.f32.mrb[152].mxu0 }
 0x484   : > { %5088 = vst [vmem:[#allocation3 + $0x1a8] sm:$0xff] %v12036_v58  ;;  %v4687_v55 = vsel %vm4655_vm4, 0.0, %v12041_v34  ;;  %v4751_v2 = vsel %vm4655_vm4, 1.0, %v12947_v60  ;;  %vm4653_vm10 = vcmp.ge.f32.partialorder %v12050_v15, 1.0  ;;  %v12079_v19 = vadd.f32 %v4590_v39, %v4526_v32  ;;  %8550 = vmatpush3.bf16.msra.mxu0 %v9163_v63  ;;  %v9165_v14 = vld [vmem:[%s12872_s5 + $0x1b8] sm:$0xff]   ;;  %v4593_v5 = vld [vmem:[#allocation6 + $0xc0] sm:$0xff] }
 0x485   : > { %5089 = vst [vmem:[#allocation3 + $0x1f0] sm:$0xff] %v12045_v7  ;;  %4719 = vst [vmem:[#allocation6 + $0xb0] sm:$0xff] %v4687_v55  ;;  %v4685_v16 = vsel %vm4653_vm10, 0.0, %v12050_v15  ;;  %v4749_v51 = vsel %vm4653_vm10, 1.0, %v12947_v60  ;;  %vm12899_vm8 = vcmp.ge.f32.partialorder %v12057_v45, 1.0  ;;  %v4813_v24 = vld [vmem:[#allocation2 + $0xf0] sm:$0xff]  ;;  %8551 = vmatprep.subr.bf16.mxu0 %v9164_v25  ;;  %v4547_v13 = vadd.f32 %v8780_v59, %v11719_v11 }
 0x486   : > { %4783 = vst [vmem:[#allocation2 + $0x121] sm:$0xff] %v4751_v2  ;;  %v4811_v22 = vld [vmem:[#allocation2 + $0xd8] sm:$0xff]  ;;  %4717 = vst [vmem:[#allocation6 + $0xa0] sm:$0xff] %v4685_v16  ;;  %v4688_v47 = vsel %vm12899_vm8, 0.0, %v12057_v45  ;;  %v4752_v46 = vsel %vm12899_vm8, 1.0, %v12947_v60  ;;  %vm4654_vm0 = vcmp.ge.f32.partialorder %v12079_v19, 1.0 }
 0x487   : > { %4781 = vst [vmem:[#allocation2 + $0x109] sm:$0xff] %v4749_v51  ;;  %v4814_v30 = vld [vmem:[#allocation2 + $0xf8] sm:$0xff]  ;;  %4720 = vst [vmem:[#allocation6 + $0xb8] sm:$0xff] %v4688_v47  ;;  %v4686_v12 = vsel %vm4654_vm0, 0.0, %v12079_v19  ;;  %v4750_v31 = vsel %vm4654_vm0, 1.0, %v12947_v60  ;;  %v4538_v38 = vpop.f32.mrb[153].mxu0  ;;  %v12113_v47 = vadd.f32 %v4595_v56, %v4547_v13 }
 0x488   : > { %v5017_v9 = vld [vmem:[#allocation2 + $0xf2] sm:$0xff]  ;;  %4784 = vst [vmem:[#allocation2 + $0x129] sm:$0xff] %v4752_v46  ;;  %v4812_v28 = vld [vmem:[#allocation2 + $0xe0] sm:$0xff]  ;;  %v12106_v63 = vpack.c.bf16 %v4814_v30, %v4813_v24  ;;  %4718 = vst [vmem:[#allocation6 + $0xa8] sm:$0xff] %v4686_v12  ;;  %v4539_v39 = vadd.f32 %v4538_v38, %v11707_v18  ;;  %v8781_v25 = vpop.f32.mrb[154].mxu0  ;;  %8552 = vmatpush3.bf16.msra.mxu0 %v9165_v14  ;;  %v4943_v12 = vpack.c.bf16 %v4752_v46, %v4751_v2 }
 0x489   : > { %v5015_v1 = vld [vmem:[#allocation2 + $0xda] sm:$0xff]  ;;  %v5016_v52 = vld [vmem:[#allocation2 + $0xe2] sm:$0xff]  ;;  %4782 = vst [vmem:[#allocation2 + $0x111] sm:$0xff] %v4750_v31  ;;  %v12109_v55 = vpack.c.bf16 %v4812_v28, %v4811_v22  ;;  %v4550_v11 = vadd.f32 %v8781_v25, %v11722_v36  ;;  %v4541_v24 = vpop.f32.mrb[155].mxu0  ;;  %5899 = vmatmul.mubr.bf16.gmra.mrb[148].mxu1 %v11960_v20  ;;  %vm12900_vm5 = vcmp.ge.f32.partialorder %v12113_v47, 1.0  ;;  %6052 = vmatmul.mubr.bf16.gmra.mrb[176].mxu0 %v11897_v43  ;;  %vm12131_vm8 = vmpackc.low %vm4644_vm11, %vm4643_vm6 }
 0x48a   : > { %v4596_v32 = vld [vmem:[#allocation6 + $0xd8] sm:$0xff]  ;;  %v12111_v16 = vpack.c.bf16 %v5016_v52, %v5015_v1  ;;  %v5018_v51 = vld [vmem:[#allocation2 + $0xfa] sm:$0xff]  ;;  %v12118_v31 = vadd.f32 %v4593_v5, %v4539_v39  ;;  %v4542_v18 = vadd.f32 %v4541_v24, %v11716_v37  ;;  %9252 = vmatprep.mubr.msk.bf16.mxu1 %vm12131_vm8, %v12948_v0  ;;  %4975 = vst [vmem:[#allocation3 + $0x338] sm:$0xff] %v4943_v12  ;;  %4991 = vst [vmem:[#allocation3 + $0x308] sm:$0xff] %v4943_v12 }
 0x48b   : > { %v4594_v59 = vld [vmem:[#allocation6 + $0xc8] sm:$0xff]  ;;  %v12116_v30 = vpack.c.bf16 %v5018_v51, %v5017_v9  ;;  %v12124_v14 = vadd.f32 %v4596_v32, %v4550_v11  ;;  %v4691_v37 = vsel %vm12900_vm5, 0.0, %v12113_v47  ;;  %v4755_v17 = vsel %vm12900_vm5, 1.0, %v12947_v60  ;;  %v4599_v2 = vld [vmem:[#allocation6 + $0xf0] sm:$0xff]  ;;  %6059 = vmatprep.mubr.bf16.mxu0 %v11957_v62  ;;  %v4597_v22 = vld [vmem:[#allocation6 + $0xe0] sm:$0xff]  ;;  %v8784_v28 = vpop.f32.mrb[156].mxu0 }
 0x48c   : > { %5090 = vst [vmem:[#allocation3 + $0x238] sm:$0xff] %v12111_v16  ;;  %vm12906_vm6 = vcmp.ge.f32.partialorder %v12118_v31, 1.0  ;;  %v12146_v61 = vadd.f32 %v4594_v59, %v4542_v18  ;;  %4723 = vst [vmem:[#allocation6 + $0xd0] sm:$0xff] %v4691_v37  ;;  %v4563_v32 = vadd.f32 %v8784_v28, %v11745_v41  ;;  %v4554_v51 = vpop.f32.mrb[157].mxu0 }
 0x48d   : > { %5091 = vst [vmem:[#allocation3 + $0x280] sm:$0xff] %v12116_v30  ;;  %4787 = vst [vmem:[#allocation2 + $0x151] sm:$0xff] %v4755_v17  ;;  %v4689_v56 = vsel %vm12906_vm6, 0.0, %v12118_v31  ;;  %v4753_v5 = vsel %vm12906_vm6, 1.0, %v12947_v60  ;;  %vm12904_vm11 = vcmp.ge.f32.partialorder %v12124_v14, 1.0  ;;  %v4817_v9 = vld [vmem:[#allocation2 + $0x120] sm:$0xff]  ;;  %v4555_v18 = vadd.f32 %v4554_v51, %v11725_v27 }
 0x48e   : > { %v4815_v46 = vld [vmem:[#allocation2 + $0x108] sm:$0xff]  ;;  %4721 = vst [vmem:[#allocation6 + $0xc0] sm:$0xff] %v4689_v56  ;;  %4785 = vst [vmem:[#allocation2 + $0x139] sm:$0xff] %v4753_v5  ;;  %v4692_v13 = vsel %vm12904_vm11, 0.0, %v12124_v14  ;;  %v4756_v38 = vsel %vm12904_vm11, 1.0, %v12947_v60  ;;  %vm12905_vm5 = vcmp.ge.f32.partialorder %v12146_v61, 1.0  ;;  %v4631_v23 = vadd.f32 %v4599_v2, %v4563_v32 }
 0x48f   : > { %v4818_v1 = vld [vmem:[#allocation2 + $0x128] sm:$0xff]  ;;  %4724 = vst [vmem:[#allocation6 + $0xd8] sm:$0xff] %v4692_v13  ;;  %4788 = vst [vmem:[#allocation2 + $0x159] sm:$0xff] %v4756_v38  ;;  %v4690_v39 = vsel %vm12905_vm5, 0.0, %v12146_v61  ;;  %v4754_v25 = vsel %vm12905_vm5, 1.0, %v12947_v60  ;;  %v8785_v37 = vpop.f32.mrb[158].mxu0  ;;  %v4945_v27 = vpack.c.bf16 %v4756_v38, %v4755_v17 }
 0x490   : > { %v5021_v52 = vld [vmem:[#allocation2 + $0x122] sm:$0xff]  ;;  %v4816_v11 = vld [vmem:[#allocation2 + $0x110] sm:$0xff]  ;;  %v12170_v24 = vpack.c.bf16 %v4818_v1, %v4817_v9  ;;  %4722 = vst [vmem:[#allocation6 + $0xc8] sm:$0xff] %v4690_v39  ;;  %4786 = vst [vmem:[#allocation2 + $0x141] sm:$0xff] %v4754_v25  ;;  %v4944_v44 = vpack.c.bf16 %v4754_v25, %v4753_v5  ;;  %v4566_v41 = vadd.f32 %v8785_v37, %v11757_v29  ;;  %v4557_v28 = vpop.f32.mrb[159].mxu0  ;;  %vm4663_vm11 = vcmp.ge.f32.partialorder %v4631_v23, 1.0 }
 0x491   : > { %v5019_v59 = vld [vmem:[#allocation2 + $0x10a] sm:$0xff]  ;;  %v5020_v12 = vld [vmem:[#allocation2 + $0x112] sm:$0xff]  ;;  %v12173_v13 = vpack.c.bf16 %v4816_v11, %v4815_v46  ;;  %v12182_v39 = vadd.f32 %v4597_v22, %v4555_v18  ;;  %v4558_v46 = vadd.f32 %v4557_v28, %v11734_v53  ;;  %5907 = vmatmul.mubr.bf16.gmra.mrb[152].mxu1 %v11957_v62  ;;  %6060 = vmatmul.mubr.bf16.gmra.mrb[180].mxu0 %v11962_v6  ;;  %vm12192_vm5 = vmpackc.low %vm4646_vm14, %vm4645_vm12  ;;  %v4759_v53 = vsel %vm4663_vm11, 1.0, %v12947_v60 }
 0x492   : > { %v4600_v56 = vld [vmem:[#allocation6 + $0xf8] sm:$0xff]  ;;  %v12175_v4 = vpack.c.bf16 %v5020_v12, %v5019_v59  ;;  %v4598_v9 = vld [vmem:[#allocation6 + $0xe8] sm:$0xff]  ;;  %4873 = vst [vmem:[#allocation3 + $0x330] sm:$0xff] %v12170_v24  ;;  %4889 = vst [vmem:[#allocation3 + $0x300] sm:$0xff] %v12170_v24  ;;  %9254 = vmatprep.mubr.msk.bf16.mxu1 %vm12192_vm5, %v12948_v0  ;;  %6067 = vmatprep.mubr.bf16.mxu0 %v12034_v10 }
 0x493   : > { %v5022_v8 = vld [vmem:[#allocation2 + $0x12a] sm:$0xff]  ;;  %4976 = vst [vmem:[#allocation3 + $0x380] sm:$0xff] %v4944_v44  ;;  %4992 = vst [vmem:[#allocation3 + $0x350] sm:$0xff] %v4944_v44  ;;  %v4632_v29 = vadd.f32 %v4600_v56, %v4566_v41  ;;  %v4695_v44 = vsel %vm4663_vm11, 0.0, %v4631_v23  ;;  %vm4661_vm6 = vcmp.ge.f32.partialorder %v12182_v39, 1.0  ;;  %v12202_v40 = vadd.f32 %v4598_v9, %v4558_v46 }
 0x494   : > { %v12180_v1 = vpack.c.bf16 %v5022_v8, %v5021_v52  ;;  %5092 = vst [vmem:[#allocation3 + $0x2c8] sm:$0xff] %v12175_v4  ;;  %4977 = vst [vmem:[#allocation3 + $0x3c8] sm:$0xff] %v4945_v27  ;;  %v4693_v42 = vsel %vm4661_vm6, 0.0, %v12182_v39  ;;  %v4757_v17 = vsel %vm4661_vm6, 1.0, %v12947_v60  ;;  %v4821_v2 = vld [vmem:[#allocation2 + $0x150] sm:$0xff]  ;;  %v5113_v39 = vld [vmem:[#allocation3 + $0x70] sm:$0xff] }
 0x495   : > { %4993 = vst [vmem:[#allocation3 + $0x398] sm:$0xff] %v4945_v27  ;;  %4727 = vst [vmem:[#allocation6 + $0xf0] sm:$0xff] %v4695_v44  ;;  %vm4664_vm12 = vcmp.ge.f32.partialorder %v4632_v29, 1.0  ;;  %v4819_v23 = vld [vmem:[#allocation2 + $0x138] sm:$0xff]  ;;  %vm4662_vm14 = vcmp.ge.f32.partialorder %v12202_v40, 1.0 }
 0x496   : > { %5093 = vst [vmem:[#allocation3 + $0x310] sm:$0xff] %v12180_v1  ;;  %4791 = vst [vmem:[#allocation2 + $0x181] sm:$0xff] %v4759_v53  ;;  %v4696_v5 = vsel %vm4664_vm12, 0.0, %v4632_v29  ;;  %v4760_v22 = vsel %vm4664_vm12, 1.0, %v12947_v60  ;;  %v4822_v38 = vld [vmem:[#allocation2 + $0x158] sm:$0xff]  ;;  %v4694_v32 = vsel %vm4662_vm14, 0.0, %v12202_v40 }
 0x497   : > { %4725 = vst [vmem:[#allocation6 + $0xe0] sm:$0xff] %v4693_v42  ;;  %4789 = vst [vmem:[#allocation2 + $0x169] sm:$0xff] %v4757_v17  ;;  %v5025_v52 = vld [vmem:[#allocation2 + $0x152] sm:$0xff]  ;;  %v5026_v25 = vld [vmem:[#allocation2 + $0x15a] sm:$0xff]  ;;  %v4758_v51 = vsel %vm4662_vm14, 1.0, %v12947_v60  ;;  %v12219_v59 = vpack.c.bf16 %v4822_v38, %v4821_v2  ;;  %vm12971_vm12 = vcmp.ge.f32.partialorder %v12124_v14, 1.0 }
 0x498   : > { %4728 = vst [vmem:[#allocation6 + $0xf8] sm:$0xff] %v4696_v5  ;;  %4792 = vst [vmem:[#allocation2 + $0x189] sm:$0xff] %v4760_v22  ;;  %v4820_v11 = vld [vmem:[#allocation2 + $0x140] sm:$0xff]  ;;  %v12221_v37 = vpack.c.bf16 %v5026_v25, %v5025_v52  ;;  %v4946_v28 = vpack.c.bf16 %v4758_v51, %v4757_v17  ;;  %v5103_v14 = vld [vmem:[#allocation3 + $0x20] sm:$0xff] }
 0x499   : > { %v5023_v12 = vld [vmem:[#allocation2 + $0x13a] sm:$0xff]  ;;  %v5024_v18 = vld [vmem:[#allocation2 + $0x142] sm:$0xff]  ;;  %4726 = vst [vmem:[#allocation6 + $0xe8] sm:$0xff] %v4694_v32  ;;  %4790 = vst [vmem:[#allocation2 + $0x171] sm:$0xff] %v4758_v51  ;;  %v12223_v56 = vpack.c.bf16 %v4820_v11, %v4819_v23  ;;  %5915 = vmatmul.mubr.bf16.gmra.mrb[156].mxu1 %v12034_v10  ;;  %6068 = vmatmul.mubr.bf16.gmra.mrb[184].mxu0 %v11971_v54 }
 0x49a   : > { %v12225_v41 = vpack.c.bf16 %v5024_v18, %v5023_v12  ;;  %4891 = vst [vmem:[#allocation3 + $0x390] sm:$0xff] %v12219_v59  ;;  %4978 = vst [vmem:[#allocation3 + $0x410] sm:$0xff] %v4946_v28  ;;  %6075 = vmatprep.mubr.bf16.mxu0 %v12031_v21  ;;  %v5106_v40 = vld [vmem:[#allocation3 + $0x38] sm:$0xff]  ;;  %v9174_v12 = vld [vmem:[%s12872_s5 + $0x200] sm:$0xff]  }
 0x49b   : > { %4874 = vst [vmem:[#allocation3 + $0x378] sm:$0xff] %v12223_v56  ;;  %4890 = vst [vmem:[#allocation3 + $0x348] sm:$0xff] %v12223_v56  ;;  %v9167_v18 = vld [vmem:[%s12872_s5 + $0x210] sm:$0xff]  }
 0x49c   : > { %5094 = vst [vmem:[#allocation3 + $0x358] sm:$0xff] %v12225_v41  ;;  %4994 = vst [vmem:[#allocation3 + $0x3e0] sm:$0xff] %v4946_v28  ;;  %v5112_v28 = vld [vmem:[#allocation3 + $0x68] sm:$0xff] }
 0x49d   : > { %vm12237_vm11 = vmpackc.low %vm4648_vm13, %vm4647_vm9  ;;  %v4825_v46 = vld [vmem:[#allocation2 + $0x180] sm:$0xff] }
 0x49e   : > { %9256 = vmatprep.mubr.msk.bf16.mxu1 %vm12237_vm11, %v12948_v0  ;;  %v4823_v27 = vld [vmem:[#allocation2 + $0x168] sm:$0xff]  ;;  %vm12262_vm9 = vmpackc.low %vm4650_vm3, %vm4649_vm2  ;;  %vm12966_vm3 = vcmp.ge.f32.partialorder %v12118_v31, 1.0  ;;  %v5104_v31 = vld [vmem:[#allocation3 + $0x28] sm:$0xff] }
 0x49f   : > { %v4826_v29 = vld [vmem:[#allocation2 + $0x188] sm:$0xff]  ;;  %vm12276_vm13 = vmpackc.low %vm4652_vm1, %vm4651_vm15  ;;  %vm12963_vm15 = vcmp.ge.f32.partialorder %v12057_v45, 1.0 }
 0x4a0   : > { %v5029_v44 = vld [vmem:[#allocation2 + $0x182] sm:$0xff]  ;;  %v5030_v53 = vld [vmem:[#allocation2 + $0x18a] sm:$0xff]  ;;  %v12245_v17 = vpack.c.bf16 %v4826_v29, %v4825_v46  ;;  %v5028_v3 = vld [vmem:[#allocation2 + $0x172] sm:$0xff] }
 0x4a1   : > { %v4824_v42 = vld [vmem:[#allocation2 + $0x170] sm:$0xff]  ;;  %v12247_v23 = vpack.c.bf16 %v5030_v53, %v5029_v44  ;;  %v4927_v22 = vld [vmem:[#allocation2 + $0x181] sm:$0xff]  ;;  %5923 = vmatmul.mubr.bf16.gmra.mrb[160].mxu1 %v12031_v21  ;;  %6076 = vmatmul.mubr.bf16.gmra.mrb[188].mxu0 %v12036_v58  ;;  %vm12290_vm2 = vmpackc.low %vm4654_vm0, %vm4653_vm10  ;;  %vm12970_vm0 = vcmp.ge.f32.partialorder %v12113_v47, 1.0 }
 0x4a2   : > { %v5027_v57 = vld [vmem:[#allocation2 + $0x16a] sm:$0xff]  ;;  %v12249_v2 = vpack.c.bf16 %v4824_v42, %v4823_v27  ;;  %9258 = vmatprep.mubr.msk.bf16.mxu1 %vm12262_vm9, %v12948_v0  ;;  %6083 = vmatprep.mubr.bf16.mxu0 %v12109_v55  ;;  %vm12304_vm1 = vmpackc.low %vm12963_vm15, %vm4655_vm4  ;;  %vm12967_vm4 = vcmp.ge.f32.partialorder %v12146_v61, 1.0  ;;  %v9168_v27 = vld [vmem:[%s12872_s5 + $0x218] sm:$0xff]  }
 0x4a3   : > { %v12251_v5 = vpack.c.bf16 %v5028_v3, %v5027_v57  ;;  %v4928_v38 = vld [vmem:[#allocation2 + $0x189] sm:$0xff]  ;;  %vm12322_vm10 = vmpackc.low %vm12967_vm4, %vm12966_vm3  ;;  %v5105_v46 = vld [vmem:[#allocation3 + $0x30] sm:$0xff] }
 0x4a4   : > { %v12253_v52 = vpack.c.bf16 %v4928_v38, %v4927_v22  ;;  %4892 = vst [vmem:[#allocation3 + $0x3d8] sm:$0xff] %v12249_v2  ;;  %vm12336_vm15 = vmpackc.low %vm12971_vm12, %vm12970_vm0  ;;  %v9166_v61 = vld [vmem:[%s12872_s5 + $0x208] sm:$0xff]   ;;  %v5115_v29 = vld [vmem:[#allocation3 + $0x80] sm:$0xff] }
 0x4a5   : > { %vm12350_vm3 = vmpackc.low %vm4662_vm14, %vm4661_vm6  ;;  %v9169_v44 = vld [vmem:[%s12872_s5 + $0x220] sm:$0xff]   ;;  %v9170_v42 = vld [vmem:[%s12872_s5 + $0x228] sm:$0xff]  }
 0x4a6   : > { %v5121_v53 = vld [vmem:[#allocation3 + $0xb0] sm:$0xff]  ;;  %v5114_v57 = vld [vmem:[#allocation3 + $0x78] sm:$0xff]  ;;  %v9171_v3 = vld [vmem:[%s12872_s5 + $0x230] sm:$0xff]  }
 0x4a7   : > { %v5130_v22 = vld [vmem:[#allocation3 + $0xf8] sm:$0xff]  ;;  %v9172_v38 = vld [vmem:[%s12872_s5 + $0x238] sm:$0xff]  }
 0x4a9   : > { %5931 = vmatmul.mubr.bf16.gmra.mrb[164].mxu1 %v12109_v55  ;;  %6084 = vmatmul.mubr.bf16.gmra.mrb[192].mxu0 %v12045_v7 }
 0x4aa   : > { %9260 = vmatprep.mubr.msk.bf16.mxu1 %vm12276_vm13, %v12948_v0  ;;  %6091 = vmatprep.mubr.bf16.mxu0 %v12106_v63 }
 0x4b1   : > { %5939 = vmatmul.mubr.bf16.gmra.mrb[168].mxu1 %v12106_v63  ;;  %6092 = vmatmul.mubr.bf16.gmra.mrb[196].mxu0 %v12111_v16 }
 0x4b2   : > { %9262 = vmatprep.mubr.msk.bf16.mxu1 %vm12290_vm2, %v12948_v0  ;;  %6099 = vmatprep.mubr.bf16.mxu0 %v12173_v13 }
 0x4b3   : > { %v8217_v33 = vpop.f32.mrb[128].mxu1 }
 0x4b4   : > { %v8218_v35 = vpop.f32.mrb[129].mxu1 }
 0x4b5   : > { %v12311_v19 = vadd.f32 %v8218_v35, %v8217_v33  ;;  %v8220_v32 = vpop.f32.mrb[130].mxu1  ;;  %v5123_v33 = vld [vmem:[#allocation3 + $0xc0] sm:$0xff] }
 0x4b6   : > { %v8221_v51 = vpop.f32.mrb[131].mxu1 }
 0x4b7   : > { %v12314_v11 = vadd.f32 %v8221_v51, %v8220_v32 }
 0x4b9   : > { %5947 = vmatmul.mubr.bf16.gmra.mrb[172].mxu1 %v12173_v13  ;;  %6100 = vmatmul.mubr.bf16.gmra.mrb[200].mxu0 %v12116_v30 }
 0x4ba   : > { %9264 = vmatprep.mubr.msk.bf16.mxu1 %vm12304_vm1, %v12948_v0  ;;  %6107 = vmatprep.mubr.bf16.mxu0 %v12170_v24 }
 0x4c1   : > { %5955 = vmatmul.mubr.bf16.gmra.mrb[176].mxu1 %v12170_v24  ;;  %6108 = vmatmul.mubr.bf16.gmra.mrb[204].mxu0 %v12175_v4 }
 0x4c2   : > { %9266 = vmatprep.mubr.msk.bf16.mxu1 %vm12322_vm10, %v12948_v0  ;;  %6115 = vmatprep.mubr.bf16.mxu0 %v12223_v56 }
 0x4c9   : > { %5963 = vmatmul.mubr.bf16.gmra.mrb[180].mxu1 %v12223_v56  ;;  %6116 = vmatmul.mubr.bf16.gmra.mrb[208].mxu0 %v12180_v1 }
 0x4ca   : > { %9268 = vmatprep.mubr.msk.bf16.mxu1 %vm12336_vm15, %v12948_v0  ;;  %6123 = vmatprep.mubr.bf16.mxu0 %v12219_v59 }
 0x4d1   : > { %5971 = vmatmul.mubr.bf16.gmra.mrb[184].mxu1 %v12219_v59  ;;  %6124 = vmatmul.mubr.bf16.gmra.mrb[212].mxu0 %v12225_v41 }
 0x4d2   : > { %9270 = vmatprep.mubr.msk.bf16.mxu1 %vm12350_vm3, %v12948_v0  ;;  %6131 = vmatprep.mubr.bf16.mxu0 %v12249_v2 }
 0x4d9   : > { %5979 = vmatmul.mubr.bf16.gmra.mrb[188].mxu1 %v12249_v2  ;;  %6132 = vmatmul.mubr.bf16.gmra.mrb[216].mxu0 %v12221_v37 }
 0x4da   : > { %6180 = vmatprep.mubr.bf16.mxu1 %v5104_v31  ;;  %6139 = vmatprep.mubr.bf16.mxu0 %v12245_v17 }
 0x4e1   : > { %6181 = vmatmul.mubr.bf16.vlgmr.msra.gmra.mrb[192].mxu1 %v5103_v14  ;;  %6140 = vmatmul.mubr.bf16.gmra.mrb[220].mxu0 %v12251_v5 }
 0x4e2   : > { %6188 = vmatprep.mubr.bf16.mxu1 %v5113_v39  ;;  %6341 = vmatprep.mubr.bf16.mxu0 %v5106_v40 }
 0x4e3   : > { %8787 = vmatpush3.bf16.msra.mxu1 %v9174_v12 }
 0x4e4   : > { %8788 = vmatprep.subr.bf16.mxu1 %v9166_v61 }
 0x4e7   : > { %8789 = vmatpush3.bf16.msra.mxu1 %v9166_v61 }
 0x4e8   : > { %8790 = vmatprep.subr.bf16.mxu1 %v9167_v18 }
 0x4e9   : > { %6189 = vmatmul.mubr.bf16.gmra.mrb[196].mxu1 %v5112_v28  ;;  %6342 = vmatmul.mubr.bf16.vlgmr.msra.gmra.mrb[224].mxu0 %v5105_v46 }
 0x4ea   : > { %6196 = vmatprep.mubr.bf16.mxu1 %v11888_v26  ;;  %6349 = vmatprep.mubr.bf16.mxu0 %v5115_v29  ;;  %v5124_v26 = vld [vmem:[#allocation3 + $0xc8] sm:$0xff] }
 0x4eb   : > { %8791 = vmatpush3.bf16.msra.mxu1 %v9167_v18 }
 0x4ec   : > { %8792 = vmatprep.subr.bf16.mxu1 %v9168_v27 }
 0x4ef   : > { %8793 = vmatpush3.bf16.msra.mxu1 %v9168_v27 }
 0x4f0   : > { %8794 = vmatprep.subr.bf16.mxu1 %v9169_v44 }
 0x4f1   : > { %6197 = vmatmul.mubr.bf16.gmra.mrb[200].mxu1 %v5121_v53  ;;  %6350 = vmatmul.mubr.bf16.gmra.mrb[228].mxu0 %v5114_v57 }
 0x4f2   : > { %6204 = vmatprep.mubr.bf16.mxu1 %v11897_v43  ;;  %6357 = vmatprep.mubr.bf16.mxu0 %v5124_v26  ;;  %v12459_v43 = vld [vmem:[%s12873_s6] ss:$0 sm:$0xff] }
 0x4f3   : > { %8795 = vmatpush3.bf16.msra.mxu1 %v9169_v44 }
 0x4f4   : > { %8796 = vmatprep.subr.bf16.mxu1 %v9170_v42 }
 0x4f7   : > { %8797 = vmatpush3.bf16.msra.mxu1 %v9170_v42 }
 0x4f8   : > { %8798 = vmatprep.subr.bf16.mxu1 %v9171_v3 }
 0x4f9   : > { %6205 = vmatmul.mubr.bf16.gmra.mrb[204].mxu1 %v5130_v22  ;;  %6358 = vmatmul.mubr.bf16.gmra.mrb[232].mxu0 %v5123_v33 }
 0x4fa   : > { %6212 = vmatprep.mubr.bf16.mxu1 %v11962_v6  ;;  %9272 = vmatprep.mubr.msk.bf16.mxu0 %vm12064_vm7, %v12948_v0 }
 0x4fb   : > { %8799 = vmatpush3.bf16.msra.mxu1 %v9171_v3 }
 0x4fc   : > { %8800 = vmatprep.subr.bf16.mxu1 %v9172_v38 }
 0x4ff   : > { %8801 = vmatpush3.bf16.msra.mxu1 %v9172_v38 }
 0x501   : > { %9274 = vmatmul.mubr.msk.bf16.gmra.mrb[208].mxu1 %vm12064_vm7, %v12948_v0  ;;  %6366 = vmatmul.mubr.bf16.gmra.mrb[236].mxu0 %v11960_v20 }
 0x502   : > { %6220 = vmatprep.mubr.bf16.mxu1 %v11971_v54  ;;  %9276 = vmatprep.mubr.msk.bf16.mxu0 %vm12131_vm8, %v12948_v0 }
 0x509   : > { %9278 = vmatmul.mubr.msk.bf16.gmra.mrb[212].mxu1 %vm12131_vm8, %v12948_v0  ;;  %6374 = vmatmul.mubr.bf16.gmra.mrb[240].mxu0 %v11957_v62 }
 0x50a   : > { %6228 = vmatprep.mubr.bf16.mxu1 %v12036_v58  ;;  %9280 = vmatprep.mubr.msk.bf16.mxu0 %vm12192_vm5, %v12948_v0  ;;  %v5861_v58 = vadd.f32 %v12311_v19, %v12459_v43 }
 0x511   : > { %9282 = vmatmul.mubr.msk.bf16.gmra.mrb[216].mxu1 %vm12192_vm5, %v12948_v0  ;;  %6382 = vmatmul.mubr.bf16.gmra.mrb[244].mxu0 %v12034_v10 }
 0x512   : > { %6236 = vmatprep.mubr.bf16.mxu1 %v12045_v7  ;;  %9284 = vmatprep.mubr.msk.bf16.mxu0 %vm12237_vm11, %v12948_v0 }
 0x519   : > { %9286 = vmatmul.mubr.msk.bf16.gmra.mrb[220].mxu1 %vm12237_vm11, %v12948_v0  ;;  %6390 = vmatmul.mubr.bf16.gmra.mrb[248].mxu0 %v12031_v21 }
 0x51a   : > { %6244 = vmatprep.mubr.bf16.mxu1 %v12111_v16  ;;  %9288 = vmatprep.mubr.msk.bf16.mxu0 %vm12262_vm9, %v12948_v0 }
 0x521   : > { %9290 = vmatmul.mubr.msk.bf16.gmra.mrb[224].mxu1 %vm12262_vm9, %v12948_v0  ;;  %6398 = vmatmul.mubr.bf16.gmra.mrb[252].mxu0 %v12109_v55 }
 0x522   : > { %6252 = vmatprep.mubr.bf16.mxu1 %v12116_v30  ;;  %9292 = vmatprep.mubr.msk.bf16.mxu0 %vm12276_vm13, %v12948_v0  ;;  %v5864_v30 = vadd.f32 %v12314_v11, %v12459_v43 }
 0x529   : > { %9294 = vmatmul.mubr.msk.bf16.gmra.mrb[228].mxu1 %vm12276_vm13, %v12948_v0  ;;  %6406 = vmatmul.mubr.bf16.gmra.mrb[0].mxu0 %v12106_v63 }
 0x52a   : > { %6260 = vmatprep.mubr.bf16.mxu1 %v12175_v4  ;;  %9296 = vmatprep.mubr.msk.bf16.mxu0 %vm12290_vm2, %v12948_v0 }
 0x531   : > { %9298 = vmatmul.mubr.msk.bf16.gmra.mrb[232].mxu1 %vm12290_vm2, %v12948_v0  ;;  %6414 = vmatmul.mubr.bf16.gmra.mrb[4].mxu0 %v12173_v13 }
 0x532   : > { %6268 = vmatprep.mubr.bf16.mxu1 %v12180_v1  ;;  %9300 = vmatprep.mubr.msk.bf16.mxu0 %vm12304_vm1, %v12948_v0 }
 0x539   : > { %9302 = vmatmul.mubr.msk.bf16.gmra.mrb[236].mxu1 %vm12304_vm1, %v12948_v0  ;;  %6422 = vmatmul.mubr.bf16.gmra.mrb[8].mxu0 %v12170_v24 }
 0x53a   : > { %6276 = vmatprep.mubr.bf16.mxu1 %v12225_v41  ;;  %9304 = vmatprep.mubr.msk.bf16.mxu0 %vm12322_vm10, %v12948_v0 }
 0x53b   : > { %v8223_v62 = vpop.f32.mrb[132].mxu1 }
 0x53c   : > { %v8329_v20 = vpop.f32.mrb[160].mxu0  ;;  %v8224_v6 = vpop.f32.mrb[133].mxu1 }
 0x53d   : > { %v8225_v54 = vadd.f32 %v8224_v6, %v8223_v62  ;;  %v8330_v21 = vpop.f32.mrb[161].mxu0  ;;  %v8226_v10 = vpop.f32.mrb[134].mxu1 }
 0x53e   : > { %v8331_v7 = vadd.f32 %v8330_v21, %v8329_v20  ;;  %v8332_v49 = vpop.f32.mrb[162].mxu0  ;;  %v8227_v63 = vpop.f32.mrb[135].mxu1 }
 0x53f   : > { %v8228_v55 = vadd.f32 %v8227_v63, %v8226_v10  ;;  %v8333_v16 = vpop.f32.mrb[163].mxu0  ;;  %v5869_v15 = vadd.f32 %v8225_v54, %v12459_v43 }
 0x540   : > { %v12465_v36 = vadd.f32 %v8331_v7, %v5861_v58  ;;  %v8334_v24 = vadd.f32 %v8333_v16, %v8332_v49 }
 0x541   : > { %9306 = vmatmul.mubr.msk.bf16.gmra.mrb[240].mxu1 %vm12322_vm10, %v12948_v0  ;;  %6430 = vmatmul.mubr.bf16.gmra.mrb[12].mxu0 %v12223_v56  ;;  %v5872_v34 = vadd.f32 %v8228_v55, %v12459_v43  ;;  %v5107_v55 = vld [vmem:[#allocation3 + $0x40] sm:$0xff] }
 0x542   : > { %6284 = vmatprep.mubr.bf16.mxu1 %v12221_v37  ;;  %v12472_v13 = vadd.f32 %v8334_v24, %v5864_v30  ;;  %9308 = vmatprep.mubr.msk.bf16.mxu0 %vm12336_vm15, %v12948_v0 }
 0x543   : > { %v8229_v8 = vpop.f32.mrb[136].mxu1 }
 0x544   : > { %v8335_v9 = vpop.f32.mrb[164].mxu0  ;;  %v8230_v25 = vpop.f32.mrb[137].mxu1 }
 0x545   : > { %v8231_v50 = vadd.f32 %v8230_v25, %v8229_v8  ;;  %v8336_v48 = vpop.f32.mrb[165].mxu0  ;;  %v8232_v35 = vpop.f32.mrb[138].mxu1 }
 0x546   : > { %v8337_v19 = vadd.f32 %v8336_v48, %v8335_v9  ;;  %v8338_v32 = vpop.f32.mrb[166].mxu0  ;;  %v8233_v51 = vpop.f32.mrb[139].mxu1 }
 0x547   : > { %v8234_v56 = vadd.f32 %v8233_v51, %v8232_v35  ;;  %v8339_v11 = vpop.f32.mrb[167].mxu0  ;;  %v5877_v46 = vadd.f32 %v8231_v50, %v12459_v43 }
 0x548   : > { %v12479_v31 = vadd.f32 %v8337_v19, %v5869_v15  ;;  %v8340_v14 = vadd.f32 %v8339_v11, %v8338_v32  ;;  %v5240_v32 = vld [vmem:[#allocation3 + $0x468] sm:$0xff] }
 0x549   : > { %9310 = vmatmul.mubr.msk.bf16.gmra.mrb[244].mxu1 %vm12336_vm15, %v12948_v0  ;;  %6438 = vmatmul.mubr.bf16.gmra.mrb[16].mxu0 %v12219_v59  ;;  %v5880_v42 = vadd.f32 %v8234_v56, %v12459_v43  ;;  %v5116_v56 = vld [vmem:[#allocation3 + $0x88] sm:$0xff] }
 0x54a   : > { %6292 = vmatprep.mubr.bf16.mxu1 %v12251_v5  ;;  %v12486_v61 = vadd.f32 %v8340_v14, %v5872_v34  ;;  %9312 = vmatprep.mubr.msk.bf16.mxu0 %vm12350_vm3, %v12948_v0  ;;  %v5125_v14 = vld [vmem:[#allocation3 + $0xd0] sm:$0xff] }
 0x54b   : > { %v8235_v39 = vpop.f32.mrb[140].mxu1 }
 0x54c   : > { %v8341_v40 = vpop.f32.mrb[168].mxu0  ;;  %v8236_v12 = vpop.f32.mrb[141].mxu1 }
 0x54d   : > { %v8237_v18 = vadd.f32 %v8236_v12, %v8235_v39  ;;  %v8342_v28 = vpop.f32.mrb[169].mxu0  ;;  %v8238_v27 = vpop.f32.mrb[142].mxu1 }
 0x54e   : > { %v8343_v45 = vadd.f32 %v8342_v28, %v8341_v40  ;;  %v8344_v29 = vpop.f32.mrb[170].mxu0  ;;  %v8239_v44 = vpop.f32.mrb[143].mxu1 }
 0x54f   : > { %v8240_v59 = vadd.f32 %v8239_v44, %v8238_v27  ;;  %v8345_v53 = vpop.f32.mrb[171].mxu0  ;;  %v5885_v54 = vadd.f32 %v8237_v18, %v12459_v43 }
 0x550   : > { %v12493_v57 = vadd.f32 %v8343_v45, %v5877_v46  ;;  %v8346_v26 = vadd.f32 %v8345_v53, %v8344_v29 }
 0x551   : > { %9314 = vmatmul.mubr.msk.bf16.gmra.mrb[248].mxu1 %vm12350_vm3, %v12948_v0  ;;  %6446 = vmatmul.mubr.bf16.gmra.mrb[20].mxu0 %v12249_v2  ;;  %v5241_v2 = vld [vmem:[#allocation3 + $0x470] sm:$0xff]  ;;  %v5888_v7 = vadd.f32 %v8240_v59, %v12459_v43 }
 0x552   : > { %6300 = vmatprep.mubr.bf16.mxu1 %v12247_v23  ;;  %v12500_v3 = vadd.f32 %v8346_v26, %v5880_v42  ;;  %6453 = vmatprep.mubr.bf16.mxu0 %v12253_v52  ;;  %v5134_v26 = vld [vmem:[#allocation3 + $0x118] sm:$0xff] }
 0x553   : > { %v8241_v22 = vpop.f32.mrb[144].mxu1 }
 0x554   : > { %v8347_v38 = vpop.f32.mrb[172].mxu0  ;;  %v8242_v33 = vpop.f32.mrb[145].mxu1 }
 0x555   : > { %v8243_v62 = vadd.f32 %v8242_v33, %v8241_v22  ;;  %v8348_v20 = vpop.f32.mrb[173].mxu0  ;;  %v8244_v6 = vpop.f32.mrb[146].mxu1 }
 0x556   : > { %v8349_v21 = vadd.f32 %v8348_v20, %v8347_v38  ;;  %v8350_v10 = vpop.f32.mrb[174].mxu0  ;;  %v8245_v47 = vpop.f32.mrb[147].mxu1 }
 0x557   : > { %v8246_v0 = vadd.f32 %v8245_v47, %v8244_v6  ;;  %v8351_v58 = vpop.f32.mrb[175].mxu0  ;;  %v5893_v48 = vadd.f32 %v8243_v62, %v12459_v43  ;;  %v5143_v62 = vld [vmem:[#allocation3 + $0x160] sm:$0xff] }
 0x558   : > { %v12505_v49 = vadd.f32 %v8349_v21, %v5885_v54  ;;  %v8352_v63 = vadd.f32 %v8351_v58, %v8350_v10 }
 0x559   : > { %6301 = vmatmul.mubr.bf16.gmra.mrb[252].mxu1 %v12253_v52  ;;  %6454 = vmatmul.mubr.bf16.gmra.mrb[24].mxu0 %v12245_v17  ;;  %v5896_v17 = vadd.f32 %v8246_v0, %v12459_v43 }
 0x55a   : > { %8802 = vmatprep.mubr.bf16.mxu1 %v5107_v55  ;;  %v12509_v16 = vadd.f32 %v8352_v63, %v5888_v7  ;;  %6461 = vmatprep.mubr.bf16.mxu0 %v5241_v2 }
 0x55c   : > { %v8247_v30 = vpop.f32.mrb[148].mxu1  ;;  %v8353_v24 = vpop.f32.mrb[176].mxu0 }
 0x55d   : > { %v8248_v8 = vpop.f32.mrb[149].mxu1  ;;  %v8354_v25 = vpop.f32.mrb[177].mxu0 }
 0x55e   : > { %v8249_v9 = vadd.f32 %v8248_v8, %v8247_v30  ;;  %v8250_v50 = vpop.f32.mrb[150].mxu1  ;;  %v8355_v35 = vadd.f32 %v8354_v25, %v8353_v24  ;;  %v8356_v15 = vpop.f32.mrb[178].mxu0  ;;  %v5152_v24 = vld [vmem:[#allocation3 + $0x1a8] sm:$0xff] }
 0x55f   : > { %v8251_v19 = vpop.f32.mrb[151].mxu1  ;;  %v8357_v51 = vpop.f32.mrb[179].mxu0 }
 0x560   : > { %v8252_v52 = vadd.f32 %v8251_v19, %v8250_v50  ;;  %v12513_v11 = vadd.f32 %v8355_v35, %v5893_v48  ;;  %v8358_v34 = vadd.f32 %v8357_v51, %v8356_v15  ;;  %v5901_v45 = vadd.f32 %v8249_v9, %v12459_v43  ;;  %v5161_v50 = vld [vmem:[#allocation3 + $0x1f0] sm:$0xff] }
 0x561   : > { %8803 = vmatmul.mubr.bf16.vlgmr.msra.gmra.mrb[0].mxu1 %v5116_v56  ;;  %6462 = vmatmul.mubr.bf16.gmra.mrb[28].mxu0 %v5240_v32 }
 0x562   : > { %8806 = vmatprep.mubr.bf16.mxu1 %v5125_v14  ;;  %v12515_v39 = vadd.f32 %v8358_v34, %v5896_v17  ;;  %v5904_v22 = vadd.f32 %v8252_v52, %v12459_v43 }
 0x564   : > { %v8253_v40 = vpop.f32.mrb[152].mxu1  ;;  %v8359_v12 = vpop.f32.mrb[180].mxu0 }
 0x565   : > { %v8254_v18 = vpop.f32.mrb[153].mxu1  ;;  %v8360_v27 = vpop.f32.mrb[181].mxu0 }
 0x566   : > { %v8255_v28 = vadd.f32 %v8254_v18, %v8253_v40  ;;  %v8256_v46 = vpop.f32.mrb[154].mxu1  ;;  %v8361_v29 = vadd.f32 %v8360_v27, %v8359_v12  ;;  %v8362_v44 = vpop.f32.mrb[182].mxu0  ;;  %v5170_v18 = vld [vmem:[#allocation3 + $0x238] sm:$0xff] }
 0x567   : > { %v8257_v59 = vpop.f32.mrb[155].mxu1  ;;  %v8363_v42 = vpop.f32.mrb[183].mxu0 }
 0x568   : > { %v8258_v53 = vadd.f32 %v8257_v59, %v8256_v46  ;;  %v12519_v38 = vadd.f32 %v8361_v29, %v5901_v45  ;;  %v8364_v33 = vadd.f32 %v8363_v42, %v8362_v44  ;;  %v5909_v58 = vadd.f32 %v8255_v28, %v12459_v43  ;;  %v5179_v45 = vld [vmem:[#allocation3 + $0x280] sm:$0xff] }
 0x569   : > { %8807 = vmatmul.mubr.bf16.gmra.mrb[4].mxu1 %v5134_v26 }
 0x56a   : > { %8810 = vmatprep.mubr.bf16.mxu1 %v5143_v62  ;;  %v12521_v20 = vadd.f32 %v8364_v33, %v5904_v22  ;;  %v5912_v8 = vadd.f32 %v8258_v53, %v12459_v43 }
 0x56c   : > { %v8259_v6 = vpop.f32.mrb[156].mxu1  ;;  %v8365_v54 = vpop.f32.mrb[184].mxu0 }
 0x56d   : > { %v8260_v21 = vpop.f32.mrb[157].mxu1  ;;  %v8366_v47 = vpop.f32.mrb[185].mxu0 }
 0x56e   : > { %v8261_v10 = vadd.f32 %v8260_v21, %v8259_v6  ;;  %v8262_v0 = vpop.f32.mrb[158].mxu1  ;;  %v8367_v2 = vadd.f32 %v8366_v47, %v8365_v54  ;;  %v8368_v7 = vpop.f32.mrb[186].mxu0 }
 0x56f   : > { %v8263_v63 = vpop.f32.mrb[159].mxu1  ;;  %v8369_v30 = vpop.f32.mrb[187].mxu0 }
 0x570   : > { %v8264_v55 = vadd.f32 %v8263_v63, %v8262_v0  ;;  %v12525_v9 = vadd.f32 %v8367_v2, %v5909_v58  ;;  %v8370_v25 = vadd.f32 %v8369_v30, %v8368_v7  ;;  %v5917_v56 = vadd.f32 %v8261_v10, %v12459_v43 }
 0x571   : > { %8811 = vmatmul.mubr.bf16.gmra.mrb[8].mxu1 %v5152_v24 }
 0x572   : > { %8814 = vmatprep.mubr.bf16.mxu1 %v5161_v50  ;;  %v12527_v48 = vadd.f32 %v8370_v25, %v5912_v8  ;;  %v5920_v28 = vadd.f32 %v8264_v55, %v12459_v43 }
 0x574   : > { %v8265_v35 = vpop.f32.mrb[160].mxu1  ;;  %v8371_v15 = vpop.f32.mrb[188].mxu0 }
 0x575   : > { %v8266_v19 = vpop.f32.mrb[161].mxu1  ;;  %v8372_v52 = vpop.f32.mrb[189].mxu0 }
 0x576   : > { %v8267_v32 = vadd.f32 %v8266_v19, %v8265_v35  ;;  %v8268_v51 = vpop.f32.mrb[162].mxu1  ;;  %v8373_v17 = vadd.f32 %v8372_v52, %v8371_v15  ;;  %v8374_v34 = vpop.f32.mrb[190].mxu0 }
 0x577   : > { %v8269_v14 = vpop.f32.mrb[163].mxu1  ;;  %v8375_v12 = vpop.f32.mrb[191].mxu0 }
 0x578   : > { %v8270_v40 = vadd.f32 %v8269_v14, %v8268_v51  ;;  %v12531_v27 = vadd.f32 %v8373_v17, %v5917_v56  ;;  %v8376_v46 = vadd.f32 %v8375_v12, %v8374_v34  ;;  %v5925_v33 = vadd.f32 %v8267_v32, %v12459_v43 }
 0x579   : > { %8815 = vmatmul.mubr.bf16.gmra.mrb[12].mxu1 %v5170_v18 }
 0x57a   : > { %8818 = vmatprep.mubr.bf16.mxu1 %v5179_v45  ;;  %v12533_v29 = vadd.f32 %v8376_v46, %v5920_v28  ;;  %v5928_v47 = vadd.f32 %v8270_v40, %v12459_v43 }
 0x57c   : > { %v8271_v44 = vpop.f32.mrb[164].mxu1  ;;  %v8377_v59 = vpop.f32.mrb[192].mxu0 }
 0x57d   : > { %v8272_v53 = vpop.f32.mrb[165].mxu1  ;;  %v8378_v26 = vpop.f32.mrb[193].mxu0 }
 0x57e   : > { %v8273_v42 = vadd.f32 %v8272_v53, %v8271_v44  ;;  %v8274_v22 = vpop.f32.mrb[166].mxu1  ;;  %v8379_v62 = vadd.f32 %v8378_v26, %v8377_v59  ;;  %v8380_v6 = vpop.f32.mrb[194].mxu0 }
 0x57f   : > { %v8275_v54 = vpop.f32.mrb[167].mxu1  ;;  %v8381_v10 = vpop.f32.mrb[195].mxu0 }
 0x580   : > { %v8276_v21 = vadd.f32 %v8275_v54, %v8274_v22  ;;  %v12537_v0 = vadd.f32 %v8379_v62, %v5925_v33  ;;  %v8382_v58 = vadd.f32 %v8381_v10, %v8380_v6  ;;  %v5933_v25 = vadd.f32 %v8273_v42, %v12459_v43 }
 0x581   : > { %8819 = vmatmul.mubr.bf16.gmra.mrb[16].mxu1 %v12175_v4 }
 0x582   : > { %8822 = vmatprep.mubr.bf16.mxu1 %v12180_v1  ;;  %v12541_v2 = vadd.f32 %v8382_v58, %v5928_v47  ;;  %v5936_v52 = vadd.f32 %v8276_v21, %v12459_v43  ;;  %v5242_v21 = vld [vmem:[#allocation3 + $0x478] sm:$0xff] }
 0x584   : > { %v8277_v7 = vpop.f32.mrb[168].mxu1  ;;  %v8383_v63 = vpop.f32.mrb[196].mxu0 }
 0x585   : > { %v8278_v55 = vpop.f32.mrb[169].mxu1  ;;  %v8384_v24 = vpop.f32.mrb[197].mxu0 }
 0x586   : > { %v8279_v30 = vadd.f32 %v8278_v55, %v8277_v7  ;;  %v8280_v8 = vpop.f32.mrb[170].mxu1  ;;  %v8385_v50 = vadd.f32 %v8384_v24, %v8383_v63  ;;  %v8386_v35 = vpop.f32.mrb[198].mxu0 }
 0x587   : > { %v8281_v15 = vpop.f32.mrb[171].mxu1  ;;  %v8387_v32 = vpop.f32.mrb[199].mxu0 }
 0x588   : > { %v8282_v19 = vadd.f32 %v8281_v15, %v8280_v8  ;;  %v12545_v4 = vadd.f32 %v8385_v50, %v5933_v25  ;;  %v8388_v1 = vadd.f32 %v8387_v32, %v8386_v35  ;;  %v5941_v18 = vadd.f32 %v8279_v30, %v12459_v43 }
 0x589   : > { %8823 = vmatmul.mubr.bf16.gmra.mrb[20].mxu1 %v12225_v41 }
 0x58a   : > { %8826 = vmatprep.mubr.bf16.mxu1 %v12221_v37  ;;  %v12549_v51 = vadd.f32 %v8388_v1, %v5936_v52  ;;  %v5944_v53 = vadd.f32 %v8282_v19, %v12459_v43 }
 0x58c   : > { %v8283_v56 = vpop.f32.mrb[172].mxu1  ;;  %v8389_v17 = vpop.f32.mrb[200].mxu0 }
 0x58d   : > { %v8284_v34 = vpop.f32.mrb[173].mxu1  ;;  %v8390_v40 = vpop.f32.mrb[201].mxu0 }
 0x58e   : > { %v8285_v14 = vadd.f32 %v8284_v34, %v8283_v56  ;;  %v8286_v12 = vpop.f32.mrb[174].mxu1  ;;  %v8391_v28 = vadd.f32 %v8390_v40, %v8389_v17  ;;  %v8392_v46 = vpop.f32.mrb[202].mxu0 }
 0x58f   : > { %v8287_v45 = vpop.f32.mrb[175].mxu1  ;;  %v8393_v59 = vpop.f32.mrb[203].mxu0 }
 0x590   : > { %v8288_v44 = vadd.f32 %v8287_v45, %v8286_v12  ;;  %v12553_v41 = vadd.f32 %v8391_v28, %v5941_v18  ;;  %v8394_v37 = vadd.f32 %v8393_v59, %v8392_v46  ;;  %v5949_v10 = vadd.f32 %v8285_v14, %v12459_v43 }
 0x591   : > { %8827 = vmatmul.mubr.bf16.gmra.mrb[24].mxu1 %v12251_v5 }
 0x592   : > { %8830 = vmatprep.mubr.bf16.mxu1 %v12247_v23  ;;  %v12557_v42 = vadd.f32 %v8394_v37, %v5944_v53  ;;  %v5952_v5 = vadd.f32 %v8288_v44, %v12459_v43 }
 0x594   : > { %v8289_v26 = vpop.f32.mrb[176].mxu1  ;;  %v8395_v22 = vpop.f32.mrb[204].mxu0 }
 0x595   : > { %v8290_v33 = vpop.f32.mrb[177].mxu1  ;;  %v8396_v6 = vpop.f32.mrb[205].mxu0 }
 0x596   : > { %v8291_v62 = vadd.f32 %v8290_v33, %v8289_v26  ;;  %v8292_v54 = vpop.f32.mrb[178].mxu1  ;;  %v8397_v47 = vadd.f32 %v8396_v6, %v8395_v22  ;;  %v8398_v58 = vpop.f32.mrb[206].mxu0 }
 0x597   : > { %v8293_v7 = vpop.f32.mrb[179].mxu1  ;;  %v8399_v55 = vpop.f32.mrb[207].mxu0 }
 0x598   : > { %v8294_v63 = vadd.f32 %v8293_v7, %v8292_v54  ;;  %v12561_v30 = vadd.f32 %v8397_v47, %v5949_v10  ;;  %v8400_v23 = vadd.f32 %v8399_v55, %v8398_v58  ;;  %v5957_v32 = vadd.f32 %v8291_v62, %v12459_v43 }
 0x599   : > { %8831 = vmatmul.mubr.bf16.gmra.mrb[28].mxu1 %v5242_v21 }
 0x59a   : > { %v12563_v24 = vadd.f32 %v8400_v23, %v5952_v5  ;;  %v5960_v14 = vadd.f32 %v8294_v63, %v12459_v43 }
 0x59c   : > { %v8295_v8 = vpop.f32.mrb[180].mxu1  ;;  %v8401_v25 = vpop.f32.mrb[208].mxu0 }
 0x59d   : > { %v8296_v50 = vpop.f32.mrb[181].mxu1  ;;  %v8402_v15 = vpop.f32.mrb[209].mxu0 }
 0x59e   : > { %v8297_v35 = vadd.f32 %v8296_v50, %v8295_v8  ;;  %v8298_v19 = vpop.f32.mrb[182].mxu1  ;;  %v8403_v52 = vadd.f32 %v8402_v15, %v8401_v25  ;;  %v8404_v1 = vpop.f32.mrb[210].mxu0 }
 0x59f   : > { %v8299_v56 = vpop.f32.mrb[183].mxu1  ;;  %v8405_v34 = vpop.f32.mrb[211].mxu0 }
 0x5a0   : > { %v8300_v17 = vadd.f32 %v8299_v56, %v8298_v19  ;;  %v12567_v40 = vadd.f32 %v8403_v52, %v5957_v32  ;;  %v8406_v12 = vadd.f32 %v8405_v34, %v8404_v1  ;;  %v5965_v37 = vadd.f32 %v8297_v35, %v12459_v43 }
 0x5a2   : > { %v12569_v18 = vadd.f32 %v8406_v12, %v5960_v14  ;;  %v5968_v54 = vadd.f32 %v8300_v17, %v12459_v43 }
 0x5a4   : > { %v8301_v28 = vpop.f32.mrb[184].mxu1  ;;  %v8407_v46 = vpop.f32.mrb[212].mxu0 }
 0x5a5   : > { %v8302_v45 = vpop.f32.mrb[185].mxu1  ;;  %v8408_v59 = vpop.f32.mrb[213].mxu0 }
 0x5a6   : > { %v8303_v44 = vadd.f32 %v8302_v45, %v8301_v28  ;;  %v8304_v53 = vpop.f32.mrb[186].mxu1  ;;  %v8409_v26 = vadd.f32 %v8408_v59, %v8407_v46  ;;  %v8410_v22 = vpop.f32.mrb[214].mxu0 }
 0x5a7   : > { %v8305_v33 = vpop.f32.mrb[187].mxu1  ;;  %v8411_v6 = vpop.f32.mrb[215].mxu0 }
 0x5a8   : > { %v8306_v62 = vadd.f32 %v8305_v33, %v8304_v53  ;;  %v12573_v21 = vadd.f32 %v8409_v26, %v5965_v37  ;;  %v8412_v10 = vadd.f32 %v8411_v6, %v8410_v22  ;;  %v5973_v8 = vadd.f32 %v8303_v44, %v12459_v43 }
 0x5aa   : > { %v12575_v47 = vadd.f32 %v8412_v10, %v5968_v54  ;;  %v5976_v32 = vadd.f32 %v8306_v62, %v12459_v43 }
 0x5ac   : > { %v8307_v58 = vpop.f32.mrb[188].mxu1  ;;  %v8413_v7 = vpop.f32.mrb[216].mxu0 }
 0x5ad   : > { %v8308_v63 = vpop.f32.mrb[189].mxu1  ;;  %v8414_v5 = vpop.f32.mrb[217].mxu0 }
 0x5ae   : > { %v8309_v55 = vadd.f32 %v8308_v63, %v8307_v58  ;;  %v8310_v23 = vpop.f32.mrb[190].mxu1  ;;  %v8415_v25 = vadd.f32 %v8414_v5, %v8413_v7  ;;  %v8416_v50 = vpop.f32.mrb[218].mxu0 }
 0x5af   : > { %v8311_v35 = vpop.f32.mrb[191].mxu1  ;;  %v8417_v19 = vpop.f32.mrb[219].mxu0 }
 0x5b0   : > { %v8312_v15 = vadd.f32 %v8311_v35, %v8310_v23  ;;  %v12579_v52 = vadd.f32 %v8415_v25, %v5973_v8  ;;  %v8418_v1 = vadd.f32 %v8417_v19, %v8416_v50  ;;  %v5981_v45 = vadd.f32 %v8309_v55, %v12459_v43 }
 0x5b2   : > { %v12581_v56 = vadd.f32 %v8418_v1, %v5976_v32  ;;  %v5984_v33 = vadd.f32 %v8312_v15, %v12459_v43 }
 0x5b4   : > { %v8441_v17 = vpop.f32.mrb[192].mxu1  ;;  %v8419_v34 = vpop.f32.mrb[220].mxu0 }
 0x5b5   : > { %v8442_v14 = vpop.f32.mrb[193].mxu1  ;;  %v8420_v12 = vpop.f32.mrb[221].mxu0 }
 0x5b6   : > { %v8443_v28 = vadd.f32 %v8442_v14, %v8441_v17  ;;  %v8444_v46 = vpop.f32.mrb[194].mxu1  ;;  %v8421_v44 = vadd.f32 %v8420_v12, %v8419_v34  ;;  %v8422_v59 = vpop.f32.mrb[222].mxu0 }
 0x5b7   : > { %v8445_v53 = vpop.f32.mrb[195].mxu1  ;;  %v8423_v26 = vpop.f32.mrb[223].mxu0 }
 0x5b8   : > { %v6183_v37 = vadd.f32 %v8443_v28, %v12465_v36  ;;  %v8446_v22 = vadd.f32 %v8445_v53, %v8444_v46  ;;  %v12586_v62 = vadd.f32 %v8421_v44, %v5981_v45  ;;  %v8424_v6 = vadd.f32 %v8423_v26, %v8422_v59 }
 0x5ba   : > { %v6186_v54 = vadd.f32 %v8446_v22, %v12472_v13  ;;  %v12589_v10 = vadd.f32 %v8424_v6, %v5984_v33 }
 0x5bc   : > { %v8447_v58 = vpop.f32.mrb[196].mxu1  ;;  %v8553_v7 = vpop.f32.mrb[224].mxu0 }
 0x5bd   : > { %v8448_v63 = vpop.f32.mrb[197].mxu1  ;;  %v8554_v5 = vpop.f32.mrb[225].mxu0 }
 0x5be   : > { %v8449_v55 = vadd.f32 %v8448_v63, %v8447_v58  ;;  %v8450_v23 = vpop.f32.mrb[198].mxu1  ;;  %v8555_v8 = vadd.f32 %v8554_v5, %v8553_v7  ;;  %v8556_v25 = vpop.f32.mrb[226].mxu0 }
 0x5bf   : > { %v8451_v36 = vpop.f32.mrb[199].mxu1  ;;  %v8557_v43 = vpop.f32.mrb[227].mxu0 }
 0x5c0   : > { %v6191_v50 = vadd.f32 %v8449_v55, %v12479_v31  ;;  %v8452_v35 = vadd.f32 %v8451_v36, %v8450_v23  ;;  %v8558_v15 = vadd.f32 %v8557_v43, %v8556_v25  ;;  %v12592_v19 = vadd.f32 %v8555_v8, %v6183_v37  ;;  %v12976_v43 = vld [vmem:[#allocation9_spill] sm:$0xff] }
 0x5c2   : > { %v6194_v13 = vadd.f32 %v8452_v35, %v12486_v61  ;;  %v12595_v32 = vadd.f32 %v8558_v15, %v6186_v54  ;;  %v12977_v15 = vld [vmem:[#allocation10_spill] sm:$0xff] }
 0x5c4   : > { %v8453_v1 = vpop.f32.mrb[200].mxu1  ;;  %v8559_v17 = vpop.f32.mrb[228].mxu0 }
 0x5c5   : > { %v8454_v34 = vpop.f32.mrb[201].mxu1  ;;  %v8560_v12 = vpop.f32.mrb[229].mxu0 }
 0x5c6   : > { %v8455_v14 = vadd.f32 %v8454_v34, %v8453_v1  ;;  %v8456_v28 = vpop.f32.mrb[202].mxu1  ;;  %v8561_v46 = vadd.f32 %v8560_v12, %v8559_v17  ;;  %v8562_v45 = vpop.f32.mrb[230].mxu0 }
 0x5c7   : > { %v8457_v44 = vpop.f32.mrb[203].mxu1  ;;  %v8563_v53 = vpop.f32.mrb[231].mxu0 }
 0x5c8   : > { %v6199_v31 = vadd.f32 %v8455_v14, %v12493_v57  ;;  %v8458_v59 = vadd.f32 %v8457_v44, %v8456_v28  ;;  %v8564_v26 = vadd.f32 %v8563_v53, %v8562_v45  ;;  %v12598_v37 = vadd.f32 %v8561_v46, %v6191_v50  ;;  %v12978_v14 = vld [vmem:[#allocation11_spill] sm:$0xff] }
 0x5ca   : > { %v6202_v61 = vadd.f32 %v8458_v59, %v12500_v3  ;;  %v12601_v22 = vadd.f32 %v8564_v26, %v6194_v13  ;;  %v2671_v13 = vadd.f32 %v12977_v15, %v12976_v43 }
 0x5cc   : > { %v8459_v33 = vpop.f32.mrb[204].mxu1  ;;  %v8565_v6 = vpop.f32.mrb[232].mxu0  ;;  %v2672_v12 = vadd.f32 %v2671_v13, %v12978_v14 }
 0x5cd   : > { %v8460_v54 = vpop.f32.mrb[205].mxu1  ;;  %v8566_v7 = vpop.f32.mrb[233].mxu0 }
 0x5ce   : > { %v8461_v58 = vadd.f32 %v8460_v54, %v8459_v33  ;;  %v8462_v63 = vpop.f32.mrb[206].mxu1  ;;  %v8567_v55 = vadd.f32 %v8566_v7, %v8565_v6  ;;  %v8568_v5 = vpop.f32.mrb[234].mxu0  ;;  %v12980_v54 = vld [vmem:[#allocation13_spill] sm:$0xff] }
 0x5cf   : > { %v8463_v23 = vpop.f32.mrb[207].mxu1  ;;  %v8569_v25 = vpop.f32.mrb[235].mxu0 }
 0x5d0   : > { %v6207_v57 = vadd.f32 %v8461_v58, %v12505_v49  ;;  %v8464_v8 = vadd.f32 %v8463_v23, %v8462_v63  ;;  %v8570_v36 = vadd.f32 %v8569_v25, %v8568_v5  ;;  %v12604_v50 = vadd.f32 %v8567_v55, %v6199_v31  ;;  %v12979_v31 = vld [vmem:[#allocation12_spill] sm:$0xff]  ;;  %v12981_v55 = vld [vmem:[#allocation14_spill] sm:$0xff] }
 0x5d1   : > { %v2673_v53 = vadd.f32 %v2672_v12, %v12979_v31  ;;  %v12985_v31 = vld [vmem:[#allocation18_spill] sm:$0xff] }
 0x5d2   : > { %v6210_v3 = vadd.f32 %v8464_v8, %v12509_v16  ;;  %v12607_v35 = vadd.f32 %v8570_v36, %v6202_v61  ;;  %v12982_v36 = vld [vmem:[#allocation15_spill] sm:$0xff] }
 0x5d3   : > { %v2674_v58 = vadd.f32 %v2673_v53, %v12980_v54  ;;  %v12986_v54 = vld [vmem:[#allocation19_spill] sm:$0xff] }
 0x5d4   : > { %v8465_v1 = vpop.f32.mrb[208].mxu1  ;;  %v8571_v17 = vpop.f32.mrb[236].mxu0 }
 0x5d5   : > { %v8466_v34 = vpop.f32.mrb[209].mxu1  ;;  %v8572_v46 = vpop.f32.mrb[237].mxu0  ;;  %v2675_v5 = vadd.f32 %v2674_v58, %v12981_v55 }
 0x5d6   : > { %v8467_v28 = vadd.f32 %v8466_v34, %v8465_v1  ;;  %v8468_v49 = vpop.f32.mrb[210].mxu1  ;;  %v8573_v45 = vadd.f32 %v8572_v46, %v8571_v17  ;;  %v8574_v44 = vpop.f32.mrb[238].mxu0  ;;  %v12983_v34 = vld [vmem:[#allocation16_spill] sm:$0xff] }
 0x5d7   : > { %v8469_v59 = vpop.f32.mrb[211].mxu1  ;;  %v8575_v61 = vpop.f32.mrb[239].mxu0  ;;  %v2676_v43 = vadd.f32 %v2675_v5, %v12982_v36 }
 0x5d8   : > { %v6215_v16 = vadd.f32 %v8467_v28, %v12513_v11  ;;  %v8470_v26 = vadd.f32 %v8469_v59, %v8468_v49  ;;  %v8576_v33 = vadd.f32 %v8575_v61, %v8574_v44  ;;  %v12614_v6 = vadd.f32 %v8573_v45, %v6207_v57  ;;  %v12984_v49 = vld [vmem:[#allocation17_spill] sm:$0xff] }
 0x5d9   : > { %v2677_v14 = vadd.f32 %v2676_v43, %v12983_v34  ;;  %v12989_v34 = vld [vmem:[#allocation22_spill] sm:$0xff] }
 0x5da   : > { %v6218_v7 = vadd.f32 %v8470_v26, %v12515_v39  ;;  %v12618_v63 = vadd.f32 %v8576_v33, %v6210_v3 }
 0x5db   : > { %v2678_v45 = vadd.f32 %v2677_v14, %v12984_v49  ;;  %v12990_v49 = vld [vmem:[#allocation23_spill] sm:$0xff] }
 0x5dc   : > { %v8471_v23 = vpop.f32.mrb[212].mxu1  ;;  %v8577_v8 = vpop.f32.mrb[240].mxu0 }
 0x5dd   : > { %v8472_v25 = vpop.f32.mrb[213].mxu1  ;;  %v8578_v11 = vpop.f32.mrb[241].mxu0  ;;  %v2679_v53 = vadd.f32 %v2678_v45, %v12985_v31 }
 0x5de   : > { %v8473_v15 = vadd.f32 %v8472_v25, %v8471_v23  ;;  %v8474_v13 = vpop.f32.mrb[214].mxu1  ;;  %v8579_v1 = vadd.f32 %v8578_v11, %v8577_v8  ;;  %v8580_v17 = vpop.f32.mrb[242].mxu0  ;;  %v12987_v25 = vld [vmem:[#allocation20_spill] sm:$0xff] }
 0x5df   : > { %v8475_v57 = vpop.f32.mrb[215].mxu1  ;;  %v8581_v3 = vpop.f32.mrb[243].mxu0  ;;  %v2680_v58 = vadd.f32 %v2679_v53, %v12986_v54 }
 0x5e0   : > { %v6223_v12 = vadd.f32 %v8473_v15, %v12519_v38  ;;  %v8476_v39 = vadd.f32 %v8475_v57, %v8474_v13  ;;  %v8582_v28 = vadd.f32 %v8581_v3, %v8580_v17  ;;  %v12624_v46 = vadd.f32 %v8579_v1, %v6215_v16  ;;  %v12988_v13 = vld [vmem:[#allocation21_spill] sm:$0xff] }
 0x5e1   : > { %v2681_v36 = vadd.f32 %v2680_v58, %v12987_v25  ;;  %v12993_v25 = vld [vmem:[#allocation26_spill] sm:$0xff] }
 0x5e2   : > { %v6226_v44 = vadd.f32 %v8476_v39, %v12521_v20  ;;  %v12628_v59 = vadd.f32 %v8582_v28, %v6218_v7 }
 0x5e3   : > { %v2682_v1 = vadd.f32 %v2681_v36, %v12988_v13  ;;  %v12994_v13 = vld [vmem:[#allocation27_spill] sm:$0xff] }
 0x5e4   : > { %v8477_v26 = vpop.f32.mrb[216].mxu1  ;;  %v8583_v61 = vpop.f32.mrb[244].mxu0 }
 0x5e5   : > { %v8478_v33 = vpop.f32.mrb[217].mxu1  ;;  %v8584_v38 = vpop.f32.mrb[245].mxu0  ;;  %v2683_v14 = vadd.f32 %v2682_v1, %v12989_v34 }
 0x5e6   : > { %v8479_v55 = vadd.f32 %v8478_v33, %v8477_v26  ;;  %v8480_v5 = vpop.f32.mrb[218].mxu1  ;;  %v8585_v23 = vadd.f32 %v8584_v38, %v8583_v61  ;;  %v8586_v8 = vpop.f32.mrb[246].mxu0  ;;  %v12991_v33 = vld [vmem:[#allocation24_spill] sm:$0xff] }
 0x5e7   : > { %v8481_v16 = vpop.f32.mrb[219].mxu1  ;;  %v8587_v7 = vpop.f32.mrb[247].mxu0  ;;  %v2684_v45 = vadd.f32 %v2683_v14, %v12990_v49 }
 0x5e8   : > { %v6231_v43 = vadd.f32 %v8479_v55, %v12525_v9  ;;  %v8482_v20 = vadd.f32 %v8481_v16, %v8480_v5  ;;  %v8588_v15 = vadd.f32 %v8587_v7, %v8586_v8  ;;  %v12634_v11 = vadd.f32 %v8585_v23, %v6223_v12  ;;  %v12992_v5 = vld [vmem:[#allocation25_spill] sm:$0xff] }
 0x5e9   : > { %v2685_v54 = vadd.f32 %v2684_v45, %v12991_v33 }
 0x5ea   : > { %v6234_v17 = vadd.f32 %v8482_v20, %v12527_v48  ;;  %v12638_v57 = vadd.f32 %v8588_v15, %v6226_v44 }
 0x5eb   : > { %v2686_v23 = vadd.f32 %v2685_v54, %v12992_v5 }
 0x5ec   : > { %v8483_v39 = vpop.f32.mrb[220].mxu1  ;;  %v8589_v3 = vpop.f32.mrb[248].mxu0 }
 0x5ed   : > { %v8484_v28 = vpop.f32.mrb[221].mxu1  ;;  %v8590_v9 = vpop.f32.mrb[249].mxu0  ;;  %v2687_v36 = vadd.f32 %v2686_v23, %v12993_v25 }
 0x5ee   : > { %v8485_v31 = vadd.f32 %v8484_v28, %v8483_v39  ;;  %v8486_v53 = vpop.f32.mrb[222].mxu1  ;;  %v8591_v26 = vadd.f32 %v8590_v9, %v8589_v3  ;;  %v8592_v61 = vpop.f32.mrb[250].mxu0  ;;  %v12995_v28 = vld [vmem:[#allocation28_spill] sm:$0xff] }
 0x5ef   : > { %v8487_v12 = vpop.f32.mrb[223].mxu1  ;;  %v8593_v44 = vpop.f32.mrb[251].mxu0  ;;  %v2688_v1 = vadd.f32 %v2687_v36, %v12994_v13 }
 0x5f0   : > { %v6239_v58 = vadd.f32 %v8485_v31, %v12531_v27  ;;  %v8488_v48 = vadd.f32 %v8487_v12, %v8486_v53  ;;  %v8594_v55 = vadd.f32 %v8593_v44, %v8592_v61  ;;  %v12644_v38 = vadd.f32 %v8591_v26, %v6231_v43 }
 0x5f1   : > { %v2689_v49 = vadd.f32 %v2688_v1, %v12995_v28 }
 0x5f2   : > { %v6242_v8 = vadd.f32 %v8488_v48, %v12533_v29  ;;  %v12648_v16 = vadd.f32 %v8594_v55, %v6234_v17 }
 0x5f3   : > { %v2690_v53 = vrot.slane %v2689_v49, 4 }
 0x5f4   : > { %v8489_v20 = vpop.f32.mrb[224].mxu1  ;;  %v8595_v7 = vpop.f32.mrb[252].mxu0 }
 0x5f5   : > { %v8490_v15 = vpop.f32.mrb[225].mxu1  ;;  %v8596_v27 = vpop.f32.mrb[253].mxu0  ;;  %v2691_v12 = vadd.f32 %v2690_v53, %v2689_v49 }
 0x5f6   : > { %v8491_v34 = vadd.f32 %v8490_v15, %v8489_v20  ;;  %v8492_v14 = vpop.f32.mrb[226].mxu1  ;;  %v8597_v39 = vadd.f32 %v8596_v27, %v8595_v7  ;;  %v8598_v3 = vpop.f32.mrb[254].mxu0 }
 0x5f7   : > { %v8493_v43 = vpop.f32.mrb[227].mxu1  ;;  %v8599_v17 = vpop.f32.mrb[255].mxu0  ;;  %v2692_v44 = vrot.slane %v2691_v12, 2 }
 0x5f8   : > { %v6247_v45 = vadd.f32 %v8491_v34, %v12537_v0  ;;  %v8494_v29 = vadd.f32 %v8493_v43, %v8492_v14  ;;  %v8600_v31 = vadd.f32 %v8599_v17, %v8598_v3  ;;  %v12654_v9 = vadd.f32 %v8597_v39, %v6239_v58  ;;  %v2658_v34 = vld [vmem:[#allocation8] sm:$0x1] }
 0x5f9   : > { %v2693_v20 = vadd.f32 %v2692_v44, %v2691_v12 }
 0x5fa   : > { %v6250_v26 = vadd.f32 %v8494_v29, %v12541_v2  ;;  %v12657_v61 = vadd.f32 %v8600_v31, %v6242_v8 }
 0x5fb   : > { %v2694_v8 = vrot.slane %v2693_v20, 1 }
 0x5fc   : > { %v8495_v33 = vpop.f32.mrb[228].mxu1  ;;  %v8601_v54 = vpop.f32.mrb[0].mxu0 }
 0x5fd   : > { %v8496_v48 = vpop.f32.mrb[229].mxu1  ;;  %v8602_v5 = vpop.f32.mrb[1].mxu0  ;;  %v2695_v14 = vadd.f32 %v2694_v8, %v2693_v20 }
 0x5fe   : > { %v8497_v55 = vadd.f32 %v8496_v48, %v8495_v33  ;;  %v8498_v23 = vpop.f32.mrb[230].mxu1  ;;  %v8603_v25 = vadd.f32 %v8602_v5, %v8601_v54  ;;  %v8604_v0 = vpop.f32.mrb[2].mxu0 }
 0x5ff   : > { %v8499_v36 = vpop.f32.mrb[231].mxu1  ;;  %v8605_v15 = vpop.f32.mrb[3].mxu0  ;;  %v2696_v28 = vadd.f32 %v2695_v14, %v2658_v34 }
 0x600   : > { %v6255_v58 = vadd.f32 %v8497_v55, %v12545_v4  ;;  %v8500_v7 = vadd.f32 %v8499_v36, %v8498_v23  ;;  %v8606_v13 = vadd.f32 %v8605_v15, %v8604_v0  ;;  %v12660_v2 = vadd.f32 %v8603_v25, %v6247_v45 }
 0x601   : > { %2697 = vst [vmem:[#allocation8] sm:$0x1] %v2696_v28 }
 0x602   : > { %v6258_v1 = vadd.f32 %v8500_v7, %v12549_v51  ;;  %v12663_v27 = vadd.f32 %v8606_v13, %v6250_v26 }
 0x604   : > { %v8501_v39 = vpop.f32.mrb[232].mxu1  ;;  %v8607_v3 = vpop.f32.mrb[4].mxu0 }
 0x605   : > { %v8502_v43 = vpop.f32.mrb[233].mxu1  ;;  %v8608_v29 = vpop.f32.mrb[5].mxu0 }
 0x606   : > { %v8503_v49 = vadd.f32 %v8502_v43, %v8501_v39  ;;  %v8504_v17 = vpop.f32.mrb[234].mxu1  ;;  %v8609_v4 = vadd.f32 %v8608_v29, %v8607_v3  ;;  %v8610_v31 = vpop.f32.mrb[6].mxu0 }
 0x607   : > { %v8505_v53 = vpop.f32.mrb[235].mxu1  ;;  %v8611_v33 = vpop.f32.mrb[7].mxu0 }
 0x608   : > { %v6263_v45 = vadd.f32 %v8503_v49, %v12553_v41  ;;  %v8506_v12 = vadd.f32 %v8505_v53, %v8504_v17  ;;  %v8612_v51 = vadd.f32 %v8611_v33, %v8610_v31  ;;  %v12666_v54 = vadd.f32 %v8609_v4, %v6255_v58 }
 0x60a   : > { %v6266_v26 = vadd.f32 %v8506_v12, %v12557_v42  ;;  %v12669_v48 = vadd.f32 %v8612_v51, %v6258_v1 }
 0x60c   : > { %v8507_v44 = vpop.f32.mrb[236].mxu1  ;;  %v8613_v55 = vpop.f32.mrb[8].mxu0 }
 0x60d   : > { %v8508_v5 = vpop.f32.mrb[237].mxu1  ;;  %v8614_v25 = vpop.f32.mrb[9].mxu0 }
 0x60e   : > { %v8509_v23 = vadd.f32 %v8508_v5, %v8507_v44  ;;  %v8510_v0 = vpop.f32.mrb[238].mxu1  ;;  %v8615_v36 = vadd.f32 %v8614_v25, %v8613_v55  ;;  %v8616_v20 = vpop.f32.mrb[10].mxu0 }
 0x60f   : > { %v8511_v7 = vpop.f32.mrb[239].mxu1  ;;  %v8617_v13 = vpop.f32.mrb[11].mxu0 }
 0x610   : > { %v6271_v41 = vadd.f32 %v8509_v23, %v12561_v30  ;;  %v8512_v15 = vadd.f32 %v8511_v7, %v8510_v0  ;;  %v8618_v8 = vadd.f32 %v8617_v13, %v8616_v20  ;;  %v12672_v58 = vadd.f32 %v8615_v36, %v6263_v45 }
 0x612   : > { %v6274_v42 = vadd.f32 %v8512_v15, %v12563_v24  ;;  %v12675_v1 = vadd.f32 %v8618_v8, %v6266_v26 }
 0x614   : > { %v8513_v34 = vpop.f32.mrb[240].mxu1  ;;  %v8619_v14 = vpop.f32.mrb[12].mxu0 }
 0x615   : > { %v8514_v39 = vpop.f32.mrb[241].mxu1  ;;  %v8620_v43 = vpop.f32.mrb[13].mxu0 }
 0x616   : > { %v8515_v3 = vadd.f32 %v8514_v39, %v8513_v34  ;;  %v8516_v28 = vpop.f32.mrb[242].mxu1  ;;  %v8621_v49 = vadd.f32 %v8620_v43, %v8619_v14  ;;  %v8622_v29 = vpop.f32.mrb[14].mxu0 }
 0x617   : > { %v8517_v17 = vpop.f32.mrb[243].mxu1  ;;  %v8623_v31 = vpop.f32.mrb[15].mxu0 }
 0x618   : > { %v6279_v30 = vadd.f32 %v8515_v3, %v12567_v40  ;;  %v8518_v4 = vadd.f32 %v8517_v17, %v8516_v28  ;;  %v8624_v53 = vadd.f32 %v8623_v31, %v8622_v29  ;;  %v12678_v45 = vadd.f32 %v8621_v49, %v6271_v41 }
 0x61a   : > { %v6282_v24 = vadd.f32 %v8518_v4, %v12569_v18  ;;  %v12681_v12 = vadd.f32 %v8624_v53, %v6274_v42 }
 0x61c   : > { %v8519_v33 = vpop.f32.mrb[244].mxu1  ;;  %v8625_v51 = vpop.f32.mrb[16].mxu0 }
 0x61d   : > { %v8520_v26 = vpop.f32.mrb[245].mxu1  ;;  %v8626_v55 = vpop.f32.mrb[17].mxu0 }
 0x61e   : > { %v8521_v44 = vadd.f32 %v8520_v26, %v8519_v33  ;;  %v8522_v5 = vpop.f32.mrb[246].mxu1  ;;  %v8627_v23 = vadd.f32 %v8626_v55, %v8625_v51  ;;  %v8628_v25 = vpop.f32.mrb[18].mxu0 }
 0x61f   : > { %v8523_v0 = vpop.f32.mrb[247].mxu1  ;;  %v8629_v20 = vpop.f32.mrb[19].mxu0 }
 0x620   : > { %v6287_v40 = vadd.f32 %v8521_v44, %v12573_v21  ;;  %v8524_v36 = vadd.f32 %v8523_v0, %v8522_v5  ;;  %v8630_v7 = vadd.f32 %v8629_v20, %v8628_v25  ;;  %v12684_v41 = vadd.f32 %v8627_v23, %v6279_v30 }
 0x622   : > { %v6290_v18 = vadd.f32 %v8524_v36, %v12575_v47  ;;  %v12687_v15 = vadd.f32 %v8630_v7, %v6282_v24  ;;  %v6633_v7 = vld [vmem:[#allocation7 + $0x10] sm:$0xff] }
 0x624   : > { %v8525_v13 = vpop.f32.mrb[248].mxu1  ;;  %v8631_v8 = vpop.f32.mrb[20].mxu0 }
 0x625   : > { %v8526_v42 = vpop.f32.mrb[249].mxu1  ;;  %v8632_v14 = vpop.f32.mrb[21].mxu0 }
 0x626   : > { %v8527_v34 = vadd.f32 %v8526_v42, %v8525_v13  ;;  %v8528_v39 = vpop.f32.mrb[250].mxu1  ;;  %v8633_v3 = vadd.f32 %v8632_v14, %v8631_v8  ;;  %v8634_v43 = vpop.f32.mrb[22].mxu0  ;;  %v6631_v42 = vld [vmem:[#allocation7] sm:$0xff] }
 0x627   : > { %v8529_v28 = vpop.f32.mrb[251].mxu1  ;;  %v8635_v29 = vpop.f32.mrb[23].mxu0 }
 0x628   : > { %v6295_v21 = vadd.f32 %v8527_v34, %v12579_v52  ;;  %v8530_v49 = vadd.f32 %v8529_v28, %v8528_v39  ;;  %v8636_v17 = vadd.f32 %v8635_v29, %v8634_v43  ;;  %v12690_v30 = vadd.f32 %v8633_v3, %v6287_v40  ;;  %v6634_v39 = vld [vmem:[#allocation7 + $0x18] sm:$0xff] }
 0x62a   : > { %v6298_v47 = vadd.f32 %v8530_v49, %v12581_v56  ;;  %v12693_v4 = vadd.f32 %v8636_v17, %v6290_v18  ;;  %v6632_v49 = vld [vmem:[#allocation7 + $0x8] sm:$0xff] }
 0x62c   : > { %v8531_v31 = vpop.f32.mrb[252].mxu1  ;;  %v8637_v53 = vpop.f32.mrb[24].mxu0 }
 0x62d   : > { %v8532_v24 = vpop.f32.mrb[253].mxu1  ;;  %v8638_v51 = vpop.f32.mrb[25].mxu0 }
 0x62e   : > { %v8533_v33 = vadd.f32 %v8532_v24, %v8531_v31  ;;  %v8534_v26 = vpop.f32.mrb[254].mxu1  ;;  %v8639_v44 = vadd.f32 %v8638_v51, %v8637_v53  ;;  %v8640_v55 = vpop.f32.mrb[26].mxu0 }
 0x62f   : > { %v8535_v5 = vpop.f32.mrb[255].mxu1  ;;  %v8641_v25 = vpop.f32.mrb[27].mxu0 }
 0x630   : > { %v6303_v52 = vadd.f32 %v8533_v33, %v12586_v62  ;;  %v8536_v23 = vadd.f32 %v8535_v5, %v8534_v26  ;;  %v8642_v0 = vadd.f32 %v8641_v25, %v8640_v55  ;;  %v12696_v40 = vadd.f32 %v8639_v44, %v6295_v21  ;;  %v6635_v25 = vld [vmem:[#allocation7 + $0x20] sm:$0xff] }
 0x632   : > { %v6306_v56 = vadd.f32 %v8536_v23, %v12589_v10  ;;  %v12699_v36 = vadd.f32 %v8642_v0, %v6298_v47 }
 0x634   : > { %v8804_v20 = vpop.f32.mrb[0].mxu1  ;;  %v8643_v18 = vpop.f32.mrb[28].mxu0 }
 0x635   : > { %v6513_v13 = vadd.f32 %v8804_v20, %v12598_v37  ;;  %v6504_v8 = vpop.f32.mrb[1].mxu1  ;;  %v8644_v34 = vpop.f32.mrb[29].mxu0 }
 0x636   : > { %v6505_v14 = vadd.f32 %v6504_v8, %v12592_v19  ;;  %v8805_v62 = vpop.f32.mrb[2].mxu1  ;;  %v8645_v43 = vadd.f32 %v8644_v34, %v8643_v18  ;;  %v8646_v28 = vpop.f32.mrb[30].mxu0 }
 0x637   : > { %v6665_v3 = vadd.f32 %v6633_v7, %v6513_v13  ;;  %v6516_v21 = vadd.f32 %v8805_v62, %v12601_v22  ;;  %v6507_v10 = vpop.f32.mrb[3].mxu1  ;;  %v8647_v17 = vpop.f32.mrb[31].mxu0  ;;  %v6638_v7 = vld [vmem:[#allocation7 + $0x38] sm:$0xff] }
 0x638   : > { %v6663_v29 = vadd.f32 %v6631_v42, %v6505_v14  ;;  %v6508_v47 = vadd.f32 %v6507_v10, %v12595_v32  ;;  %v8648_v31 = vadd.f32 %v8647_v17, %v8646_v28  ;;  %v12705_v53 = vadd.f32 %v8645_v43, %v6303_v52  ;;  %v6637_v32 = vld [vmem:[#allocation7 + $0x30] sm:$0xff] }
 0x639   : > { %vm6697_vm7 = vcmp.ge.f32.partialorder %v6665_v3, 1.0  ;;  %v6666_v37 = vadd.f32 %v6634_v39, %v6516_v21 }
 0x63a   : > { %v6729_v19 = vsel %vm6697_vm7, 0.0, %v6665_v3  ;;  %vm6695_vm8 = vcmp.ge.f32.partialorder %v6663_v29, 1.0  ;;  %v6664_v24 = vadd.f32 %v6632_v49, %v6508_v47  ;;  %v12708_v51 = vadd.f32 %v8648_v31, %v6306_v56 }
 0x63b   : > { %6761 = vst [vmem:[#allocation7 + $0x10] sm:$0xff] %v6729_v19  ;;  %v6727_v33 = vsel %vm6695_vm8, 0.0, %v6663_v29  ;;  %vm6698_vm5 = vcmp.ge.f32.partialorder %v6666_v37, 1.0  ;;  %v6791_v44 = vsel %vm6695_vm8, 1.0, %v12947_v60  ;;  %v6793_v18 = vsel %vm6697_vm7, 1.0, %v12947_v60  ;;  %v6641_v29 = vld [vmem:[#allocation7 + $0x50] sm:$0xff] }
 0x63c   : > { %6759 = vst [vmem:[#allocation7] sm:$0xff] %v6727_v33  ;;  %v6730_v22 = vsel %vm6698_vm5, 0.0, %v6666_v37  ;;  %vm6696_vm6 = vcmp.ge.f32.partialorder %v6664_v24, 1.0  ;;  %v8808_v26 = vpop.f32.mrb[4].mxu1  ;;  %v6794_v39 = vsel %vm6698_vm5, 1.0, %v12947_v60  ;;  %v6639_v37 = vld [vmem:[#allocation7 + $0x40] sm:$0xff] }
 0x63d   : > { %6762 = vst [vmem:[#allocation7 + $0x18] sm:$0xff] %v6730_v22  ;;  %v6728_v55 = vsel %vm6696_vm6, 0.0, %v6664_v24  ;;  %v6792_v5 = vsel %vm6696_vm6, 1.0, %v12947_v60  ;;  %v6529_v52 = vadd.f32 %v8808_v26, %v12614_v6  ;;  %v6520_v23 = vpop.f32.mrb[5].mxu1  ;;  %v6636_v6 = vld [vmem:[#allocation7 + $0x28] sm:$0xff]  ;;  %v6642_v22 = vld [vmem:[#allocation7 + $0x58] sm:$0xff] }
 0x63e   : > { %6760 = vst [vmem:[#allocation7 + $0x8] sm:$0xff] %v6728_v55  ;;  %v6824_v0 = vadd.f32 %v6792_v5, %v6791_v44  ;;  %v6521_v56 = vadd.f32 %v6520_v23, %v12604_v50  ;;  %v8809_v20 = vpop.f32.mrb[6].mxu1  ;;  %v6640_v5 = vld [vmem:[#allocation7 + $0x48] sm:$0xff] }
 0x63f   : > { %v6669_v13 = vadd.f32 %v6637_v32, %v6529_v52  ;;  %v6532_v8 = vadd.f32 %v8809_v20, %v12618_v63  ;;  %v6523_v42 = vpop.f32.mrb[7].mxu1 }
 0x640   : > { %v6825_v34 = vadd.f32 %v6824_v0, %v6793_v18  ;;  %v6667_v14 = vadd.f32 %v6635_v25, %v6521_v56  ;;  %v6524_v62 = vadd.f32 %v6523_v42, %v12607_v35 }
 0x641   : > { %vm6701_vm14 = vcmp.ge.f32.partialorder %v6669_v13, 1.0  ;;  %v6670_v43 = vadd.f32 %v6638_v7, %v6532_v8  ;;  %v6645_v8 = vld [vmem:[#allocation7 + $0x70] sm:$0xff] }
 0x642   : > { %v6733_v50 = vsel %vm6701_vm14, 0.0, %v6669_v13  ;;  %vm6699_vm11 = vcmp.ge.f32.partialorder %v6667_v14, 1.0  ;;  %v6826_v28 = vadd.f32 %v6825_v34, %v6794_v39  ;;  %v6668_v63 = vadd.f32 %v6636_v6, %v6524_v62  ;;  %v6643_v39 = vld [vmem:[#allocation7 + $0x60] sm:$0xff] }
 0x643   : > { %6765 = vst [vmem:[#allocation7 + $0x30] sm:$0xff] %v6733_v50  ;;  %v6731_v3 = vsel %vm6699_vm11, 0.0, %v6667_v14  ;;  %v6795_v21 = vsel %vm6699_vm11, 1.0, %v12947_v60  ;;  %vm6702_vm9 = vcmp.ge.f32.partialorder %v6670_v43, 1.0  ;;  %v6797_v52 = vsel %vm6701_vm14, 1.0, %v12947_v60 }
 0x644   : > { %6763 = vst [vmem:[#allocation7 + $0x20] sm:$0xff] %v6731_v3  ;;  %v6827_v10 = vadd.f32 %v6826_v28, %v6795_v21  ;;  %v6734_v35 = vsel %vm6702_vm9, 0.0, %v6670_v43  ;;  %v8812_v49 = vpop.f32.mrb[8].mxu1  ;;  %vm6700_vm13 = vcmp.ge.f32.partialorder %v6668_v63, 1.0  ;;  %v6646_v28 = vld [vmem:[#allocation7 + $0x78] sm:$0xff] }
 0x645   : > { %6766 = vst [vmem:[#allocation7 + $0x38] sm:$0xff] %v6734_v35  ;;  %v6545_v17 = vadd.f32 %v8812_v49, %v12634_v11  ;;  %v6536_v47 = vpop.f32.mrb[9].mxu1  ;;  %v6732_v31 = vsel %vm6700_vm13, 0.0, %v6668_v63  ;;  %v6796_v19 = vsel %vm6700_vm13, 1.0, %v12947_v60  ;;  %v6644_v35 = vld [vmem:[#allocation7 + $0x68] sm:$0xff] }
 0x646   : > { %v6537_v24 = vadd.f32 %v6536_v47, %v12624_v46  ;;  %v8813_v33 = vpop.f32.mrb[10].mxu1  ;;  %6764 = vst [vmem:[#allocation7 + $0x28] sm:$0xff] %v6732_v31  ;;  %v6828_v26 = vadd.f32 %v6827_v10, %v6796_v19  ;;  %v6798_v46 = vsel %vm6702_vm9, 1.0, %v12947_v60 }
 0x647   : > { %v6673_v32 = vadd.f32 %v6641_v29, %v6545_v17  ;;  %v6548_v44 = vadd.f32 %v8813_v33, %v12638_v57  ;;  %v6539_v55 = vpop.f32.mrb[11].mxu1 }
 0x648   : > { %v6671_v11 = vadd.f32 %v6639_v37, %v6537_v24  ;;  %v6540_v23 = vadd.f32 %v6539_v55, %v12628_v59  ;;  %v6829_v25 = vadd.f32 %v6828_v26, %v6797_v52  ;;  %v6647_v52 = vld [vmem:[#allocation7 + $0x80] sm:$0xff] }
 0x649   : > { %vm6705_vm2 = vcmp.ge.f32.partialorder %v6673_v32, 1.0  ;;  %v6674_v0 = vadd.f32 %v6642_v22, %v6548_v44  ;;  %v6649_v22 = vld [vmem:[#allocation7 + $0x90] sm:$0xff] }
 0x64a   : > { %v6737_v56 = vsel %vm6705_vm2, 0.0, %v6673_v32  ;;  %vm6703_vm1 = vcmp.ge.f32.partialorder %v6671_v11, 1.0  ;;  %v6672_v20 = vadd.f32 %v6640_v5, %v6540_v23  ;;  %v6830_v18 = vadd.f32 %v6829_v25, %v6798_v46  ;;  %v6650_v25 = vld [vmem:[#allocation7 + $0x98] sm:$0xff] }
 0x64b   : > { %6769 = vst [vmem:[#allocation7 + $0x50] sm:$0xff] %v6737_v56  ;;  %v6735_v57 = vsel %vm6703_vm1, 0.0, %v6671_v11  ;;  %v6799_v7 = vsel %vm6703_vm1, 1.0, %v12947_v60  ;;  %vm6706_vm4 = vcmp.ge.f32.partialorder %v6674_v0, 1.0  ;;  %v6801_v49 = vsel %vm6705_vm2, 1.0, %v12947_v60 }
 0x64c   : > { %6767 = vst [vmem:[#allocation7 + $0x40] sm:$0xff] %v6735_v57  ;;  %v6738_v13 = vsel %vm6706_vm4, 0.0, %v6674_v0  ;;  %vm6704_vm10 = vcmp.ge.f32.partialorder %v6672_v20, 1.0  ;;  %v8816_v59 = vpop.f32.mrb[12].mxu1  ;;  %v6831_v42 = vadd.f32 %v6830_v18, %v6799_v7  ;;  %v6648_v57 = vld [vmem:[#allocation7 + $0x88] sm:$0xff] }
 0x64d   : > { %6770 = vst [vmem:[#allocation7 + $0x58] sm:$0xff] %v6738_v13  ;;  %v6736_v34 = vsel %vm6704_vm10, 0.0, %v6672_v20  ;;  %v6800_v14 = vsel %vm6704_vm10, 1.0, %v12947_v60  ;;  %v6561_v62 = vadd.f32 %v8816_v59, %v12654_v9  ;;  %v6552_v6 = vpop.f32.mrb[13].mxu1 }
 0x64e   : > { %6768 = vst [vmem:[#allocation7 + $0x48] sm:$0xff] %v6736_v34  ;;  %v6553_v43 = vadd.f32 %v6552_v6, %v12644_v38  ;;  %v8817_v50 = vpop.f32.mrb[14].mxu1  ;;  %v6832_v3 = vadd.f32 %v6831_v42, %v6800_v14  ;;  %v6802_v38 = vsel %vm6706_vm4, 1.0, %v12947_v60  ;;  %v6653_v6 = vld [vmem:[#allocation7 + $0xb0] sm:$0xff] }
 0x64f   : > { %v6677_v21 = vadd.f32 %v6645_v8, %v6561_v62  ;;  %v6564_v63 = vadd.f32 %v8817_v50, %v12657_v61  ;;  %v6555_v10 = vpop.f32.mrb[15].mxu1 }
 0x650   : > { %v6675_v29 = vadd.f32 %v6643_v39, %v6553_v43  ;;  %v6556_v17 = vadd.f32 %v6555_v10, %v12648_v16  ;;  %v6833_v9 = vadd.f32 %v6832_v3, %v6801_v49 }
 0x651   : > { %vm6709_vm0 = vcmp.ge.f32.partialorder %v6677_v21, 1.0  ;;  %v6678_v47 = vadd.f32 %v6646_v28, %v6564_v63 }
 0x652   : > { %v6741_v37 = vsel %vm6709_vm0, 0.0, %v6677_v21  ;;  %vm6707_vm12 = vcmp.ge.f32.partialorder %v6675_v29, 1.0  ;;  %v6676_v31 = vadd.f32 %v6644_v35, %v6556_v17  ;;  %v6834_v24 = vadd.f32 %v6833_v9, %v6802_v38  ;;  %v6651_v21 = vld [vmem:[#allocation7 + $0xa0] sm:$0xff]  ;;  %v6654_v35 = vld [vmem:[#allocation7 + $0xb8] sm:$0xff] }
 0x653   : > { %6773 = vst [vmem:[#allocation7 + $0x70] sm:$0xff] %v6741_v37  ;;  %v6739_v61 = vsel %vm6707_vm12, 0.0, %v6675_v29  ;;  %v6803_v19 = vsel %vm6707_vm12, 1.0, %v12947_v60  ;;  %vm6710_vm15 = vcmp.ge.f32.partialorder %v6678_v47, 1.0  ;;  %v6805_v7 = vsel %vm6709_vm0, 1.0, %v12947_v60 }
 0x654   : > { %6771 = vst [vmem:[#allocation7 + $0x60] sm:$0xff] %v6739_v61  ;;  %v6742_v33 = vsel %vm6710_vm15, 0.0, %v6678_v47  ;;  %vm6708_vm3 = vcmp.ge.f32.partialorder %v6676_v31, 1.0  ;;  %v8820_v16 = vpop.f32.mrb[16].mxu1  ;;  %v6835_v26 = vadd.f32 %v6834_v24, %v6803_v19  ;;  %v6652_v47 = vld [vmem:[#allocation7 + $0xa8] sm:$0xff] }
 0x655   : > { %6774 = vst [vmem:[#allocation7 + $0x78] sm:$0xff] %v6742_v33  ;;  %v6740_v32 = vsel %vm6708_vm3, 0.0, %v6676_v31  ;;  %v6804_v44 = vsel %vm6708_vm3, 1.0, %v12947_v60  ;;  %v6577_v55 = vadd.f32 %v8820_v16, %v12666_v54  ;;  %v6568_v5 = vpop.f32.mrb[17].mxu1 }
 0x656   : > { %6772 = vst [vmem:[#allocation7 + $0x68] sm:$0xff] %v6740_v32  ;;  %v6569_v11 = vadd.f32 %v6568_v5, %v12660_v2  ;;  %v8821_v23 = vpop.f32.mrb[18].mxu1  ;;  %v6836_v0 = vadd.f32 %v6835_v26, %v6804_v44  ;;  %v6806_v2 = vsel %vm6710_vm15, 1.0, %v12947_v60  ;;  %v6657_v26 = vld [vmem:[#allocation7 + $0xd0] sm:$0xff] }
 0x657   : > { %v6681_v46 = vadd.f32 %v6649_v22, %v6577_v55  ;;  %v6580_v56 = vadd.f32 %v8821_v23, %v12669_v48  ;;  %v6571_v20 = vpop.f32.mrb[19].mxu1 }
 0x658   : > { %v6679_v18 = vadd.f32 %v6647_v52, %v6569_v11  ;;  %v6572_v13 = vadd.f32 %v6571_v20, %v12663_v27  ;;  %v6837_v54 = vadd.f32 %v6836_v0, %v6805_v7  ;;  %v6655_v11 = vld [vmem:[#allocation7 + $0xc0] sm:$0xff]  ;;  %v6658_v0 = vld [vmem:[#allocation7 + $0xd8] sm:$0xff]  ;;  %v6656_v7 = vld [vmem:[#allocation7 + $0xc8] sm:$0xff] }
 0x659   : > { %vm6713_vm7 = vcmp.ge.f32.partialorder %v6681_v46, 1.0  ;;  %v6682_v59 = vadd.f32 %v6650_v25, %v6580_v56 }
 0x65a   : > { %v6745_v8 = vsel %vm6713_vm7, 0.0, %v6681_v46  ;;  %vm6711_vm8 = vcmp.ge.f32.partialorder %v6679_v18, 1.0  ;;  %v6680_v42 = vadd.f32 %v6648_v57, %v6572_v13  ;;  %v6838_v14 = vadd.f32 %v6837_v54, %v6806_v2 }
 0x65b   : > { %6777 = vst [vmem:[#allocation7 + $0x90] sm:$0xff] %v6745_v8  ;;  %v6743_v48 = vsel %vm6711_vm8, 0.0, %v6679_v18  ;;  %v6807_v34 = vsel %vm6711_vm8, 1.0, %v12947_v60  ;;  %vm6714_vm5 = vcmp.ge.f32.partialorder %v6682_v59, 1.0  ;;  %v6809_v38 = vsel %vm6713_vm7, 1.0, %v12947_v60 }
 0x65c   : > { %6775 = vst [vmem:[#allocation7 + $0x80] sm:$0xff] %v6743_v48  ;;  %v6746_v62 = vsel %vm6714_vm5, 0.0, %v6682_v59  ;;  %vm6712_vm6 = vcmp.ge.f32.partialorder %v6680_v42, 1.0  ;;  %v8824_v27 = vpop.f32.mrb[20].mxu1  ;;  %v6839_v39 = vadd.f32 %v6838_v14, %v6807_v34  ;;  %v6661_v14 = vld [vmem:[#allocation7 + $0xf0] sm:$0xff]  ;;  %vm9360_vm7 = vmmov (!%p7253_p7), 0  }
 0x65d   : > { %6778 = vst [vmem:[#allocation7 + $0x98] sm:$0xff] %v6746_v62  ;;  %v6744_v43 = vsel %vm6712_vm6, 0.0, %v6680_v42  ;;  %v6808_v50 = vsel %vm6712_vm6, 1.0, %v12947_v60  ;;  %v6593_v28 = vadd.f32 %v8824_v27, %v12678_v45  ;;  %v6584_v3 = vpop.f32.mrb[21].mxu1 }
 0x65e   : > { %6776 = vst [vmem:[#allocation7 + $0x88] sm:$0xff] %v6744_v43  ;;  %v6585_v63 = vadd.f32 %v6584_v3, %v12672_v58  ;;  %v8825_v10 = vpop.f32.mrb[22].mxu1  ;;  %v6840_v49 = vadd.f32 %v6839_v39, %v6808_v50  ;;  %v6810_v58 = vsel %vm6714_vm5, 1.0, %v12947_v60  ;;  %v6659_v50 = vld [vmem:[#allocation7 + $0xe0] sm:$0xff] }
 0x65f   : > { %v6685_v29 = vadd.f32 %v6653_v6, %v6593_v28  ;;  %v6596_v17 = vadd.f32 %v8825_v10, %v12681_v12  ;;  %v6587_v9 = vpop.f32.mrb[23].mxu1 }
 0x660   : > { %v6683_v37 = vadd.f32 %v6651_v21, %v6585_v63  ;;  %v6588_v31 = vadd.f32 %v6587_v9, %v12675_v1  ;;  %v6841_v45 = vadd.f32 %v6840_v49, %v6809_v38  ;;  %v6662_v21 = vld [vmem:[#allocation7 + $0xf8] sm:$0xff] }
 0x661   : > { %vm6717_vm14 = vcmp.ge.f32.partialorder %v6685_v29, 1.0  ;;  %v6686_v61 = vadd.f32 %v6654_v35, %v6596_v17 }
 0x662   : > { %v6749_v19 = vsel %vm6717_vm14, 0.0, %v6685_v29  ;;  %vm6715_vm11 = vcmp.ge.f32.partialorder %v6683_v37, 1.0  ;;  %v6684_v24 = vadd.f32 %v6652_v47, %v6588_v31  ;;  %v6842_v16 = vadd.f32 %v6841_v45, %v6810_v58  ;;  %v6660_v29 = vld [vmem:[#allocation7 + $0xe8] sm:$0xff] }
 0x663   : > { %6781 = vst [vmem:[#allocation7 + $0xb0] sm:$0xff] %v6749_v19  ;;  %v6747_v12 = vsel %vm6715_vm11, 0.0, %v6683_v37  ;;  %v6811_v33 = vsel %vm6715_vm11, 1.0, %v12947_v60  ;;  %vm6718_vm9 = vcmp.ge.f32.partialorder %v6686_v61, 1.0  ;;  %v6813_v18 = vsel %vm6717_vm14, 1.0, %v12947_v60 }
 0x664   : > { %6779 = vst [vmem:[#allocation7 + $0xa0] sm:$0xff] %v6747_v12  ;;  %v6750_v22 = vsel %vm6718_vm9, 0.0, %v6686_v61  ;;  %vm6716_vm13 = vcmp.ge.f32.partialorder %v6684_v24, 1.0  ;;  %v8828_v1 = vpop.f32.mrb[24].mxu1  ;;  %v6843_v32 = vadd.f32 %v6842_v16, %v6811_v33 }
 0x665   : > { %6782 = vst [vmem:[#allocation7 + $0xb8] sm:$0xff] %v6750_v22  ;;  %v6748_v44 = vsel %vm6716_vm13, 0.0, %v6684_v24  ;;  %v6812_v55 = vsel %vm6716_vm13, 1.0, %v12947_v60  ;;  %v6609_v5 = vadd.f32 %v8828_v1, %v12690_v30  ;;  %v6600_v52 = vpop.f32.mrb[25].mxu1 }
 0x666   : > { %6780 = vst [vmem:[#allocation7 + $0xa8] sm:$0xff] %v6748_v44  ;;  %v6601_v23 = vadd.f32 %v6600_v52, %v12684_v41  ;;  %v8829_v25 = vpop.f32.mrb[26].mxu1  ;;  %v6844_v46 = vadd.f32 %v6843_v32, %v6812_v55  ;;  %v6814_v41 = vsel %vm6718_vm9, 1.0, %v12947_v60  ;;  %v6823_v52 = vld [vmem:[#allocation8] sm:$0x1] }
 0x667   : > { %v6689_v56 = vadd.f32 %v6657_v26, %v6609_v5  ;;  %v6612_v20 = vadd.f32 %v8829_v25, %v12693_v4  ;;  %v6603_v57 = vpop.f32.mrb[27].mxu1  ;;  %v6869_v25 = vld [vmem:[%s12874_s7] sm:$0xff] (!%p7253_p7) }
 0x668   : > { %v6687_v13 = vadd.f32 %v6655_v11, %v6601_v23  ;;  %v6604_v54 = vadd.f32 %v6603_v57, %v12687_v15  ;;  %v6845_v30 = vadd.f32 %v6844_v46, %v6813_v18  ;;  %v9359_v46 = vmov (!%p7253_p7), 0.0|0.0   ;;  %v6873_v18 = vld [vmem:[%s12874_s7 + $0x20] sm:$0xff] (!%p7253_p7) }
 0x669   : > { %vm6721_vm2 = vcmp.ge.f32.partialorder %v6689_v56, 1.0  ;;  %v6690_v59 = vadd.f32 %v6658_v0, %v6612_v20  ;;  %v6871_v0 = vld [vmem:[%s12874_s7 + $0x10] sm:$0xff] (!%p7253_p7)  ;;  %8869 = vmatprep.subr.bf16.mxu0 (!%p7253_p7), %v9359_v46  ;;  %v6872_v20 = vld [vmem:[%s12874_s7 + $0x18] sm:$0xff] (!%p7253_p7)  ;;  %v9361_v57 = vmov (!%p7253_p7), 0.0  }
 0x66a   : > { %v6753_v2 = vsel %vm6721_vm2, 0.0, %v6689_v56  ;;  %vm6719_vm1 = vcmp.ge.f32.partialorder %v6687_v13, 1.0  ;;  %v6688_v8 = vadd.f32 %v6656_v7, %v6604_v54  ;;  %v6846_v48 = vadd.f32 %v6845_v30, %v6814_v41  ;;  %8866 = vmatprep.mubr.msk.f32.mxu0 (!%p7253_p7), %vm9360_vm7, %v9361_v57  ;;  %v6875_v30 = vld [vmem:[%s12874_s7 + $0x30] sm:$0xff] (!%p7253_p7) }
 0x66b   : > { %6785 = vst [vmem:[#allocation7 + $0xd0] sm:$0xff] %v6753_v2  ;;  %v6751_v4 = vsel %vm6719_vm1, 0.0, %v6687_v13  ;;  %v6815_v42 = vsel %vm6719_vm1, 1.0, %v12947_v60  ;;  %vm6722_vm4 = vcmp.ge.f32.partialorder %v6690_v59, 1.0  ;;  %v6817_v17 = vsel %vm6721_vm2, 1.0, %v12947_v60  ;;  %v6874_v13 = vld [vmem:[%s12874_s7 + $0x28] sm:$0xff] (!%p7253_p7) }
 0x66c   : > { %6783 = vst [vmem:[#allocation7 + $0xc0] sm:$0xff] %v6751_v4  ;;  %v6754_v34 = vsel %vm6722_vm4, 0.0, %v6690_v59  ;;  %vm6720_vm10 = vcmp.ge.f32.partialorder %v6688_v8, 1.0  ;;  %v8832_v15 = vpop.f32.mrb[28].mxu1  ;;  %v6847_v62 = vadd.f32 %v6846_v48, %v6815_v42  ;;  %v8873_v7 = vpack.c.bf16 (!%p7253_p7), %v6872_v20, %v6871_v0  ;;  %v6876_v59 = vld [vmem:[%s12874_s7 + $0x38] sm:$0xff] (!%p7253_p7)  ;;  %v6877_v2 = vld [vmem:[%s12874_s7 + $0x40] sm:$0xff] (!%p7253_p7) }
 0x66d   : > { %6786 = vst [vmem:[#allocation7 + $0xd8] sm:$0xff] %v6754_v34  ;;  %v6752_v27 = vsel %vm6720_vm10, 0.0, %v6688_v8  ;;  %v6816_v6 = vsel %vm6720_vm10, 1.0, %v12947_v60  ;;  %v6625_v39 = vadd.f32 %v8832_v15, %v12705_v53  ;;  %v6616_v43 = vpop.f32.mrb[29].mxu1  ;;  %v8876_v54 = vpack.c.bf16 (!%p7253_p7), %v6874_v13, %v6873_v18  ;;  %v6878_v8 = vld [vmem:[%s12874_s7 + $0x48] sm:$0xff] (!%p7253_p7)  ;;  %v6879_v42 = vld [vmem:[%s12874_s7 + $0x50] sm:$0xff] (!%p7253_p7) }
 0x66e   : > { %6784 = vst [vmem:[#allocation7 + $0xc8] sm:$0xff] %v6752_v27  ;;  %v6617_v28 = vadd.f32 %v6616_v43, %v12696_v40  ;;  %v8833_v3 = vpop.f32.mrb[30].mxu1  ;;  %v6848_v63 = vadd.f32 %v6847_v62, %v6816_v6  ;;  %v6818_v40 = vsel %vm6722_vm4, 1.0, %v12947_v60  ;;  %v8879_v41 = vpack.c.bf16 (!%p7253_p7), %v6876_v59, %v6875_v30  ;;  %v6880_v48 = vld [vmem:[%s12874_s7 + $0x58] sm:$0xff] (!%p7253_p7)  ;;  %v6881_v15 = vld [vmem:[%s12874_s7 + $0x60] sm:$0xff] (!%p7253_p7)  ;;  %v6883_v27 = vld [vmem:[%s12874_s7 + $0x70] sm:$0xff] (!%p7253_p7) }
 0x66f   : > { %v6693_v10 = vadd.f32 %v6661_v14, %v6625_v39  ;;  %v6628_v35 = vadd.f32 %v8833_v3, %v12708_v51  ;;  %v6619_v49 = vpop.f32.mrb[31].mxu1  ;;  %v8882_v4 = vpack.c.bf16 (!%p7253_p7), %v6878_v8, %v6877_v2  ;;  %v8885_v34 = vpack.c.bf16 (!%p7253_p7), %v6880_v48, %v6879_v42  ;;  %v6882_v14 = vld [vmem:[%s12874_s7 + $0x68] sm:$0xff] (!%p7253_p7)  ;;  %v6884_v6 = vld [vmem:[%s12874_s7 + $0x78] sm:$0xff] (!%p7253_p7) }
 0x670   : > { %v6691_v9 = vadd.f32 %v6659_v50, %v6617_v28  ;;  %v6620_v47 = vadd.f32 %v6619_v49, %v12699_v36  ;;  %v6849_v53 = vadd.f32 %v6848_v63, %v6817_v17  ;;  %v8888_v62 = vpack.c.bf16 (!%p7253_p7), %v6882_v14, %v6881_v15 }
 0x671   : > { %vm6725_vm0 = vcmp.ge.f32.partialorder %v6693_v10, 1.0  ;;  %v6694_v38 = vadd.f32 %v6662_v21, %v6628_v35  ;;  %v8891_v39 = vpack.c.bf16 (!%p7253_p7), %v6884_v6, %v6883_v27  ;;  %v6956_v28 = vlaneseq (!%p7253_p7)  ;;  %v6885_v21 = vld [vmem:[%s12875_s8] sm:$0x1] (!%p7253_p7) }
 0x672   : > { %v6757_v37 = vsel %vm6725_vm0, 0.0, %v6693_v10  ;;  %vm6723_vm12 = vcmp.ge.f32.partialorder %v6691_v9, 1.0  ;;  %v6692_v31 = vadd.f32 %v6660_v29, %v6620_v47  ;;  %v6850_v61 = vadd.f32 %v6849_v53, %v6818_v40 }
 0x673   : > { %6789 = vst [vmem:[#allocation7 + $0xf0] sm:$0xff] %v6757_v37  ;;  %v6755_v51 = vsel %vm6723_vm12, 0.0, %v6691_v9  ;;  %v6819_v45 = vsel %vm6723_vm12, 1.0, %v12947_v60  ;;  %vm6726_vm15 = vcmp.ge.f32.partialorder %v6694_v38, 1.0  ;;  %v6821_v33 = vsel %vm6725_vm0, 1.0, %v12947_v60 }
 0x674   : > { %6787 = vst [vmem:[#allocation7 + $0xe0] sm:$0xff] %v6755_v51  ;;  %v6758_v58 = vsel %vm6726_vm15, 0.0, %v6694_v38  ;;  %vm6724_vm3 = vcmp.ge.f32.partialorder %v6692_v31, 1.0  ;;  %v6851_v36 = vadd.f32 %v6850_v61, %v6819_v45  ;;  %v6822_v22 = vsel %vm6726_vm15, 1.0, %v12947_v60 }
 0x675   : > { %6790 = vst [vmem:[#allocation7 + $0xf8] sm:$0xff] %v6758_v58  ;;  %v6756_v19 = vsel %vm6724_vm3, 0.0, %v6692_v31  ;;  %v6820_v24 = vsel %vm6724_vm3, 1.0, %v12947_v60  ;;  %v6870_v60 = vld [vmem:[%s12874_s7 + $0x8] sm:$0xff] (!%p7253_p7)  ;;  %v6957_v3 = vshrl.u32 (!%p7253_p7), %v6956_v28, 7 }
 0x676   : > { %6788 = vst [vmem:[#allocation7 + $0xe8] sm:$0xff] %v6756_v19  ;;  %v6852_v12 = vadd.f32 %v6851_v36, %v6820_v24  ;;  %v8870_v56 = vpack.c.bf16 (!%p7253_p7), %v6870_v60, %v6869_v25 }
 0x677   : > { %v6958_v63 = vsub.s32 (!%p7253_p7), 0, %v6957_v3 }
 0x678   : > { %v6853_v16 = vadd.f32 %v6852_v12, %v6821_v33  ;;  %8871 = vmatpush3.bf16.msra.mxu0 (!%p7253_p7), %v8870_v56 }
 0x679   : > { %8872 = vmatprep.subr.bf16.mxu0 (!%p7253_p7), %v9359_v46 }
 0x67a   : > { %v6854_v1 = vadd.f32 %v6853_v16, %v6822_v22 }
 0x67c   : > { %v6855_v26 = vrot.slane %v6854_v1, 4  ;;  %8874 = vmatpush3.bf16.msra.mxu0 (!%p7253_p7), %v8873_v7 }
 0x67d   : > { %8875 = vmatprep.subr.bf16.mxu0 (!%p7253_p7), %v9359_v46 }
 0x67e   : > { %v6856_v32 = vadd.f32 %v6855_v26, %v6854_v1 }
 0x680   : > { %v6857_v44 = vrot.slane %v6856_v32, 2  ;;  %8877 = vmatpush3.bf16.msra.mxu0 (!%p7253_p7), %v8876_v54 }
 0x681   : > { %8878 = vmatprep.subr.bf16.mxu0 (!%p7253_p7), %v9359_v46 }
 0x682   : > { %v6858_v55 = vadd.f32 %v6857_v44, %v6856_v32 }
 0x684   : > { %v6859_v5 = vrot.slane %v6858_v55, 1  ;;  %6866 = sbr.rel (%p7253_p7) target bundleno = 1904 (0x770), region = 64  ;;  %8880 = vmatpush3.bf16.msra.mxu0 (!%p7253_p7), %v8879_v41 }
 0x685   : > { %8881 = vmatprep.subr.bf16.mxu0 (!%p7253_p7), %v9359_v46 }
 0x686   : > { %v6860_v11 = vadd.f32 %v6859_v5, %v6858_v55 }
 0x688   : > { %v6861_v23 = vadd.f32 %v6860_v11, %v6823_v52  ;;  %8883 = vmatpush3.bf16.msra.mxu0 (!%p7253_p7), %v8882_v4 }
 0x689   : > { %8884 = vmatprep.subr.bf16.mxu0 (!%p7253_p7), %v9359_v46 }
 0x68a   : > { %6862 = vst [vmem:[#allocation8] sm:$0x1] %v6861_v23 }
 0x68c   : > { %8886 = vmatpush3.bf16.msra.mxu0 %v8885_v34 }
 0x68d   : > { %8887 = vmatprep.subr.bf16.mxu0 %v9359_v46 }
 0x690   : > { %8889 = vmatpush3.bf16.msra.mxu0 %v8888_v62 }
 0x691   : > { %v6867_v43 = vld [vmem:[#allocation8] sm:$0x1]  ;;  %8890 = vmatprep.subr.bf16.mxu0 %v9359_v46 }
 0x692   : > { %v6868_v50 = vmul.f32 0.0009765625, %v6867_v43 }
 0x694   : > { %8892 = vmatpush3.bf16.msra.mxu0 %v8891_v39 }
 0x697   : > { %8867 = vmatmul.mubr.f32.vlgmr.msra.gmra.mrb[0].mxu0 %v6868_v50 }
 0x76a   : > { %v6952_v10 = vpop.f32.mrb[0].mxu0 }
 0x76b   : > { %v6953_v35 = vadd.f32 %v6952_v10, %v6885_v21  ;;  %v8868_v49 = vpop.f32.mrb[1].mxu0 }
 0x76d   : > { %v6959_v29 = vrot.slane %v6953_v35, %v6958_v63 }
 0x76f   : > { %6960 = vst [vmem:[%s9452_s23] sm:$0xff] %v6959_v29 }
 0x770 PF: > { %s19_s13 = sadd.s32 1, %s9353_s13   ;;  %s12996_s30 = smov %s9345_s11 }
 0x771   : > { %p16_p8 = scmp.ge.s32.totalorder %s19_s13, 10   ;;  %s12997_s10 = smov %s9349_s12 }
 0x772   : > { %s12998_s11 = smov %s13001_s14  ;;  %s12999_s12 = smov %s13005_s15 }
 0x773   :  { %18 = sbr.rel (!%p16_p8) target bundleno = 3 (0x3), region = 96 }

</bundles_post_ra>
